<compile_context>
chip_gen: v7x
topology: tpu7x:2x2x1
jax: 0.10.0
libtpu: 0.0.40
codegen_flags: <defaults>
</compile_context>

<pallas_src>
import jax
import jax.numpy as jnp
from jax import lax
from jax.experimental import pallas as pl
from jax.experimental.pallas import tpu as pltpu

_VMEM_LIMIT = 48 * 1024 * 1024  # safe on v5e/v6e (128 MiB phys) and v7x (64 MiB phys)


# ------------------------------ Mish epilogue -------------------------------

def _mish_f32(x):
    # mish(x) = x * tanh(softplus(x)) = x * (e^{2x} + 2e^x) / (e^{2x} + 2e^x + 2)
    # One EUP exp + one approx reciprocal.  Clamp avoids e^{2x} overflow; for
    # x >= 20 the ratio is 1 to within f32 precision, so mish(x) == x anyway.
    e = jnp.exp(jnp.minimum(x, 20.0))
    n = e * (e + 2.0)
    return x * n * pl.reciprocal(n + 2.0, approx=True)


# ------------------------------ Pallas kernels ------------------------------

def _mm_bias_mish_kernel(x_ref, w_ref, b_ref, o_ref):
    z = jnp.dot(x_ref[...], w_ref[...], preferred_element_type=jnp.float32)
    o_ref[...] = _mish_f32(z + b_ref[...]).astype(o_ref.dtype)


def _mm2_bias_mish_kernel(xa_ref, wa_ref, xb_ref, wb_ref, b_ref, o_ref):
    z = jnp.dot(xa_ref[...], wa_ref[...], preferred_element_type=jnp.float32)
    z = z + jnp.dot(xb_ref[...], wb_ref[...], preferred_element_type=jnp.float32)
    o_ref[...] = _mish_f32(z + b_ref[...]).astype(o_ref.dtype)


def _conv3x3_res_mish_kernel(x_ref, w_ref, b_ref, r_ref, o_ref):
    # x_ref : [1, H+2, W+2, C]  (padded image, bf16)
    # w_ref : [3, 3, C, tn]     (BN-folded, bf16)
    # b_ref : [1, tn]           (f32)
    # r_ref : [1, H, W, tn]     (residual, bf16)
    # o_ref : [1, H, W, tn]
    _, H, W, tn = o_ref.shape
    C = x_ref.shape[-1]
    acc = jnp.zeros((H * W, tn), jnp.float32)
    for dh in range(3):
        for dw in range(3):
            xs = x_ref[0, dh:dh + H, dw:dw + W, :]            # [H, W, C]
            acc = acc + jnp.dot(xs.reshape(H * W, C), w_ref[dh, dw],
                                preferred_element_type=jnp.float32)
    y = _mish_f32(acc + b_ref[...])
    y = y + r_ref[0].reshape(H * W, tn).astype(jnp.float32)
    o_ref[...] = y.reshape(1, H, W, tn).astype(o_ref.dtype)


# ------------------------------ kernel wrappers ------------------------------

def _pick_tm(m):
    """Row-tile: big tiles for HBM roofline, but >=2 blocks when possible (v7x)."""
    if m >= 1024:
        return 512
    if m <= 8:
        return 8
    half = -(-m // 2)
    return max(8, ((half + 7) // 8) * 8)


def _pick_tn(cout):
    return 256 if cout % 256 == 0 else cout


def _matmul_mish(x2d, wq, bias):
    """mish(x2d @ wq + bias); x2d/wq bf16, bias f32, output bf16."""
    M, K = x2d.shape
    Cout = wq.shape[1]
    tm = _pick_tm(M)
    nm = -(-M // tm)
    Mp = nm * tm
    if Mp != M:
        x2d = jnp.pad(x2d, ((0, Mp - M), (0, 0)))
    tn = _pick_tn(Cout)
    out = pl.pallas_call(
        _mm_bias_mish_kernel,
        out_shape=jax.ShapeDtypeStruct((Mp, Cout), jnp.bfloat16),
        grid=(nm, Cout // tn),
        in_specs=[pl.BlockSpec((tm, K), lambda i, j: (i, 0)),
                  pl.BlockSpec((K, tn), lambda i, j: (0, j)),
                  pl.BlockSpec((1, tn), lambda i, j: (0, j))],
        out_specs=pl.BlockSpec((tm, tn), lambda i, j: (i, j)),
        compiler_params=pltpu.CompilerParams(
            dimension_semantics=("parallel", "parallel"),
            vmem_limit_bytes=_VMEM_LIMIT),
    )(x2d, wq, bias)
    return out[:M] if Mp != M else out


def _matmul2_mish(xa, wa, xb, wb, bias):
    """mish(xa @ wa + xb @ wb + bias) -- avoids materializing concat([xa, xb])."""
    M, Ka = xa.shape
    Kb = xb.shape[1]
    Cout = wa.shape[1]
    tm = _pick_tm(M)
    nm = -(-M // tm)
    Mp = nm * tm
    if Mp != M:
        xa = jnp.pad(xa, ((0, Mp - M), (0, 0)))
        xb = jnp.pad(xb, ((0, Mp - M), (0, 0)))
    tn = _pick_tn(Cout)
    out = pl.pallas_call(
        _mm2_bias_mish_kernel,
        out_shape=jax.ShapeDtypeStruct((Mp, Cout), jnp.bfloat16),
        grid=(nm, Cout // tn),
        in_specs=[pl.BlockSpec((tm, Ka), lambda i, j: (i, 0)),
                  pl.BlockSpec((Ka, tn), lambda i, j: (0, j)),
                  pl.BlockSpec((tm, Kb), lambda i, j: (i, 0)),
                  pl.BlockSpec((Kb, tn), lambda i, j: (0, j)),
                  pl.BlockSpec((1, tn), lambda i, j: (0, j))],
        out_specs=pl.BlockSpec((tm, tn), lambda i, j: (i, j)),
        compiler_params=pltpu.CompilerParams(
            dimension_semantics=("parallel", "parallel"),
            vmem_limit_bytes=_VMEM_LIMIT),
    )(xa, wa, xb, wb, bias)
    return out[:M] if Mp != M else out


def _conv3x3_res_mish(x_nhwc, wq, bias, residual_nhwc):
    """Direct 3x3 stride-1 conv + bias + mish + residual (ResBlock second layer)."""
    N, H, W, C = x_nhwc.shape
    Cout = wq.shape[-1]
    xp = jnp.pad(x_nhwc, ((0, 0), (1, 1), (1, 1), (0, 0)))
    Hp, Wp = H + 2, W + 2
    tn = _pick_tn(Cout)
    return pl.pallas_call(
        _conv3x3_res_mish_kernel,
        out_shape=jax.ShapeDtypeStruct((N, H, W, Cout), jnp.bfloat16),
        grid=(N, Cout // tn),
        in_specs=[pl.BlockSpec((1, Hp, Wp, C), lambda n, j: (n, 0, 0, 0)),
                  pl.BlockSpec((3, 3, C, tn), lambda n, j: (0, 0, 0, j)),
                  pl.BlockSpec((1, tn), lambda n, j: (0, j)),
                  pl.BlockSpec((1, H, W, tn), lambda n, j: (n, 0, 0, j))],
        out_specs=pl.BlockSpec((1, H, W, tn), lambda n, j: (n, 0, 0, j)),
        compiler_params=pltpu.CompilerParams(
            dimension_semantics=("parallel", "parallel"),
            vmem_limit_bytes=_VMEM_LIMIT),
    )(xp, wq, bias, residual_nhwc)


# ------------------------------- glue (JAX) ---------------------------------

def _im2col_3x3(x_nhwc, stride):
    """3x3, pad=1 im2col (tap-major, channel-minor).  Used only for conv1 (stride 2)."""
    N, H, W, C = x_nhwc.shape
    xp = jnp.pad(x_nhwc, ((0, 0), (1, 1), (1, 1), (0, 0)))
    Ho = (H + 2 - 3) // stride + 1
    Wo = (W + 2 - 3) // stride + 1
    cols = []
    for dh in range(3):
        for dw in range(3):
            cols.append(xp[:, dh:dh + stride * (Ho - 1) + 1:stride,
                              dw:dw + stride * (Wo - 1) + 1:stride, :])
    patches = jnp.concatenate(cols, axis=-1)                  # [N, Ho, Wo, 9C]
    return patches.reshape(N * Ho * Wo, 9 * C), (N, Ho, Wo)


def downsample4_forward(x_nchw, prep):
    N = x_nchw.shape[0]
    x = jnp.transpose(x_nchw, (0, 2, 3, 1)).astype(jnp.bfloat16)   # NCHW -> NHWC bf16

    # conv1: 3x3 / stride 2, 256 -> 512 (single layer; im2col gather stays in XLA)
    # TODO(synk): move the stride-2 tap gather into the kernel (phase-split input)
    #             to also drop conv1's im2col HBM traffic.
    p = prep["conv1"]
    x2d, (_, Ho, Wo) = _im2col_3x3(x, 2)
    x1 = _matmul_mish(x2d, p["wq"], p["bias"])                # [M, 512]
    M = N * Ho * Wo

    # conv2 + conv3 fused into one 512 -> 512 matmul over x1
    p = prep["conv23"]
    y = _matmul_mish(x1, p["wq"], p["bias"])                  # [M, 512]
    x2 = y[:, :256]                                           # conv2 output
    r = y[:, 256:]                                            # conv3 output

    # 8 residual blocks: 1x1 (matmul kernel) then direct 3x3 + residual kernel
    for (p1, p2) in prep["resblock"]:
        h = _matmul_mish(r, p1["wq"], p1["bias"])             # [M, 256]
        h4 = h.reshape(N, Ho, Wo, 256)
        r4 = r.reshape(N, Ho, Wo, 256)
        r = _conv3x3_res_mish(h4, p2["wq"], p2["bias"], r4).reshape(M, 256)

    # conv4: 1x1, 256 -> 256
    p = prep["conv4"]
    x4 = _matmul_mish(r, p["wq"], p["bias"])                  # [M, 256]

    # conv5: 1x1 over cat([x4, x2]) -- done as two dots in-kernel (no concat in HBM)
    p = prep["conv5"]
    x5 = _matmul2_mish(x4, p["wa"], x2, p["wb"], p["bias"])   # [M, 512]

    out = x5.reshape(N, Ho, Wo, 512)
    return jnp.transpose(out, (0, 3, 1, 2)).astype(jnp.float32)   # NHWC -> NCHW


# --------------------------- parameter creation ------------------------------

def make_conv_params(key, cin, cout, k, stride):
    kw_, kg, kb, km, kv = jax.random.split(key, 5)
    fan_in = cin * k * k
    w = (jax.random.normal(kw_, (k, k, cin, cout), jnp.float32)
         / jnp.sqrt(jnp.float32(fan_in)))
    gamma = 1.0 + 0.1 * jax.random.normal(kg, (cout,), jnp.float32)
    beta = 0.1 * jax.random.normal(kb, (cout,), jnp.float32)
    mean = 0.1 * jax.random.normal(km, (cout,), jnp.float32)
    var = 1.0 + 0.1 * jax.random.uniform(kv, (cout,), dtype=jnp.float32)
    eps = 1e-5
    scale = gamma / jnp.sqrt(var + eps)
    bias = beta - mean * scale
    return {"w": w,
            "scale": scale.reshape(1, cout),
            "bias": bias.reshape(1, cout),
            "stride": stride}


def make_downsample4_params(key):
    keys = jax.random.split(key, 5 + 16)
    params = {
        "conv1": make_conv_params(keys[0], 256, 512, 3, 2),
        "conv2": make_conv_params(keys[1], 512, 256, 1, 1),
        "conv3": make_conv_params(keys[2], 512, 256, 1, 1),
        "conv4": make_conv_params(keys[3], 256, 256, 1, 1),
        "conv5": make_conv_params(keys[4], 512, 512, 1, 1),
        "resblock": [],
    }
    for i in range(8):
        p1 = make_conv_params(keys[5 + 2 * i], 256, 256, 1, 1)
        p2 = make_conv_params(keys[6 + 2 * i], 256, 256, 3, 1)
        params["resblock"].append((p1, p2))
    return params


def prepare_params(params):
    """Fold BN scale into bf16 weights; fuse conv2/conv3; split conv5 for 2-input dot."""
    def fold_mm(p):                       # -> [K, Cout] bf16 weight + f32 bias
        w = p["w"]
        cout = w.shape[-1]
        wq = (w.reshape(-1, cout) * p["scale"]).astype(jnp.bfloat16)
        return {"wq": wq, "bias": p["bias"].astype(jnp.float32)}

    def fold_conv3(p):                    # -> [3,3,C,Cout] bf16 weight + f32 bias
        wq = (p["w"] * p["scale"].reshape(1, 1, 1, -1)).astype(jnp.bfloat16)
        return {"wq": wq, "bias": p["bias"].astype(jnp.float32)}

    prep = {"conv1": fold_mm(params["conv1"]),
            "conv4": fold_mm(params["conv4"])}
    c2, c3 = fold_mm(params["conv2"]), fold_mm(params["conv3"])
    prep["conv23"] = {"wq": jnp.concatenate([c2["wq"], c3["wq"]], axis=1),
                      "bias": jnp.concatenate([c2["bias"], c3["bias"]], axis=1)}
    prep["resblock"] = [(fold_mm(p1), fold_conv3(p2))
                        for (p1, p2) in params["resblock"]]
    c5 = fold_mm(params["conv5"])
    prep["conv5"] = {"wa": c5["wq"][:256], "wb": c5["wq"][256:], "bias": c5["bias"]}
    return prep


# ------------------------- pure-JAX reference check --------------------------

def _ref_conv(x_nhwc, p):
    k = p["w"].shape[0]
    pad = (k - 1) // 2
    z = lax.conv_general_dilated(
        x_nhwc, p["w"], (p["stride"], p["stride"]),
        padding=[(pad, pad), (pad, pad)],
        dimension_numbers=("NHWC", "HWIO", "NHWC"),
        precision=lax.Precision.HIGHEST)
    z = z * p["scale"].reshape(1, 1, 1, -1) + p["bias"].reshape(1, 1, 1, -1)
    return z * jnp.tanh(jax.nn.softplus(z))


def ref_forward(x_nchw, params):
    x = jnp.transpose(x_nchw, (0, 2, 3, 1))
    x1 = _ref_conv(x, params["conv1"])
    x2 = _ref_conv(x1, params["conv2"])
    x3 = _ref_conv(x1, params["conv3"])
    r = x3
    for (p1, p2) in params["resblock"]:
        h = _ref_conv(r, p1)
        h = _ref_conv(h, p2)
        r = r + h
    x4 = _ref_conv(r, params["conv4"])
    x4 = jnp.concatenate([x4, x2], axis=-1)
    x5 = _ref_conv(x4, params["conv5"])
    return jnp.transpose(x5, (0, 3, 1, 2))


# ----------------------------------- main ------------------------------------

if __name__ == "__main__":
    key = jax.random.PRNGKey(0)
    k_in, k_p = jax.random.split(key)

    # Small but module-consistent shapes: DownSample4 requires C_in = 256.
    N, C, H, W = 2, 256, 16, 16
    x = jax.random.normal(k_in, (N, C, H, W), jnp.float32)
    params = make_downsample4_params(k_p)
    prep = prepare_params(params)

    fwd = jax.jit(downsample4_forward)
    out = jax.block_until_ready(fwd(x, prep))

    assert out.shape == (N, 512, H // 2, W // 2), out.shape
    assert out.dtype == jnp.float32

    ref = jax.block_until_ready(ref_forward(x, params))
    ref_scale = float(jnp.maximum(1.0, jnp.max(jnp.abs(ref))))
    max_err = float(jnp.max(jnp.abs(out - ref)))
    # bf16 activations/weights through 21 layers: allow a modest relative tolerance.
    assert max_err < 8e-2 * ref_scale, f"mismatch vs reference: {max_err} (scale {ref_scale})"

    print("KERNEL_OK")
</pallas_src>

<mosaic_0001>
module attributes {stable_mosaic.version = 11 : i64} {
  func.func @_mm_bias_mish_kernel(%arg0: i32, %arg1: i32, %arg2: memref<64x512xbf16, #tpu.memory_space<vmem>>, %arg3: memref<512x256xbf16, #tpu.memory_space<vmem>>, %arg4: memref<1x256xf32, #tpu.memory_space<vmem>>, %arg5: memref<64x256xbf16, #tpu.memory_space<vmem>>) attributes {dimension_semantics = [#tpu.dimension_semantics<parallel>, #tpu.dimension_semantics<parallel>], iteration_bounds = array<i64: 2, 2>, scalar_prefetch = 0 : i64, scratch_operands = 0 : i64, tpu.core_type = #tpu.core_type<tc>, window_params = [{transform_indices = @transform_0, window_bounds = array<i64: 64, 512>}, {transform_indices = @transform_1, window_bounds = array<i64: 512, 256>}, {transform_indices = @transform_2, window_bounds = array<i64: 1, 256>}, {transform_indices = @transform_3, window_bounds = array<i64: 64, 256>}]} {
    %c0 = arith.constant 0 : index
    %c0_0 = arith.constant 0 : index
    %0 = vector.load %arg2[%c0, %c0_0] : memref<64x512xbf16, #tpu.memory_space<vmem>>, vector<64x512xbf16>
    %c0_1 = arith.constant 0 : index
    %c0_2 = arith.constant 0 : index
    %1 = vector.load %arg3[%c0_1, %c0_2] : memref<512x256xbf16, #tpu.memory_space<vmem>>, vector<512x256xbf16>
    %cst = arith.constant dense<0.000000e+00> : vector<64x256xf32>
    %2 = tpu.matmul %0, %1, %cst {dimension_numbers = #tpu.dot_dimension_numbers<[1], [0], [0], [1], [0, 0, 1, 1], [], []>} : vector<64x512xbf16>, vector<512x256xbf16>, vector<64x256xf32> -> vector<64x256xf32>
    %c0_3 = arith.constant 0 : index
    %c0_4 = arith.constant 0 : index
    %3 = vector.load %arg4[%c0_3, %c0_4] : memref<1x256xf32, #tpu.memory_space<vmem>>, vector<1x256xf32>
    %4 = vector.broadcast %3 : vector<1x256xf32> to vector<64x256xf32>
    %5 = arith.addf %2, %4 : vector<64x256xf32>
    %cst_5 = arith.constant 2.000000e+01 : f32
    %6 = vector.broadcast %cst_5 : f32 to vector<64x256xf32>
    %7 = arith.minimumf %5, %6 : vector<64x256xf32>
    %8 = math.exp %7 : vector<64x256xf32>
    %cst_6 = arith.constant 2.000000e+00 : f32
    %9 = vector.broadcast %cst_6 : f32 to vector<64x256xf32>
    %10 = arith.addf %8, %9 : vector<64x256xf32>
    %11 = arith.mulf %8, %10 : vector<64x256xf32>
    %12 = arith.mulf %5, %11 : vector<64x256xf32>
    %cst_7 = arith.constant 2.000000e+00 : f32
    %13 = vector.broadcast %cst_7 : f32 to vector<64x256xf32>
    %14 = arith.addf %11, %13 : vector<64x256xf32>
    %15 = tpu.reciprocal %14 {approx = true} : vector<64x256xf32> -> vector<64x256xf32>
    %16 = arith.mulf %12, %15 : vector<64x256xf32>
    %17 = arith.truncf %16 : vector<64x256xf32> to vector<64x256xbf16>
    %c0_8 = arith.constant 0 : index
    %c0_9 = arith.constant 0 : index
    %18 = vector.load %arg5[%c0_8, %c0_9] : memref<64x256xbf16, #tpu.memory_space<vmem>>, vector<64x256xbf16>
    tpu.vector_store %arg5[%c0_8, %c0_9], %17 {strides = array<i32>} : memref<64x256xbf16, #tpu.memory_space<vmem>>, vector<64x256xbf16>,
    return
  }
  func.func @transform_0(%arg0: i32, %arg1: i32) -> (i32, i32) {
    %c0_i32 = arith.constant 0 : i32
    %c0_i32_0 = arith.constant 0 : i32
    return %arg0, %c0_i32 : i32, i32
  }
  func.func @transform_1(%arg0: i32, %arg1: i32) -> (i32, i32) {
    %c0_i32 = arith.constant 0 : i32
    %c0_i32_0 = arith.constant 0 : i32
    return %c0_i32, %arg1 : i32, i32
  }
  func.func @transform_2(%arg0: i32, %arg1: i32) -> (i32, i32) {
    %c0_i32 = arith.constant 0 : i32
    %c0_i32_0 = arith.constant 0 : i32
    return %c0_i32, %arg1 : i32, i32
  }
  func.func @transform_3(%arg0: i32, %arg1: i32) -> (i32, i32) {
    %c0_i32 = arith.constant 0 : i32
    return %arg0, %arg1 : i32, i32
  }
}

module attributes {stable_mosaic.version = 11 : i64} {
  func.func @_mm_bias_mish_kernel(%arg0: i32, %arg1: i32, %arg2: memref<64x2304xbf16, #tpu.memory_space<vmem>>, %arg3: memref<2304x256xbf16, #tpu.memory_space<vmem>>, %arg4: memref<1x256xf32, #tpu.memory_space<vmem>>, %arg5: memref<64x256xbf16, #tpu.memory_space<vmem>>) attributes {dimension_semantics = [#tpu.dimension_semantics<parallel>, #tpu.dimension_semantics<parallel>], iteration_bounds = array<i64: 2, 2>, scalar_prefetch = 0 : i64, scratch_operands = 0 : i64, tpu.core_type = #tpu.core_type<tc>, window_params = [{transform_indices = @transform_0, window_bounds = array<i64: 64, 2304>}, {transform_indices = @transform_1, window_bounds = array<i64: 2304, 256>}, {transform_indices = @transform_2, window_bounds = array<i64: 1, 256>}, {transform_indices = @transform_3, window_bounds = array<i64: 64, 256>}]} {
    %c0 = arith.constant 0 : index
    %c0_0 = arith.constant 0 : index
    %0 = vector.load %arg2[%c0, %c0_0] : memref<64x2304xbf16, #tpu.memory_space<vmem>>, vector<64x2304xbf16>
    %c0_1 = arith.constant 0 : index
    %c0_2 = arith.constant 0 : index
    %1 = vector.load %arg3[%c0_1, %c0_2] : memref<2304x256xbf16, #tpu.memory_space<vmem>>, vector<2304x256xbf16>
    %cst = arith.constant dense<0.000000e+00> : vector<64x256xf32>
    %2 = tpu.matmul %0, %1, %cst {dimension_numbers = #tpu.dot_dimension_numbers<[1], [0], [0], [1], [0, 0, 1, 1], [], []>} : vector<64x2304xbf16>, vector<2304x256xbf16>, vector<64x256xf32> -> vector<64x256xf32>
    %c0_3 = arith.constant 0 : index
    %c0_4 = arith.constant 0 : index
    %3 = vector.load %arg4[%c0_3, %c0_4] : memref<1x256xf32, #tpu.memory_space<vmem>>, vector<1x256xf32>
    %4 = vector.broadcast %3 : vector<1x256xf32> to vector<64x256xf32>
    %5 = arith.addf %2, %4 : vector<64x256xf32>
    %cst_5 = arith.constant 2.000000e+01 : f32
    %6 = vector.broadcast %cst_5 : f32 to vector<64x256xf32>
    %7 = arith.minimumf %5, %6 : vector<64x256xf32>
    %8 = math.exp %7 : vector<64x256xf32>
    %cst_6 = arith.constant 2.000000e+00 : f32
    %9 = vector.broadcast %cst_6 : f32 to vector<64x256xf32>
    %10 = arith.addf %8, %9 : vector<64x256xf32>
    %11 = arith.mulf %8, %10 : vector<64x256xf32>
    %12 = arith.mulf %5, %11 : vector<64x256xf32>
    %cst_7 = arith.constant 2.000000e+00 : f32
    %13 = vector.broadcast %cst_7 : f32 to vector<64x256xf32>
    %14 = arith.addf %11, %13 : vector<64x256xf32>
    %15 = tpu.reciprocal %14 {approx = true} : vector<64x256xf32> -> vector<64x256xf32>
    %16 = arith.mulf %12, %15 : vector<64x256xf32>
    %17 = arith.truncf %16 : vector<64x256xf32> to vector<64x256xbf16>
    %c0_8 = arith.constant 0 : index
    %c0_9 = arith.constant 0 : index
    %18 = vector.load %arg5[%c0_8, %c0_9] : memref<64x256xbf16, #tpu.memory_space<vmem>>, vector<64x256xbf16>
    tpu.vector_store %arg5[%c0_8, %c0_9], %17 {strides = array<i32>} : memref<64x256xbf16, #tpu.memory_space<vmem>>, vector<64x256xbf16>,
    return
  }
  func.func @transform_0(%arg0: i32, %arg1: i32) -> (i32, i32) {
    %c0_i32 = arith.constant 0 : i32
    %c0_i32_0 = arith.constant 0 : i32
    return %arg0, %c0_i32 : i32, i32
  }
  func.func @transform_1(%arg0: i32, %arg1: i32) -> (i32, i32) {
    %c0_i32 = arith.constant 0 : i32
    %c0_i32_0 = arith.constant 0 : i32
    return %c0_i32, %arg1 : i32, i32
  }
  func.func @transform_2(%arg0: i32, %arg1: i32) -> (i32, i32) {
    %c0_i32 = arith.constant 0 : i32
    %c0_i32_0 = arith.constant 0 : i32
    return %c0_i32, %arg1 : i32, i32
  }
  func.func @transform_3(%arg0: i32, %arg1: i32) -> (i32, i32) {
    %c0_i32 = arith.constant 0 : i32
    return %arg0, %arg1 : i32, i32
  }
}

module attributes {stable_mosaic.version = 11 : i64} {
  func.func @_mm_bias_mish_kernel(%arg0: i32, %arg1: i32, %arg2: memref<64x256xbf16, #tpu.memory_space<vmem>>, %arg3: memref<256x256xbf16, #tpu.memory_space<vmem>>, %arg4: memref<1x256xf32, #tpu.memory_space<vmem>>, %arg5: memref<64x256xbf16, #tpu.memory_space<vmem>>) attributes {dimension_semantics = [#tpu.dimension_semantics<parallel>, #tpu.dimension_semantics<parallel>], iteration_bounds = array<i64: 2, 1>, scalar_prefetch = 0 : i64, scratch_operands = 0 : i64, tpu.core_type = #tpu.core_type<tc>, window_params = [{transform_indices = @transform_0, window_bounds = array<i64: 64, 256>}, {transform_indices = @transform_1, window_bounds = array<i64: 256, 256>}, {transform_indices = @transform_2, window_bounds = array<i64: 1, 256>}, {transform_indices = @transform_3, window_bounds = array<i64: 64, 256>}]} {
    %c0 = arith.constant 0 : index
    %c0_0 = arith.constant 0 : index
    %0 = vector.load %arg2[%c0, %c0_0] : memref<64x256xbf16, #tpu.memory_space<vmem>>, vector<64x256xbf16>
    %c0_1 = arith.constant 0 : index
    %c0_2 = arith.constant 0 : index
    %1 = vector.load %arg3[%c0_1, %c0_2] : memref<256x256xbf16, #tpu.memory_space<vmem>>, vector<256x256xbf16>
    %cst = arith.constant dense<0.000000e+00> : vector<64x256xf32>
    %2 = tpu.matmul %0, %1, %cst {dimension_numbers = #tpu.dot_dimension_numbers<[1], [0], [0], [1], [0, 0, 1, 1], [], []>} : vector<64x256xbf16>, vector<256x256xbf16>, vector<64x256xf32> -> vector<64x256xf32>
    %c0_3 = arith.constant 0 : index
    %c0_4 = arith.constant 0 : index
    %3 = vector.load %arg4[%c0_3, %c0_4] : memref<1x256xf32, #tpu.memory_space<vmem>>, vector<1x256xf32>
    %4 = vector.broadcast %3 : vector<1x256xf32> to vector<64x256xf32>
    %5 = arith.addf %2, %4 : vector<64x256xf32>
    %cst_5 = arith.constant 2.000000e+01 : f32
    %6 = vector.broadcast %cst_5 : f32 to vector<64x256xf32>
    %7 = arith.minimumf %5, %6 : vector<64x256xf32>
    %8 = math.exp %7 : vector<64x256xf32>
    %cst_6 = arith.constant 2.000000e+00 : f32
    %9 = vector.broadcast %cst_6 : f32 to vector<64x256xf32>
    %10 = arith.addf %8, %9 : vector<64x256xf32>
    %11 = arith.mulf %8, %10 : vector<64x256xf32>
    %12 = arith.mulf %5, %11 : vector<64x256xf32>
    %cst_7 = arith.constant 2.000000e+00 : f32
    %13 = vector.broadcast %cst_7 : f32 to vector<64x256xf32>
    %14 = arith.addf %11, %13 : vector<64x256xf32>
    %15 = tpu.reciprocal %14 {approx = true} : vector<64x256xf32> -> vector<64x256xf32>
    %16 = arith.mulf %12, %15 : vector<64x256xf32>
    %17 = arith.truncf %16 : vector<64x256xf32> to vector<64x256xbf16>
    %c0_8 = arith.constant 0 : index
    %c0_9 = arith.constant 0 : index
    %18 = vector.load %arg5[%c0_8, %c0_9] : memref<64x256xbf16, #tpu.memory_space<vmem>>, vector<64x256xbf16>
    tpu.vector_store %arg5[%c0_8, %c0_9], %17 {strides = array<i32>} : memref<64x256xbf16, #tpu.memory_space<vmem>>, vector<64x256xbf16>,
    return
  }
  func.func @transform_0(%arg0: i32, %arg1: i32) -> (i32, i32) {
    %c0_i32 = arith.constant 0 : i32
    %c0_i32_0 = arith.constant 0 : i32
    return %arg0, %c0_i32 : i32, i32
  }
  func.func @transform_1(%arg0: i32, %arg1: i32) -> (i32, i32) {
    %c0_i32 = arith.constant 0 : i32
    %c0_i32_0 = arith.constant 0 : i32
    return %c0_i32, %arg1 : i32, i32
  }
  func.func @transform_2(%arg0: i32, %arg1: i32) -> (i32, i32) {
    %c0_i32 = arith.constant 0 : i32
    %c0_i32_0 = arith.constant 0 : i32
    return %c0_i32, %arg1 : i32, i32
  }
  func.func @transform_3(%arg0: i32, %arg1: i32) -> (i32, i32) {
    %c0_i32 = arith.constant 0 : i32
    return %arg0, %arg1 : i32, i32
  }
}

module attributes {stable_mosaic.version = 11 : i64} {
  func.func @_conv3x3_res_mish_kernel(%arg0: i32, %arg1: i32, %arg2: memref<1x10x10x256xbf16, #tpu.memory_space<vmem>>, %arg3: memref<3x3x256x256xbf16, #tpu.memory_space<vmem>>, %arg4: memref<1x256xf32, #tpu.memory_space<vmem>>, %arg5: memref<1x8x8x256xbf16, #tpu.memory_space<vmem>>, %arg6: memref<1x8x8x256xbf16, #tpu.memory_space<vmem>>) attributes {dimension_semantics = [#tpu.dimension_semantics<parallel>, #tpu.dimension_semantics<parallel>], iteration_bounds = array<i64: 2, 1>, scalar_prefetch = 0 : i64, scratch_operands = 0 : i64, tpu.core_type = #tpu.core_type<tc>, window_params = [{transform_indices = @transform_0, window_bounds = array<i64: 1, 10, 10, 256>}, {transform_indices = @transform_1, window_bounds = array<i64: 3, 3, 256, 256>}, {transform_indices = @transform_2, window_bounds = array<i64: 1, 256>}, {transform_indices = @transform_3, window_bounds = array<i64: 1, 8, 8, 256>}, {transform_indices = @transform_4, window_bounds = array<i64: 1, 8, 8, 256>}]} {
    %cst = arith.constant 0.000000e+00 : f32
    %0 = vector.broadcast %cst : f32 to vector<64x256xf32>
    %c0 = arith.constant 0 : index
    %c0_0 = arith.constant 0 : index
    %c0_1 = arith.constant 0 : index
    %c0_2 = arith.constant 0 : index
    %1 = vector.load %arg2[%c0, %c0_0, %c0_1, %c0_2] : memref<1x10x10x256xbf16, #tpu.memory_space<vmem>>, vector<1x8x8x256xbf16>
    %2 = vector.shape_cast %1 : vector<1x8x8x256xbf16> to vector<8x8x256xbf16>
    %3 = vector.shape_cast %2 : vector<8x8x256xbf16> to vector<64x256xbf16>
    %c0_3 = arith.constant 0 : index
    %c0_4 = arith.constant 0 : index
    %c0_5 = arith.constant 0 : index
    %c0_6 = arith.constant 0 : index
    %4 = vector.load %arg3[%c0_3, %c0_4, %c0_5, %c0_6] : memref<3x3x256x256xbf16, #tpu.memory_space<vmem>>, vector<1x1x256x256xbf16>
    %5 = vector.shape_cast %4 : vector<1x1x256x256xbf16> to vector<256x256xbf16>
    %cst_7 = arith.constant dense<0.000000e+00> : vector<64x256xf32>
    %6 = tpu.matmul %3, %5, %cst_7 {dimension_numbers = #tpu.dot_dimension_numbers<[1], [0], [0], [1], [0, 0, 1, 1], [], []>} : vector<64x256xbf16>, vector<256x256xbf16>, vector<64x256xf32> -> vector<64x256xf32>
    %7 = arith.addf %0, %6 : vector<64x256xf32>
    %c0_8 = arith.constant 0 : index
    %c0_9 = arith.constant 0 : index
    %c1 = arith.constant 1 : index
    %c0_10 = arith.constant 0 : index
    %8 = vector.load %arg2[%c0_8, %c0_9, %c1, %c0_10] : memref<1x10x10x256xbf16, #tpu.memory_space<vmem>>, vector<1x8x8x256xbf16>
    %9 = vector.shape_cast %8 : vector<1x8x8x256xbf16> to vector<8x8x256xbf16>
    %10 = vector.shape_cast %9 : vector<8x8x256xbf16> to vector<64x256xbf16>
    %c0_11 = arith.constant 0 : index
    %c1_12 = arith.constant 1 : index
    %c0_13 = arith.constant 0 : index
    %c0_14 = arith.constant 0 : index
    %11 = vector.load %arg3[%c0_11, %c1_12, %c0_13, %c0_14] : memref<3x3x256x256xbf16, #tpu.memory_space<vmem>>, vector<1x1x256x256xbf16>
    %12 = vector.shape_cast %11 : vector<1x1x256x256xbf16> to vector<256x256xbf16>
    %cst_15 = arith.constant dense<0.000000e+00> : vector<64x256xf32>
    %13 = tpu.matmul %10, %12, %cst_15 {dimension_numbers = #tpu.dot_dimension_numbers<[1], [0], [0], [1], [0, 0, 1, 1], [], []>} : vector<64x256xbf16>, vector<256x256xbf16>, vector<64x256xf32> -> vector<64x256xf32>
    %14 = arith.addf %7, %13 : vector<64x256xf32>
    %c0_16 = arith.constant 0 : index
    %c0_17 = arith.constant 0 : index
    %c2 = arith.constant 2 : index
    %c0_18 = arith.constant 0 : index
    %15 = vector.load %arg2[%c0_16, %c0_17, %c2, %c0_18] : memref<1x10x10x256xbf16, #tpu.memory_space<vmem>>, vector<1x8x8x256xbf16>
    %16 = vector.shape_cast %15 : vector<1x8x8x256xbf16> to vector<8x8x256xbf16>
    %17 = vector.shape_cast %16 : vector<8x8x256xbf16> to vector<64x256xbf16>
    %c0_19 = arith.constant 0 : index
    %c2_20 = arith.constant 2 : index
    %c0_21 = arith.constant 0 : index
    %c0_22 = arith.constant 0 : index
    %18 = vector.load %arg3[%c0_19, %c2_20, %c0_21, %c0_22] : memref<3x3x256x256xbf16, #tpu.memory_space<vmem>>, vector<1x1x256x256xbf16>
    %19 = vector.shape_cast %18 : vector<1x1x256x256xbf16> to vector<256x256xbf16>
    %cst_23 = arith.constant dense<0.000000e+00> : vector<64x256xf32>
    %20 = tpu.matmul %17, %19, %cst_23 {dimension_numbers = #tpu.dot_dimension_numbers<[1], [0], [0], [1], [0, 0, 1, 1], [], []>} : vector<64x256xbf16>, vector<256x256xbf16>, vector<64x256xf32> -> vector<64x256xf32>
    %21 = arith.addf %14, %20 : vector<64x256xf32>
    %c0_24 = arith.constant 0 : index
    %c1_25 = arith.constant 1 : index
    %c0_26 = arith.constant 0 : index
    %c0_27 = arith.constant 0 : index
    %22 = vector.load %arg2[%c0_24, %c1_25, %c0_26, %c0_27] : memref<1x10x10x256xbf16, #tpu.memory_space<vmem>>, vector<1x8x8x256xbf16>
    %23 = vector.shape_cast %22 : vector<1x8x8x256xbf16> to vector<8x8x256xbf16>
    %24 = vector.shape_cast %23 : vector<8x8x256xbf16> to vector<64x256xbf16>
    %c1_28 = arith.constant 1 : index
    %c0_29 = arith.constant 0 : index
    %c0_30 = arith.constant 0 : index
    %c0_31 = arith.constant 0 : index
    %25 = vector.load %arg3[%c1_28, %c0_29, %c0_30, %c0_31] : memref<3x3x256x256xbf16, #tpu.memory_space<vmem>>, vector<1x1x256x256xbf16>
    %26 = vector.shape_cast %25 : vector<1x1x256x256xbf16> to vector<256x256xbf16>
    %cst_32 = arith.constant dense<0.000000e+00> : vector<64x256xf32>
    %27 = tpu.matmul %24, %26, %cst_32 {dimension_numbers = #tpu.dot_dimension_numbers<[1], [0], [0], [1], [0, 0, 1, 1], [], []>} : vector<64x256xbf16>, vector<256x256xbf16>, vector<64x256xf32> -> vector<64x256xf32>
    %28 = arith.addf %21, %27 : vector<64x256xf32>
    %c0_33 = arith.constant 0 : index
    %c1_34 = arith.constant 1 : index
    %c1_35 = arith.constant 1 : index
    %c0_36 = arith.constant 0 : index
    %29 = vector.load %arg2[%c0_33, %c1_34, %c1_35, %c0_36] : memref<1x10x10x256xbf16, #tpu.memory_space<vmem>>, vector<1x8x8x256xbf16>
    %30 = vector.shape_cast %29 : vector<1x8x8x256xbf16> to vector<8x8x256xbf16>
    %31 = vector.shape_cast %30 : vector<8x8x256xbf16> to vector<64x256xbf16>
    %c1_37 = arith.constant 1 : index
    %c1_38 = arith.constant 1 : index
    %c0_39 = arith.constant 0 : index
    %c0_40 = arith.constant 0 : index
    %32 = vector.load %arg3[%c1_37, %c1_38, %c0_39, %c0_40] : memref<3x3x256x256xbf16, #tpu.memory_space<vmem>>, vector<1x1x256x256xbf16>
    %33 = vector.shape_cast %32 : vector<1x1x256x256xbf16> to vector<256x256xbf16>
    %cst_41 = arith.constant dense<0.000000e+00> : vector<64x256xf32>
    %34 = tpu.matmul %31, %33, %cst_41 {dimension_numbers = #tpu.dot_dimension_numbers<[1], [0], [0], [1], [0, 0, 1, 1], [], []>} : vector<64x256xbf16>, vector<256x256xbf16>, vector<64x256xf32> -> vector<64x256xf32>
    %35 = arith.addf %28, %34 : vector<64x256xf32>
    %c0_42 = arith.constant 0 : index
    %c1_43 = arith.constant 1 : index
    %c2_44 = arith.constant 2 : index
    %c0_45 = arith.constant 0 : index
    %36 = vector.load %arg2[%c0_42, %c1_43, %c2_44, %c0_45] : memref<1x10x10x256xbf16, #tpu.memory_space<vmem>>, vector<1x8x8x256xbf16>
    %37 = vector.shape_cast %36 : vector<1x8x8x256xbf16> to vector<8x8x256xbf16>
    %38 = vector.shape_cast %37 : vector<8x8x256xbf16> to vector<64x256xbf16>
    %c1_46 = arith.constant 1 : index
    %c2_47 = arith.constant 2 : index
    %c0_48 = arith.constant 0 : index
    %c0_49 = arith.constant 0 : index
    %39 = vector.load %arg3[%c1_46, %c2_47, %c0_48, %c0_49] : memref<3x3x256x256xbf16, #tpu.memory_space<vmem>>, vector<1x1x256x256xbf16>
    %40 = vector.shape_cast %39 : vector<1x1x256x256xbf16> to vector<256x256xbf16>
    %cst_50 = arith.constant dense<0.000000e+00> : vector<64x256xf32>
    %41 = tpu.matmul %38, %40, %cst_50 {dimension_numbers = #tpu.dot_dimension_numbers<[1], [0], [0], [1], [0, 0, 1, 1], [], []>} : vector<64x256xbf16>, vector<256x256xbf16>, vector<64x256xf32> -> vector<64x256xf32>
    %42 = arith.addf %35, %41 : vector<64x256xf32>
    %c0_51 = arith.constant 0 : index
    %c2_52 = arith.constant 2 : index
    %c0_53 = arith.constant 0 : index
    %c0_54 = arith.constant 0 : index
    %43 = vector.load %arg2[%c0_51, %c2_52, %c0_53, %c0_54] : memref<1x10x10x256xbf16, #tpu.memory_space<vmem>>, vector<1x8x8x256xbf16>
    %44 = vector.shape_cast %43 : vector<1x8x8x256xbf16> to vector<8x8x256xbf16>
    %45 = vector.shape_cast %44 : vector<8x8x256xbf16> to vector<64x256xbf16>
    %c2_55 = arith.constant 2 : index
    %c0_56 = arith.constant 0 : index
    %c0_57 = arith.constant 0 : index
    %c0_58 = arith.constant 0 : index
    %46 = vector.load %arg3[%c2_55, %c0_56, %c0_57, %c0_58] : memref<3x3x256x256xbf16, #tpu.memory_space<vmem>>, vector<1x1x256x256xbf16>
    %47 = vector.shape_cast %46 : vector<1x1x256x256xbf16> to vector<256x256xbf16>
    %cst_59 = arith.constant dense<0.000000e+00> : vector<64x256xf32>
    %48 = tpu.matmul %45, %47, %cst_59 {dimension_numbers = #tpu.dot_dimension_numbers<[1], [0], [0], [1], [0, 0, 1, 1], [], []>} : vector<64x256xbf16>, vector<256x256xbf16>, vector<64x256xf32> -> vector<64x256xf32>
    %49 = arith.addf %42, %48 : vector<64x256xf32>
    %c0_60 = arith.constant 0 : index
    %c2_61 = arith.constant 2 : index
    %c1_62 = arith.constant 1 : index
    %c0_63 = arith.constant 0 : index
    %50 = vector.load %arg2[%c0_60, %c2_61, %c1_62, %c0_63] : memref<1x10x10x256xbf16, #tpu.memory_space<vmem>>, vector<1x8x8x256xbf16>
    %51 = vector.shape_cast %50 : vector<1x8x8x256xbf16> to vector<8x8x256xbf16>
    %52 = vector.shape_cast %51 : vector<8x8x256xbf16> to vector<64x256xbf16>
    %c2_64 = arith.constant 2 : index
    %c1_65 = arith.constant 1 : index
    %c0_66 = arith.constant 0 : index
    %c0_67 = arith.constant 0 : index
    %53 = vector.load %arg3[%c2_64, %c1_65, %c0_66, %c0_67] : memref<3x3x256x256xbf16, #tpu.memory_space<vmem>>, vector<1x1x256x256xbf16>
    %54 = vector.shape_cast %53 : vector<1x1x256x256xbf16> to vector<256x256xbf16>
    %cst_68 = arith.constant dense<0.000000e+00> : vector<64x256xf32>
    %55 = tpu.matmul %52, %54, %cst_68 {dimension_numbers = #tpu.dot_dimension_numbers<[1], [0], [0], [1], [0, 0, 1, 1], [], []>} : vector<64x256xbf16>, vector<256x256xbf16>, vector<64x256xf32> -> vector<64x256xf32>
    %56 = arith.addf %49, %55 : vector<64x256xf32>
    %c0_69 = arith.constant 0 : index
    %c2_70 = arith.constant 2 : index
    %c2_71 = arith.constant 2 : index
    %c0_72 = arith.constant 0 : index
    %57 = vector.load %arg2[%c0_69, %c2_70, %c2_71, %c0_72] : memref<1x10x10x256xbf16, #tpu.memory_space<vmem>>, vector<1x8x8x256xbf16>
    %58 = vector.shape_cast %57 : vector<1x8x8x256xbf16> to vector<8x8x256xbf16>
    %59 = vector.shape_cast %58 : vector<8x8x256xbf16> to vector<64x256xbf16>
    %c2_73 = arith.constant 2 : index
    %c2_74 = arith.constant 2 : index
    %c0_75 = arith.constant 0 : index
    %c0_76 = arith.constant 0 : index
    %60 = vector.load %arg3[%c2_73, %c2_74, %c0_75, %c0_76] : memref<3x3x256x256xbf16, #tpu.memory_space<vmem>>, vector<1x1x256x256xbf16>
    %61 = vector.shape_cast %60 : vector<1x1x256x256xbf16> to vector<256x256xbf16>
    %cst_77 = arith.constant dense<0.000000e+00> : vector<64x256xf32>
    %62 = tpu.matmul %59, %61, %cst_77 {dimension_numbers = #tpu.dot_dimension_numbers<[1], [0], [0], [1], [0, 0, 1, 1], [], []>} : vector<64x256xbf16>, vector<256x256xbf16>, vector<64x256xf32> -> vector<64x256xf32>
    %63 = arith.addf %56, %62 : vector<64x256xf32>
    %c0_78 = arith.constant 0 : index
    %c0_79 = arith.constant 0 : index
    %64 = vector.load %arg4[%c0_78, %c0_79] : memref<1x256xf32, #tpu.memory_space<vmem>>, vector<1x256xf32>
    %65 = vector.broadcast %64 : vector<1x256xf32> to vector<64x256xf32>
    %66 = arith.addf %63, %65 : vector<64x256xf32>
    %cst_80 = arith.constant 2.000000e+01 : f32
    %67 = vector.broadcast %cst_80 : f32 to vector<64x256xf32>
    %68 = arith.minimumf %66, %67 : vector<64x256xf32>
    %69 = math.exp %68 : vector<64x256xf32>
    %cst_81 = arith.constant 2.000000e+00 : f32
    %70 = vector.broadcast %cst_81 : f32 to vector<64x256xf32>
    %71 = arith.addf %69, %70 : vector<64x256xf32>
    %72 = arith.mulf %69, %71 : vector<64x256xf32>
    %73 = arith.mulf %66, %72 : vector<64x256xf32>
    %cst_82 = arith.constant 2.000000e+00 : f32
    %74 = vector.broadcast %cst_82 : f32 to vector<64x256xf32>
    %75 = arith.addf %72, %74 : vector<64x256xf32>
    %76 = tpu.reciprocal %75 {approx = true} : vector<64x256xf32> -> vector<64x256xf32>
    %77 = arith.mulf %73, %76 : vector<64x256xf32>
    %c0_83 = arith.constant 0 : index
    %c0_84 = arith.constant 0 : index
    %c0_85 = arith.constant 0 : index
    %c0_86 = arith.constant 0 : index
    %78 = vector.load %arg5[%c0_83, %c0_84, %c0_85, %c0_86] : memref<1x8x8x256xbf16, #tpu.memory_space<vmem>>, vector<1x8x8x256xbf16>
    %79 = vector.shape_cast %78 : vector<1x8x8x256xbf16> to vector<8x8x256xbf16>
    %80 = vector.shape_cast %79 : vector<8x8x256xbf16> to vector<64x256xbf16>
    %81 = arith.extf %80 : vector<64x256xbf16> to vector<64x256xf32>
    %82 = arith.addf %77, %81 : vector<64x256xf32>
    %83 = vector.shape_cast %82 : vector<64x256xf32> to vector<1x8x8x256xf32>
    %84 = arith.truncf %83 : vector<1x8x8x256xf32> to vector<1x8x8x256xbf16>
    %c0_87 = arith.constant 0 : index
    %c0_88 = arith.constant 0 : index
    %c0_89 = arith.constant 0 : index
    %c0_90 = arith.constant 0 : index
    %85 = vector.load %arg6[%c0_87, %c0_88, %c0_89, %c0_90] : memref<1x8x8x256xbf16, #tpu.memory_space<vmem>>, vector<1x8x8x256xbf16>
    tpu.vector_store %arg6[%c0_87, %c0_88, %c0_89, %c0_90], %84 {strides = array<i32>} : memref<1x8x8x256xbf16, #tpu.memory_space<vmem>>, vector<1x8x8x256xbf16>,
    return
  }
  func.func @transform_0(%arg0: i32, %arg1: i32) -> (i32, i32, i32, i32) {
    %c0_i32 = arith.constant 0 : i32
    %c0_i32_0 = arith.constant 0 : i32
    %c0_i32_1 = arith.constant 0 : i32
    %c0_i32_2 = arith.constant 0 : i32
    return %arg0, %c0_i32, %c0_i32_0, %c0_i32_1 : i32, i32, i32, i32
  }
  func.func @transform_1(%arg0: i32, %arg1: i32) -> (i32, i32, i32, i32) {
    %c0_i32 = arith.constant 0 : i32
    %c0_i32_0 = arith.constant 0 : i32
    %c0_i32_1 = arith.constant 0 : i32
    %c0_i32_2 = arith.constant 0 : i32
    return %c0_i32, %c0_i32_0, %c0_i32_1, %arg1 : i32, i32, i32, i32
  }
  func.func @transform_2(%arg0: i32, %arg1: i32) -> (i32, i32) {
    %c0_i32 = arith.constant 0 : i32
    %c0_i32_0 = arith.constant 0 : i32
    return %c0_i32, %arg1 : i32, i32
  }
  func.func @transform_3(%arg0: i32, %arg1: i32) -> (i32, i32, i32, i32) {
    %c0_i32 = arith.constant 0 : i32
    %c0_i32_0 = arith.constant 0 : i32
    %c0_i32_1 = arith.constant 0 : i32
    return %arg0, %c0_i32, %c0_i32_0, %arg1 : i32, i32, i32, i32
  }
  func.func @transform_4(%arg0: i32, %arg1: i32) -> (i32, i32, i32, i32) {
    %c0_i32 = arith.constant 0 : i32
    %c0_i32_0 = arith.constant 0 : i32
    %c0_i32_1 = arith.constant 0 : i32
    return %arg0, %c0_i32, %c0_i32_0, %arg1 : i32, i32, i32, i32
  }
}

module attributes {stable_mosaic.version = 11 : i64} {
  func.func @_mm2_bias_mish_kernel(%arg0: i32, %arg1: i32, %arg2: memref<64x256xbf16, #tpu.memory_space<vmem>>, %arg3: memref<256x256xbf16, #tpu.memory_space<vmem>>, %arg4: memref<64x256xbf16, #tpu.memory_space<vmem>>, %arg5: memref<256x256xbf16, #tpu.memory_space<vmem>>, %arg6: memref<1x256xf32, #tpu.memory_space<vmem>>, %arg7: memref<64x256xbf16, #tpu.memory_space<vmem>>) attributes {dimension_semantics = [#tpu.dimension_semantics<parallel>, #tpu.dimension_semantics<parallel>], iteration_bounds = array<i64: 2, 2>, scalar_prefetch = 0 : i64, scratch_operands = 0 : i64, tpu.core_type = #tpu.core_type<tc>, window_params = [{transform_indices = @transform_0, window_bounds = array<i64: 64, 256>}, {transform_indices = @transform_1, window_bounds = array<i64: 256, 256>}, {transform_indices = @transform_2, window_bounds = array<i64: 64, 256>}, {transform_indices = @transform_3, window_bounds = array<i64: 256, 256>}, {transform_indices = @transform_4, window_bounds = array<i64: 1, 256>}, {transform_indices = @transform_5, window_bounds = array<i64: 64, 256>}]} {
    %c0 = arith.constant 0 : index
    %c0_0 = arith.constant 0 : index
    %0 = vector.load %arg2[%c0, %c0_0] : memref<64x256xbf16, #tpu.memory_space<vmem>>, vector<64x256xbf16>
    %c0_1 = arith.constant 0 : index
    %c0_2 = arith.constant 0 : index
    %1 = vector.load %arg3[%c0_1, %c0_2] : memref<256x256xbf16, #tpu.memory_space<vmem>>, vector<256x256xbf16>
    %cst = arith.constant dense<0.000000e+00> : vector<64x256xf32>
    %2 = tpu.matmul %0, %1, %cst {dimension_numbers = #tpu.dot_dimension_numbers<[1], [0], [0], [1], [0, 0, 1, 1], [], []>} : vector<64x256xbf16>, vector<256x256xbf16>, vector<64x256xf32> -> vector<64x256xf32>
    %c0_3 = arith.constant 0 : index
    %c0_4 = arith.constant 0 : index
    %3 = vector.load %arg4[%c0_3, %c0_4] : memref<64x256xbf16, #tpu.memory_space<vmem>>, vector<64x256xbf16>
    %c0_5 = arith.constant 0 : index
    %c0_6 = arith.constant 0 : index
    %4 = vector.load %arg5[%c0_5, %c0_6] : memref<256x256xbf16, #tpu.memory_space<vmem>>, vector<256x256xbf16>
    %cst_7 = arith.constant dense<0.000000e+00> : vector<64x256xf32>
    %5 = tpu.matmul %3, %4, %cst_7 {dimension_numbers = #tpu.dot_dimension_numbers<[1], [0], [0], [1], [0, 0, 1, 1], [], []>} : vector<64x256xbf16>, vector<256x256xbf16>, vector<64x256xf32> -> vector<64x256xf32>
    %6 = arith.addf %2, %5 : vector<64x256xf32>
    %c0_8 = arith.constant 0 : index
    %c0_9 = arith.constant 0 : index
    %7 = vector.load %arg6[%c0_8, %c0_9] : memref<1x256xf32, #tpu.memory_space<vmem>>, vector<1x256xf32>
    %8 = vector.broadcast %7 : vector<1x256xf32> to vector<64x256xf32>
    %9 = arith.addf %6, %8 : vector<64x256xf32>
    %cst_10 = arith.constant 2.000000e+01 : f32
    %10 = vector.broadcast %cst_10 : f32 to vector<64x256xf32>
    %11 = arith.minimumf %9, %10 : vector<64x256xf32>
    %12 = math.exp %11 : vector<64x256xf32>
    %cst_11 = arith.constant 2.000000e+00 : f32
    %13 = vector.broadcast %cst_11 : f32 to vector<64x256xf32>
    %14 = arith.addf %12, %13 : vector<64x256xf32>
    %15 = arith.mulf %12, %14 : vector<64x256xf32>
    %16 = arith.mulf %9, %15 : vector<64x256xf32>
    %cst_12 = arith.constant 2.000000e+00 : f32
    %17 = vector.broadcast %cst_12 : f32 to vector<64x256xf32>
    %18 = arith.addf %15, %17 : vector<64x256xf32>
    %19 = tpu.reciprocal %18 {approx = true} : vector<64x256xf32> -> vector<64x256xf32>
    %20 = arith.mulf %16, %19 : vector<64x256xf32>
    %21 = arith.truncf %20 : vector<64x256xf32> to vector<64x256xbf16>
    %c0_13 = arith.constant 0 : index
    %c0_14 = arith.constant 0 : index
    %22 = vector.load %arg7[%c0_13, %c0_14] : memref<64x256xbf16, #tpu.memory_space<vmem>>, vector<64x256xbf16>
    tpu.vector_store %arg7[%c0_13, %c0_14], %21 {strides = array<i32>} : memref<64x256xbf16, #tpu.memory_space<vmem>>, vector<64x256xbf16>,
    return
  }
  func.func @transform_0(%arg0: i32, %arg1: i32) -> (i32, i32) {
    %c0_i32 = arith.constant 0 : i32
    %c0_i32_0 = arith.constant 0 : i32
    return %arg0, %c0_i32 : i32, i32
  }
  func.func @transform_1(%arg0: i32, %arg1: i32) -> (i32, i32) {
    %c0_i32 = arith.constant 0 : i32
    %c0_i32_0 = arith.constant 0 : i32
    return %c0_i32, %arg1 : i32, i32
  }
  func.func @transform_2(%arg0: i32, %arg1: i32) -> (i32, i32) {
    %c0_i32 = arith.constant 0 : i32
    %c0_i32_0 = arith.constant 0 : i32
    return %arg0, %c0_i32 : i32, i32
  }
  func.func @transform_3(%arg0: i32, %arg1: i32) -> (i32, i32) {
    %c0_i32 = arith.constant 0 : i32
    %c0_i32_0 = arith.constant 0 : i32
    return %c0_i32, %arg1 : i32, i32
  }
  func.func @transform_4(%arg0: i32, %arg1: i32) -> (i32, i32) {
    %c0_i32 = arith.constant 0 : i32
    %c0_i32_0 = arith.constant 0 : i32
    return %c0_i32, %arg1 : i32, i32
  }
  func.func @transform_5(%arg0: i32, %arg1: i32) -> (i32, i32) {
    %c0_i32 = arith.constant 0 : i32
    return %arg0, %arg1 : i32, i32
  }
}

</mosaic_0001>

<bundles_post_ra>
// kernel: downsample4_forward.21
= control target key start
LH: loop header
LB: loop body
LE: loop exit
PB: predicated region body
PF: predicated region fallthrough
CT: control target
= control target key end

     0   :  { %s2016_s12 = smov 0   ;;  %s2018_s13 = smov 0   ;;  %s2468_s0 = inlined_call_operand.vmem [shape: bf16[128,512], index: 0, kind: input, shape index: {}]   ;;  %s2469_s1 = inlined_call_operand.vmem [shape: bf16[512,512], index: 1, kind: input, shape index: {}]   ;;  %s2470_s2 = inlined_call_operand.vmem [shape: f32[1,512], index: 2, kind: input, shape index: {}]   ;;  %s2471_s3 = inlined_call_operand.vmem [shape: bf16[128,512], index: 3, kind: output, shape index: {}]  }
   0x1   :  { %s2020_s14 = smov 0   ;;  %s2022_s15 = smov 0  }
   0x2   :  { %s2024_s16 = smov 0   ;;  %s2026_s17 = smov 0  }
   0x3   :  { %s2028_s18 = smov 0   ;;  %s2030_s19 = smov 0  }
   0x4   :  { %s2032_s20 = smov 0  }
   0x5 LB: > { %s1516_s21 = sadd.s32 4294967295, %s1994_s20   ;;  %s22_s22 = sadd.s32 1, %s1986_s18  ;;  %s1994_s20 = sphi %s2032_s20, %s13_s20   ;;  %s1990_s19 = sphi %s2030_s19, %s2480_s19   ;;  %s1986_s18 = sphi %s2028_s18, %s2479_s18   ;;  %s1982_s17 = sphi %s2026_s17, %s2478_s17   ;;  %s1978_s16 = sphi %s2024_s16, %s2477_s16   ;;  %s1974_s15 = sphi %s2022_s15, %s2476_s15   ;;  %s1970_s14 = sphi %s2020_s14, %s2475_s14   ;;  %s1966_s13 = sphi %s2018_s13, %s2474_s13   ;;  %s1962_s12 = sphi %s2016_s12, %s2473_s12  }
   0x6   : > { %p23_p0 = scmp.ge.s32.totalorder %s22_s22, 2  ;;  %s25_s23 = sadd.s32 1, %s1990_s19 }
   0x7   : > { %s58_s24 = sadd.s32 1, %s1974_s15  ;;  %p65_p1 = scmp.ne.s32.totalorder %s1974_s15, %s1970_s14 }
   0x8   : > { %s2482_s22 = smov (%p23_p0, %s22_s22), 0  ;;  %s2484_s23 = smov (!%p23_p0, %s25_s23), %s1990_s19 }
   0x9   : > { %s55_s25 = ssub.s32 %s1986_s18, %s2482_s22  ;;  %p66_p2 = scmp.eq.s32.totalorder %s1994_s20, 0 }
   0xa   : > { %p27_p3 = scmp.ge.s32.totalorder %s2484_s23, 2  ;;  %p56_p4 = scmp.eq.s32.totalorder %s55_s25, 0 }
   0xb   : > { %p67_p5 = por %p66_p2, %p65_p1  ;;  %s112_s26 = sadd.s32 1, %s1966_s13 }
   0xc   : > { %s2486_s23 = smov (%p27_p3, %s2484_s23), 0  ;;  %p122_p6 = scmp.ne.s32.totalorder %s1966_s13, %s1962_s12 }
   0xd   : > { %s2077_s27 = scalar_select %p56_p4, %s1974_s15, %s58_s24  }
   0xe   : > { %s107_s28 = ssub.s32 %s1990_s19, %s2486_s23  ;;  %p123_p7 = scmp.eq.s32.totalorder %s1516_s21, 3 }
   0xf   : > { %s109_s29 = sor.u32 %s107_s28, %s55_s25  ;;  %p1519_p10 = scmp.ge.s32.totalorder %s1994_s20, 4 }
  0x10   : > { %p110_p8 = scmp.eq.s32.totalorder %s109_s29, 0  ;;  %p2083_p9 = por %p123_p7, %p122_p6 }
  0x11   : > { %145 = sbr.rel (%p1519_p10) target bundleno = 60 (0x3c), region = 16 }
  0x12   : > { %s2088_s4 = scalar_select %p110_p8, %s1966_s13, %s112_s26  }
  0x18   : > { %158 = sbr.rel (!%p67_p5) target bundleno = 60 (0x3c), region = 24  ;;  %s160_s5 = sand.u32 (%p67_p5), 1, %s1974_s15  }
  0x19   : > { %s1625_s6 = sshll.u32 (%p67_p5), %s1986_s18, 3  ;;  %s1520_s7 = sshll.u32 (%p67_p5), %s160_s5, 9 }
  0x1a   : > { %s2096_s10 = scalar_lea.vmem (%p67_p5), %s2469_s1, %s1625_s6  ;;  %s2101_s11 = scalar_lea.vmem (%p67_p5), [#allocation2], %s1520_s7 }
  0x1b   : > { %v319_v0 = vld [vmem:[%s2096_s10] sm:$0xff] (%p67_p5)  ;;  %v321_v1 = vld [vmem:[%s2096_s10 + $0x10] sm:$0xff] (%p67_p5) }
  0x1c   : > { %v323_v2 = vld [vmem:[%s2096_s10 + $0x20] sm:$0xff] (%p67_p5)  ;;  %320 = vst [vmem:[%s2101_s11] sm:$0xff] (%p67_p5), %v319_v0  ;;  %322 = vst [vmem:[%s2101_s11 + $0x8] sm:$0xff] (%p67_p5), %v321_v1  ;;  %v325_v3 = vld [vmem:[%s2096_s10 + $0x30] sm:$0xff] (%p67_p5) }
  0x1d   : > { %324 = vst [vmem:[%s2101_s11 + $0x10] sm:$0xff] (%p67_p5), %v323_v2  ;;  %v327_v4 = vld [vmem:[%s2096_s10 + $0x40] sm:$0xff] (%p67_p5)  ;;  %v329_v5 = vld [vmem:[%s2096_s10 + $0x50] sm:$0xff] (%p67_p5)  ;;  %326 = vst [vmem:[%s2101_s11 + $0x18] sm:$0xff] (%p67_p5), %v325_v3 }
  0x1e   : > { %328 = vst [vmem:[%s2101_s11 + $0x20] sm:$0xff] (%p67_p5), %v327_v4  ;;  %330 = vst [vmem:[%s2101_s11 + $0x28] sm:$0xff] (%p67_p5), %v329_v5  ;;  %v331_v6 = vld [vmem:[%s2096_s10 + $0x60] sm:$0xff] (%p67_p5)  ;;  %v333_v7 = vld [vmem:[%s2096_s10 + $0x70] sm:$0xff] (%p67_p5) }
  0x1f   : > { %v335_v8 = vld [vmem:[%s2096_s10 + $0x80] sm:$0xff]  ;;  %332 = vst [vmem:[%s2101_s11 + $0x30] sm:$0xff] %v331_v6  ;;  %334 = vst [vmem:[%s2101_s11 + $0x38] sm:$0xff] %v333_v7  ;;  %v337_v9 = vld [vmem:[%s2096_s10 + $0x90] sm:$0xff] }
  0x20   : > { %336 = vst [vmem:[%s2101_s11 + $0x40] sm:$0xff] %v335_v8  ;;  %v339_v10 = vld [vmem:[%s2096_s10 + $0xa0] sm:$0xff]  ;;  %v341_v11 = vld [vmem:[%s2096_s10 + $0xb0] sm:$0xff]  ;;  %338 = vst [vmem:[%s2101_s11 + $0x48] sm:$0xff] %v337_v9 }
  0x21   : > { %340 = vst [vmem:[%s2101_s11 + $0x50] sm:$0xff] %v339_v10  ;;  %342 = vst [vmem:[%s2101_s11 + $0x58] sm:$0xff] %v341_v11  ;;  %v343_v12 = vld [vmem:[%s2096_s10 + $0xc0] sm:$0xff]  ;;  %v345_v13 = vld [vmem:[%s2096_s10 + $0xd0] sm:$0xff] }
  0x22   : > { %v347_v14 = vld [vmem:[%s2096_s10 + $0xe0] sm:$0xff]  ;;  %344 = vst [vmem:[%s2101_s11 + $0x60] sm:$0xff] %v343_v12  ;;  %346 = vst [vmem:[%s2101_s11 + $0x68] sm:$0xff] %v345_v13  ;;  %v349_v15 = vld [vmem:[%s2096_s10 + $0xf0] sm:$0xff] }
  0x23   : > { %348 = vst [vmem:[%s2101_s11 + $0x70] sm:$0xff] %v347_v14  ;;  %v351_v16 = vld [vmem:[%s2096_s10 + $0x100] sm:$0xff]  ;;  %v353_v17 = vld [vmem:[%s2096_s10 + $0x110] sm:$0xff]  ;;  %350 = vst [vmem:[%s2101_s11 + $0x78] sm:$0xff] %v349_v15 }
  0x24   : > { %352 = vst [vmem:[%s2101_s11 + $0x80] sm:$0xff] %v351_v16  ;;  %354 = vst [vmem:[%s2101_s11 + $0x88] sm:$0xff] %v353_v17  ;;  %v355_v18 = vld [vmem:[%s2096_s10 + $0x120] sm:$0xff]  ;;  %v357_v19 = vld [vmem:[%s2096_s10 + $0x130] sm:$0xff] }
  0x25   : > { %v359_v20 = vld [vmem:[%s2096_s10 + $0x140] sm:$0xff]  ;;  %356 = vst [vmem:[%s2101_s11 + $0x90] sm:$0xff] %v355_v18  ;;  %358 = vst [vmem:[%s2101_s11 + $0x98] sm:$0xff] %v357_v19  ;;  %v361_v21 = vld [vmem:[%s2096_s10 + $0x150] sm:$0xff] }
  0x26   : > { %360 = vst [vmem:[%s2101_s11 + $0xa0] sm:$0xff] %v359_v20  ;;  %v363_v22 = vld [vmem:[%s2096_s10 + $0x160] sm:$0xff]  ;;  %v365_v23 = vld [vmem:[%s2096_s10 + $0x170] sm:$0xff]  ;;  %362 = vst [vmem:[%s2101_s11 + $0xa8] sm:$0xff] %v361_v21 }
  0x27   : > { %364 = vst [vmem:[%s2101_s11 + $0xb0] sm:$0xff] %v363_v22  ;;  %366 = vst [vmem:[%s2101_s11 + $0xb8] sm:$0xff] %v365_v23  ;;  %v367_v24 = vld [vmem:[%s2096_s10 + $0x180] sm:$0xff]  ;;  %v369_v25 = vld [vmem:[%s2096_s10 + $0x190] sm:$0xff] }
  0x28   : > { %v371_v26 = vld [vmem:[%s2096_s10 + $0x1a0] sm:$0xff]  ;;  %368 = vst [vmem:[%s2101_s11 + $0xc0] sm:$0xff] %v367_v24  ;;  %370 = vst [vmem:[%s2101_s11 + $0xc8] sm:$0xff] %v369_v25  ;;  %v373_v27 = vld [vmem:[%s2096_s10 + $0x1b0] sm:$0xff] }
  0x29   : > { %372 = vst [vmem:[%s2101_s11 + $0xd0] sm:$0xff] %v371_v26  ;;  %v375_v28 = vld [vmem:[%s2096_s10 + $0x1c0] sm:$0xff]  ;;  %v377_v29 = vld [vmem:[%s2096_s10 + $0x1d0] sm:$0xff]  ;;  %374 = vst [vmem:[%s2101_s11 + $0xd8] sm:$0xff] %v373_v27 }
  0x2a   : > { %376 = vst [vmem:[%s2101_s11 + $0xe0] sm:$0xff] %v375_v28  ;;  %378 = vst [vmem:[%s2101_s11 + $0xe8] sm:$0xff] %v377_v29  ;;  %v379_v30 = vld [vmem:[%s2096_s10 + $0x1e0] sm:$0xff]  ;;  %v381_v31 = vld [vmem:[%s2096_s10 + $0x1f0] sm:$0xff] }
  0x2b   : > { %v383_v32 = vld [vmem:[%s2096_s10 + $0x200] sm:$0xff]  ;;  %380 = vst [vmem:[%s2101_s11 + $0xf0] sm:$0xff] %v379_v30  ;;  %382 = vst [vmem:[%s2101_s11 + $0xf8] sm:$0xff] %v381_v31  ;;  %v385_v33 = vld [vmem:[%s2096_s10 + $0x210] sm:$0xff] }
  0x2c   : > { %384 = vst [vmem:[%s2101_s11 + $0x100] sm:$0xff] %v383_v32  ;;  %v387_v34 = vld [vmem:[%s2096_s10 + $0x220] sm:$0xff]  ;;  %v389_v35 = vld [vmem:[%s2096_s10 + $0x230] sm:$0xff]  ;;  %386 = vst [vmem:[%s2101_s11 + $0x108] sm:$0xff] %v385_v33 }
  0x2d   : > { %388 = vst [vmem:[%s2101_s11 + $0x110] sm:$0xff] %v387_v34  ;;  %390 = vst [vmem:[%s2101_s11 + $0x118] sm:$0xff] %v389_v35  ;;  %v391_v36 = vld [vmem:[%s2096_s10 + $0x240] sm:$0xff]  ;;  %v393_v37 = vld [vmem:[%s2096_s10 + $0x250] sm:$0xff] }
  0x2e   : > { %v395_v38 = vld [vmem:[%s2096_s10 + $0x260] sm:$0xff]  ;;  %392 = vst [vmem:[%s2101_s11 + $0x120] sm:$0xff] %v391_v36  ;;  %394 = vst [vmem:[%s2101_s11 + $0x128] sm:$0xff] %v393_v37  ;;  %v397_v39 = vld [vmem:[%s2096_s10 + $0x270] sm:$0xff] }
  0x2f   : > { %396 = vst [vmem:[%s2101_s11 + $0x130] sm:$0xff] %v395_v38  ;;  %v399_v40 = vld [vmem:[%s2096_s10 + $0x280] sm:$0xff]  ;;  %v401_v41 = vld [vmem:[%s2096_s10 + $0x290] sm:$0xff]  ;;  %398 = vst [vmem:[%s2101_s11 + $0x138] sm:$0xff] %v397_v39 }
  0x30   : > { %400 = vst [vmem:[%s2101_s11 + $0x140] sm:$0xff] %v399_v40  ;;  %402 = vst [vmem:[%s2101_s11 + $0x148] sm:$0xff] %v401_v41  ;;  %v403_v42 = vld [vmem:[%s2096_s10 + $0x2a0] sm:$0xff]  ;;  %v405_v43 = vld [vmem:[%s2096_s10 + $0x2b0] sm:$0xff] }
  0x31   : > { %v407_v44 = vld [vmem:[%s2096_s10 + $0x2c0] sm:$0xff]  ;;  %404 = vst [vmem:[%s2101_s11 + $0x150] sm:$0xff] %v403_v42  ;;  %406 = vst [vmem:[%s2101_s11 + $0x158] sm:$0xff] %v405_v43  ;;  %v409_v45 = vld [vmem:[%s2096_s10 + $0x2d0] sm:$0xff] }
  0x32   : > { %408 = vst [vmem:[%s2101_s11 + $0x160] sm:$0xff] %v407_v44  ;;  %v411_v46 = vld [vmem:[%s2096_s10 + $0x2e0] sm:$0xff]  ;;  %v413_v47 = vld [vmem:[%s2096_s10 + $0x2f0] sm:$0xff]  ;;  %410 = vst [vmem:[%s2101_s11 + $0x168] sm:$0xff] %v409_v45 }
  0x33   : > { %412 = vst [vmem:[%s2101_s11 + $0x170] sm:$0xff] %v411_v46  ;;  %414 = vst [vmem:[%s2101_s11 + $0x178] sm:$0xff] %v413_v47  ;;  %v415_v48 = vld [vmem:[%s2096_s10 + $0x300] sm:$0xff]  ;;  %v417_v49 = vld [vmem:[%s2096_s10 + $0x310] sm:$0xff] }
  0x34   : > { %v419_v50 = vld [vmem:[%s2096_s10 + $0x320] sm:$0xff]  ;;  %416 = vst [vmem:[%s2101_s11 + $0x180] sm:$0xff] %v415_v48  ;;  %418 = vst [vmem:[%s2101_s11 + $0x188] sm:$0xff] %v417_v49  ;;  %v421_v51 = vld [vmem:[%s2096_s10 + $0x330] sm:$0xff] }
  0x35   : > { %420 = vst [vmem:[%s2101_s11 + $0x190] sm:$0xff] %v419_v50  ;;  %v423_v52 = vld [vmem:[%s2096_s10 + $0x340] sm:$0xff]  ;;  %v425_v53 = vld [vmem:[%s2096_s10 + $0x350] sm:$0xff]  ;;  %422 = vst [vmem:[%s2101_s11 + $0x198] sm:$0xff] %v421_v51 }
  0x36   : > { %424 = vst [vmem:[%s2101_s11 + $0x1a0] sm:$0xff] %v423_v52  ;;  %426 = vst [vmem:[%s2101_s11 + $0x1a8] sm:$0xff] %v425_v53  ;;  %v427_v54 = vld [vmem:[%s2096_s10 + $0x360] sm:$0xff]  ;;  %v429_v55 = vld [vmem:[%s2096_s10 + $0x370] sm:$0xff] }
  0x37   : > { %v431_v56 = vld [vmem:[%s2096_s10 + $0x380] sm:$0xff]  ;;  %428 = vst [vmem:[%s2101_s11 + $0x1b0] sm:$0xff] %v427_v54  ;;  %430 = vst [vmem:[%s2101_s11 + $0x1b8] sm:$0xff] %v429_v55  ;;  %v433_v57 = vld [vmem:[%s2096_s10 + $0x390] sm:$0xff] }
  0x38   : > { %432 = vst [vmem:[%s2101_s11 + $0x1c0] sm:$0xff] %v431_v56  ;;  %v435_v58 = vld [vmem:[%s2096_s10 + $0x3a0] sm:$0xff]  ;;  %v437_v59 = vld [vmem:[%s2096_s10 + $0x3b0] sm:$0xff]  ;;  %434 = vst [vmem:[%s2101_s11 + $0x1c8] sm:$0xff] %v433_v57 }
  0x39   : > { %436 = vst [vmem:[%s2101_s11 + $0x1d0] sm:$0xff] %v435_v58  ;;  %438 = vst [vmem:[%s2101_s11 + $0x1d8] sm:$0xff] %v437_v59  ;;  %v439_v60 = vld [vmem:[%s2096_s10 + $0x3c0] sm:$0xff]  ;;  %v441_v61 = vld [vmem:[%s2096_s10 + $0x3d0] sm:$0xff] }
  0x3a   : > { %v443_v62 = vld [vmem:[%s2096_s10 + $0x3e0] sm:$0xff]  ;;  %440 = vst [vmem:[%s2101_s11 + $0x1e0] sm:$0xff] %v439_v60  ;;  %442 = vst [vmem:[%s2101_s11 + $0x1e8] sm:$0xff] %v441_v61  ;;  %v445_v63 = vld [vmem:[%s2096_s10 + $0x3f0] sm:$0xff] }
  0x3b   : > { %444 = vst [vmem:[%s2101_s11 + $0x1f0] sm:$0xff] %v443_v62  ;;  %446 = vst [vmem:[%s2101_s11 + $0x1f8] sm:$0xff] %v445_v63 }
  0x3c PF: > { %p1523_p11 = scmp.ge.s32.totalorder %s1994_s20, 1  ;;  %p459_p12 = scmp.lt.s32.totalorder %s1994_s20, 5 }
  0x3e   : > { %p460_p13 = pnand %p1523_p11, %p459_p12 }
  0x3f   : > { %s466_s21 = sand.u32 (!%p460_p13), 1, %s1970_s14   ;;  %s1526_s14 = sshll.u32 (!%p460_p13), %s1982_s17, 3 }
  0x40   : > { %463 = sbr.rel (%p460_p13) target bundleno = 427 (0x1ab), region = 66  ;;  %s1524_s24 = sshll.u32 (!%p460_p13), %s466_s21, 9 }
  0x41   : > { %s2231_s25 = scalar_lea.vmem (!%p460_p13), [#allocation2], %s1524_s24  ;;  %p499_p0 = scmp.lt.s32.totalorder (!%p460_p13), %s1526_s14, 15 }
  0x42   : > { %v1740_v0 = vld [vmem:[%s2231_s25 + $0x4] ss:$8 sps:$4 sm:$0xff] (!%p460_p13)   ;;  %v1744_v2 = vld [vmem:[%s2231_s25] ss:$8 sps:$4 sm:$0xff] (!%p460_p13)   ;;  %v1746_v4 = vld [vmem:[%s2231_s25 + $0x14] ss:$8 sps:$4 sm:$0xff] (!%p460_p13)  }
  0x43   : > { %v1742_v1 = vld [vmem:[%s2231_s25 + $0x104] ss:$8 sps:$4 sm:$0xff] (!%p460_p13)   ;;  %1005 = vmatprep.subr.bf16.mxu1 (!%p460_p13), %v1740_v0  ;;  %v1745_v3 = vld [vmem:[%s2231_s25 + $0x100] ss:$8 sps:$4 sm:$0xff] (!%p460_p13)   ;;  %v1748_v5 = vld [vmem:[%s2231_s25 + $0x114] ss:$8 sps:$4 sm:$0xff] (!%p460_p13)  }
  0x44   : > { %1078 = vmatprep.subr.bf16.mxu0 (!%p460_p13), %v1742_v1  ;;  %1006 = vmatpush1.bf16.msra.mxu1 (!%p460_p13), %v1744_v2  ;;  %v1750_v6 = vld [vmem:[%s2231_s25 + $0x10] ss:$8 sps:$4 sm:$0xff] (!%p460_p13)   ;;  %v1752_v8 = vld [vmem:[%s2231_s25 + $0x24] ss:$8 sps:$4 sm:$0xff] (!%p460_p13)   ;;  %v1756_v10 = vld [vmem:[%s2231_s25 + $0x20] ss:$8 sps:$4 sm:$0xff] (!%p460_p13)  }
  0x45   : > { %1079 = vmatpush1.bf16.msra.mxu0 (!%p460_p13), %v1745_v3  ;;  %1007 = vmatprep.subr.bf16.mxu1 (!%p460_p13), %v1746_v4  ;;  %v1751_v7 = vld [vmem:[%s2231_s25 + $0x110] ss:$8 sps:$4 sm:$0xff] (!%p460_p13)   ;;  %v1754_v9 = vld [vmem:[%s2231_s25 + $0x124] ss:$8 sps:$4 sm:$0xff] (!%p460_p13)   ;;  %v1757_v11 = vld [vmem:[%s2231_s25 + $0x120] ss:$8 sps:$4 sm:$0xff] (!%p460_p13)  }
  0x46   : > { %1080 = vmatprep.subr.bf16.mxu0 (!%p460_p13), %v1748_v5  ;;  %v1758_v12 = vld [vmem:[%s2231_s25 + $0x34] ss:$8 sps:$4 sm:$0xff] (!%p460_p13)   ;;  %v1762_v14 = vld [vmem:[%s2231_s25 + $0x30] ss:$8 sps:$4 sm:$0xff] (!%p460_p13)   ;;  %v1764_v16 = vld [vmem:[%s2231_s25 + $0x44] ss:$8 sps:$4 sm:$0xff] (!%p460_p13)  }
  0x47   : > { %v1760_v13 = vld [vmem:[%s2231_s25 + $0x134] ss:$8 sps:$4 sm:$0xff]   ;;  %v1763_v15 = vld [vmem:[%s2231_s25 + $0x130] ss:$8 sps:$4 sm:$0xff]   ;;  %v1766_v17 = vld [vmem:[%s2231_s25 + $0x144] ss:$8 sps:$4 sm:$0xff]  }
  0x48   : > { %1008 = vmatpush1.bf16.msra.mxu1 %v1750_v6  ;;  %v1768_v18 = vld [vmem:[%s2231_s25 + $0x40] ss:$8 sps:$4 sm:$0xff]   ;;  %v1770_v20 = vld [vmem:[%s2231_s25 + $0x54] ss:$8 sps:$4 sm:$0xff]   ;;  %v1774_v22 = vld [vmem:[%s2231_s25 + $0x50] ss:$8 sps:$4 sm:$0xff]  }
  0x49   : > { %1081 = vmatpush1.bf16.msra.mxu0 %v1751_v7  ;;  %1009 = vmatprep.subr.bf16.mxu1 %v1752_v8  ;;  %v1769_v19 = vld [vmem:[%s2231_s25 + $0x140] ss:$8 sps:$4 sm:$0xff]   ;;  %v1772_v21 = vld [vmem:[%s2231_s25 + $0x154] ss:$8 sps:$4 sm:$0xff]   ;;  %v1775_v23 = vld [vmem:[%s2231_s25 + $0x150] ss:$8 sps:$4 sm:$0xff]  }
  0x4a   : > { %1082 = vmatprep.subr.bf16.mxu0 %v1754_v9  ;;  %v1776_v24 = vld [vmem:[%s2231_s25 + $0x64] ss:$8 sps:$4 sm:$0xff]   ;;  %v1780_v26 = vld [vmem:[%s2231_s25 + $0x60] ss:$8 sps:$4 sm:$0xff]   ;;  %v1782_v28 = vld [vmem:[%s2231_s25 + $0x74] ss:$8 sps:$4 sm:$0xff]  }
  0x4b   : > { %v1778_v25 = vld [vmem:[%s2231_s25 + $0x164] ss:$8 sps:$4 sm:$0xff]   ;;  %v1781_v27 = vld [vmem:[%s2231_s25 + $0x160] ss:$8 sps:$4 sm:$0xff]   ;;  %v1784_v29 = vld [vmem:[%s2231_s25 + $0x174] ss:$8 sps:$4 sm:$0xff]  }
  0x4c   : > { %1010 = vmatpush1.bf16.msra.mxu1 %v1756_v10  ;;  %v1786_v30 = vld [vmem:[%s2231_s25 + $0x70] ss:$8 sps:$4 sm:$0xff]   ;;  %v1788_v32 = vld [vmem:[%s2231_s25 + $0x84] ss:$8 sps:$4 sm:$0xff]   ;;  %v1792_v34 = vld [vmem:[%s2231_s25 + $0x80] ss:$8 sps:$4 sm:$0xff]  }
  0x4d   : > { %1083 = vmatpush1.bf16.msra.mxu0 %v1757_v11  ;;  %1011 = vmatprep.subr.bf16.mxu1 %v1758_v12  ;;  %v1787_v31 = vld [vmem:[%s2231_s25 + $0x170] ss:$8 sps:$4 sm:$0xff]   ;;  %v1790_v33 = vld [vmem:[%s2231_s25 + $0x184] ss:$8 sps:$4 sm:$0xff]   ;;  %v1793_v35 = vld [vmem:[%s2231_s25 + $0x180] ss:$8 sps:$4 sm:$0xff]  }
  0x4e   : > { %1084 = vmatprep.subr.bf16.mxu0 %v1760_v13  ;;  %v1794_v36 = vld [vmem:[%s2231_s25 + $0x94] ss:$8 sps:$4 sm:$0xff]   ;;  %s2488_s14 = smov (!%p499_p0, %s1526_s14), 15  ;;  %v1798_v38 = vld [vmem:[%s2231_s25 + $0x90] ss:$8 sps:$4 sm:$0xff]   ;;  %s2320_s6 = sshll.u32 %s1978_s16, 1 }
  0x4f   : > { %v1796_v37 = vld [vmem:[%s2231_s25 + $0x194] ss:$8 sps:$4 sm:$0xff]   ;;  %v1799_v39 = vld [vmem:[%s2231_s25 + $0x190] ss:$8 sps:$4 sm:$0xff]   ;;  %v1800_v40 = vld [vmem:[%s2231_s25 + $0xa4] ss:$8 sps:$4 sm:$0xff]  }
  0x50   : > { %1012 = vmatpush1.bf16.msra.mxu1 %v1762_v14  ;;  %v1802_v41 = vld [vmem:[%s2231_s25 + $0x1a4] ss:$8 sps:$4 sm:$0xff]   ;;  %s1626_s26 = sshll.u32 %s2488_s14, 4  ;;  %v1804_v42 = vld [vmem:[%s2231_s25 + $0xa0] ss:$8 sps:$4 sm:$0xff]   ;;  %p507_p1 = scmp.lt.s32.totalorder %s2320_s6, 3 }
  0x51   : > { %1085 = vmatpush1.bf16.msra.mxu0 %v1763_v15  ;;  %1013 = vmatprep.subr.bf16.mxu1 %v1764_v16  ;;  %v1805_v43 = vld [vmem:[%s2231_s25 + $0x1a0] ss:$8 sps:$4 sm:$0xff]   ;;  %v1806_v44 = vld [vmem:[%s2231_s25 + $0xb4] ss:$8 sps:$4 sm:$0xff]   ;;  %s2282_s5 = scalar_lea.vmem %s2468_s0, %s1626_s26  ;;  %v1810_v46 = vld [vmem:[%s2231_s25 + $0xb0] ss:$8 sps:$4 sm:$0xff]   ;;  %v595_v16 = vlaneseq }
  0x52   : > { %1086 = vmatprep.subr.bf16.mxu0 %v1766_v17  ;;  %v1808_v45 = vld [vmem:[%s2231_s25 + $0x1b4] ss:$8 sps:$4 sm:$0xff]   ;;  %v1811_v47 = vld [vmem:[%s2231_s25 + $0x1b0] ss:$8 sps:$4 sm:$0xff]   ;;  %v1812_v48 = vld [vmem:[%s2231_s25 + $0xc4] ss:$8 sps:$4 sm:$0xff]  }
  0x53   : > { %v1838_v49 = vld [vmem:[%s2282_s5 + $0x4] ss:$16 sps:$4 sm:$0xff]   ;;  %v1841_v51 = vld [vmem:[%s2282_s5 + $0xc] ss:$16 sps:$4 sm:$0xff]   ;;  %v1816_v52 = vld [vmem:[%s2231_s25 + $0xc0] ss:$8 sps:$4 sm:$0xff]  }
  0x54   : > { %1014 = vmatpush1.bf16.msra.mxu1 %v1768_v18  ;;  %v1814_v50 = vld [vmem:[%s2231_s25 + $0x1c4] ss:$8 sps:$4 sm:$0xff]   ;;  %1037 = vmatprep.mubr.bf16.mxu1 %v1838_v49  ;;  %v1817_v53 = vld [vmem:[%s2231_s25 + $0x1c0] ss:$8 sps:$4 sm:$0xff]   ;;  %v1818_v54 = vld [vmem:[%s2231_s25 + $0xd4] ss:$8 sps:$4 sm:$0xff]  }
  0x55   : > { %1087 = vmatpush1.bf16.msra.mxu0 %v1769_v19  ;;  %1015 = vmatprep.subr.bf16.mxu1 %v1770_v20  ;;  %v1820_v55 = vld [vmem:[%s2231_s25 + $0x1d4] ss:$8 sps:$4 sm:$0xff]   ;;  %v1822_v56 = vld [vmem:[%s2231_s25 + $0xd0] ss:$8 sps:$4 sm:$0xff]   ;;  %v1824_v58 = vld [vmem:[%s2231_s25 + $0xe4] ss:$8 sps:$4 sm:$0xff]  }
  0x56   : > { %1088 = vmatprep.subr.bf16.mxu0 %v1772_v21  ;;  %1110 = vmatprep.mubr.bf16.mxu0 %v1841_v51  ;;  %v1823_v57 = vld [vmem:[%s2231_s25 + $0x1d0] ss:$8 sps:$4 sm:$0xff]   ;;  %v1826_v59 = vld [vmem:[%s2231_s25 + $0x1e4] ss:$8 sps:$4 sm:$0xff]   ;;  %v1828_v60 = vld [vmem:[%s2231_s25 + $0xe0] ss:$8 sps:$4 sm:$0xff]  }
  0x57   : > { %v1829_v61 = vld [vmem:[%s2231_s25 + $0x1e0] ss:$8 sps:$4 sm:$0xff]   ;;  %v1830_v62 = vld [vmem:[%s2231_s25 + $0xf4] ss:$8 sps:$4 sm:$0xff]   ;;  %v1834_v0 = vld [vmem:[%s2231_s25 + $0xf0] ss:$8 sps:$4 sm:$0xff]  }
  0x58   : > { %1016 = vmatpush1.bf16.msra.mxu1 %v1774_v22  ;;  %v1832_v63 = vld [vmem:[%s2231_s25 + $0x1f4] ss:$8 sps:$4 sm:$0xff]   ;;  %v1835_v1 = vld [vmem:[%s2231_s25 + $0x1f0] ss:$8 sps:$4 sm:$0xff]   ;;  %s508_s7 = scalar_select %p507_p1, %s2320_s6, 3  ;;  %v596_v17 = vshrl.u32 %v595_v16, 7 }
  0x59   : > { %1089 = vmatpush1.bf16.msra.mxu0 %v1775_v23  ;;  %1017 = vmatprep.subr.bf16.mxu1 %v1776_v24  ;;  %v1836_v2 = vld [vmem:[%s2282_s5] ss:$16 sps:$4 sm:$0xff]   ;;  %v1839_v3 = vld [vmem:[%s2282_s5 + $0x8] ss:$16 sps:$4 sm:$0xff]   ;;  %v1842_v4 = vld [vmem:[%s2282_s5 + $0x24] ss:$16 sps:$4 sm:$0xff]  }
  0x5a   : > { %1090 = vmatprep.subr.bf16.mxu0 %v1778_v25  ;;  %v1844_v5 = vld [vmem:[%s2282_s5 + $0x2c] ss:$16 sps:$4 sm:$0xff]   ;;  %v1846_v6 = vld [vmem:[%s2282_s5 + $0x20] ss:$16 sps:$4 sm:$0xff]   ;;  %v1847_v7 = vld [vmem:[%s2282_s5 + $0x28] ss:$16 sps:$4 sm:$0xff]   ;;  %s509_s10 = scalar_lea.vmem %s2470_s2, %s508_s7 }
  0x5b   : > { %v1848_v8 = vld [vmem:[%s2282_s5 + $0x44] ss:$16 sps:$4 sm:$0xff]   ;;  %v1850_v9 = vld [vmem:[%s2282_s5 + $0x4c] ss:$16 sps:$4 sm:$0xff]   ;;  %v1852_v10 = vld [vmem:[%s2282_s5 + $0x40] ss:$16 sps:$4 sm:$0xff]  }
  0x5c   : > { %1018 = vmatpush1.bf16.msra.mxu1 %v1780_v26  ;;  %v1853_v11 = vld [vmem:[%s2282_s5 + $0x48] ss:$16 sps:$4 sm:$0xff]   ;;  %v1854_v12 = vld [vmem:[%s2282_s5 + $0x64] ss:$16 sps:$4 sm:$0xff]   ;;  %v1856_v13 = vld [vmem:[%s2282_s5 + $0x6c] ss:$16 sps:$4 sm:$0xff]  }
  0x5d   : > { %1091 = vmatpush1.bf16.msra.mxu0 %v1781_v27  ;;  %1019 = vmatprep.subr.bf16.mxu1 %v1782_v28  ;;  %v1858_v14 = vld [vmem:[%s2282_s5 + $0x60] ss:$16 sps:$4 sm:$0xff]   ;;  %v1859_v15 = vld [vmem:[%s2282_s5 + $0x68] ss:$16 sps:$4 sm:$0xff]   ;;  %v597_v18 = vsub.s32 0, %v596_v17  ;;  %v601_v20 = vsub.s32 1, %v596_v17 }
  0x5e   : > { %1092 = vmatprep.subr.bf16.mxu0 %v1784_v29  ;;  %v593_v19 = vld [vmem:[%s509_s10] sm:$0x3]  ;;  %s495_s16 = sand.u32 1, %s1962_s12   ;;  %s1635_s21 = sshll.u32 (%p2083_p9), %s1982_s17, 5 }
  0x5f   : > { %v2327_v21 = vrot.slane %v593_v19, %v597_v18  ;;  %v2329_v22 = vrot.slane %v593_v19, %v601_v20  ;;  %s1525_s11 = sshll.u32 %s495_s16, 6  ;;  %s1361_s24 = sadd.s32 (%p2083_p9), %s1635_s21, %s2320_s6 }
  0x60   : > { %1020 = vmatpush1.bf16.msra.mxu1 %v1786_v30  ;;  %s2403_s12 = scalar_lea.vmem [#allocation3], %s1525_s11  ;;  %s1622_s30 = sshll.u32 (%p2083_p9), %s1361_s24, 2 }
  0x61   : > { %1093 = vmatpush1.bf16.msra.mxu0 %v1787_v31  ;;  %1021 = vmatprep.subr.bf16.mxu1 %v1788_v32  ;;  %s1363_s26 = scalar_lea.vmem (%p2083_p9), %s2471_s3, %s1622_s30 }
  0x62   : > { %1094 = vmatprep.subr.bf16.mxu0 %v1790_v33 }
  0x64   : > { %1022 = vmatpush1.bf16.msra.mxu1 %v1792_v34 }
  0x65   : > { %1095 = vmatpush1.bf16.msra.mxu0 %v1793_v35  ;;  %1023 = vmatprep.subr.bf16.mxu1 %v1794_v36 }
  0x66   : > { %1096 = vmatprep.subr.bf16.mxu0 %v1796_v37 }
  0x68   : > { %1024 = vmatpush1.bf16.msra.mxu1 %v1798_v38 }
  0x69   : > { %1097 = vmatpush1.bf16.msra.mxu0 %v1799_v39  ;;  %1025 = vmatprep.subr.bf16.mxu1 %v1800_v40 }
  0x6a   : > { %1098 = vmatprep.subr.bf16.mxu0 %v1802_v41 }
  0x6c   : > { %1026 = vmatpush1.bf16.msra.mxu1 %v1804_v42 }
  0x6d   : > { %1099 = vmatpush1.bf16.msra.mxu0 %v1805_v43  ;;  %1027 = vmatprep.subr.bf16.mxu1 %v1806_v44 }
  0x6e   : > { %1100 = vmatprep.subr.bf16.mxu0 %v1808_v45 }
  0x70   : > { %1028 = vmatpush1.bf16.msra.mxu1 %v1810_v46 }
  0x71   : > { %1101 = vmatpush1.bf16.msra.mxu0 %v1811_v47  ;;  %1029 = vmatprep.subr.bf16.mxu1 %v1812_v48 }
  0x72   : > { %1102 = vmatprep.subr.bf16.mxu0 %v1814_v50 }
  0x74   : > { %1030 = vmatpush1.bf16.msra.mxu1 %v1816_v52 }
  0x75   : > { %1103 = vmatpush1.bf16.msra.mxu0 %v1817_v53  ;;  %1031 = vmatprep.subr.bf16.mxu1 %v1818_v54 }
  0x76   : > { %1104 = vmatprep.subr.bf16.mxu0 %v1820_v55 }
  0x78   : > { %1032 = vmatpush1.bf16.msra.mxu1 %v1822_v56 }
  0x79   : > { %1105 = vmatpush1.bf16.msra.mxu0 %v1823_v57  ;;  %1033 = vmatprep.subr.bf16.mxu1 %v1824_v58 }
  0x7a   : > { %1106 = vmatprep.subr.bf16.mxu0 %v1826_v59 }
  0x7c   : > { %1034 = vmatpush1.bf16.msra.mxu1 %v1828_v60 }
  0x7d   : > { %1107 = vmatpush1.bf16.msra.mxu0 %v1829_v61  ;;  %1035 = vmatprep.subr.bf16.mxu1 %v1830_v62 }
  0x7e   : > { %1108 = vmatprep.subr.bf16.mxu0 %v1832_v63 }
  0x80   : > { %1036 = vmatpush1.bf16.msra.mxu1 %v1834_v0 }
  0x81   : > { %1109 = vmatpush1.bf16.msra.mxu0 %v1835_v1 }
  0x83   : > { %1038 = vmatmul.mubr.bf16.vlgmr.msra.gmra.mrb[0].mxu1 %v1836_v2 }
  0x84   : > { %1111 = vmatmul.mubr.bf16.vlgmr.msra.gmra.mrb[0].mxu0 %v1839_v3  ;;  %1047 = vmatprep.mubr.bf16.mxu1 %v1842_v4 }
  0x85   : > { %1120 = vmatprep.mubr.bf16.mxu0 %v1844_v5 }
  0x8b   : > { %1048 = vmatmul.mubr.bf16.gmra.mrb[4].mxu1 %v1846_v6 }
  0x8c   : > { %1121 = vmatmul.mubr.bf16.gmra.mrb[4].mxu0 %v1847_v7  ;;  %1057 = vmatprep.mubr.bf16.mxu1 %v1848_v8 }
  0x8d   : > { %1130 = vmatprep.mubr.bf16.mxu0 %v1850_v9 }
  0x93   : > { %1058 = vmatmul.mubr.bf16.gmra.mrb[8].mxu1 %v1852_v10 }
  0x94   : > { %1131 = vmatmul.mubr.bf16.gmra.mrb[8].mxu0 %v1853_v11  ;;  %1067 = vmatprep.mubr.bf16.mxu1 %v1854_v12 }
  0x95   : > { %1140 = vmatprep.mubr.bf16.mxu0 %v1856_v13 }
  0x9b   : > { %1068 = vmatmul.mubr.bf16.gmra.mrb[12].mxu1 %v1858_v14 }
  0x9c   : > { %1141 = vmatmul.mubr.bf16.gmra.mrb[12].mxu0 %v1859_v15 }
 0x156   : > { %v1039_v23 = vpop.f32.mrb[0].mxu1 }
 0x157   : > { %v1112_v24 = vpop.f32.mrb[0].mxu0  ;;  %v1040_v25 = vadd.f32 %v1039_v23, %v2327_v21  ;;  %v1041_v26 = vpop.f32.mrb[1].mxu1 }
 0x158   : > { %v1114_v27 = vpop.f32.mrb[1].mxu0  ;;  %v1042_v28 = vadd.f32 %v1041_v26, %v2329_v22  ;;  %v1043_v29 = vpop.f32.mrb[2].mxu1 }
 0x159   : > { %v1116_v30 = vpop.f32.mrb[2].mxu0  ;;  %v2333_v31 = vadd.f32 %v1112_v24, %v1040_v25  ;;  %v1044_v32 = vadd.f32 %v1043_v29, %v2327_v21  ;;  %v1045_v33 = vpop.f32.mrb[3].mxu1 }
 0x15a   : > { %v1118_v34 = vpop.f32.mrb[3].mxu0  ;;  %v2336_v35 = vadd.f32 %v1114_v27, %v1042_v28  ;;  %v1046_v36 = vadd.f32 %v1045_v33, %v2329_v22 }
 0x15b   : > { %v1151_v37 = vmin.f32 %v2333_v31, 20.0  ;;  %v2340_v38 = vadd.f32 %v1116_v30, %v1044_v32 }
 0x15c   : > { %v1152_v39 = vmin.f32 %v2336_v35, 20.0  ;;  %v2343_v40 = vadd.f32 %v1118_v34, %v1046_v36 }
 0x15d   : > { %v1167_v41 = vmul.f32 1.442695, %v1151_v37  ;;  %v1153_v42 = vmin.f32 %v2340_v38, 20.0 }
 0x15e   : > { %v1169_v43 = vmul.f32 1.442695, %v1152_v39  ;;  %v1154_v44 = vmin.f32 %v2343_v40, 20.0  ;;  %v1049_v45 = vpop.f32.mrb[4].mxu1 }
 0x15f   : > { %v1122_v46 = vpop.f32.mrb[4].mxu0  ;;  %1860 = vpow2.f32 %v1167_v41  ;;  %v1171_v47 = vmul.f32 1.442695, %v1153_v42  ;;  %v1050_v48 = vadd.f32 %v1049_v45, %v2327_v21  ;;  %v1051_v49 = vpop.f32.mrb[5].mxu1 }
 0x160   : > { %v1124_v50 = vpop.f32.mrb[5].mxu0  ;;  %1862 = vpow2.f32 %v1169_v43  ;;  %v1173_v51 = vmul.f32 1.442695, %v1154_v44  ;;  %v1052_v52 = vadd.f32 %v1051_v49, %v2329_v22  ;;  %v1053_v53 = vpop.f32.mrb[6].mxu1 }
 0x161   : > { %v1126_v54 = vpop.f32.mrb[6].mxu0  ;;  %1864 = vpow2.f32 %v1171_v47  ;;  %v2349_v55 = vadd.f32 %v1122_v46, %v1050_v48  ;;  %v1054_v56 = vadd.f32 %v1053_v53, %v2327_v21  ;;  %v1055_v57 = vpop.f32.mrb[7].mxu1 }
 0x162   : > { %v1128_v58 = vpop.f32.mrb[7].mxu0  ;;  %1866 = vpow2.f32 %v1173_v51  ;;  %v2352_v59 = vadd.f32 %v1124_v50, %v1052_v52  ;;  %v1056_v60 = vadd.f32 %v1055_v57, %v2329_v22 }
 0x163   : > { %v1155_v61 = vmin.f32 %v2349_v55, 20.0  ;;  %v2356_v62 = vadd.f32 %v1126_v54, %v1054_v56 }
 0x164   : > { %v1156_v63 = vmin.f32 %v2352_v59, 20.0  ;;  %v2359_v0 = vadd.f32 %v1128_v58, %v1056_v60 }
 0x165   : > { %v1175_v1 = vmul.f32 1.442695, %v1155_v61  ;;  %v1157_v2 = vmin.f32 %v2356_v62, 20.0 }
 0x166   : > { %v1177_v3 = vmul.f32 1.442695, %v1156_v63  ;;  %v1158_v4 = vmin.f32 %v2359_v0, 20.0  ;;  %v1059_v5 = vpop.f32.mrb[8].mxu1 }
 0x167   : > { %v1132_v6 = vpop.f32.mrb[8].mxu0  ;;  %1868 = vpow2.f32 %v1175_v1  ;;  %v1179_v7 = vmul.f32 1.442695, %v1157_v2  ;;  %v1060_v8 = vadd.f32 %v1059_v5, %v2327_v21  ;;  %v1061_v9 = vpop.f32.mrb[9].mxu1 }
 0x168   : > { %v1134_v10 = vpop.f32.mrb[9].mxu0  ;;  %1870 = vpow2.f32 %v1177_v3  ;;  %v1181_v11 = vmul.f32 1.442695, %v1158_v4  ;;  %v1062_v12 = vadd.f32 %v1061_v9, %v2329_v22  ;;  %v1063_v13 = vpop.f32.mrb[10].mxu1 }
 0x169   : > { %v1136_v14 = vpop.f32.mrb[10].mxu0  ;;  %v1861_v15 = vpop.eup %1860  ;;  %1872 = vpow2.f32 %v1179_v7  ;;  %v2365_v16 = vadd.f32 %v1132_v6, %v1060_v8  ;;  %v1064_v17 = vadd.f32 %v1063_v13, %v2327_v21 }
 0x16a   : > { %v1065_v18 = vpop.f32.mrb[11].mxu1  ;;  %v1138_v19 = vpop.f32.mrb[11].mxu0  ;;  %v1199_v23 = vadd.f32 2.0, %v1861_v15  ;;  %1874 = vpow2.f32 %v1181_v11  ;;  %v2368_v24 = vadd.f32 %v1134_v10, %v1062_v12 }
 0x16b   : > { %v1863_v20 = vpop.eup %1862  ;;  %v1066_v25 = vadd.f32 %v1065_v18, %v2329_v22  ;;  %v1159_v28 = vmin.f32 %v2365_v16, 20.0  ;;  %v2372_v29 = vadd.f32 %v1136_v14, %v1064_v17 }
 0x16c   : > { %v1865_v26 = vpop.eup %1864  ;;  %v1200_v27 = vadd.f32 2.0, %v1863_v20  ;;  %v1215_v32 = vmul.f32 %v1861_v15, %v1199_v23  ;;  %v1160_v34 = vmin.f32 %v2368_v24, 20.0 }
 0x16d   : > { %v1867_v30 = vpop.eup %1866  ;;  %v1201_v33 = vadd.f32 2.0, %v1865_v26  ;;  %v2375_v36 = vadd.f32 %v1138_v19, %v1066_v25  ;;  %v1183_v41 = vmul.f32 1.442695, %v1159_v28  ;;  %v1161_v42 = vmin.f32 %v2372_v29, 20.0 }
 0x16e   : > { %v1216_v37 = vmul.f32 %v1863_v20, %v1200_v27  ;;  %v1202_v39 = vadd.f32 2.0, %v1867_v30  ;;  %v1247_v43 = vadd.f32 2.0, %v1215_v32  ;;  %v1069_v45 = vpop.f32.mrb[12].mxu1  ;;  %v1185_v52 = vmul.f32 1.442695, %v1160_v34 }
 0x16f   : > { %v1217_v44 = vmul.f32 %v1865_v26, %v1201_v33  ;;  %v1142_v46 = vpop.f32.mrb[12].mxu0  ;;  %1876 = vpow2.f32 %v1183_v41  ;;  %v1071_v49 = vpop.f32.mrb[13].mxu1  ;;  %v1187_v58 = vmul.f32 1.442695, %v1161_v42  ;;  %v1162_v60 = vmin.f32 %v2375_v36, 20.0 }
 0x170   : > { %v1248_v47 = vadd.f32 2.0, %v1216_v37  ;;  %v1218_v48 = vmul.f32 %v1867_v30, %v1202_v39  ;;  %v1144_v50 = vpop.f32.mrb[13].mxu0  ;;  %1878 = vrcp.f32 %v1247_v43  ;;  %v1073_v53 = vpop.f32.mrb[14].mxu1  ;;  %v1070_v3 = vadd.f32 %v1069_v45, %v2327_v21 }
 0x171   : > { %v1249_v51 = vadd.f32 2.0, %v1217_v44  ;;  %v1146_v54 = vpop.f32.mrb[14].mxu0  ;;  %v1869_v56 = vpop.eup %1868  ;;  %v1072_v4 = vadd.f32 %v1071_v49, %v2329_v22  ;;  %v1189_v7 = vmul.f32 1.442695, %v1162_v60  ;;  %v1074_v18 = vadd.f32 %v1073_v53, %v2327_v21 }
 0x172   : > { %1880 = vrcp.f32 %v1248_v47  ;;  %v1250_v57 = vadd.f32 2.0, %v1218_v48  ;;  %v1075_v61 = vpop.f32.mrb[15].mxu1  ;;  %v1148_v63 = vpop.f32.mrb[15].mxu0  ;;  %v1203_v2 = vadd.f32 2.0, %v1869_v56  ;;  %v2381_v11 = vadd.f32 %v1142_v46, %v1070_v3 }
 0x173   : > { %v1871_v1 = vpop.eup %1870  ;;  %1882 = vrcp.f32 %v1249_v51  ;;  %v2385_v14 = vadd.f32 %v1144_v50, %v1072_v4  ;;  %v1231_v19 = vmul.f32 %v1215_v32, %v2333_v31  ;;  %v1232_v26 = vmul.f32 %v1216_v37, %v2336_v35 }
 0x174   : > { %v1873_v5 = vpop.eup %1872  ;;  %1884 = vrcp.f32 %v1250_v57  ;;  %v1204_v6 = vadd.f32 2.0, %v1871_v1  ;;  %v1219_v9 = vmul.f32 %v1869_v56, %v1203_v2  ;;  %v1163_v25 = vmin.f32 %v2381_v11, 20.0 }
 0x175   : > { %v1875_v8 = vpop.eup %1874  ;;  %v1205_v10 = vadd.f32 2.0, %v1873_v5  ;;  %1886 = vpow2.f32 %v1185_v52  ;;  %v1164_v28 = vmin.f32 %v2385_v14, 20.0  ;;  %v1233_v33 = vmul.f32 %v1217_v44, %v2340_v38 }
 0x176   : > { %v2383_v12 = vmul.f32 %v1871_v1, %v1204_v6  ;;  %v1206_v13 = vadd.f32 2.0, %v1875_v8  ;;  %1888 = vpow2.f32 %v1187_v58  ;;  %v1251_v15 = vadd.f32 2.0, %v1219_v9 }
 0x177   : > { %v1221_v17 = vmul.f32 %v1873_v5, %v1205_v10  ;;  %1890 = vpow2.f32 %v1189_v7  ;;  %v1191_v21 = vmul.f32 1.442695, %v1163_v25  ;;  %v1193_v32 = vmul.f32 1.442695, %v1164_v28 }
 0x178   : > { %v1252_v20 = vadd.f32 2.0, %v2383_v12  ;;  %v1222_v23 = vmul.f32 %v1875_v8, %v1206_v13  ;;  %1892 = vrcp.f32 %v1251_v15  ;;  %v2395_v41 = vadd.f32 %v1146_v54, %v1074_v18 }
 0x179   : > { %v1253_v27 = vadd.f32 2.0, %v1221_v17  ;;  %v1877_v30 = vpop.eup %1876  ;;  %v1234_v35 = vmul.f32 %v1218_v48, %v2343_v40  ;;  %v1076_v37 = vadd.f32 %v1075_v61, %v2329_v22  ;;  %v1235_v60 = vmul.f32 %v1219_v9, %v2349_v55 }
 0x17a   : > { %1894 = vrcp.f32 %v1252_v20  ;;  %v1254_v34 = vadd.f32 2.0, %v1222_v23  ;;  %v1879_v39 = vpop.eup %1878  ;;  %v1207_v31 = vadd.f32 2.0, %v1877_v30  ;;  %v1165_v44 = vmin.f32 %v2395_v41, 20.0 }
 0x17b   : > { %1896 = vrcp.f32 %v1253_v27  ;;  %v1279_v43 = vmul.f32 %v1879_v39, %v1231_v19  ;;  %v2400_v50 = vadd.f32 %v1148_v63, %v1076_v37  ;;  %v1236_v4 = vmul.f32 %v2383_v12, %v2352_v59 }
 0x17c   : > { %v1881_v42 = vpop.eup %1880  ;;  %1898 = vrcp.f32 %v1254_v34  ;;  %v1223_v38 = vmul.f32 %v1877_v30, %v1207_v31  ;;  %v1195_v48 = vmul.f32 1.442695, %v1165_v44  ;;  %v1237_v8 = vmul.f32 %v1221_v17, %v2356_v62 }
 0x17d   : > { %v1883_v45 = vpop.eup %1882  ;;  %v1280_v46 = vmul.f32 %v1881_v42, %v1232_v26  ;;  %1900 = vpow2.f32 %v1191_v21  ;;  %v1166_v22 = vmin.f32 %v2400_v50, 20.0  ;;  %v1238_v9 = vmul.f32 %v1222_v23, %v2359_v0 }
 0x17e   : > { %v1885_v47 = vpop.eup %1884  ;;  %v1281_v49 = vmul.f32 %v1883_v45, %v1233_v33  ;;  %1902 = vpow2.f32 %v1193_v32  ;;  %v1255_v54 = vadd.f32 2.0, %v1223_v38  ;;  %v1239_v21 = vmul.f32 %v1223_v38, %v2365_v16 }
 0x17f   : > { %v1887_v51 = vpop.eup %1886  ;;  %v1627_v52 = vpack.c.bf16 %v1280_v46, %v1279_v43  ;;  %v1282_v53 = vmul.f32 %v1885_v47, %v1234_v35  ;;  %v1197_v2 = vmul.f32 1.442695, %v1166_v22 }
 0x180   : > { %v1889_v56 = vpop.eup %1888  ;;  %v1208_v40 = vadd.f32 2.0, %v1887_v51  ;;  %1904 = vrcp.f32 %v1255_v54 }
 0x181   : > { %v1891_v57 = vpop.eup %1890  ;;  %1343 = vst [vmem:[%s2403_s12] sm:$0xff] %v1627_v52  ;;  %v1628_v58 = vpack.c.bf16 %v1282_v53, %v1281_v49  ;;  %v1209_v61 = vadd.f32 2.0, %v1889_v56  ;;  %1906 = vpow2.f32 %v1195_v48 }
 0x182   : > { %v1224_v63 = vmul.f32 %v1887_v51, %v1208_v40  ;;  %v1210_v1 = vadd.f32 2.0, %v1891_v57  ;;  %v1893_v3 = vpop.eup %1892  ;;  %1908 = vpow2.f32 %v1197_v2 }
 0x183   : > { %1344 = vst [vmem:[%s2403_s12 + $0x8] sm:$0xff] %v1628_v58  ;;  %v1225_v5 = vmul.f32 %v1889_v56, %v1209_v61  ;;  %v1283_v7 = vmul.f32 %v1893_v3, %v1235_v60 }
 0x184   : > { %v1895_v6 = vpop.eup %1894  ;;  %v1256_v10 = vadd.f32 2.0, %v1224_v63  ;;  %v1226_v13 = vmul.f32 %v1891_v57, %v1210_v1  ;;  %v1240_v43 = vmul.f32 %v1224_v63, %v2368_v24 }
 0x185   : > { %v1897_v15 = vpop.eup %1896  ;;  %v1284_v55 = vmul.f32 %v1895_v6, %v1236_v4  ;;  %v1257_v18 = vadd.f32 2.0, %v1225_v5  ;;  %v1241_v45 = vmul.f32 %v1225_v5, %v2372_v29 }
 0x186   : > { %v1899_v19 = vpop.eup %1898  ;;  %v1285_v20 = vmul.f32 %v1897_v15, %v1237_v8  ;;  %1910 = vrcp.f32 %v1256_v10  ;;  %v1258_v25 = vadd.f32 2.0, %v1226_v13  ;;  %v1242_v49 = vmul.f32 %v1226_v13, %v2375_v36 }
 0x187   : > { %v1901_v59 = vpop.eup %1900  ;;  %v1629_v12 = vpack.c.bf16 %v1284_v55, %v1283_v7  ;;  %v1286_v26 = vmul.f32 %v1899_v19, %v1238_v9  ;;  %1912 = vrcp.f32 %v1257_v18 }
 0x188   : > { %v1903_v27 = vpop.eup %1902  ;;  %1914 = vrcp.f32 %v1258_v25  ;;  %v1211_v62 = vadd.f32 2.0, %v1901_v59 }
 0x189   : > { %1345 = vst [vmem:[%s2403_s12 + $0x10] sm:$0xff] %v1629_v12  ;;  %v1630_v17 = vpack.c.bf16 %v1286_v26, %v1285_v20  ;;  %v1212_v28 = vadd.f32 2.0, %v1903_v27 }
 0x18a   : > { %v1227_v30 = vmul.f32 %v1901_v59, %v1211_v62  ;;  %v1905_v33 = vpop.eup %1904 }
 0x18b   : > { %1346 = vst [vmem:[%s2403_s12 + $0x18] sm:$0xff] %v1630_v17  ;;  %v1228_v0 = vmul.f32 %v1903_v27, %v1212_v28  ;;  %v1907_v23 = vpop.eup %1906  ;;  %v1287_v42 = vmul.f32 %v1905_v33, %v1239_v21 }
 0x18c   : > { %v1259_v34 = vadd.f32 2.0, %v1227_v30  ;;  %v1213_v31 = vadd.f32 2.0, %v1907_v23  ;;  %v1909_v32 = vpop.eup %1908  ;;  %v1243_v29 = vmul.f32 %v1227_v30, %v2381_v11  ;;  %v1405_v11 = vld [vmem:[%s2403_s12] sm:$0xff] (%p2083_p9) }
 0x18d   : > { %v1260_v39 = vadd.f32 2.0, %v1228_v0  ;;  %v1214_v46 = vadd.f32 2.0, %v1909_v32  ;;  %v1244_v48 = vmul.f32 %v1228_v0, %v2385_v14  ;;  %v1407_v14 = vld [vmem:[%s2403_s12 + $0x8] sm:$0xff] (%p2083_p9)  ;;  %1406 = vst [vmem:[%s1363_s26] sm:$0xff] (%p2083_p9), %v1405_v11 }
 0x18e   : > { %1916 = vrcp.f32 %v1259_v34  ;;  %v1229_v35 = vmul.f32 %v1907_v23, %v1213_v31  ;;  %1408 = vst [vmem:[%s1363_s26 + $0x10] sm:$0xff] (%p2083_p9), %v1407_v14 }
 0x18f   : > { %1918 = vrcp.f32 %v1260_v39  ;;  %v1230_v52 = vmul.f32 %v1909_v32, %v1214_v46 }
 0x190   : > { %v1911_v37 = vpop.eup %1910  ;;  %v1261_v16 = vadd.f32 2.0, %v1229_v35  ;;  %v1245_v61 = vmul.f32 %v1229_v35, %v2395_v41  ;;  %v1409_v41 = vld [vmem:[%s2403_s12 + $0x10] sm:$0xff] (%p2083_p9) }
 0x191   : > { %v1913_v44 = vpop.eup %1912  ;;  %v1288_v47 = vmul.f32 %v1911_v37, %v1240_v43  ;;  %v1262_v24 = vadd.f32 2.0, %v1230_v52  ;;  %v1246_v1 = vmul.f32 %v1230_v52, %v2400_v50  ;;  %1410 = vst [vmem:[%s1363_s26 + $0x20] sm:$0xff] (%p2083_p9), %v1409_v41 }
 0x192   : > { %v1915_v38 = vpop.eup %1914  ;;  %v1289_v51 = vmul.f32 %v1913_v44, %v1241_v45  ;;  %1920 = vrcp.f32 %v1261_v16  ;;  %v1411_v50 = vld [vmem:[%s2403_s12 + $0x18] sm:$0xff] (%p2083_p9) }
 0x193   : > { %v1631_v53 = vpack.c.bf16 %v1288_v47, %v1287_v42  ;;  %v1290_v54 = vmul.f32 %v1915_v38, %v1242_v49  ;;  %1922 = vrcp.f32 %v1262_v24  ;;  %1412 = vst [vmem:[%s1363_s26 + $0x30] sm:$0xff] (%p2083_p9), %v1411_v50 }
 0x195   : > { %1347 = vst [vmem:[%s2403_s12 + $0x20] sm:$0xff] %v1631_v53  ;;  %v1632_v56 = vpack.c.bf16 %v1290_v54, %v1289_v51 }
 0x197   : > { %1348 = vst [vmem:[%s2403_s12 + $0x28] sm:$0xff] %v1632_v56 }
 0x198   : > { %v1917_v40 = vpop.eup %1916 }
 0x199   : > { %v1919_v36 = vpop.eup %1918  ;;  %v1291_v22 = vmul.f32 %v1917_v40, %v1243_v29 }
 0x19a   : > { %v1292_v57 = vmul.f32 %v1919_v36, %v1244_v48 }
 0x19c   : > { %v1633_v58 = vpack.c.bf16 %v1292_v57, %v1291_v22  ;;  %v1921_v60 = vpop.eup %1920  ;;  %1357 = sbr.rel (!%p2083_p9) target bundleno = 427 (0x1ab), region = 74  ;;  %v1413_v5 = vld [vmem:[%s2403_s12 + $0x20] sm:$0xff] (%p2083_p9) }
 0x19d   : > { %v1293_v63 = vmul.f32 %v1921_v60, %v1245_v61  ;;  %v1923_v2 = vpop.eup %1922  ;;  %1414 = vst [vmem:[%s1363_s26 + $0x40] sm:$0xff] (%p2083_p9), %v1413_v5 }
 0x19e   : > { %1349 = vst [vmem:[%s2403_s12 + $0x30] sm:$0xff] %v1633_v58  ;;  %v1294_v3 = vmul.f32 %v1923_v2, %v1246_v1  ;;  %v1415_v6 = vld [vmem:[%s2403_s12 + $0x28] sm:$0xff] (%p2083_p9) }
 0x19f   : > { %1416 = vst [vmem:[%s1363_s26 + $0x50] sm:$0xff] (%p2083_p9), %v1415_v6 }
 0x1a0   : > { %v1634_v4 = vpack.c.bf16 %v1294_v3, %v1293_v63 }
 0x1a2   : > { %1350 = vst [vmem:[%s2403_s12 + $0x38] sm:$0xff] %v1634_v4 }
 0x1a5   : > { %v1417_v7 = vld [vmem:[%s2403_s12 + $0x30] sm:$0xff] }
 0x1a6   : > { %1418 = vst [vmem:[%s1363_s26 + $0x60] sm:$0xff] %v1417_v7 }
 0x1a9   : > { %v1419_v8 = vld [vmem:[%s2403_s12 + $0x38] sm:$0xff] }
 0x1aa   : > { %1420 = vst [vmem:[%s1363_s26 + $0x70] sm:$0xff] %v1419_v8 }
 0x1ab PF: > { %s13_s20 = sadd.s32 1, %s1994_s20   ;;  %s2473_s12 = smov %s1966_s13 }
 0x1ac   : > { %p10_p2 = scmp.ge.s32.totalorder %s13_s20, 6   ;;  %s2474_s13 = smov %s2088_s4 }
 0x1ad   : > { %s2475_s14 = smov %s1974_s15  ;;  %s2476_s15 = smov %s2077_s27 }
 0x1ae   : > { %s2477_s16 = smov %s1986_s18  ;;  %s2478_s17 = smov %s1990_s19 }
 0x1af   : > { %s2479_s18 = smov %s2482_s22  ;;  %s2480_s19 = smov %s2486_s23 }
 0x1b0   :  { %12 = sbr.rel (!%p10_p2) target bundleno = 5 (0x5), region = 149 }

// kernel: downsample4_forward.22
= control target key start
LH: loop header
LB: loop body
LE: loop exit
PB: predicated region body
PF: predicated region fallthrough
CT: control target
= control target key end

     0   :  { %s1176_s12 = smov 0   ;;  %s1178_s13 = smov 0   ;;  %s1424_s0 = inlined_call_operand.vmem [shape: bf16[128,256], index: 0, kind: input, shape index: {}]   ;;  %s1425_s1 = inlined_call_operand.vmem [shape: bf16[256,256], index: 1, kind: input, shape index: {}]   ;;  %s1426_s2 = inlined_call_operand.vmem [shape: f32[1,256], index: 2, kind: input, shape index: {}]   ;;  %s1427_s3 = inlined_call_operand.vmem [shape: bf16[128,256], index: 3, kind: output, shape index: {}]  }
   0x1   :  { %s1180_s14 = smov 0  }
   0x2 LB: > { %s25_s15 = sadd.s32 1, %s1150_s13  ;;  %p885_p0 = scmp.ge.s32.totalorder %s1154_s14, 1  ;;  %s1154_s14 = sphi %s1180_s14, %s13_s14   ;;  %s1150_s13 = sphi %s1178_s13, %s1429_s13   ;;  %s1146_s12 = sphi %s1176_s12, %s1428_s12  }
   0x3   : > { %p27_p1 = scmp.ge.s32.totalorder %s25_s15, 2  ;;  %p174_p2 = scmp.lt.s32.totalorder %s1154_s14, 3 }
   0x5   : > { %s1431_s15 = smov (%p27_p1, %s25_s15), 0  ;;  %p175_p3 = pnand %p885_p0, %p174_p2 }
   0x6   : > { %v1008_v0 = vld [vmem:[%s1425_s1 + $0x4] ss:$8 sps:$4 sm:$0xff] (!%p175_p3)   ;;  %v1010_v1 = vld [vmem:[%s1425_s1] ss:$8 sps:$4 sm:$0xff] (!%p175_p3)   ;;  %v1011_v2 = vld [vmem:[%s1425_s1 + $0x14] ss:$8 sps:$4 sm:$0xff] (!%p175_p3)   ;;  %v285_v40 = vlaneseq (!%p175_p3) }
   0x7   : > { %178 = sbr.rel (%p175_p3) target bundleno = 351 (0x15f), region = 32  ;;  %495 = vmatprep.subr.bf16.mxu0 (!%p175_p3), %v1008_v0  ;;  %952 = vmatprep.subr.bf16.mxu1 (!%p175_p3), %v1008_v0  ;;  %v1013_v3 = vld [vmem:[%s1425_s1 + $0x10] ss:$8 sps:$4 sm:$0xff] (!%p175_p3)   ;;  %v1014_v4 = vld [vmem:[%s1425_s1 + $0x24] ss:$8 sps:$4 sm:$0xff] (!%p175_p3)   ;;  %s886_s26 = sshll.u32 (!%p175_p3), %s1146_s12, 3 }
   0x8   : > { %496 = vmatpush1.bf16.msra.mxu0 (!%p175_p3), %v1010_v1  ;;  %968 = vmatpush1.bf16.msra.mxu1 (!%p175_p3), %v1010_v1  ;;  %v1016_v5 = vld [vmem:[%s1425_s1 + $0x20] ss:$8 sps:$4 sm:$0xff] (!%p175_p3)   ;;  %v1017_v6 = vld [vmem:[%s1425_s1 + $0x34] ss:$8 sps:$4 sm:$0xff] (!%p175_p3)   ;;  %p214_p4 = scmp.lt.s32.totalorder (!%p175_p3), %s886_s26, 15  ;;  %v286_v41 = vshrl.u32 (!%p175_p3), %v285_v40, 7 }
   0x9   : > { %497 = vmatprep.subr.bf16.mxu0 (!%p175_p3), %v1011_v2  ;;  %953 = vmatprep.subr.bf16.mxu1 (!%p175_p3), %v1011_v2  ;;  %v1019_v7 = vld [vmem:[%s1425_s1 + $0x30] ss:$8 sps:$4 sm:$0xff] (!%p175_p3)   ;;  %v1020_v8 = vld [vmem:[%s1425_s1 + $0x44] ss:$8 sps:$4 sm:$0xff] (!%p175_p3)   ;;  %v1022_v9 = vld [vmem:[%s1425_s1 + $0x40] ss:$8 sps:$4 sm:$0xff] (!%p175_p3)  }
   0xa   : > { %v1023_v10 = vld [vmem:[%s1425_s1 + $0x54] ss:$8 sps:$4 sm:$0xff] (!%p175_p3)   ;;  %v1025_v11 = vld [vmem:[%s1425_s1 + $0x50] ss:$8 sps:$4 sm:$0xff] (!%p175_p3)   ;;  %v1026_v12 = vld [vmem:[%s1425_s1 + $0x64] ss:$8 sps:$4 sm:$0xff] (!%p175_p3)  }
   0xb   : > { %v1028_v14 = vld [vmem:[%s1425_s1 + $0x60] ss:$8 sps:$4 sm:$0xff] (!%p175_p3)   ;;  %v1029_v16 = vld [vmem:[%s1425_s1 + $0x74] ss:$8 sps:$4 sm:$0xff] (!%p175_p3)   ;;  %v1031_v17 = vld [vmem:[%s1425_s1 + $0x70] ss:$8 sps:$4 sm:$0xff] (!%p175_p3)  }
   0xc   : > { %498 = vmatpush1.bf16.msra.mxu0 (!%p175_p3), %v1013_v3  ;;  %969 = vmatpush1.bf16.msra.mxu1 (!%p175_p3), %v1013_v3  ;;  %v1032_v18 = vld [vmem:[%s1425_s1 + $0x84] ss:$8 sps:$4 sm:$0xff] (!%p175_p3)   ;;  %v1034_v19 = vld [vmem:[%s1425_s1 + $0x80] ss:$8 sps:$4 sm:$0xff] (!%p175_p3)   ;;  %v1035_v20 = vld [vmem:[%s1425_s1 + $0x94] ss:$8 sps:$4 sm:$0xff] (!%p175_p3)  }
   0xd   : > { %499 = vmatprep.subr.bf16.mxu0 (!%p175_p3), %v1014_v4  ;;  %954 = vmatprep.subr.bf16.mxu1 (!%p175_p3), %v1014_v4  ;;  %v1037_v21 = vld [vmem:[%s1425_s1 + $0x90] ss:$8 sps:$4 sm:$0xff] (!%p175_p3)   ;;  %v1038_v22 = vld [vmem:[%s1425_s1 + $0xa4] ss:$8 sps:$4 sm:$0xff] (!%p175_p3)   ;;  %v1040_v23 = vld [vmem:[%s1425_s1 + $0xa0] ss:$8 sps:$4 sm:$0xff] (!%p175_p3)  }
   0xe   : > { %s1433_s26 = smov (!%p214_p4, %s886_s26), 15  ;;  %v1041_v24 = vld [vmem:[%s1425_s1 + $0xb4] ss:$8 sps:$4 sm:$0xff]   ;;  %v1043_v25 = vld [vmem:[%s1425_s1 + $0xb0] ss:$8 sps:$4 sm:$0xff]   ;;  %v287_v42 = vsub.s32 0, %v286_v41 }
   0xf   : > { %s942_s12 = sshll.u32 %s1433_s26, 3  ;;  %v1044_v26 = vld [vmem:[%s1425_s1 + $0xc4] ss:$8 sps:$4 sm:$0xff]   ;;  %v1046_v27 = vld [vmem:[%s1425_s1 + $0xc0] ss:$8 sps:$4 sm:$0xff]   ;;  %v291_v44 = vsub.s32 1, %v286_v41 }
  0x10   : > { %500 = vmatpush1.bf16.msra.mxu0 %v1016_v5  ;;  %970 = vmatpush1.bf16.msra.mxu1 %v1016_v5  ;;  %s1241_s20 = scalar_lea.vmem %s1424_s0, %s942_s12  ;;  %v1047_v28 = vld [vmem:[%s1425_s1 + $0xd4] ss:$8 sps:$4 sm:$0xff]   ;;  %v1049_v29 = vld [vmem:[%s1425_s1 + $0xd0] ss:$8 sps:$4 sm:$0xff]   ;;  %v1050_v30 = vld [vmem:[%s1425_s1 + $0xe4] ss:$8 sps:$4 sm:$0xff]   ;;  %s1390_s22 = scalar_lea.vmem %s1427_s3, %s942_s12 }
  0x11   : > { %501 = vmatprep.subr.bf16.mxu0 %v1017_v6  ;;  %955 = vmatprep.subr.bf16.mxu1 %v1017_v6  ;;  %v1058_v13 = vld [vmem:[%s1241_s20 + $0x4] ss:$8 sps:$4 sm:$0xff]   ;;  %v1052_v31 = vld [vmem:[%s1425_s1 + $0xe0] ss:$8 sps:$4 sm:$0xff]   ;;  %v1053_v32 = vld [vmem:[%s1425_s1 + $0xf4] ss:$8 sps:$4 sm:$0xff]  }
  0x12   : > { %v1061_v15 = vld [vmem:[%s1241_s20 + $0x24] ss:$8 sps:$4 sm:$0xff]   ;;  %527 = vmatprep.mubr.bf16.mxu0 %v1058_v13  ;;  %v1055_v33 = vld [vmem:[%s1425_s1 + $0xf0] ss:$8 sps:$4 sm:$0xff]   ;;  %v1056_v34 = vld [vmem:[%s1241_s20] ss:$8 sps:$4 sm:$0xff]  }
  0x13   : > { %547 = vmatprep.mubr.bf16.mxu1 %v1061_v15  ;;  %v1059_v35 = vld [vmem:[%s1241_s20 + $0x20] ss:$8 sps:$4 sm:$0xff]   ;;  %v1062_v36 = vld [vmem:[%s1241_s20 + $0x14] ss:$8 sps:$4 sm:$0xff]   ;;  %v1066_v38 = vld [vmem:[%s1241_s20 + $0x10] ss:$8 sps:$4 sm:$0xff]  }
  0x14   : > { %502 = vmatpush1.bf16.msra.mxu0 %v1019_v7  ;;  %971 = vmatpush1.bf16.msra.mxu1 %v1019_v7  ;;  %v1064_v37 = vld [vmem:[%s1241_s20 + $0x34] ss:$8 sps:$4 sm:$0xff]   ;;  %v1067_v39 = vld [vmem:[%s1241_s20 + $0x30] ss:$8 sps:$4 sm:$0xff]   ;;  %v283_v43 = vld [vmem:[%s1426_s2] sm:$0x3] }
  0x15   : > { %503 = vmatprep.subr.bf16.mxu0 %v1020_v8  ;;  %956 = vmatprep.subr.bf16.mxu1 %v1020_v8  ;;  %v288_v45 = vrot.slane %v283_v43, %v287_v42  ;;  %v1314_v46 = vrot.slane %v283_v43, %v291_v44 }
  0x18   : > { %504 = vmatpush1.bf16.msra.mxu0 %v1022_v9  ;;  %972 = vmatpush1.bf16.msra.mxu1 %v1022_v9 }
  0x19   : > { %505 = vmatprep.subr.bf16.mxu0 %v1023_v10  ;;  %957 = vmatprep.subr.bf16.mxu1 %v1023_v10 }
  0x1c   : > { %506 = vmatpush1.bf16.msra.mxu0 %v1025_v11  ;;  %973 = vmatpush1.bf16.msra.mxu1 %v1025_v11 }
  0x1d   : > { %507 = vmatprep.subr.bf16.mxu0 %v1026_v12  ;;  %958 = vmatprep.subr.bf16.mxu1 %v1026_v12 }
  0x20   : > { %508 = vmatpush1.bf16.msra.mxu0 %v1028_v14  ;;  %974 = vmatpush1.bf16.msra.mxu1 %v1028_v14 }
  0x21   : > { %509 = vmatprep.subr.bf16.mxu0 %v1029_v16  ;;  %959 = vmatprep.subr.bf16.mxu1 %v1029_v16 }
  0x24   : > { %510 = vmatpush1.bf16.msra.mxu0 %v1031_v17  ;;  %975 = vmatpush1.bf16.msra.mxu1 %v1031_v17 }
  0x25   : > { %511 = vmatprep.subr.bf16.mxu0 %v1032_v18  ;;  %960 = vmatprep.subr.bf16.mxu1 %v1032_v18 }
  0x28   : > { %512 = vmatpush1.bf16.msra.mxu0 %v1034_v19  ;;  %976 = vmatpush1.bf16.msra.mxu1 %v1034_v19 }
  0x29   : > { %513 = vmatprep.subr.bf16.mxu0 %v1035_v20  ;;  %961 = vmatprep.subr.bf16.mxu1 %v1035_v20 }
  0x2c   : > { %514 = vmatpush1.bf16.msra.mxu0 %v1037_v21  ;;  %977 = vmatpush1.bf16.msra.mxu1 %v1037_v21 }
  0x2d   : > { %515 = vmatprep.subr.bf16.mxu0 %v1038_v22  ;;  %962 = vmatprep.subr.bf16.mxu1 %v1038_v22 }
  0x30   : > { %516 = vmatpush1.bf16.msra.mxu0 %v1040_v23  ;;  %978 = vmatpush1.bf16.msra.mxu1 %v1040_v23 }
  0x31   : > { %517 = vmatprep.subr.bf16.mxu0 %v1041_v24  ;;  %963 = vmatprep.subr.bf16.mxu1 %v1041_v24 }
  0x34   : > { %518 = vmatpush1.bf16.msra.mxu0 %v1043_v25  ;;  %979 = vmatpush1.bf16.msra.mxu1 %v1043_v25 }
  0x35   : > { %519 = vmatprep.subr.bf16.mxu0 %v1044_v26  ;;  %964 = vmatprep.subr.bf16.mxu1 %v1044_v26 }
  0x38   : > { %520 = vmatpush1.bf16.msra.mxu0 %v1046_v27  ;;  %980 = vmatpush1.bf16.msra.mxu1 %v1046_v27 }
  0x39   : > { %521 = vmatprep.subr.bf16.mxu0 %v1047_v28  ;;  %965 = vmatprep.subr.bf16.mxu1 %v1047_v28 }
  0x3c   : > { %522 = vmatpush1.bf16.msra.mxu0 %v1049_v29  ;;  %981 = vmatpush1.bf16.msra.mxu1 %v1049_v29 }
  0x3d   : > { %523 = vmatprep.subr.bf16.mxu0 %v1050_v30  ;;  %966 = vmatprep.subr.bf16.mxu1 %v1050_v30 }
  0x40   : > { %524 = vmatpush1.bf16.msra.mxu0 %v1052_v31  ;;  %982 = vmatpush1.bf16.msra.mxu1 %v1052_v31 }
  0x41   : > { %525 = vmatprep.subr.bf16.mxu0 %v1053_v32  ;;  %967 = vmatprep.subr.bf16.mxu1 %v1053_v32 }
  0x44   : > { %526 = vmatpush1.bf16.msra.mxu0 %v1055_v33  ;;  %983 = vmatpush1.bf16.msra.mxu1 %v1055_v33 }
  0x47   : > { %528 = vmatmul.mubr.bf16.vlgmr.msra.gmra.mrb[0].mxu0 %v1056_v34  ;;  %548 = vmatmul.mubr.bf16.vlgmr.msra.gmra.mrb[0].mxu1 %v1059_v35 }
  0x48   : > { %537 = vmatprep.mubr.bf16.mxu0 %v1062_v36  ;;  %557 = vmatprep.mubr.bf16.mxu1 %v1064_v37 }
  0x4f   : > { %538 = vmatmul.mubr.bf16.gmra.mrb[4].mxu0 %v1066_v38  ;;  %558 = vmatmul.mubr.bf16.gmra.mrb[4].mxu1 %v1067_v39 }
 0x11a   : > { %v529_v47 = vpop.f32.mrb[0].mxu0  ;;  %v549_v48 = vpop.f32.mrb[0].mxu1 }
 0x11b   : > { %v1316_v49 = vadd.f32 %v529_v47, %v288_v45  ;;  %v1318_v50 = vadd.f32 %v549_v48, %v288_v45  ;;  %v531_v51 = vpop.f32.mrb[1].mxu0  ;;  %v551_v52 = vpop.f32.mrb[1].mxu1 }
 0x11c   : > { %v1321_v53 = vadd.f32 %v531_v51, %v1314_v46  ;;  %v1324_v54 = vadd.f32 %v551_v52, %v1314_v46  ;;  %v533_v55 = vpop.f32.mrb[2].mxu0  ;;  %v553_v56 = vpop.f32.mrb[2].mxu1 }
 0x11d   : > { %v568_v57 = vmin.f32 %v1316_v49, 20.0  ;;  %v576_v58 = vmin.f32 %v1318_v50, 20.0  ;;  %v1328_v59 = vadd.f32 %v533_v55, %v288_v45  ;;  %v1330_v60 = vadd.f32 %v553_v56, %v288_v45  ;;  %v535_v61 = vpop.f32.mrb[3].mxu0  ;;  %v555_v62 = vpop.f32.mrb[3].mxu1 }
 0x11e   : > { %v569_v63 = vmin.f32 %v1321_v53, 20.0  ;;  %v577_v0 = vmin.f32 %v1324_v54, 20.0  ;;  %v1335_v1 = vadd.f32 %v535_v61, %v1314_v46  ;;  %v1338_v2 = vadd.f32 %v555_v62, %v1314_v46 }
 0x11f   : > { %v584_v3 = vmul.f32 1.442695, %v568_v57  ;;  %v600_v4 = vmul.f32 1.442695, %v576_v58  ;;  %v570_v5 = vmin.f32 %v1328_v59, 20.0  ;;  %v578_v6 = vmin.f32 %v1330_v60, 20.0 }
 0x120   : > { %v586_v7 = vmul.f32 1.442695, %v569_v63  ;;  %v602_v8 = vmul.f32 1.442695, %v577_v0  ;;  %v571_v9 = vmin.f32 %v1335_v1, 20.0  ;;  %v579_v10 = vmin.f32 %v1338_v2, 20.0 }
 0x121   : > { %1068 = vpow2.f32 %v584_v3  ;;  %v588_v11 = vmul.f32 1.442695, %v570_v5  ;;  %v604_v12 = vmul.f32 1.442695, %v578_v6 }
 0x122   : > { %1070 = vpow2.f32 %v600_v4  ;;  %v539_v13 = vpop.f32.mrb[4].mxu0  ;;  %v559_v14 = vpop.f32.mrb[4].mxu1  ;;  %v590_v15 = vmul.f32 1.442695, %v571_v9  ;;  %v606_v20 = vmul.f32 1.442695, %v579_v10 }
 0x123   : > { %1072 = vpow2.f32 %v586_v7  ;;  %v1344_v16 = vadd.f32 %v539_v13, %v288_v45  ;;  %v1346_v17 = vadd.f32 %v559_v14, %v288_v45  ;;  %v541_v18 = vpop.f32.mrb[5].mxu0  ;;  %v561_v19 = vpop.f32.mrb[5].mxu1 }
 0x124   : > { %1074 = vpow2.f32 %v602_v8  ;;  %v1349_v21 = vadd.f32 %v541_v18, %v1314_v46  ;;  %v1352_v22 = vadd.f32 %v561_v19, %v1314_v46  ;;  %v543_v23 = vpop.f32.mrb[6].mxu0  ;;  %v563_v24 = vpop.f32.mrb[6].mxu1 }
 0x125   : > { %1076 = vpow2.f32 %v588_v11  ;;  %v572_v25 = vmin.f32 %v1344_v16, 20.0  ;;  %v580_v26 = vmin.f32 %v1346_v17, 20.0  ;;  %v1356_v27 = vadd.f32 %v543_v23, %v288_v45  ;;  %v545_v28 = vpop.f32.mrb[7].mxu0  ;;  %v565_v29 = vpop.f32.mrb[7].mxu1 }
 0x126   : > { %1078 = vpow2.f32 %v604_v12  ;;  %v573_v30 = vmin.f32 %v1349_v21, 20.0  ;;  %v581_v31 = vmin.f32 %v1352_v22, 20.0  ;;  %v1360_v32 = vadd.f32 %v563_v24, %v288_v45 }
 0x127   : > { %1080 = vpow2.f32 %v590_v15  ;;  %v592_v33 = vmul.f32 1.442695, %v572_v25  ;;  %v608_v34 = vmul.f32 1.442695, %v580_v26  ;;  %v574_v35 = vmin.f32 %v1356_v27, 20.0 }
 0x128   : > { %1082 = vpow2.f32 %v606_v20  ;;  %v594_v36 = vmul.f32 1.442695, %v573_v30  ;;  %v610_v37 = vmul.f32 1.442695, %v581_v31  ;;  %v582_v38 = vmin.f32 %v1360_v32, 20.0 }
 0x129   : > { %1084 = vpow2.f32 %v592_v33  ;;  %v1365_v39 = vadd.f32 %v545_v28, %v1314_v46  ;;  %v596_v41 = vmul.f32 1.442695, %v574_v35  ;;  %v1369_v62 = vadd.f32 %v565_v29, %v1314_v46 }
 0x12a   : > { %1086 = vpow2.f32 %v608_v34  ;;  %v612_v48 = vmul.f32 1.442695, %v582_v38 }
 0x12b   : > { %v1069_v40 = vpop.eup %1068  ;;  %1088 = vpow2.f32 %v594_v36  ;;  %v575_v42 = vmin.f32 %v1365_v39, 20.0  ;;  %v583_v24 = vmin.f32 %v1369_v62, 20.0 }
 0x12c   : > { %v1071_v43 = vpop.eup %1070  ;;  %v616_v44 = vadd.f32 2.0, %v1069_v40  ;;  %1090 = vpow2.f32 %v610_v37 }
 0x12d   : > { %v1073_v45 = vpop.eup %1072  ;;  %v624_v47 = vadd.f32 2.0, %v1071_v43  ;;  %v598_v51 = vmul.f32 1.442695, %v575_v42  ;;  %1092 = vpow2.f32 %v596_v41 }
 0x12e   : > { %v1075_v52 = vpop.eup %1074  ;;  %v632_v55 = vmul.f32 %v1069_v40, %v616_v44  ;;  %v617_v56 = vadd.f32 2.0, %v1073_v45  ;;  %v614_v44 = vmul.f32 1.442695, %v583_v24 }
 0x12f   : > { %v1077_v57 = vpop.eup %1076  ;;  %v640_v58 = vmul.f32 %v1071_v43, %v624_v47  ;;  %v625_v61 = vadd.f32 2.0, %v1075_v52  ;;  %1094 = vpow2.f32 %v598_v51 }
 0x130   : > { %v1079_v63 = vpop.eup %1078  ;;  %v664_v0 = vadd.f32 2.0, %v632_v55  ;;  %v633_v3 = vmul.f32 %v1073_v45, %v617_v56  ;;  %v618_v4 = vadd.f32 2.0, %v1077_v57  ;;  %1096 = vpow2.f32 %v612_v48 }
 0x131   : > { %v1081_v5 = vpop.eup %1080  ;;  %v672_v6 = vadd.f32 2.0, %v640_v58  ;;  %v641_v7 = vmul.f32 %v1075_v52, %v625_v61  ;;  %v626_v8 = vadd.f32 2.0, %v1079_v63  ;;  %v648_v47 = vmul.f32 %v632_v55, %v1316_v49 }
 0x132   : > { %v1083_v9 = vpop.eup %1082  ;;  %1098 = vrcp.f32 %v664_v0  ;;  %v665_v10 = vadd.f32 2.0, %v633_v3  ;;  %v1371_v11 = vmul.f32 %v1077_v57, %v618_v4  ;;  %v619_v18 = vadd.f32 2.0, %v1081_v5 }
 0x133   : > { %v1085_v12 = vpop.eup %1084  ;;  %1100 = vrcp.f32 %v672_v6  ;;  %v673_v13 = vadd.f32 2.0, %v641_v7  ;;  %v1373_v46 = vmul.f32 %v1079_v63, %v626_v8  ;;  %v627_v23 = vadd.f32 2.0, %v1083_v9 }
 0x134   : > { %v1087_v14 = vpop.eup %1086  ;;  %1102 = vrcp.f32 %v665_v10  ;;  %v666_v15 = vadd.f32 2.0, %v1371_v11  ;;  %v635_v26 = vmul.f32 %v1081_v5, %v619_v18  ;;  %v620_v28 = vadd.f32 2.0, %v1085_v12 }
 0x135   : > { %v1089_v19 = vpop.eup %1088  ;;  %1104 = vrcp.f32 %v673_v13  ;;  %v674_v20 = vadd.f32 2.0, %v1373_v46  ;;  %v628_v29 = vadd.f32 2.0, %v1087_v14  ;;  %v643_v30 = vmul.f32 %v1083_v9, %v627_v23 }
 0x136   : > { %v1091_v25 = vpop.eup %1090  ;;  %1106 = vrcp.f32 %v666_v15  ;;  %v621_v31 = vadd.f32 2.0, %v1089_v19  ;;  %v667_v34 = vadd.f32 2.0, %v635_v26  ;;  %v636_v35 = vmul.f32 %v1085_v12, %v620_v28 }
 0x137   : > { %1108 = vrcp.f32 %v674_v20  ;;  %v629_v33 = vadd.f32 2.0, %v1091_v25  ;;  %v644_v36 = vmul.f32 %v1087_v14, %v628_v29  ;;  %v1093_v37 = vpop.eup %1092  ;;  %v675_v38 = vadd.f32 2.0, %v643_v30 }
 0x138   : > { %v637_v40 = vmul.f32 %v1089_v19, %v621_v31  ;;  %1110 = vrcp.f32 %v667_v34  ;;  %v668_v43 = vadd.f32 2.0, %v636_v35  ;;  %v656_v56 = vmul.f32 %v640_v58, %v1318_v50 }
 0x139   : > { %v1378_v41 = vmul.f32 %v1091_v25, %v629_v33  ;;  %v1095_v42 = vpop.eup %1094  ;;  %1112 = vrcp.f32 %v675_v38  ;;  %v676_v48 = vadd.f32 2.0, %v644_v36  ;;  %v622_v61 = vadd.f32 2.0, %v1093_v37 }
 0x13a   : > { %v1097_v45 = vpop.eup %1096  ;;  %v669_v51 = vadd.f32 2.0, %v637_v40  ;;  %1114 = vrcp.f32 %v668_v43  ;;  %v649_v4 = vmul.f32 %v633_v3, %v1321_v53  ;;  %v623_v5 = vadd.f32 2.0, %v1095_v42 }
 0x13b   : > { %v677_v57 = vadd.f32 2.0, %v1378_v41  ;;  %1116 = vrcp.f32 %v676_v48  ;;  %v657_v49 = vmul.f32 %v641_v7, %v1324_v54  ;;  %v638_v55 = vmul.f32 %v1093_v37, %v622_v61 }
 0x13c   : > { %v1099_v52 = vpop.eup %1098  ;;  %1118 = vrcp.f32 %v669_v51  ;;  %v639_v50 = vmul.f32 %v1095_v42, %v623_v5  ;;  %v650_v7 = vmul.f32 %v1371_v11, %v1328_v59  ;;  %v630_v13 = vadd.f32 2.0, %v1097_v45 }
 0x13d   : > { %v1101_v63 = vpop.eup %1100  ;;  %v696_v0 = vmul.f32 %v1099_v52, %v648_v47  ;;  %1120 = vrcp.f32 %v677_v57  ;;  %v670_v3 = vadd.f32 2.0, %v638_v55  ;;  %v658_v15 = vmul.f32 %v1373_v46, %v1330_v60 }
 0x13e   : > { %v1103_v6 = vpop.eup %1102  ;;  %v704_v8 = vmul.f32 %v1101_v63, %v656_v56  ;;  %1122 = vpow2.f32 %v614_v44  ;;  %v651_v19 = vmul.f32 %v635_v26, %v1335_v1  ;;  %v671_v20 = vadd.f32 2.0, %v639_v50 }
 0x13f   : > { %v1105_v9 = vpop.eup %1104  ;;  %v697_v10 = vmul.f32 %v1103_v6, %v649_v4  ;;  %1124 = vrcp.f32 %v670_v3  ;;  %v659_v25 = vmul.f32 %v643_v30, %v1338_v2  ;;  %v652_v59 = vmul.f32 %v636_v35, %v1344_v16 }
 0x140   : > { %v1107_v58 = vpop.eup %1106  ;;  %v705_v53 = vmul.f32 %v1105_v9, %v657_v49  ;;  %v646_v11 = vmul.f32 %v1097_v45, %v630_v13  ;;  %1126 = vrcp.f32 %v671_v20  ;;  %v660_v46 = vmul.f32 %v644_v36, %v1346_v17 }
 0x141   : > { %v1109_v12 = vpop.eup %1108  ;;  %v944_v54 = vpack.c.bf16 %v697_v10, %v696_v0  ;;  %v698_v18 = vmul.f32 %v1107_v58, %v650_v7  ;;  %v653_v34 = vmul.f32 %v637_v40, %v1349_v21  ;;  %v661_v38 = vmul.f32 %v1378_v41, %v1352_v22 }
 0x142   : > { %v948_v14 = vpack.c.bf16 %v705_v53, %v704_v8  ;;  %v1111_v23 = vpop.eup %1110  ;;  %v706_v24 = vmul.f32 %v1109_v12, %v658_v15  ;;  %v678_v42 = vadd.f32 2.0, %v646_v11  ;;  %v654_v40 = vmul.f32 %v638_v55, %v1356_v27 }
 0x143   : > { %760 = vst [vmem:[%s1390_s22] sm:$0xff] %v944_v54  ;;  %v1113_v28 = vpop.eup %1112  ;;  %v699_v29 = vmul.f32 %v1111_v23, %v651_v19  ;;  %v655_v41 = vmul.f32 %v639_v50, %v1365_v39  ;;  %v662_v61 = vmul.f32 %v646_v11, %v1360_v32 }
 0x144   : > { %764 = vst [vmem:[%s1390_s22 + $0x20] sm:$0xff] %v948_v14  ;;  %v1115_v31 = vpop.eup %1114  ;;  %v707_v60 = vmul.f32 %v1113_v28, %v659_v25  ;;  %1128 = vrcp.f32 %v678_v42 }
 0x145   : > { %v1117_v33 = vpop.eup %1116  ;;  %v945_v1 = vpack.c.bf16 %v699_v29, %v698_v18  ;;  %v700_v26 = vmul.f32 %v1115_v31, %v652_v59 }
 0x146   : > { %v1119_v37 = vpop.eup %1118  ;;  %v949_v2 = vpack.c.bf16 %v707_v60, %v706_v24  ;;  %v708_v30 = vmul.f32 %v1117_v33, %v660_v46 }
 0x147   : > { %v1121_v16 = vpop.eup %1120  ;;  %761 = vst [vmem:[%s1390_s22 + $0x8] sm:$0xff] %v945_v1  ;;  %v701_v35 = vmul.f32 %v1119_v37, %v653_v34 }
 0x148   : > { %v1123_v43 = vpop.eup %1122  ;;  %765 = vst [vmem:[%s1390_s22 + $0x28] sm:$0xff] %v949_v2  ;;  %v709_v17 = vmul.f32 %v1121_v16, %v661_v38 }
 0x149   : > { %v946_v36 = vpack.c.bf16 %v701_v35, %v700_v26  ;;  %v631_v44 = vadd.f32 2.0, %v1123_v43  ;;  %v1125_v45 = vpop.eup %1124 }
 0x14a   : > { %v950_v21 = vpack.c.bf16 %v709_v17, %v708_v30  ;;  %v702_v22 = vmul.f32 %v1125_v45, %v654_v40  ;;  %v1127_v48 = vpop.eup %1126 }
 0x14b   : > { %762 = vst [vmem:[%s1390_s22 + $0x10] sm:$0xff] %v946_v36  ;;  %v647_v47 = vmul.f32 %v1123_v43, %v631_v44  ;;  %v703_v52 = vmul.f32 %v1127_v48, %v655_v41 }
 0x14c   : > { %766 = vst [vmem:[%s1390_s22 + $0x30] sm:$0xff] %v950_v21 }
 0x14d   : > { %v679_v51 = vadd.f32 2.0, %v647_v47  ;;  %v947_v56 = vpack.c.bf16 %v703_v52, %v702_v22  ;;  %v663_v27 = vmul.f32 %v647_v47, %v1369_v62 }
 0x14e   : > { %v1129_v57 = vpop.eup %1128 }
 0x14f   : > { %1130 = vrcp.f32 %v679_v51  ;;  %763 = vst [vmem:[%s1390_s22 + $0x18] sm:$0xff] %v947_v56  ;;  %v710_v63 = vmul.f32 %v1129_v57, %v662_v61 }
 0x159   : > { %v1131_v0 = vpop.eup %1130 }
 0x15a   : > { %v711_v4 = vmul.f32 %v1131_v0, %v663_v27 }
 0x15c   : > { %v951_v5 = vpack.c.bf16 %v711_v4, %v710_v63 }
 0x15e   : > { %767 = vst [vmem:[%s1390_s22 + $0x38] sm:$0xff] %v951_v5 }
 0x15f PF: > { %s13_s14 = sadd.s32 1, %s1154_s14   ;;  %s1428_s12 = smov %s1150_s13 }
 0x160   : > { %p10_p5 = scmp.ge.s32.totalorder %s13_s14, 4   ;;  %s1429_s13 = smov %s1431_s15 }
 0x162   :  { %12 = sbr.rel (!%p10_p5) target bundleno = 2 (0x2), region = 68 }

// kernel: downsample4_forward.39
= control target key start
LH: loop header
LB: loop body
LE: loop exit
PB: predicated region body
PF: predicated region fallthrough
CT: control target
= control target key end

     0   :  { %s2196_s18 = smov 0   ;;  %s2198_s19 = smov 0   ;;  %s2668_s0 = inlined_call_operand.vmem [shape: bf16[128,256], index: 0, kind: input, shape index: {}]   ;;  %s2669_s1 = inlined_call_operand.vmem [shape: bf16[256,512], index: 1, kind: input, shape index: {}]   ;;  %s2670_s2 = inlined_call_operand.vmem [shape: bf16[128,256], index: 2, kind: input, shape index: {}]   ;;  %s2671_s3 = inlined_call_operand.vmem [shape: bf16[256,512], index: 3, kind: input, shape index: {}]   ;;  %s2672_s4 = inlined_call_operand.vmem [shape: f32[1,512], index: 4, kind: input, shape index: {}]   ;;  %s2673_s5 = inlined_call_operand.vmem [shape: bf16[128,512], index: 5, kind: output, shape index: {}]  }
   0x1   :  { %s2200_s20 = smov 0   ;;  %s2202_s21 = smov 0  }
   0x2   :  { %s2204_s22 = smov 0   ;;  %s2206_s23 = smov 0  }
   0x3   :  { %s2208_s24 = smov 0   ;;  %s2210_s25 = smov 0  }
   0x4   :  { %s2212_s26 = smov 0  }
   0x5 LB: > { %s1693_s27 = sadd.s32 4294967295, %s2164_s26   ;;  %s24_s28 = sadd.s32 1, %s2156_s24  ;;  %s2164_s26 = sphi %s2212_s26, %s15_s26   ;;  %s2160_s25 = sphi %s2210_s25, %s2683_s25   ;;  %s2156_s24 = sphi %s2208_s24, %s2682_s24   ;;  %s2152_s23 = sphi %s2206_s23, %s2681_s23   ;;  %s2148_s22 = sphi %s2204_s22, %s2680_s22   ;;  %s2144_s21 = sphi %s2202_s21, %s2679_s21   ;;  %s2140_s20 = sphi %s2200_s20, %s2678_s20   ;;  %s2136_s19 = sphi %s2198_s19, %s2677_s19   ;;  %s2132_s18 = sphi %s2196_s18, %s2676_s18  }
   0x6   : > { %p25_p0 = scmp.ge.s32.totalorder %s24_s28, 2  ;;  %s27_s29 = sadd.s32 1, %s2160_s25 }
   0x7   : > { %s60_s30 = sadd.s32 1, %s2144_s21  ;;  %p67_p1 = scmp.ne.s32.totalorder %s2144_s21, %s2140_s20 }
   0x8   : > { %s2685_s28 = smov (%p25_p0, %s24_s28), 0  ;;  %s2687_s29 = smov (!%p25_p0, %s27_s29), %s2160_s25 }
   0x9   : > { %s57_s6 = ssub.s32 %s2156_s24, %s2685_s28  ;;  %p68_p2 = scmp.eq.s32.totalorder %s2164_s26, 0 }
   0xa   : > { %p29_p3 = scmp.ge.s32.totalorder %s2687_s29, 2  ;;  %p58_p4 = scmp.eq.s32.totalorder %s57_s6, 0 }
   0xb   : > { %p2253_p5 = por %p68_p2, %p67_p1  ;;  %s166_s8 = sadd.s32 1, %s2136_s19 }
   0xc   : > { %s2689_s29 = smov (%p29_p3, %s2687_s29), 0  ;;  %p176_p6 = scmp.ne.s32.totalorder %s2136_s19, %s2132_s18 }
   0xd   : > { %s2261_s9 = scalar_select %p58_p4, %s2144_s21, %s60_s30  }
   0xe   : > { %s161_s10 = ssub.s32 %s2160_s25, %s2689_s29  ;;  %p177_p7 = scmp.eq.s32.totalorder %s1693_s27, 3 }
   0xf   : > { %s163_s11 = sor.u32 %s161_s10, %s57_s6  ;;  %p1696_p10 = scmp.ge.s32.totalorder %s2164_s26, 4 }
  0x10   : > { %p164_p8 = scmp.eq.s32.totalorder %s163_s11, 0  ;;  %p2267_p9 = por %p177_p7, %p176_p6 }
  0x11   : > { %199 = sbr.rel (%p1696_p10) target bundleno = 64 (0x40), region = 16 }
  0x12   : > { %s2272_s13 = scalar_select %p164_p8, %s2136_s19, %s166_s8  }
  0x18   : > { %212 = sbr.rel (!%p2253_p5) target bundleno = 44 (0x2c), region = 24  ;;  %s214_s14 = sand.u32 (%p2253_p5), 1, %s2144_s21  }
  0x19   : > { %s1809_s15 = sshll.u32 (%p2253_p5), %s2156_s24, 3  ;;  %s1697_s16 = sshll.u32 (%p2253_p5), %s214_s14, 8 }
  0x1a   : > { %s2282_s30 = scalar_lea.vmem (%p2253_p5), %s2669_s1, %s1809_s15  ;;  %s2287_s6 = scalar_lea.vmem (%p2253_p5), [#allocation2], %s1697_s16 }
  0x1b   : > { %v309_v0 = vld [vmem:[%s2282_s30] sm:$0xff] (%p2253_p5)  ;;  %v311_v1 = vld [vmem:[%s2282_s30 + $0x10] sm:$0xff] (%p2253_p5) }
  0x1c   : > { %v313_v2 = vld [vmem:[%s2282_s30 + $0x20] sm:$0xff] (%p2253_p5)  ;;  %310 = vst [vmem:[%s2287_s6] sm:$0xff] (%p2253_p5), %v309_v0  ;;  %312 = vst [vmem:[%s2287_s6 + $0x8] sm:$0xff] (%p2253_p5), %v311_v1  ;;  %v315_v3 = vld [vmem:[%s2282_s30 + $0x30] sm:$0xff] (%p2253_p5) }
  0x1d   : > { %314 = vst [vmem:[%s2287_s6 + $0x10] sm:$0xff] (%p2253_p5), %v313_v2  ;;  %v317_v4 = vld [vmem:[%s2282_s30 + $0x40] sm:$0xff] (%p2253_p5)  ;;  %v319_v5 = vld [vmem:[%s2282_s30 + $0x50] sm:$0xff] (%p2253_p5)  ;;  %316 = vst [vmem:[%s2287_s6 + $0x18] sm:$0xff] (%p2253_p5), %v315_v3 }
  0x1e   : > { %318 = vst [vmem:[%s2287_s6 + $0x20] sm:$0xff] (%p2253_p5), %v317_v4  ;;  %320 = vst [vmem:[%s2287_s6 + $0x28] sm:$0xff] (%p2253_p5), %v319_v5  ;;  %v321_v6 = vld [vmem:[%s2282_s30 + $0x60] sm:$0xff] (%p2253_p5)  ;;  %v323_v7 = vld [vmem:[%s2282_s30 + $0x70] sm:$0xff] (%p2253_p5) }
  0x1f   : > { %v325_v8 = vld [vmem:[%s2282_s30 + $0x80] sm:$0xff]  ;;  %322 = vst [vmem:[%s2287_s6 + $0x30] sm:$0xff] %v321_v6  ;;  %324 = vst [vmem:[%s2287_s6 + $0x38] sm:$0xff] %v323_v7  ;;  %v327_v9 = vld [vmem:[%s2282_s30 + $0x90] sm:$0xff] }
  0x20   : > { %326 = vst [vmem:[%s2287_s6 + $0x40] sm:$0xff] %v325_v8  ;;  %v329_v10 = vld [vmem:[%s2282_s30 + $0xa0] sm:$0xff]  ;;  %v331_v11 = vld [vmem:[%s2282_s30 + $0xb0] sm:$0xff]  ;;  %328 = vst [vmem:[%s2287_s6 + $0x48] sm:$0xff] %v327_v9 }
  0x21   : > { %330 = vst [vmem:[%s2287_s6 + $0x50] sm:$0xff] %v329_v10  ;;  %332 = vst [vmem:[%s2287_s6 + $0x58] sm:$0xff] %v331_v11  ;;  %v333_v12 = vld [vmem:[%s2282_s30 + $0xc0] sm:$0xff]  ;;  %v335_v13 = vld [vmem:[%s2282_s30 + $0xd0] sm:$0xff] }
  0x22   : > { %v337_v14 = vld [vmem:[%s2282_s30 + $0xe0] sm:$0xff]  ;;  %334 = vst [vmem:[%s2287_s6 + $0x60] sm:$0xff] %v333_v12  ;;  %336 = vst [vmem:[%s2287_s6 + $0x68] sm:$0xff] %v335_v13  ;;  %v339_v15 = vld [vmem:[%s2282_s30 + $0xf0] sm:$0xff] }
  0x23   : > { %338 = vst [vmem:[%s2287_s6 + $0x70] sm:$0xff] %v337_v14  ;;  %v341_v16 = vld [vmem:[%s2282_s30 + $0x100] sm:$0xff]  ;;  %v343_v17 = vld [vmem:[%s2282_s30 + $0x110] sm:$0xff]  ;;  %340 = vst [vmem:[%s2287_s6 + $0x78] sm:$0xff] %v339_v15 }
  0x24   : > { %342 = vst [vmem:[%s2287_s6 + $0x80] sm:$0xff] %v341_v16  ;;  %344 = vst [vmem:[%s2287_s6 + $0x88] sm:$0xff] %v343_v17  ;;  %v345_v18 = vld [vmem:[%s2282_s30 + $0x120] sm:$0xff]  ;;  %v347_v19 = vld [vmem:[%s2282_s30 + $0x130] sm:$0xff] }
  0x25   : > { %v349_v20 = vld [vmem:[%s2282_s30 + $0x140] sm:$0xff]  ;;  %346 = vst [vmem:[%s2287_s6 + $0x90] sm:$0xff] %v345_v18  ;;  %348 = vst [vmem:[%s2287_s6 + $0x98] sm:$0xff] %v347_v19  ;;  %v351_v21 = vld [vmem:[%s2282_s30 + $0x150] sm:$0xff] }
  0x26   : > { %350 = vst [vmem:[%s2287_s6 + $0xa0] sm:$0xff] %v349_v20  ;;  %v353_v22 = vld [vmem:[%s2282_s30 + $0x160] sm:$0xff]  ;;  %v355_v23 = vld [vmem:[%s2282_s30 + $0x170] sm:$0xff]  ;;  %352 = vst [vmem:[%s2287_s6 + $0xa8] sm:$0xff] %v351_v21 }
  0x27   : > { %354 = vst [vmem:[%s2287_s6 + $0xb0] sm:$0xff] %v353_v22  ;;  %356 = vst [vmem:[%s2287_s6 + $0xb8] sm:$0xff] %v355_v23  ;;  %v357_v24 = vld [vmem:[%s2282_s30 + $0x180] sm:$0xff]  ;;  %v359_v25 = vld [vmem:[%s2282_s30 + $0x190] sm:$0xff] }
  0x28   : > { %v361_v26 = vld [vmem:[%s2282_s30 + $0x1a0] sm:$0xff]  ;;  %358 = vst [vmem:[%s2287_s6 + $0xc0] sm:$0xff] %v357_v24  ;;  %360 = vst [vmem:[%s2287_s6 + $0xc8] sm:$0xff] %v359_v25  ;;  %v363_v27 = vld [vmem:[%s2282_s30 + $0x1b0] sm:$0xff] }
  0x29   : > { %362 = vst [vmem:[%s2287_s6 + $0xd0] sm:$0xff] %v361_v26  ;;  %v365_v28 = vld [vmem:[%s2282_s30 + $0x1c0] sm:$0xff]  ;;  %v367_v29 = vld [vmem:[%s2282_s30 + $0x1d0] sm:$0xff]  ;;  %364 = vst [vmem:[%s2287_s6 + $0xd8] sm:$0xff] %v363_v27 }
  0x2a   : > { %366 = vst [vmem:[%s2287_s6 + $0xe0] sm:$0xff] %v365_v28  ;;  %368 = vst [vmem:[%s2287_s6 + $0xe8] sm:$0xff] %v367_v29  ;;  %v369_v30 = vld [vmem:[%s2282_s30 + $0x1e0] sm:$0xff]  ;;  %v371_v31 = vld [vmem:[%s2282_s30 + $0x1f0] sm:$0xff] }
  0x2b   : > { %370 = vst [vmem:[%s2287_s6 + $0xf0] sm:$0xff] %v369_v30  ;;  %372 = vst [vmem:[%s2287_s6 + $0xf8] sm:$0xff] %v371_v31 }
  0x2c PF: > { %388 = sbr.rel (!%p2253_p5) target bundleno = 64 (0x40), region = 66  ;;  %s390_s8 = sand.u32 (%p2253_p5), 1, %s2144_s21  }
  0x2d   : > { %s1810_s10 = sshll.u32 (%p2253_p5), %s2156_s24, 3  ;;  %s1700_s11 = sshll.u32 (%p2253_p5), %s390_s8, 8 }
  0x2e   : > { %s2357_s16 = scalar_lea.vmem (%p2253_p5), %s2671_s3, %s1810_s10  ;;  %s2362_s7 = scalar_lea.vmem (%p2253_p5), [#allocation3], %s1700_s11 }
  0x2f   : > { %v485_v32 = vld [vmem:[%s2357_s16] sm:$0xff] (%p2253_p5)  ;;  %v487_v33 = vld [vmem:[%s2357_s16 + $0x10] sm:$0xff] (%p2253_p5) }
  0x30   : > { %v489_v34 = vld [vmem:[%s2357_s16 + $0x20] sm:$0xff] (%p2253_p5)  ;;  %486 = vst [vmem:[%s2362_s7] sm:$0xff] (%p2253_p5), %v485_v32  ;;  %488 = vst [vmem:[%s2362_s7 + $0x8] sm:$0xff] (%p2253_p5), %v487_v33  ;;  %v491_v35 = vld [vmem:[%s2357_s16 + $0x30] sm:$0xff] (%p2253_p5) }
  0x31   : > { %490 = vst [vmem:[%s2362_s7 + $0x10] sm:$0xff] (%p2253_p5), %v489_v34  ;;  %v493_v36 = vld [vmem:[%s2357_s16 + $0x40] sm:$0xff] (%p2253_p5)  ;;  %v495_v37 = vld [vmem:[%s2357_s16 + $0x50] sm:$0xff] (%p2253_p5)  ;;  %492 = vst [vmem:[%s2362_s7 + $0x18] sm:$0xff] (%p2253_p5), %v491_v35 }
  0x32   : > { %494 = vst [vmem:[%s2362_s7 + $0x20] sm:$0xff] (%p2253_p5), %v493_v36  ;;  %496 = vst [vmem:[%s2362_s7 + $0x28] sm:$0xff] (%p2253_p5), %v495_v37  ;;  %v497_v38 = vld [vmem:[%s2357_s16 + $0x60] sm:$0xff] (%p2253_p5)  ;;  %v499_v39 = vld [vmem:[%s2357_s16 + $0x70] sm:$0xff] (%p2253_p5) }
  0x33   : > { %v501_v40 = vld [vmem:[%s2357_s16 + $0x80] sm:$0xff]  ;;  %498 = vst [vmem:[%s2362_s7 + $0x30] sm:$0xff] %v497_v38  ;;  %500 = vst [vmem:[%s2362_s7 + $0x38] sm:$0xff] %v499_v39  ;;  %v503_v41 = vld [vmem:[%s2357_s16 + $0x90] sm:$0xff] }
  0x34   : > { %502 = vst [vmem:[%s2362_s7 + $0x40] sm:$0xff] %v501_v40  ;;  %v505_v42 = vld [vmem:[%s2357_s16 + $0xa0] sm:$0xff]  ;;  %v507_v43 = vld [vmem:[%s2357_s16 + $0xb0] sm:$0xff]  ;;  %504 = vst [vmem:[%s2362_s7 + $0x48] sm:$0xff] %v503_v41 }
  0x35   : > { %506 = vst [vmem:[%s2362_s7 + $0x50] sm:$0xff] %v505_v42  ;;  %508 = vst [vmem:[%s2362_s7 + $0x58] sm:$0xff] %v507_v43  ;;  %v509_v44 = vld [vmem:[%s2357_s16 + $0xc0] sm:$0xff]  ;;  %v511_v45 = vld [vmem:[%s2357_s16 + $0xd0] sm:$0xff] }
  0x36   : > { %v513_v46 = vld [vmem:[%s2357_s16 + $0xe0] sm:$0xff]  ;;  %510 = vst [vmem:[%s2362_s7 + $0x60] sm:$0xff] %v509_v44  ;;  %512 = vst [vmem:[%s2362_s7 + $0x68] sm:$0xff] %v511_v45  ;;  %v515_v47 = vld [vmem:[%s2357_s16 + $0xf0] sm:$0xff] }
  0x37   : > { %514 = vst [vmem:[%s2362_s7 + $0x70] sm:$0xff] %v513_v46  ;;  %v517_v48 = vld [vmem:[%s2357_s16 + $0x100] sm:$0xff]  ;;  %v519_v49 = vld [vmem:[%s2357_s16 + $0x110] sm:$0xff]  ;;  %516 = vst [vmem:[%s2362_s7 + $0x78] sm:$0xff] %v515_v47 }
  0x38   : > { %518 = vst [vmem:[%s2362_s7 + $0x80] sm:$0xff] %v517_v48  ;;  %520 = vst [vmem:[%s2362_s7 + $0x88] sm:$0xff] %v519_v49  ;;  %v521_v50 = vld [vmem:[%s2357_s16 + $0x120] sm:$0xff]  ;;  %v523_v51 = vld [vmem:[%s2357_s16 + $0x130] sm:$0xff] }
  0x39   : > { %v525_v52 = vld [vmem:[%s2357_s16 + $0x140] sm:$0xff]  ;;  %522 = vst [vmem:[%s2362_s7 + $0x90] sm:$0xff] %v521_v50  ;;  %524 = vst [vmem:[%s2362_s7 + $0x98] sm:$0xff] %v523_v51  ;;  %v527_v53 = vld [vmem:[%s2357_s16 + $0x150] sm:$0xff] }
  0x3a   : > { %526 = vst [vmem:[%s2362_s7 + $0xa0] sm:$0xff] %v525_v52  ;;  %v529_v54 = vld [vmem:[%s2357_s16 + $0x160] sm:$0xff]  ;;  %v531_v55 = vld [vmem:[%s2357_s16 + $0x170] sm:$0xff]  ;;  %528 = vst [vmem:[%s2362_s7 + $0xa8] sm:$0xff] %v527_v53 }
  0x3b   : > { %530 = vst [vmem:[%s2362_s7 + $0xb0] sm:$0xff] %v529_v54  ;;  %532 = vst [vmem:[%s2362_s7 + $0xb8] sm:$0xff] %v531_v55  ;;  %v533_v56 = vld [vmem:[%s2357_s16 + $0x180] sm:$0xff]  ;;  %v535_v57 = vld [vmem:[%s2357_s16 + $0x190] sm:$0xff] }
  0x3c   : > { %v537_v58 = vld [vmem:[%s2357_s16 + $0x1a0] sm:$0xff]  ;;  %534 = vst [vmem:[%s2362_s7 + $0xc0] sm:$0xff] %v533_v56  ;;  %536 = vst [vmem:[%s2362_s7 + $0xc8] sm:$0xff] %v535_v57  ;;  %v539_v59 = vld [vmem:[%s2357_s16 + $0x1b0] sm:$0xff] }
  0x3d   : > { %538 = vst [vmem:[%s2362_s7 + $0xd0] sm:$0xff] %v537_v58  ;;  %v541_v60 = vld [vmem:[%s2357_s16 + $0x1c0] sm:$0xff]  ;;  %v543_v61 = vld [vmem:[%s2357_s16 + $0x1d0] sm:$0xff]  ;;  %540 = vst [vmem:[%s2362_s7 + $0xd8] sm:$0xff] %v539_v59 }
  0x3e   : > { %542 = vst [vmem:[%s2362_s7 + $0xe0] sm:$0xff] %v541_v60  ;;  %544 = vst [vmem:[%s2362_s7 + $0xe8] sm:$0xff] %v543_v61  ;;  %v545_v62 = vld [vmem:[%s2357_s16 + $0x1e0] sm:$0xff]  ;;  %v547_v63 = vld [vmem:[%s2357_s16 + $0x1f0] sm:$0xff] }
  0x3f   : > { %546 = vst [vmem:[%s2362_s7 + $0xf0] sm:$0xff] %v545_v62  ;;  %548 = vst [vmem:[%s2362_s7 + $0xf8] sm:$0xff] %v547_v63 }
  0x40 PF: > { %p1703_p11 = scmp.ge.s32.totalorder %s2164_s26, 1  ;;  %p561_p12 = scmp.lt.s32.totalorder %s2164_s26, 5 }
  0x42   : > { %p562_p13 = pnand %p1703_p11, %p561_p12 }
  0x43   : > { %s568_s17 = sand.u32 (!%p562_p13), 1, %s2140_s20   ;;  %s1707_s20 = sshll.u32 (!%p562_p13), %s2152_s23, 3 }
  0x44   : > { %565 = sbr.rel (%p562_p13) target bundleno = 432 (0x1b0), region = 108  ;;  %s1704_s27 = sshll.u32 (!%p562_p13), %s568_s17, 8 }
  0x45   : > { %s2428_s30 = scalar_lea.vmem (!%p562_p13), [#allocation3], %s1704_s27  ;;  %s2431_s6 = scalar_lea.vmem (!%p562_p13), [#allocation2], %s1704_s27 }
  0x46   : > { %v1910_v0 = vld [vmem:[%s2428_s30 + $0x4] ss:$8 sps:$4 sm:$0xff] (!%p562_p13)   ;;  %v1914_v2 = vld [vmem:[%s2428_s30] ss:$8 sps:$4 sm:$0xff] (!%p562_p13)   ;;  %v1916_v4 = vld [vmem:[%s2428_s30 + $0x14] ss:$8 sps:$4 sm:$0xff] (!%p562_p13)  }
  0x47   : > { %v1912_v1 = vld [vmem:[%s2431_s6 + $0x4] ss:$8 sps:$4 sm:$0xff] (!%p562_p13)   ;;  %924 = vmatprep.subr.bf16.mxu1 (!%p562_p13), %v1910_v0  ;;  %v1915_v3 = vld [vmem:[%s2431_s6] ss:$8 sps:$4 sm:$0xff] (!%p562_p13)   ;;  %v1918_v5 = vld [vmem:[%s2431_s6 + $0x14] ss:$8 sps:$4 sm:$0xff] (!%p562_p13)  }
  0x48   : > { %1197 = vmatprep.subr.bf16.mxu0 (!%p562_p13), %v1912_v1  ;;  %925 = vmatpush1.bf16.msra.mxu1 (!%p562_p13), %v1914_v2  ;;  %v1920_v6 = vld [vmem:[%s2428_s30 + $0x10] ss:$8 sps:$4 sm:$0xff] (!%p562_p13)   ;;  %v1922_v8 = vld [vmem:[%s2428_s30 + $0x24] ss:$8 sps:$4 sm:$0xff] (!%p562_p13)   ;;  %v1926_v10 = vld [vmem:[%s2428_s30 + $0x20] ss:$8 sps:$4 sm:$0xff] (!%p562_p13)  }
  0x49   : > { %1198 = vmatpush1.bf16.msra.mxu0 (!%p562_p13), %v1915_v3  ;;  %926 = vmatprep.subr.bf16.mxu1 (!%p562_p13), %v1916_v4  ;;  %v1921_v7 = vld [vmem:[%s2431_s6 + $0x10] ss:$8 sps:$4 sm:$0xff] (!%p562_p13)   ;;  %v1924_v9 = vld [vmem:[%s2431_s6 + $0x24] ss:$8 sps:$4 sm:$0xff] (!%p562_p13)   ;;  %v1927_v11 = vld [vmem:[%s2431_s6 + $0x20] ss:$8 sps:$4 sm:$0xff] (!%p562_p13)  }
  0x4a   : > { %1199 = vmatprep.subr.bf16.mxu0 (!%p562_p13), %v1918_v5  ;;  %v1928_v12 = vld [vmem:[%s2428_s30 + $0x34] ss:$8 sps:$4 sm:$0xff] (!%p562_p13)   ;;  %v1932_v14 = vld [vmem:[%s2428_s30 + $0x30] ss:$8 sps:$4 sm:$0xff] (!%p562_p13)   ;;  %v1934_v16 = vld [vmem:[%s2428_s30 + $0x44] ss:$8 sps:$4 sm:$0xff] (!%p562_p13)  }
  0x4b   : > { %v1930_v13 = vld [vmem:[%s2431_s6 + $0x34] ss:$8 sps:$4 sm:$0xff]   ;;  %v1933_v15 = vld [vmem:[%s2431_s6 + $0x30] ss:$8 sps:$4 sm:$0xff]   ;;  %v1936_v17 = vld [vmem:[%s2431_s6 + $0x44] ss:$8 sps:$4 sm:$0xff]  }
  0x4c   : > { %927 = vmatpush1.bf16.msra.mxu1 %v1920_v6  ;;  %v1938_v18 = vld [vmem:[%s2428_s30 + $0x40] ss:$8 sps:$4 sm:$0xff]   ;;  %v1940_v20 = vld [vmem:[%s2428_s30 + $0x54] ss:$8 sps:$4 sm:$0xff]   ;;  %v1944_v22 = vld [vmem:[%s2428_s30 + $0x50] ss:$8 sps:$4 sm:$0xff]  }
  0x4d   : > { %1200 = vmatpush1.bf16.msra.mxu0 %v1921_v7  ;;  %928 = vmatprep.subr.bf16.mxu1 %v1922_v8  ;;  %v1939_v19 = vld [vmem:[%s2431_s6 + $0x40] ss:$8 sps:$4 sm:$0xff]   ;;  %v1942_v21 = vld [vmem:[%s2431_s6 + $0x54] ss:$8 sps:$4 sm:$0xff]   ;;  %v1945_v23 = vld [vmem:[%s2431_s6 + $0x50] ss:$8 sps:$4 sm:$0xff]  }
  0x4e   : > { %1201 = vmatprep.subr.bf16.mxu0 %v1924_v9  ;;  %v1946_v24 = vld [vmem:[%s2428_s30 + $0x64] ss:$8 sps:$4 sm:$0xff]   ;;  %v1950_v26 = vld [vmem:[%s2428_s30 + $0x60] ss:$8 sps:$4 sm:$0xff]   ;;  %v1952_v28 = vld [vmem:[%s2428_s30 + $0x74] ss:$8 sps:$4 sm:$0xff]  }
  0x4f   : > { %v1948_v25 = vld [vmem:[%s2431_s6 + $0x64] ss:$8 sps:$4 sm:$0xff]   ;;  %v1951_v27 = vld [vmem:[%s2431_s6 + $0x60] ss:$8 sps:$4 sm:$0xff]   ;;  %v1954_v29 = vld [vmem:[%s2431_s6 + $0x74] ss:$8 sps:$4 sm:$0xff]  }
  0x50   : > { %929 = vmatpush1.bf16.msra.mxu1 %v1926_v10  ;;  %v1956_v30 = vld [vmem:[%s2428_s30 + $0x70] ss:$8 sps:$4 sm:$0xff]   ;;  %v1958_v32 = vld [vmem:[%s2428_s30 + $0x84] ss:$8 sps:$4 sm:$0xff]   ;;  %p622_p0 = scmp.lt.s32.totalorder %s1707_s20, 15  ;;  %s2524_s17 = sshll.u32 %s2148_s22, 1 }
  0x51   : > { %1202 = vmatpush1.bf16.msra.mxu0 %v1927_v11  ;;  %930 = vmatprep.subr.bf16.mxu1 %v1928_v12  ;;  %v1957_v31 = vld [vmem:[%s2431_s6 + $0x70] ss:$8 sps:$4 sm:$0xff]   ;;  %v1960_v33 = vld [vmem:[%s2431_s6 + $0x84] ss:$8 sps:$4 sm:$0xff]   ;;  %v1962_v34 = vld [vmem:[%s2428_s30 + $0x80] ss:$8 sps:$4 sm:$0xff]  }
  0x52   : > { %1203 = vmatprep.subr.bf16.mxu0 %v1930_v13  ;;  %v1963_v35 = vld [vmem:[%s2431_s6 + $0x80] ss:$8 sps:$4 sm:$0xff]   ;;  %v1964_v36 = vld [vmem:[%s2428_s30 + $0x94] ss:$8 sps:$4 sm:$0xff]   ;;  %s2691_s20 = smov (!%p622_p0, %s1707_s20), 15  ;;  %p638_p1 = scmp.lt.s32.totalorder %s2524_s17, 3 }
  0x53   : > { %v1966_v37 = vld [vmem:[%s2431_s6 + $0x94] ss:$8 sps:$4 sm:$0xff]   ;;  %v1968_v38 = vld [vmem:[%s2428_s30 + $0x90] ss:$8 sps:$4 sm:$0xff]   ;;  %v1970_v40 = vld [vmem:[%s2428_s30 + $0xa4] ss:$8 sps:$4 sm:$0xff]  }
  0x54   : > { %931 = vmatpush1.bf16.msra.mxu1 %v1932_v14  ;;  %v1969_v39 = vld [vmem:[%s2431_s6 + $0x90] ss:$8 sps:$4 sm:$0xff]   ;;  %v1972_v41 = vld [vmem:[%s2431_s6 + $0xa4] ss:$8 sps:$4 sm:$0xff]   ;;  %s1811_s8 = sshll.u32 %s2691_s20, 3  ;;  %s618_s22 = sand.u32 1, %s2132_s18  }
  0x55   : > { %1204 = vmatpush1.bf16.msra.mxu0 %v1933_v15  ;;  %932 = vmatprep.subr.bf16.mxu1 %v1934_v16  ;;  %v1974_v42 = vld [vmem:[%s2428_s30 + $0xa0] ss:$8 sps:$4 sm:$0xff]   ;;  %v1976_v44 = vld [vmem:[%s2428_s30 + $0xb4] ss:$8 sps:$4 sm:$0xff]   ;;  %s2481_s14 = scalar_lea.vmem %s2670_s2, %s1811_s8  ;;  %v1980_v46 = vld [vmem:[%s2428_s30 + $0xb0] ss:$8 sps:$4 sm:$0xff]   ;;  %s2489_s7 = scalar_lea.vmem %s2668_s0, %s1811_s8  ;;  %v1272_v16 = vlaneseq }
  0x56   : > { %1205 = vmatprep.subr.bf16.mxu0 %v1936_v17  ;;  %v1975_v43 = vld [vmem:[%s2431_s6 + $0xa0] ss:$8 sps:$4 sm:$0xff]   ;;  %v1978_v45 = vld [vmem:[%s2431_s6 + $0xb4] ss:$8 sps:$4 sm:$0xff]   ;;  %v1981_v47 = vld [vmem:[%s2431_s6 + $0xb0] ss:$8 sps:$4 sm:$0xff]  }
  0x57   : > { %v1982_v48 = vld [vmem:[%s2428_s30 + $0xc4] ss:$8 sps:$4 sm:$0xff]   ;;  %v1986_v52 = vld [vmem:[%s2428_s30 + $0xc0] ss:$8 sps:$4 sm:$0xff]   ;;  %v1988_v54 = vld [vmem:[%s2428_s30 + $0xd4] ss:$8 sps:$4 sm:$0xff]  }
  0x58   : > { %933 = vmatpush1.bf16.msra.mxu1 %v1938_v18  ;;  %v2008_v49 = vld [vmem:[%s2481_s14 + $0x4] ss:$8 sps:$4 sm:$0xff]   ;;  %v1987_v53 = vld [vmem:[%s2431_s6 + $0xc0] ss:$8 sps:$4 sm:$0xff]   ;;  %v1990_v55 = vld [vmem:[%s2431_s6 + $0xd4] ss:$8 sps:$4 sm:$0xff]  }
  0x59   : > { %1206 = vmatpush1.bf16.msra.mxu0 %v1939_v19  ;;  %934 = vmatprep.subr.bf16.mxu1 %v1940_v20  ;;  %v1984_v50 = vld [vmem:[%s2431_s6 + $0xc4] ss:$8 sps:$4 sm:$0xff]   ;;  %v1992_v56 = vld [vmem:[%s2428_s30 + $0xd0] ss:$8 sps:$4 sm:$0xff]   ;;  %v1998_v60 = vld [vmem:[%s2428_s30 + $0xe0] ss:$8 sps:$4 sm:$0xff]  }
  0x5a   : > { %1207 = vmatprep.subr.bf16.mxu0 %v1942_v21  ;;  %v2011_v51 = vld [vmem:[%s2489_s7 + $0x4] ss:$8 sps:$4 sm:$0xff]   ;;  %956 = vmatprep.mubr.bf16.mxu1 %v2008_v49  ;;  %v1993_v57 = vld [vmem:[%s2431_s6 + $0xd0] ss:$8 sps:$4 sm:$0xff]   ;;  %v1999_v61 = vld [vmem:[%s2431_s6 + $0xe0] ss:$8 sps:$4 sm:$0xff]  }
  0x5b   : > { %1229 = vmatprep.mubr.bf16.mxu0 %v2011_v51  ;;  %v1994_v58 = vld [vmem:[%s2428_s30 + $0xe4] ss:$8 sps:$4 sm:$0xff]   ;;  %v2000_v62 = vld [vmem:[%s2428_s30 + $0xf4] ss:$8 sps:$4 sm:$0xff]   ;;  %v2004_v0 = vld [vmem:[%s2428_s30 + $0xf0] ss:$8 sps:$4 sm:$0xff]  }
  0x5c   : > { %935 = vmatpush1.bf16.msra.mxu1 %v1944_v22  ;;  %v1996_v59 = vld [vmem:[%s2431_s6 + $0xe4] ss:$8 sps:$4 sm:$0xff]   ;;  %v2002_v63 = vld [vmem:[%s2431_s6 + $0xf4] ss:$8 sps:$4 sm:$0xff]   ;;  %v2005_v1 = vld [vmem:[%s2431_s6 + $0xf0] ss:$8 sps:$4 sm:$0xff]  }
  0x5d   : > { %1208 = vmatpush1.bf16.msra.mxu0 %v1945_v23  ;;  %936 = vmatprep.subr.bf16.mxu1 %v1946_v24  ;;  %v2006_v2 = vld [vmem:[%s2481_s14] ss:$8 sps:$4 sm:$0xff]   ;;  %v2012_v4 = vld [vmem:[%s2481_s14 + $0x14] ss:$8 sps:$4 sm:$0xff]   ;;  %v2016_v6 = vld [vmem:[%s2481_s14 + $0x10] ss:$8 sps:$4 sm:$0xff]  }
  0x5e   : > { %1209 = vmatprep.subr.bf16.mxu0 %v1948_v25  ;;  %v2009_v3 = vld [vmem:[%s2489_s7] ss:$8 sps:$4 sm:$0xff]   ;;  %v2014_v5 = vld [vmem:[%s2489_s7 + $0x14] ss:$8 sps:$4 sm:$0xff]   ;;  %v2017_v7 = vld [vmem:[%s2489_s7 + $0x10] ss:$8 sps:$4 sm:$0xff]  }
  0x5f   : > { %v2018_v8 = vld [vmem:[%s2481_s14 + $0x24] ss:$8 sps:$4 sm:$0xff]   ;;  %v2022_v10 = vld [vmem:[%s2481_s14 + $0x20] ss:$8 sps:$4 sm:$0xff]   ;;  %v2024_v12 = vld [vmem:[%s2481_s14 + $0x34] ss:$8 sps:$4 sm:$0xff]  }
  0x60   : > { %937 = vmatpush1.bf16.msra.mxu1 %v1950_v26  ;;  %v2020_v9 = vld [vmem:[%s2489_s7 + $0x24] ss:$8 sps:$4 sm:$0xff]   ;;  %v2023_v11 = vld [vmem:[%s2489_s7 + $0x20] ss:$8 sps:$4 sm:$0xff]   ;;  %v2026_v13 = vld [vmem:[%s2489_s7 + $0x34] ss:$8 sps:$4 sm:$0xff]  }
  0x61   : > { %1210 = vmatpush1.bf16.msra.mxu0 %v1951_v27  ;;  %938 = vmatprep.subr.bf16.mxu1 %v1952_v28  ;;  %v2028_v14 = vld [vmem:[%s2481_s14 + $0x30] ss:$8 sps:$4 sm:$0xff]   ;;  %s639_s27 = scalar_select %p638_p1, %s2524_s17, 3  ;;  %v1273_v17 = vshrl.u32 %v1272_v16, 7 }
  0x62   : > { %1211 = vmatprep.subr.bf16.mxu0 %v1954_v29  ;;  %v2029_v15 = vld [vmem:[%s2489_s7 + $0x30] ss:$8 sps:$4 sm:$0xff]   ;;  %s1706_s8 = sshll.u32 %s618_s22, 6  ;;  %s1821_s10 = sshll.u32 (%p2267_p9), %s2152_s23, 5 }
  0x63   : > { %s640_s20 = scalar_lea.vmem %s2672_s4, %s639_s27  ;;  %v1274_v18 = vsub.s32 0, %v1273_v17  ;;  %v1278_v20 = vsub.s32 1, %v1273_v17  ;;  %s2604_s18 = scalar_lea.vmem [#allocation4], %s1706_s8 }
  0x64   : > { %939 = vmatpush1.bf16.msra.mxu1 %v1956_v30  ;;  %v1270_v19 = vld [vmem:[%s640_s20] sm:$0x3]  ;;  %s1508_s11 = sadd.s32 (%p2267_p9), %s1821_s10, %s2524_s17 }
  0x65   : > { %1212 = vmatpush1.bf16.msra.mxu0 %v1957_v31  ;;  %940 = vmatprep.subr.bf16.mxu1 %v1958_v32  ;;  %v2531_v21 = vrot.slane %v1270_v19, %v1274_v18  ;;  %v2533_v24 = vrot.slane %v1270_v19, %v1278_v20  ;;  %s1806_s12 = sshll.u32 (%p2267_p9), %s1508_s11, 2 }
  0x66   : > { %1213 = vmatprep.subr.bf16.mxu0 %v1960_v33  ;;  %s1510_s16 = scalar_lea.vmem (%p2267_p9), %s2673_s5, %s1806_s12 }
  0x68   : > { %941 = vmatpush1.bf16.msra.mxu1 %v1962_v34 }
  0x69   : > { %1214 = vmatpush1.bf16.msra.mxu0 %v1963_v35  ;;  %942 = vmatprep.subr.bf16.mxu1 %v1964_v36 }
  0x6a   : > { %1215 = vmatprep.subr.bf16.mxu0 %v1966_v37 }
  0x6c   : > { %943 = vmatpush1.bf16.msra.mxu1 %v1968_v38 }
  0x6d   : > { %1216 = vmatpush1.bf16.msra.mxu0 %v1969_v39  ;;  %944 = vmatprep.subr.bf16.mxu1 %v1970_v40 }
  0x6e   : > { %1217 = vmatprep.subr.bf16.mxu0 %v1972_v41 }
  0x70   : > { %945 = vmatpush1.bf16.msra.mxu1 %v1974_v42 }
  0x71   : > { %1218 = vmatpush1.bf16.msra.mxu0 %v1975_v43  ;;  %946 = vmatprep.subr.bf16.mxu1 %v1976_v44 }
  0x72   : > { %1219 = vmatprep.subr.bf16.mxu0 %v1978_v45 }
  0x74   : > { %947 = vmatpush1.bf16.msra.mxu1 %v1980_v46 }
  0x75   : > { %1220 = vmatpush1.bf16.msra.mxu0 %v1981_v47  ;;  %948 = vmatprep.subr.bf16.mxu1 %v1982_v48 }
  0x76   : > { %1221 = vmatprep.subr.bf16.mxu0 %v1984_v50 }
  0x78   : > { %949 = vmatpush1.bf16.msra.mxu1 %v1986_v52 }
  0x79   : > { %1222 = vmatpush1.bf16.msra.mxu0 %v1987_v53  ;;  %950 = vmatprep.subr.bf16.mxu1 %v1988_v54 }
  0x7a   : > { %1223 = vmatprep.subr.bf16.mxu0 %v1990_v55 }
  0x7c   : > { %951 = vmatpush1.bf16.msra.mxu1 %v1992_v56 }
  0x7d   : > { %1224 = vmatpush1.bf16.msra.mxu0 %v1993_v57  ;;  %952 = vmatprep.subr.bf16.mxu1 %v1994_v58 }
  0x7e   : > { %1225 = vmatprep.subr.bf16.mxu0 %v1996_v59 }
  0x80   : > { %953 = vmatpush1.bf16.msra.mxu1 %v1998_v60 }
  0x81   : > { %1226 = vmatpush1.bf16.msra.mxu0 %v1999_v61  ;;  %954 = vmatprep.subr.bf16.mxu1 %v2000_v62 }
  0x82   : > { %1227 = vmatprep.subr.bf16.mxu0 %v2002_v63 }
  0x84   : > { %955 = vmatpush1.bf16.msra.mxu1 %v2004_v0 }
  0x85   : > { %1228 = vmatpush1.bf16.msra.mxu0 %v2005_v1 }
  0x87   : > { %957 = vmatmul.mubr.bf16.vlgmr.msra.gmra.mrb[0].mxu1 %v2006_v2 }
  0x88   : > { %1230 = vmatmul.mubr.bf16.vlgmr.msra.gmra.mrb[0].mxu0 %v2009_v3  ;;  %966 = vmatprep.mubr.bf16.mxu1 %v2012_v4 }
  0x89   : > { %1239 = vmatprep.mubr.bf16.mxu0 %v2014_v5 }
  0x8f   : > { %967 = vmatmul.mubr.bf16.gmra.mrb[4].mxu1 %v2016_v6 }
  0x90   : > { %1240 = vmatmul.mubr.bf16.gmra.mrb[4].mxu0 %v2017_v7  ;;  %976 = vmatprep.mubr.bf16.mxu1 %v2018_v8 }
  0x91   : > { %1249 = vmatprep.mubr.bf16.mxu0 %v2020_v9 }
  0x97   : > { %977 = vmatmul.mubr.bf16.gmra.mrb[8].mxu1 %v2022_v10 }
  0x98   : > { %1250 = vmatmul.mubr.bf16.gmra.mrb[8].mxu0 %v2023_v11  ;;  %986 = vmatprep.mubr.bf16.mxu1 %v2024_v12 }
  0x99   : > { %1259 = vmatprep.mubr.bf16.mxu0 %v2026_v13 }
  0x9f   : > { %987 = vmatmul.mubr.bf16.gmra.mrb[12].mxu1 %v2028_v14 }
  0xa0   : > { %1260 = vmatmul.mubr.bf16.gmra.mrb[12].mxu0 %v2029_v15 }
 0x15a   : > { %v958_v22 = vpop.f32.mrb[0].mxu1 }
 0x15b   : > { %v1231_v23 = vpop.f32.mrb[0].mxu0  ;;  %v960_v26 = vpop.f32.mrb[1].mxu1 }
 0x15c   : > { %v1232_v25 = vadd.f32 %v1231_v23, %v958_v22  ;;  %v1233_v27 = vpop.f32.mrb[1].mxu0  ;;  %v962_v29 = vpop.f32.mrb[2].mxu1 }
 0x15d   : > { %v1234_v28 = vadd.f32 %v1233_v27, %v960_v26  ;;  %v1235_v30 = vpop.f32.mrb[2].mxu0  ;;  %v964_v33 = vpop.f32.mrb[3].mxu1 }
 0x15e   : > { %v2536_v31 = vadd.f32 %v2531_v21, %v1232_v25  ;;  %v1236_v32 = vadd.f32 %v1235_v30, %v962_v29  ;;  %v1237_v34 = vpop.f32.mrb[3].mxu0 }
 0x15f   : > { %v2539_v35 = vadd.f32 %v2533_v24, %v1234_v28  ;;  %v1238_v36 = vadd.f32 %v1237_v34, %v964_v33 }
 0x160   : > { %v1298_v37 = vmin.f32 %v2536_v31, 20.0  ;;  %v2543_v38 = vadd.f32 %v2531_v21, %v1236_v32 }
 0x161   : > { %v1299_v39 = vmin.f32 %v2539_v35, 20.0  ;;  %v2547_v40 = vadd.f32 %v2533_v24, %v1238_v36 }
 0x162   : > { %v1314_v41 = vmul.f32 1.442695, %v1298_v37  ;;  %v1300_v42 = vmin.f32 %v2543_v38, 20.0  ;;  %v968_v45 = vpop.f32.mrb[4].mxu1 }
 0x163   : > { %v1316_v43 = vmul.f32 1.442695, %v1299_v39  ;;  %v1301_v44 = vmin.f32 %v2547_v40, 20.0  ;;  %v1241_v46 = vpop.f32.mrb[4].mxu0  ;;  %v970_v49 = vpop.f32.mrb[5].mxu1 }
 0x164   : > { %2030 = vpow2.f32 %v1314_v41  ;;  %v1318_v47 = vmul.f32 1.442695, %v1300_v42  ;;  %v1242_v48 = vadd.f32 %v1241_v46, %v968_v45  ;;  %v1243_v50 = vpop.f32.mrb[5].mxu0  ;;  %v972_v53 = vpop.f32.mrb[6].mxu1 }
 0x165   : > { %2032 = vpow2.f32 %v1316_v43  ;;  %v1320_v51 = vmul.f32 1.442695, %v1301_v44  ;;  %v1244_v52 = vadd.f32 %v1243_v50, %v970_v49  ;;  %v1245_v54 = vpop.f32.mrb[6].mxu0  ;;  %v974_v57 = vpop.f32.mrb[7].mxu1 }
 0x166   : > { %2034 = vpow2.f32 %v1318_v47  ;;  %v2552_v55 = vadd.f32 %v2531_v21, %v1242_v48  ;;  %v1246_v56 = vadd.f32 %v1245_v54, %v972_v53  ;;  %v1247_v58 = vpop.f32.mrb[7].mxu0 }
 0x167   : > { %2036 = vpow2.f32 %v1320_v51  ;;  %v2555_v59 = vadd.f32 %v2533_v24, %v1244_v52  ;;  %v1248_v60 = vadd.f32 %v1247_v58, %v974_v57 }
 0x168   : > { %v1302_v61 = vmin.f32 %v2552_v55, 20.0  ;;  %v2559_v62 = vadd.f32 %v2531_v21, %v1246_v56 }
 0x169   : > { %v1303_v63 = vmin.f32 %v2555_v59, 20.0  ;;  %v2563_v0 = vadd.f32 %v2533_v24, %v1248_v60 }
 0x16a   : > { %v1322_v1 = vmul.f32 1.442695, %v1302_v61  ;;  %v1304_v2 = vmin.f32 %v2559_v62, 20.0  ;;  %v978_v5 = vpop.f32.mrb[8].mxu1 }
 0x16b   : > { %v1324_v3 = vmul.f32 1.442695, %v1303_v63  ;;  %v1305_v4 = vmin.f32 %v2563_v0, 20.0  ;;  %v1251_v6 = vpop.f32.mrb[8].mxu0  ;;  %v980_v9 = vpop.f32.mrb[9].mxu1 }
 0x16c   : > { %2038 = vpow2.f32 %v1322_v1  ;;  %v1326_v7 = vmul.f32 1.442695, %v1304_v2  ;;  %v1252_v8 = vadd.f32 %v1251_v6, %v978_v5  ;;  %v1253_v10 = vpop.f32.mrb[9].mxu0  ;;  %v982_v13 = vpop.f32.mrb[10].mxu1 }
 0x16d   : > { %2040 = vpow2.f32 %v1324_v3  ;;  %v1328_v11 = vmul.f32 1.442695, %v1305_v4  ;;  %v1254_v12 = vadd.f32 %v1253_v10, %v980_v9  ;;  %v1255_v14 = vpop.f32.mrb[10].mxu0  ;;  %v984_v18 = vpop.f32.mrb[11].mxu1 }
 0x16e   : > { %v2031_v15 = vpop.eup %2030  ;;  %2042 = vpow2.f32 %v1326_v7  ;;  %v2568_v16 = vadd.f32 %v2531_v21, %v1252_v8  ;;  %v1256_v17 = vadd.f32 %v1255_v14, %v982_v13  ;;  %v1257_v19 = vpop.f32.mrb[11].mxu0 }
 0x16f   : > { %v2033_v20 = vpop.eup %2032  ;;  %v1346_v22 = vadd.f32 2.0, %v2031_v15  ;;  %2044 = vpow2.f32 %v1328_v11  ;;  %v2571_v23 = vadd.f32 %v2533_v24, %v1254_v12  ;;  %v1258_v25 = vadd.f32 %v1257_v19, %v984_v18 }
 0x170   : > { %v2035_v26 = vpop.eup %2034  ;;  %v1347_v27 = vadd.f32 2.0, %v2033_v20  ;;  %v1306_v28 = vmin.f32 %v2568_v16, 20.0  ;;  %v2575_v29 = vadd.f32 %v2531_v21, %v1256_v17 }
 0x171   : > { %v2037_v30 = vpop.eup %2036  ;;  %v1362_v32 = vmul.f32 %v2031_v15, %v1346_v22  ;;  %v1348_v33 = vadd.f32 2.0, %v2035_v26  ;;  %v1307_v34 = vmin.f32 %v2571_v23, 20.0  ;;  %v2579_v36 = vadd.f32 %v2533_v24, %v1258_v25 }
 0x172   : > { %v1363_v37 = vmul.f32 %v2033_v20, %v1347_v27  ;;  %v1349_v39 = vadd.f32 2.0, %v2037_v30  ;;  %v1330_v41 = vmul.f32 1.442695, %v1306_v28  ;;  %v1308_v42 = vmin.f32 %v2575_v29, 20.0  ;;  %v988_v45 = vpop.f32.mrb[12].mxu1 }
 0x173   : > { %v1394_v43 = vadd.f32 2.0, %v1362_v32  ;;  %v1364_v44 = vmul.f32 %v2035_v26, %v1348_v33  ;;  %v1261_v46 = vpop.f32.mrb[12].mxu0  ;;  %v990_v49 = vpop.f32.mrb[13].mxu1  ;;  %v1332_v52 = vmul.f32 1.442695, %v1307_v34  ;;  %v1309_v60 = vmin.f32 %v2579_v36, 20.0 }
 0x174   : > { %v1395_v47 = vadd.f32 2.0, %v1363_v37  ;;  %v1365_v48 = vmul.f32 %v2037_v30, %v1349_v39  ;;  %2046 = vpow2.f32 %v1330_v41  ;;  %v1263_v50 = vpop.f32.mrb[13].mxu0  ;;  %v992_v53 = vpop.f32.mrb[14].mxu1  ;;  %v1334_v58 = vmul.f32 1.442695, %v1308_v42 }
 0x175   : > { %2048 = vrcp.f32 %v1394_v43  ;;  %v1396_v51 = vadd.f32 2.0, %v1364_v44  ;;  %v1265_v54 = vpop.f32.mrb[14].mxu0  ;;  %v994_v61 = vpop.f32.mrb[15].mxu1  ;;  %v1262_v3 = vadd.f32 %v1261_v46, %v988_v45  ;;  %v1264_v4 = vadd.f32 %v1263_v50, %v990_v49 }
 0x176   : > { %v2039_v56 = vpop.eup %2038  ;;  %2050 = vrcp.f32 %v1395_v47  ;;  %v1397_v57 = vadd.f32 2.0, %v1365_v48  ;;  %v1267_v63 = vpop.f32.mrb[15].mxu0  ;;  %v1336_v7 = vmul.f32 1.442695, %v1309_v60  ;;  %v1266_v8 = vadd.f32 %v1265_v54, %v992_v53 }
 0x177   : > { %v2041_v1 = vpop.eup %2040  ;;  %2052 = vrcp.f32 %v1396_v51  ;;  %v1350_v2 = vadd.f32 2.0, %v2039_v56  ;;  %v2584_v12 = vadd.f32 %v2531_v21, %v1262_v3  ;;  %v2587_v15 = vadd.f32 %v2533_v24, %v1264_v4 }
 0x178   : > { %v2043_v5 = vpop.eup %2042  ;;  %2054 = vrcp.f32 %v1397_v57  ;;  %v1351_v6 = vadd.f32 2.0, %v2041_v1  ;;  %v1378_v19 = vmul.f32 %v1362_v32, %v2536_v31  ;;  %v1379_v26 = vmul.f32 %v1363_v37, %v2539_v35 }
 0x179   : > { %v2045_v9 = vpop.eup %2044  ;;  %v1366_v10 = vmul.f32 %v2039_v56, %v1350_v2  ;;  %v1352_v11 = vadd.f32 2.0, %v2043_v5  ;;  %2056 = vpow2.f32 %v1332_v52  ;;  %v1310_v25 = vmin.f32 %v2584_v12, 20.0 }
 0x17a   : > { %v1367_v13 = vmul.f32 %v2041_v1, %v1351_v6  ;;  %v1353_v14 = vadd.f32 2.0, %v2045_v9  ;;  %2058 = vpow2.f32 %v1334_v58  ;;  %v1311_v28 = vmin.f32 %v2587_v15, 20.0 }
 0x17b   : > { %v1398_v17 = vadd.f32 2.0, %v1366_v10  ;;  %v1368_v18 = vmul.f32 %v2043_v5, %v1352_v11  ;;  %2060 = vpow2.f32 %v1336_v7  ;;  %v1380_v33 = vmul.f32 %v1364_v44, %v2543_v38 }
 0x17c   : > { %v1399_v20 = vadd.f32 2.0, %v1367_v13  ;;  %v1369_v22 = vmul.f32 %v2045_v9, %v1353_v14  ;;  %v1338_v39 = vmul.f32 1.442695, %v1310_v25  ;;  %v1340_v32 = vmul.f32 1.442695, %v1311_v28 }
 0x17d   : > { %2062 = vrcp.f32 %v1398_v17  ;;  %v1400_v27 = vadd.f32 2.0, %v1368_v18  ;;  %v2596_v42 = vadd.f32 %v2531_v21, %v1266_v8  ;;  %v1381_v37 = vmul.f32 %v1365_v48, %v2547_v40 }
 0x17e   : > { %v2047_v30 = vpop.eup %2046  ;;  %2064 = vrcp.f32 %v1399_v20  ;;  %v1401_v34 = vadd.f32 2.0, %v1369_v22  ;;  %v1268_v45 = vadd.f32 %v1267_v63, %v994_v61  ;;  %v1382_v61 = vmul.f32 %v1366_v10, %v2552_v55 }
 0x17f   : > { %v2049_v41 = vpop.eup %2048  ;;  %2066 = vrcp.f32 %v1400_v27  ;;  %v1354_v31 = vadd.f32 2.0, %v2047_v30  ;;  %v1312_v44 = vmin.f32 %v2596_v42, 20.0  ;;  %v1383_v4 = vmul.f32 %v1367_v13, %v2555_v59 }
 0x180   : > { %v2051_v43 = vpop.eup %2050  ;;  %v1426_v35 = vmul.f32 %v2049_v41, %v1378_v19  ;;  %2068 = vrcp.f32 %v1401_v34  ;;  %v2601_v51 = vadd.f32 %v2533_v24, %v1268_v45  ;;  %v1384_v8 = vmul.f32 %v1368_v18, %v2559_v62 }
 0x181   : > { %v2053_v46 = vpop.eup %2052  ;;  %v1427_v47 = vmul.f32 %v2051_v43, %v1379_v26  ;;  %v1370_v38 = vmul.f32 %v2047_v30, %v1354_v31  ;;  %2070 = vpow2.f32 %v1338_v39  ;;  %v1342_v48 = vmul.f32 1.442695, %v1312_v44 }
 0x182   : > { %v2055_v49 = vpop.eup %2054  ;;  %v1428_v50 = vmul.f32 %v2053_v46, %v1380_v33  ;;  %2072 = vpow2.f32 %v1340_v32  ;;  %v1313_v57 = vmin.f32 %v2601_v51, 20.0  ;;  %v1385_v10 = vmul.f32 %v1369_v22, %v2563_v0 }
 0x183   : > { %v2057_v21 = vpop.eup %2056  ;;  %v1813_v52 = vpack.c.bf16 %v1427_v47, %v1426_v35  ;;  %v1429_v53 = vmul.f32 %v2055_v49, %v1381_v37  ;;  %v1402_v54 = vadd.f32 2.0, %v1370_v38  ;;  %v1386_v39 = vmul.f32 %v1370_v38, %v2568_v16 }
 0x184   : > { %v2059_v56 = vpop.eup %2058  ;;  %v1355_v40 = vadd.f32 2.0, %v2057_v21  ;;  %v1344_v2 = vmul.f32 1.442695, %v1313_v57 }
 0x185   : > { %v2061_v58 = vpop.eup %2060  ;;  %1490 = vst [vmem:[%s2604_s18] sm:$0xff] %v1813_v52  ;;  %v1814_v60 = vpack.c.bf16 %v1429_v53, %v1428_v50  ;;  %2074 = vrcp.f32 %v1402_v54  ;;  %v1356_v24 = vadd.f32 2.0, %v2059_v56 }
 0x186   : > { %v1371_v63 = vmul.f32 %v2057_v21, %v1355_v40  ;;  %v1357_v1 = vadd.f32 2.0, %v2061_v58  ;;  %2076 = vpow2.f32 %v1342_v48 }
 0x187   : > { %v2063_v3 = vpop.eup %2062  ;;  %1491 = vst [vmem:[%s2604_s18 + $0x8] sm:$0xff] %v1814_v60  ;;  %v1372_v5 = vmul.f32 %v2059_v56, %v1356_v24  ;;  %2078 = vpow2.f32 %v1344_v2 }
 0x188   : > { %v2065_v6 = vpop.eup %2064  ;;  %v1430_v7 = vmul.f32 %v2063_v3, %v1382_v61  ;;  %v1403_v9 = vadd.f32 2.0, %v1371_v63  ;;  %v1373_v11 = vmul.f32 %v2061_v58, %v1357_v1  ;;  %v1387_v35 = vmul.f32 %v1371_v63, %v2571_v23 }
 0x189   : > { %v2067_v14 = vpop.eup %2066  ;;  %v1431_v55 = vmul.f32 %v2065_v6, %v1383_v4  ;;  %v1404_v17 = vadd.f32 2.0, %v1372_v5  ;;  %v1388_v46 = vmul.f32 %v1372_v5, %v2575_v29 }
 0x18a   : > { %v2069_v19 = vpop.eup %2068  ;;  %v1432_v20 = vmul.f32 %v2067_v14, %v1384_v8  ;;  %2080 = vrcp.f32 %v1403_v9  ;;  %v1405_v25 = vadd.f32 2.0, %v1373_v11  ;;  %v1389_v50 = vmul.f32 %v1373_v11, %v2579_v36 }
 0x18b   : > { %v2071_v59 = vpop.eup %2070  ;;  %v1815_v13 = vpack.c.bf16 %v1431_v55, %v1430_v7  ;;  %v1433_v26 = vmul.f32 %v2069_v19, %v1385_v10  ;;  %2082 = vrcp.f32 %v1404_v17 }
 0x18c   : > { %v2073_v27 = vpop.eup %2072  ;;  %2084 = vrcp.f32 %v1405_v25  ;;  %v1358_v62 = vadd.f32 2.0, %v2071_v59 }
 0x18d   : > { %1492 = vst [vmem:[%s2604_s18 + $0x10] sm:$0xff] %v1815_v13  ;;  %v1816_v18 = vpack.c.bf16 %v1433_v26, %v1432_v20  ;;  %v1359_v28 = vadd.f32 2.0, %v2073_v27 }
 0x18e   : > { %v1374_v30 = vmul.f32 %v2071_v59, %v1358_v62 }
 0x18f   : > { %v2075_v33 = vpop.eup %2074  ;;  %1493 = vst [vmem:[%s2604_s18 + $0x18] sm:$0xff] %v1816_v18  ;;  %v1375_v0 = vmul.f32 %v2073_v27, %v1359_v28 }
 0x190   : > { %v2077_v22 = vpop.eup %2076  ;;  %v1406_v34 = vadd.f32 2.0, %v1374_v30  ;;  %v1434_v43 = vmul.f32 %v2075_v33, %v1386_v39  ;;  %v1390_v29 = vmul.f32 %v1374_v30, %v2584_v12  ;;  %v1552_v12 = vld [vmem:[%s2604_s18] sm:$0xff] (%p2267_p9) }
 0x191   : > { %v1407_v41 = vadd.f32 2.0, %v1375_v0  ;;  %v1360_v31 = vadd.f32 2.0, %v2077_v22  ;;  %v2079_v32 = vpop.eup %2078  ;;  %v1391_v48 = vmul.f32 %v1375_v0, %v2587_v15  ;;  %v1554_v15 = vld [vmem:[%s2604_s18 + $0x8] sm:$0xff] (%p2267_p9)  ;;  %1553 = vst [vmem:[%s1510_s16] sm:$0xff] (%p2267_p9), %v1552_v12 }
 0x192   : > { %2086 = vrcp.f32 %v1406_v34  ;;  %v1361_v47 = vadd.f32 2.0, %v2079_v32  ;;  %1555 = vst [vmem:[%s1510_s16 + $0x10] sm:$0xff] (%p2267_p9), %v1554_v15 }
 0x193   : > { %2088 = vrcp.f32 %v1407_v41  ;;  %v1376_v37 = vmul.f32 %v2077_v22, %v1360_v31 }
 0x194   : > { %v2081_v45 = vpop.eup %2080  ;;  %v1377_v52 = vmul.f32 %v2079_v32, %v1361_v47 }
 0x195   : > { %v2083_v44 = vpop.eup %2082  ;;  %v1435_v49 = vmul.f32 %v2081_v45, %v1387_v35  ;;  %v1408_v16 = vadd.f32 2.0, %v1376_v37  ;;  %v1392_v24 = vmul.f32 %v1376_v37, %v2596_v42  ;;  %v1556_v42 = vld [vmem:[%s2604_s18 + $0x10] sm:$0xff] (%p2267_p9) }
 0x196   : > { %v2085_v38 = vpop.eup %2084  ;;  %v1436_v21 = vmul.f32 %v2083_v44, %v1388_v46  ;;  %v1409_v23 = vadd.f32 2.0, %v1377_v52  ;;  %v1393_v1 = vmul.f32 %v1377_v52, %v2601_v51  ;;  %v1558_v51 = vld [vmem:[%s2604_s18 + $0x18] sm:$0xff] (%p2267_p9)  ;;  %1557 = vst [vmem:[%s1510_s16 + $0x20] sm:$0xff] (%p2267_p9), %v1556_v42 }
 0x197   : > { %v1817_v53 = vpack.c.bf16 %v1435_v49, %v1434_v43  ;;  %v1437_v54 = vmul.f32 %v2085_v38, %v1389_v50  ;;  %2090 = vrcp.f32 %v1408_v16  ;;  %1559 = vst [vmem:[%s1510_s16 + $0x30] sm:$0xff] (%p2267_p9), %v1558_v51 }
 0x198   : > { %2092 = vrcp.f32 %v1409_v23 }
 0x199   : > { %1494 = vst [vmem:[%s2604_s18 + $0x20] sm:$0xff] %v1817_v53  ;;  %v1818_v56 = vpack.c.bf16 %v1437_v54, %v1436_v21 }
 0x19b   : > { %1495 = vst [vmem:[%s2604_s18 + $0x28] sm:$0xff] %v1818_v56 }
 0x19c   : > { %v2087_v40 = vpop.eup %2086 }
 0x19d   : > { %v2089_v36 = vpop.eup %2088  ;;  %v1438_v57 = vmul.f32 %v2087_v40, %v1390_v29 }
 0x19e   : > { %v1439_v58 = vmul.f32 %v2089_v36, %v1391_v48 }
 0x1a0   : > { %v1819_v60 = vpack.c.bf16 %v1439_v58, %v1438_v57  ;;  %v1560_v5 = vld [vmem:[%s2604_s18 + $0x20] sm:$0xff] (%p2267_p9) }
 0x1a1   : > { %v2091_v61 = vpop.eup %2090  ;;  %1504 = sbr.rel (!%p2267_p9) target bundleno = 432 (0x1b0), region = 120  ;;  %1561 = vst [vmem:[%s1510_s16 + $0x40] sm:$0xff] (%p2267_p9), %v1560_v5 }
 0x1a2   : > { %1496 = vst [vmem:[%s2604_s18 + $0x30] sm:$0xff] %v1819_v60  ;;  %v1440_v63 = vmul.f32 %v2091_v61, %v1392_v24  ;;  %v2093_v2 = vpop.eup %2092  ;;  %v1562_v6 = vld [vmem:[%s2604_s18 + $0x28] sm:$0xff] (%p2267_p9) }
 0x1a3   : > { %v1441_v3 = vmul.f32 %v2093_v2, %v1393_v1  ;;  %1563 = vst [vmem:[%s1510_s16 + $0x50] sm:$0xff] (%p2267_p9), %v1562_v6 }
 0x1a5   : > { %v1820_v4 = vpack.c.bf16 %v1441_v3, %v1440_v63 }
 0x1a7   : > { %1497 = vst [vmem:[%s2604_s18 + $0x38] sm:$0xff] %v1820_v4 }
 0x1a9   : > { %v1564_v7 = vld [vmem:[%s2604_s18 + $0x30] sm:$0xff] }
 0x1aa   : > { %1565 = vst [vmem:[%s1510_s16 + $0x60] sm:$0xff] %v1564_v7 }
 0x1ae   : > { %v1566_v8 = vld [vmem:[%s2604_s18 + $0x38] sm:$0xff] }
 0x1af   : > { %1567 = vst [vmem:[%s1510_s16 + $0x70] sm:$0xff] %v1566_v8 }
 0x1b0 PF: > { %s15_s26 = sadd.s32 1, %s2164_s26   ;;  %s2676_s18 = smov %s2136_s19 }
 0x1b1   : > { %p12_p2 = scmp.ge.s32.totalorder %s15_s26, 6   ;;  %s2677_s19 = smov %s2272_s13 }
 0x1b2   : > { %s2678_s20 = smov %s2144_s21  ;;  %s2679_s21 = smov %s2261_s9 }
 0x1b3   : > { %s2680_s22 = smov %s2156_s24  ;;  %s2681_s23 = smov %s2160_s25 }
 0x1b4   : > { %s2682_s24 = smov %s2685_s28  ;;  %s2683_s25 = smov %s2689_s29 }
 0x1b5   :  { %14 = sbr.rel (!%p12_p2) target bundleno = 5 (0x5), region = 206 }

// kernel: downsample4_forward.20
= control target key start
LH: loop header
LB: loop body
LE: loop exit
PB: predicated region body
PF: predicated region fallthrough
CT: control target
= control target key end

     0   :  { %s5946_s12 = smov 0   ;;  %s5948_s13 = smov 0   ;;  %s7156_s0 = inlined_call_operand.vmem [shape: bf16[128,2304], index: 0, kind: input, shape index: {}]   ;;  %s7157_s1 = inlined_call_operand.vmem [shape: bf16[2304,512], index: 1, kind: input, shape index: {}]   ;;  %s7158_s2 = inlined_call_operand.vmem [shape: f32[1,512], index: 2, kind: input, shape index: {}]   ;;  %s7159_s3 = inlined_call_operand.vmem [shape: bf16[128,512], index: 3, kind: output, shape index: {}]  }
   0x1   :  { %s5950_s14 = smov 0   ;;  %s5952_s15 = smov 0  }
   0x2   :  { %s5954_s16 = smov 0   ;;  %s5956_s17 = smov 0  }
   0x3   :  { %s5958_s18 = smov 0   ;;  %s5960_s19 = smov 0  }
   0x4   :  { %s5962_s20 = smov 0  }
   0x5 LB: > { %s4603_s21 = sadd.s32 4294967295, %s5924_s20   ;;  %s22_s22 = sadd.s32 1, %s5916_s18  ;;  %s5924_s20 = sphi %s5962_s20, %s13_s20   ;;  %s5920_s19 = sphi %s5960_s19, %s7168_s19   ;;  %s5916_s18 = sphi %s5958_s18, %s7167_s18   ;;  %s5912_s17 = sphi %s5956_s17, %s7166_s17   ;;  %s5908_s16 = sphi %s5954_s16, %s7165_s16   ;;  %s5904_s15 = sphi %s5952_s15, %s7164_s15   ;;  %s5900_s14 = sphi %s5950_s14, %s7163_s14   ;;  %s5896_s13 = sphi %s5948_s13, %s7162_s13   ;;  %s5892_s12 = sphi %s5946_s12, %s7161_s12  }
   0x6   : > { %p23_p0 = scmp.ge.s32.totalorder %s22_s22, 2  ;;  %s25_s23 = sadd.s32 1, %s5920_s19 }
   0x7   : > { %s58_s24 = sadd.s32 1, %s5904_s15  ;;  %p65_p1 = scmp.ne.s32.totalorder %s5904_s15, %s5900_s14 }
   0x8   : > { %s7170_s22 = smov (%p23_p0, %s22_s22), 0  ;;  %s7172_s23 = smov (!%p23_p0, %s25_s23), %s5920_s19 }
   0x9   : > { %s55_s25 = ssub.s32 %s5916_s18, %s7170_s22  ;;  %p66_p2 = scmp.eq.s32.totalorder %s5924_s20, 0 }
   0xa   : > { %p27_p3 = scmp.ge.s32.totalorder %s7172_s23, 2  ;;  %p56_p4 = scmp.eq.s32.totalorder %s55_s25, 0 }
   0xb   : > { %p67_p5 = por %p66_p2, %p65_p1  ;;  %s112_s26 = sadd.s32 1, %s5896_s13 }
   0xc   : > { %s7174_s23 = smov (%p27_p3, %s7172_s23), 0  ;;  %p122_p6 = scmp.ne.s32.totalorder %s5896_s13, %s5892_s12 }
   0xd   : > { %s6007_s27 = scalar_select %p56_p4, %s5904_s15, %s58_s24  }
   0xe   : > { %s107_s28 = ssub.s32 %s5920_s19, %s7174_s23  ;;  %p123_p7 = scmp.eq.s32.totalorder %s4603_s21, 3 }
   0xf   : > { %s109_s29 = sor.u32 %s107_s28, %s55_s25  ;;  %p4606_p10 = scmp.ge.s32.totalorder %s5924_s20, 4 }
  0x10   : > { %p110_p8 = scmp.eq.s32.totalorder %s109_s29, 0  ;;  %p6013_p9 = por %p123_p7, %p122_p6 }
  0x11   : > { %145 = sbr.rel (%p4606_p10) target bundleno = 172 (0xac), region = 16 }
  0x12   : > { %s6018_s4 = scalar_select %p110_p8, %s5896_s13, %s112_s26  }
  0x18   : > { %158 = sbr.rel (!%p67_p5) target bundleno = 172 (0xac), region = 24  ;;  %s160_s5 = sand.u32 (%p67_p5), 1, %s5904_s15  }
  0x19   : > { %s4989_s6 = sshll.u32 (%p67_p5), %s5916_s18, 3  ;;  %s5175_s7 = smul.u32 (%p67_p5), 2304, %s160_s5 }
  0x1a   : > { %s6026_s10 = scalar_lea.vmem (%p67_p5), %s7157_s1, %s4989_s6 }
  0x1b   : > { %v767_v0 = vld [vmem:[%s6026_s10] sm:$0xff] (%p67_p5)  ;;  %v769_v1 = vld [vmem:[%s6026_s10 + $0x10] sm:$0xff] (%p67_p5)  ;;  %s6034_s11 = scalar_lea.vmem (%p67_p5), [#allocation2], %s5175_s7 }
  0x1c   : > { %v771_v2 = vld [vmem:[%s6026_s10 + $0x20] sm:$0xff] (%p67_p5)  ;;  %v773_v3 = vld [vmem:[%s6026_s10 + $0x30] sm:$0xff] (%p67_p5)  ;;  %768 = vst [vmem:[%s6034_s11] sm:$0xff] (%p67_p5), %v767_v0  ;;  %770 = vst [vmem:[%s6034_s11 + $0x8] sm:$0xff] (%p67_p5), %v769_v1 }
  0x1d   : > { %v775_v4 = vld [vmem:[%s6026_s10 + $0x40] sm:$0xff] (%p67_p5)  ;;  %v777_v5 = vld [vmem:[%s6026_s10 + $0x50] sm:$0xff] (%p67_p5)  ;;  %772 = vst [vmem:[%s6034_s11 + $0x10] sm:$0xff] (%p67_p5), %v771_v2  ;;  %774 = vst [vmem:[%s6034_s11 + $0x18] sm:$0xff] (%p67_p5), %v773_v3 }
  0x1e   : > { %776 = vst [vmem:[%s6034_s11 + $0x20] sm:$0xff] (%p67_p5), %v775_v4  ;;  %778 = vst [vmem:[%s6034_s11 + $0x28] sm:$0xff] (%p67_p5), %v777_v5  ;;  %v779_v6 = vld [vmem:[%s6026_s10 + $0x60] sm:$0xff] (%p67_p5)  ;;  %v781_v7 = vld [vmem:[%s6026_s10 + $0x70] sm:$0xff] (%p67_p5) }
  0x1f   : > { %v783_v8 = vld [vmem:[%s6026_s10 + $0x80] sm:$0xff]  ;;  %780 = vst [vmem:[%s6034_s11 + $0x30] sm:$0xff] %v779_v6  ;;  %782 = vst [vmem:[%s6034_s11 + $0x38] sm:$0xff] %v781_v7  ;;  %v785_v9 = vld [vmem:[%s6026_s10 + $0x90] sm:$0xff] }
  0x20   : > { %784 = vst [vmem:[%s6034_s11 + $0x40] sm:$0xff] %v783_v8  ;;  %v787_v10 = vld [vmem:[%s6026_s10 + $0xa0] sm:$0xff]  ;;  %v789_v11 = vld [vmem:[%s6026_s10 + $0xb0] sm:$0xff]  ;;  %786 = vst [vmem:[%s6034_s11 + $0x48] sm:$0xff] %v785_v9 }
  0x21   : > { %788 = vst [vmem:[%s6034_s11 + $0x50] sm:$0xff] %v787_v10  ;;  %790 = vst [vmem:[%s6034_s11 + $0x58] sm:$0xff] %v789_v11  ;;  %v791_v12 = vld [vmem:[%s6026_s10 + $0xc0] sm:$0xff]  ;;  %v793_v13 = vld [vmem:[%s6026_s10 + $0xd0] sm:$0xff] }
  0x22   : > { %v795_v14 = vld [vmem:[%s6026_s10 + $0xe0] sm:$0xff]  ;;  %792 = vst [vmem:[%s6034_s11 + $0x60] sm:$0xff] %v791_v12  ;;  %794 = vst [vmem:[%s6034_s11 + $0x68] sm:$0xff] %v793_v13  ;;  %v797_v15 = vld [vmem:[%s6026_s10 + $0xf0] sm:$0xff] }
  0x23   : > { %796 = vst [vmem:[%s6034_s11 + $0x70] sm:$0xff] %v795_v14  ;;  %v799_v16 = vld [vmem:[%s6026_s10 + $0x100] sm:$0xff]  ;;  %v801_v17 = vld [vmem:[%s6026_s10 + $0x110] sm:$0xff]  ;;  %798 = vst [vmem:[%s6034_s11 + $0x78] sm:$0xff] %v797_v15 }
  0x24   : > { %800 = vst [vmem:[%s6034_s11 + $0x80] sm:$0xff] %v799_v16  ;;  %802 = vst [vmem:[%s6034_s11 + $0x88] sm:$0xff] %v801_v17  ;;  %v803_v18 = vld [vmem:[%s6026_s10 + $0x120] sm:$0xff]  ;;  %v805_v19 = vld [vmem:[%s6026_s10 + $0x130] sm:$0xff] }
  0x25   : > { %v807_v20 = vld [vmem:[%s6026_s10 + $0x140] sm:$0xff]  ;;  %804 = vst [vmem:[%s6034_s11 + $0x90] sm:$0xff] %v803_v18  ;;  %806 = vst [vmem:[%s6034_s11 + $0x98] sm:$0xff] %v805_v19  ;;  %v809_v21 = vld [vmem:[%s6026_s10 + $0x150] sm:$0xff] }
  0x26   : > { %808 = vst [vmem:[%s6034_s11 + $0xa0] sm:$0xff] %v807_v20  ;;  %v811_v22 = vld [vmem:[%s6026_s10 + $0x160] sm:$0xff]  ;;  %v813_v23 = vld [vmem:[%s6026_s10 + $0x170] sm:$0xff]  ;;  %810 = vst [vmem:[%s6034_s11 + $0xa8] sm:$0xff] %v809_v21 }
  0x27   : > { %812 = vst [vmem:[%s6034_s11 + $0xb0] sm:$0xff] %v811_v22  ;;  %814 = vst [vmem:[%s6034_s11 + $0xb8] sm:$0xff] %v813_v23  ;;  %v815_v24 = vld [vmem:[%s6026_s10 + $0x180] sm:$0xff]  ;;  %v817_v25 = vld [vmem:[%s6026_s10 + $0x190] sm:$0xff] }
  0x28   : > { %v819_v26 = vld [vmem:[%s6026_s10 + $0x1a0] sm:$0xff]  ;;  %816 = vst [vmem:[%s6034_s11 + $0xc0] sm:$0xff] %v815_v24  ;;  %818 = vst [vmem:[%s6034_s11 + $0xc8] sm:$0xff] %v817_v25  ;;  %v821_v27 = vld [vmem:[%s6026_s10 + $0x1b0] sm:$0xff] }
  0x29   : > { %820 = vst [vmem:[%s6034_s11 + $0xd0] sm:$0xff] %v819_v26  ;;  %v823_v28 = vld [vmem:[%s6026_s10 + $0x1c0] sm:$0xff]  ;;  %v825_v29 = vld [vmem:[%s6026_s10 + $0x1d0] sm:$0xff]  ;;  %822 = vst [vmem:[%s6034_s11 + $0xd8] sm:$0xff] %v821_v27 }
  0x2a   : > { %824 = vst [vmem:[%s6034_s11 + $0xe0] sm:$0xff] %v823_v28  ;;  %826 = vst [vmem:[%s6034_s11 + $0xe8] sm:$0xff] %v825_v29  ;;  %v827_v30 = vld [vmem:[%s6026_s10 + $0x1e0] sm:$0xff]  ;;  %v829_v31 = vld [vmem:[%s6026_s10 + $0x1f0] sm:$0xff] }
  0x2b   : > { %v831_v32 = vld [vmem:[%s6026_s10 + $0x200] sm:$0xff]  ;;  %828 = vst [vmem:[%s6034_s11 + $0xf0] sm:$0xff] %v827_v30  ;;  %830 = vst [vmem:[%s6034_s11 + $0xf8] sm:$0xff] %v829_v31  ;;  %v833_v33 = vld [vmem:[%s6026_s10 + $0x210] sm:$0xff] }
  0x2c   : > { %832 = vst [vmem:[%s6034_s11 + $0x100] sm:$0xff] %v831_v32  ;;  %v835_v34 = vld [vmem:[%s6026_s10 + $0x220] sm:$0xff]  ;;  %v837_v35 = vld [vmem:[%s6026_s10 + $0x230] sm:$0xff]  ;;  %834 = vst [vmem:[%s6034_s11 + $0x108] sm:$0xff] %v833_v33 }
  0x2d   : > { %836 = vst [vmem:[%s6034_s11 + $0x110] sm:$0xff] %v835_v34  ;;  %838 = vst [vmem:[%s6034_s11 + $0x118] sm:$0xff] %v837_v35  ;;  %v839_v36 = vld [vmem:[%s6026_s10 + $0x240] sm:$0xff]  ;;  %v841_v37 = vld [vmem:[%s6026_s10 + $0x250] sm:$0xff] }
  0x2e   : > { %v843_v38 = vld [vmem:[%s6026_s10 + $0x260] sm:$0xff]  ;;  %840 = vst [vmem:[%s6034_s11 + $0x120] sm:$0xff] %v839_v36  ;;  %842 = vst [vmem:[%s6034_s11 + $0x128] sm:$0xff] %v841_v37  ;;  %v845_v39 = vld [vmem:[%s6026_s10 + $0x270] sm:$0xff] }
  0x2f   : > { %844 = vst [vmem:[%s6034_s11 + $0x130] sm:$0xff] %v843_v38  ;;  %v847_v40 = vld [vmem:[%s6026_s10 + $0x280] sm:$0xff]  ;;  %v849_v41 = vld [vmem:[%s6026_s10 + $0x290] sm:$0xff]  ;;  %846 = vst [vmem:[%s6034_s11 + $0x138] sm:$0xff] %v845_v39 }
  0x30   : > { %848 = vst [vmem:[%s6034_s11 + $0x140] sm:$0xff] %v847_v40  ;;  %850 = vst [vmem:[%s6034_s11 + $0x148] sm:$0xff] %v849_v41  ;;  %v851_v42 = vld [vmem:[%s6026_s10 + $0x2a0] sm:$0xff]  ;;  %v853_v43 = vld [vmem:[%s6026_s10 + $0x2b0] sm:$0xff] }
  0x31   : > { %v855_v44 = vld [vmem:[%s6026_s10 + $0x2c0] sm:$0xff]  ;;  %852 = vst [vmem:[%s6034_s11 + $0x150] sm:$0xff] %v851_v42  ;;  %854 = vst [vmem:[%s6034_s11 + $0x158] sm:$0xff] %v853_v43  ;;  %v857_v45 = vld [vmem:[%s6026_s10 + $0x2d0] sm:$0xff] }
  0x32   : > { %856 = vst [vmem:[%s6034_s11 + $0x160] sm:$0xff] %v855_v44  ;;  %v859_v46 = vld [vmem:[%s6026_s10 + $0x2e0] sm:$0xff]  ;;  %v861_v47 = vld [vmem:[%s6026_s10 + $0x2f0] sm:$0xff]  ;;  %858 = vst [vmem:[%s6034_s11 + $0x168] sm:$0xff] %v857_v45 }
  0x33   : > { %860 = vst [vmem:[%s6034_s11 + $0x170] sm:$0xff] %v859_v46  ;;  %862 = vst [vmem:[%s6034_s11 + $0x178] sm:$0xff] %v861_v47  ;;  %v863_v48 = vld [vmem:[%s6026_s10 + $0x300] sm:$0xff]  ;;  %v865_v49 = vld [vmem:[%s6026_s10 + $0x310] sm:$0xff] }
  0x34   : > { %v867_v50 = vld [vmem:[%s6026_s10 + $0x320] sm:$0xff]  ;;  %864 = vst [vmem:[%s6034_s11 + $0x180] sm:$0xff] %v863_v48  ;;  %866 = vst [vmem:[%s6034_s11 + $0x188] sm:$0xff] %v865_v49  ;;  %v869_v51 = vld [vmem:[%s6026_s10 + $0x330] sm:$0xff] }
  0x35   : > { %868 = vst [vmem:[%s6034_s11 + $0x190] sm:$0xff] %v867_v50  ;;  %v871_v52 = vld [vmem:[%s6026_s10 + $0x340] sm:$0xff]  ;;  %v873_v53 = vld [vmem:[%s6026_s10 + $0x350] sm:$0xff]  ;;  %870 = vst [vmem:[%s6034_s11 + $0x198] sm:$0xff] %v869_v51 }
  0x36   : > { %872 = vst [vmem:[%s6034_s11 + $0x1a0] sm:$0xff] %v871_v52  ;;  %874 = vst [vmem:[%s6034_s11 + $0x1a8] sm:$0xff] %v873_v53  ;;  %v875_v54 = vld [vmem:[%s6026_s10 + $0x360] sm:$0xff]  ;;  %v877_v55 = vld [vmem:[%s6026_s10 + $0x370] sm:$0xff] }
  0x37   : > { %v879_v56 = vld [vmem:[%s6026_s10 + $0x380] sm:$0xff]  ;;  %876 = vst [vmem:[%s6034_s11 + $0x1b0] sm:$0xff] %v875_v54  ;;  %878 = vst [vmem:[%s6034_s11 + $0x1b8] sm:$0xff] %v877_v55  ;;  %v881_v57 = vld [vmem:[%s6026_s10 + $0x390] sm:$0xff] }
  0x38   : > { %880 = vst [vmem:[%s6034_s11 + $0x1c0] sm:$0xff] %v879_v56  ;;  %v883_v58 = vld [vmem:[%s6026_s10 + $0x3a0] sm:$0xff]  ;;  %v885_v59 = vld [vmem:[%s6026_s10 + $0x3b0] sm:$0xff]  ;;  %882 = vst [vmem:[%s6034_s11 + $0x1c8] sm:$0xff] %v881_v57 }
  0x39   : > { %884 = vst [vmem:[%s6034_s11 + $0x1d0] sm:$0xff] %v883_v58  ;;  %886 = vst [vmem:[%s6034_s11 + $0x1d8] sm:$0xff] %v885_v59  ;;  %v887_v60 = vld [vmem:[%s6026_s10 + $0x3c0] sm:$0xff]  ;;  %v889_v61 = vld [vmem:[%s6026_s10 + $0x3d0] sm:$0xff] }
  0x3a   : > { %v891_v62 = vld [vmem:[%s6026_s10 + $0x3e0] sm:$0xff]  ;;  %888 = vst [vmem:[%s6034_s11 + $0x1e0] sm:$0xff] %v887_v60  ;;  %890 = vst [vmem:[%s6034_s11 + $0x1e8] sm:$0xff] %v889_v61  ;;  %v893_v63 = vld [vmem:[%s6026_s10 + $0x3f0] sm:$0xff] }
  0x3b   : > { %892 = vst [vmem:[%s6034_s11 + $0x1f0] sm:$0xff] %v891_v62  ;;  %v895_v0 = vld [vmem:[%s6026_s10 + $0x400] sm:$0xff]  ;;  %v897_v1 = vld [vmem:[%s6026_s10 + $0x410] sm:$0xff]  ;;  %894 = vst [vmem:[%s6034_s11 + $0x1f8] sm:$0xff] %v893_v63 }
  0x3c   : > { %896 = vst [vmem:[%s6034_s11 + $0x200] sm:$0xff] %v895_v0  ;;  %898 = vst [vmem:[%s6034_s11 + $0x208] sm:$0xff] %v897_v1  ;;  %v899_v2 = vld [vmem:[%s6026_s10 + $0x420] sm:$0xff]  ;;  %v901_v3 = vld [vmem:[%s6026_s10 + $0x430] sm:$0xff] }
  0x3d   : > { %v903_v4 = vld [vmem:[%s6026_s10 + $0x440] sm:$0xff]  ;;  %900 = vst [vmem:[%s6034_s11 + $0x210] sm:$0xff] %v899_v2  ;;  %902 = vst [vmem:[%s6034_s11 + $0x218] sm:$0xff] %v901_v3  ;;  %v905_v5 = vld [vmem:[%s6026_s10 + $0x450] sm:$0xff] }
  0x3e   : > { %904 = vst [vmem:[%s6034_s11 + $0x220] sm:$0xff] %v903_v4  ;;  %v907_v6 = vld [vmem:[%s6026_s10 + $0x460] sm:$0xff]  ;;  %v909_v7 = vld [vmem:[%s6026_s10 + $0x470] sm:$0xff]  ;;  %906 = vst [vmem:[%s6034_s11 + $0x228] sm:$0xff] %v905_v5 }
  0x3f   : > { %908 = vst [vmem:[%s6034_s11 + $0x230] sm:$0xff] %v907_v6  ;;  %910 = vst [vmem:[%s6034_s11 + $0x238] sm:$0xff] %v909_v7  ;;  %v911_v8 = vld [vmem:[%s6026_s10 + $0x480] sm:$0xff]  ;;  %v913_v9 = vld [vmem:[%s6026_s10 + $0x490] sm:$0xff] }
  0x40   : > { %v915_v10 = vld [vmem:[%s6026_s10 + $0x4a0] sm:$0xff]  ;;  %912 = vst [vmem:[%s6034_s11 + $0x240] sm:$0xff] %v911_v8  ;;  %914 = vst [vmem:[%s6034_s11 + $0x248] sm:$0xff] %v913_v9  ;;  %v917_v11 = vld [vmem:[%s6026_s10 + $0x4b0] sm:$0xff] }
  0x41   : > { %916 = vst [vmem:[%s6034_s11 + $0x250] sm:$0xff] %v915_v10  ;;  %v919_v12 = vld [vmem:[%s6026_s10 + $0x4c0] sm:$0xff]  ;;  %v921_v13 = vld [vmem:[%s6026_s10 + $0x4d0] sm:$0xff]  ;;  %918 = vst [vmem:[%s6034_s11 + $0x258] sm:$0xff] %v917_v11 }
  0x42   : > { %920 = vst [vmem:[%s6034_s11 + $0x260] sm:$0xff] %v919_v12  ;;  %922 = vst [vmem:[%s6034_s11 + $0x268] sm:$0xff] %v921_v13  ;;  %v923_v14 = vld [vmem:[%s6026_s10 + $0x4e0] sm:$0xff]  ;;  %v925_v15 = vld [vmem:[%s6026_s10 + $0x4f0] sm:$0xff] }
  0x43   : > { %v927_v16 = vld [vmem:[%s6026_s10 + $0x500] sm:$0xff]  ;;  %924 = vst [vmem:[%s6034_s11 + $0x270] sm:$0xff] %v923_v14  ;;  %926 = vst [vmem:[%s6034_s11 + $0x278] sm:$0xff] %v925_v15  ;;  %v929_v17 = vld [vmem:[%s6026_s10 + $0x510] sm:$0xff] }
  0x44   : > { %928 = vst [vmem:[%s6034_s11 + $0x280] sm:$0xff] %v927_v16  ;;  %v931_v18 = vld [vmem:[%s6026_s10 + $0x520] sm:$0xff]  ;;  %v933_v19 = vld [vmem:[%s6026_s10 + $0x530] sm:$0xff]  ;;  %930 = vst [vmem:[%s6034_s11 + $0x288] sm:$0xff] %v929_v17 }
  0x45   : > { %932 = vst [vmem:[%s6034_s11 + $0x290] sm:$0xff] %v931_v18  ;;  %934 = vst [vmem:[%s6034_s11 + $0x298] sm:$0xff] %v933_v19  ;;  %v935_v20 = vld [vmem:[%s6026_s10 + $0x540] sm:$0xff]  ;;  %v937_v21 = vld [vmem:[%s6026_s10 + $0x550] sm:$0xff] }
  0x46   : > { %v939_v22 = vld [vmem:[%s6026_s10 + $0x560] sm:$0xff]  ;;  %936 = vst [vmem:[%s6034_s11 + $0x2a0] sm:$0xff] %v935_v20  ;;  %938 = vst [vmem:[%s6034_s11 + $0x2a8] sm:$0xff] %v937_v21  ;;  %v941_v23 = vld [vmem:[%s6026_s10 + $0x570] sm:$0xff] }
  0x47   : > { %940 = vst [vmem:[%s6034_s11 + $0x2b0] sm:$0xff] %v939_v22  ;;  %v943_v24 = vld [vmem:[%s6026_s10 + $0x580] sm:$0xff]  ;;  %v945_v25 = vld [vmem:[%s6026_s10 + $0x590] sm:$0xff]  ;;  %942 = vst [vmem:[%s6034_s11 + $0x2b8] sm:$0xff] %v941_v23 }
  0x48   : > { %944 = vst [vmem:[%s6034_s11 + $0x2c0] sm:$0xff] %v943_v24  ;;  %946 = vst [vmem:[%s6034_s11 + $0x2c8] sm:$0xff] %v945_v25  ;;  %v947_v26 = vld [vmem:[%s6026_s10 + $0x5a0] sm:$0xff]  ;;  %v949_v27 = vld [vmem:[%s6026_s10 + $0x5b0] sm:$0xff] }
  0x49   : > { %v951_v28 = vld [vmem:[%s6026_s10 + $0x5c0] sm:$0xff]  ;;  %948 = vst [vmem:[%s6034_s11 + $0x2d0] sm:$0xff] %v947_v26  ;;  %950 = vst [vmem:[%s6034_s11 + $0x2d8] sm:$0xff] %v949_v27  ;;  %v953_v29 = vld [vmem:[%s6026_s10 + $0x5d0] sm:$0xff] }
  0x4a   : > { %952 = vst [vmem:[%s6034_s11 + $0x2e0] sm:$0xff] %v951_v28  ;;  %v955_v30 = vld [vmem:[%s6026_s10 + $0x5e0] sm:$0xff]  ;;  %v957_v31 = vld [vmem:[%s6026_s10 + $0x5f0] sm:$0xff]  ;;  %954 = vst [vmem:[%s6034_s11 + $0x2e8] sm:$0xff] %v953_v29 }
  0x4b   : > { %956 = vst [vmem:[%s6034_s11 + $0x2f0] sm:$0xff] %v955_v30  ;;  %958 = vst [vmem:[%s6034_s11 + $0x2f8] sm:$0xff] %v957_v31  ;;  %v959_v32 = vld [vmem:[%s6026_s10 + $0x600] sm:$0xff]  ;;  %v961_v33 = vld [vmem:[%s6026_s10 + $0x610] sm:$0xff] }
  0x4c   : > { %v963_v34 = vld [vmem:[%s6026_s10 + $0x620] sm:$0xff]  ;;  %960 = vst [vmem:[%s6034_s11 + $0x300] sm:$0xff] %v959_v32  ;;  %962 = vst [vmem:[%s6034_s11 + $0x308] sm:$0xff] %v961_v33  ;;  %v965_v35 = vld [vmem:[%s6026_s10 + $0x630] sm:$0xff] }
  0x4d   : > { %964 = vst [vmem:[%s6034_s11 + $0x310] sm:$0xff] %v963_v34  ;;  %v967_v36 = vld [vmem:[%s6026_s10 + $0x640] sm:$0xff]  ;;  %v969_v37 = vld [vmem:[%s6026_s10 + $0x650] sm:$0xff]  ;;  %966 = vst [vmem:[%s6034_s11 + $0x318] sm:$0xff] %v965_v35 }
  0x4e   : > { %968 = vst [vmem:[%s6034_s11 + $0x320] sm:$0xff] %v967_v36  ;;  %970 = vst [vmem:[%s6034_s11 + $0x328] sm:$0xff] %v969_v37  ;;  %v971_v38 = vld [vmem:[%s6026_s10 + $0x660] sm:$0xff]  ;;  %v973_v39 = vld [vmem:[%s6026_s10 + $0x670] sm:$0xff] }
  0x4f   : > { %v975_v40 = vld [vmem:[%s6026_s10 + $0x680] sm:$0xff]  ;;  %972 = vst [vmem:[%s6034_s11 + $0x330] sm:$0xff] %v971_v38  ;;  %974 = vst [vmem:[%s6034_s11 + $0x338] sm:$0xff] %v973_v39  ;;  %v977_v41 = vld [vmem:[%s6026_s10 + $0x690] sm:$0xff] }
  0x50   : > { %976 = vst [vmem:[%s6034_s11 + $0x340] sm:$0xff] %v975_v40  ;;  %v979_v42 = vld [vmem:[%s6026_s10 + $0x6a0] sm:$0xff]  ;;  %v981_v43 = vld [vmem:[%s6026_s10 + $0x6b0] sm:$0xff]  ;;  %978 = vst [vmem:[%s6034_s11 + $0x348] sm:$0xff] %v977_v41 }
  0x51   : > { %980 = vst [vmem:[%s6034_s11 + $0x350] sm:$0xff] %v979_v42  ;;  %982 = vst [vmem:[%s6034_s11 + $0x358] sm:$0xff] %v981_v43  ;;  %v983_v44 = vld [vmem:[%s6026_s10 + $0x6c0] sm:$0xff]  ;;  %v985_v45 = vld [vmem:[%s6026_s10 + $0x6d0] sm:$0xff] }
  0x52   : > { %v987_v46 = vld [vmem:[%s6026_s10 + $0x6e0] sm:$0xff]  ;;  %984 = vst [vmem:[%s6034_s11 + $0x360] sm:$0xff] %v983_v44  ;;  %986 = vst [vmem:[%s6034_s11 + $0x368] sm:$0xff] %v985_v45  ;;  %v989_v47 = vld [vmem:[%s6026_s10 + $0x6f0] sm:$0xff] }
  0x53   : > { %988 = vst [vmem:[%s6034_s11 + $0x370] sm:$0xff] %v987_v46  ;;  %v991_v48 = vld [vmem:[%s6026_s10 + $0x700] sm:$0xff]  ;;  %v993_v49 = vld [vmem:[%s6026_s10 + $0x710] sm:$0xff]  ;;  %990 = vst [vmem:[%s6034_s11 + $0x378] sm:$0xff] %v989_v47 }
  0x54   : > { %992 = vst [vmem:[%s6034_s11 + $0x380] sm:$0xff] %v991_v48  ;;  %994 = vst [vmem:[%s6034_s11 + $0x388] sm:$0xff] %v993_v49  ;;  %v995_v50 = vld [vmem:[%s6026_s10 + $0x720] sm:$0xff]  ;;  %v997_v51 = vld [vmem:[%s6026_s10 + $0x730] sm:$0xff] }
  0x55   : > { %v999_v52 = vld [vmem:[%s6026_s10 + $0x740] sm:$0xff]  ;;  %996 = vst [vmem:[%s6034_s11 + $0x390] sm:$0xff] %v995_v50  ;;  %998 = vst [vmem:[%s6034_s11 + $0x398] sm:$0xff] %v997_v51  ;;  %v1001_v53 = vld [vmem:[%s6026_s10 + $0x750] sm:$0xff] }
  0x56   : > { %1000 = vst [vmem:[%s6034_s11 + $0x3a0] sm:$0xff] %v999_v52  ;;  %v1003_v54 = vld [vmem:[%s6026_s10 + $0x760] sm:$0xff]  ;;  %v1005_v55 = vld [vmem:[%s6026_s10 + $0x770] sm:$0xff]  ;;  %1002 = vst [vmem:[%s6034_s11 + $0x3a8] sm:$0xff] %v1001_v53 }
  0x57   : > { %1004 = vst [vmem:[%s6034_s11 + $0x3b0] sm:$0xff] %v1003_v54  ;;  %1006 = vst [vmem:[%s6034_s11 + $0x3b8] sm:$0xff] %v1005_v55  ;;  %v1007_v56 = vld [vmem:[%s6026_s10 + $0x780] sm:$0xff]  ;;  %v1009_v57 = vld [vmem:[%s6026_s10 + $0x790] sm:$0xff] }
  0x58   : > { %v1011_v58 = vld [vmem:[%s6026_s10 + $0x7a0] sm:$0xff]  ;;  %1008 = vst [vmem:[%s6034_s11 + $0x3c0] sm:$0xff] %v1007_v56  ;;  %1010 = vst [vmem:[%s6034_s11 + $0x3c8] sm:$0xff] %v1009_v57  ;;  %v1013_v59 = vld [vmem:[%s6026_s10 + $0x7b0] sm:$0xff] }
  0x59   : > { %1012 = vst [vmem:[%s6034_s11 + $0x3d0] sm:$0xff] %v1011_v58  ;;  %v1015_v60 = vld [vmem:[%s6026_s10 + $0x7c0] sm:$0xff]  ;;  %v1017_v61 = vld [vmem:[%s6026_s10 + $0x7d0] sm:$0xff]  ;;  %1014 = vst [vmem:[%s6034_s11 + $0x3d8] sm:$0xff] %v1013_v59 }
  0x5a   : > { %1016 = vst [vmem:[%s6034_s11 + $0x3e0] sm:$0xff] %v1015_v60  ;;  %1018 = vst [vmem:[%s6034_s11 + $0x3e8] sm:$0xff] %v1017_v61  ;;  %v1019_v62 = vld [vmem:[%s6026_s10 + $0x7e0] sm:$0xff]  ;;  %v1021_v63 = vld [vmem:[%s6026_s10 + $0x7f0] sm:$0xff] }
  0x5b   : > { %v1023_v0 = vld [vmem:[%s6026_s10 + $0x800] sm:$0xff]  ;;  %1020 = vst [vmem:[%s6034_s11 + $0x3f0] sm:$0xff] %v1019_v62  ;;  %1022 = vst [vmem:[%s6034_s11 + $0x3f8] sm:$0xff] %v1021_v63  ;;  %v1025_v1 = vld [vmem:[%s6026_s10 + $0x810] sm:$0xff] }
  0x5c   : > { %1024 = vst [vmem:[%s6034_s11 + $0x400] sm:$0xff] %v1023_v0  ;;  %v1027_v2 = vld [vmem:[%s6026_s10 + $0x820] sm:$0xff]  ;;  %v1029_v3 = vld [vmem:[%s6026_s10 + $0x830] sm:$0xff]  ;;  %1026 = vst [vmem:[%s6034_s11 + $0x408] sm:$0xff] %v1025_v1 }
  0x5d   : > { %1028 = vst [vmem:[%s6034_s11 + $0x410] sm:$0xff] %v1027_v2  ;;  %1030 = vst [vmem:[%s6034_s11 + $0x418] sm:$0xff] %v1029_v3  ;;  %v1031_v4 = vld [vmem:[%s6026_s10 + $0x840] sm:$0xff]  ;;  %v1033_v5 = vld [vmem:[%s6026_s10 + $0x850] sm:$0xff] }
  0x5e   : > { %v1035_v6 = vld [vmem:[%s6026_s10 + $0x860] sm:$0xff]  ;;  %1032 = vst [vmem:[%s6034_s11 + $0x420] sm:$0xff] %v1031_v4  ;;  %1034 = vst [vmem:[%s6034_s11 + $0x428] sm:$0xff] %v1033_v5  ;;  %v1037_v7 = vld [vmem:[%s6026_s10 + $0x870] sm:$0xff] }
  0x5f   : > { %1036 = vst [vmem:[%s6034_s11 + $0x430] sm:$0xff] %v1035_v6  ;;  %v1039_v8 = vld [vmem:[%s6026_s10 + $0x880] sm:$0xff]  ;;  %v1041_v9 = vld [vmem:[%s6026_s10 + $0x890] sm:$0xff]  ;;  %1038 = vst [vmem:[%s6034_s11 + $0x438] sm:$0xff] %v1037_v7 }
  0x60   : > { %1040 = vst [vmem:[%s6034_s11 + $0x440] sm:$0xff] %v1039_v8  ;;  %1042 = vst [vmem:[%s6034_s11 + $0x448] sm:$0xff] %v1041_v9  ;;  %v1043_v10 = vld [vmem:[%s6026_s10 + $0x8a0] sm:$0xff]  ;;  %v1045_v11 = vld [vmem:[%s6026_s10 + $0x8b0] sm:$0xff] }
  0x61   : > { %v1047_v12 = vld [vmem:[%s6026_s10 + $0x8c0] sm:$0xff]  ;;  %1044 = vst [vmem:[%s6034_s11 + $0x450] sm:$0xff] %v1043_v10  ;;  %1046 = vst [vmem:[%s6034_s11 + $0x458] sm:$0xff] %v1045_v11  ;;  %v1049_v13 = vld [vmem:[%s6026_s10 + $0x8d0] sm:$0xff] }
  0x62   : > { %1048 = vst [vmem:[%s6034_s11 + $0x460] sm:$0xff] %v1047_v12  ;;  %v1051_v14 = vld [vmem:[%s6026_s10 + $0x8e0] sm:$0xff]  ;;  %v1053_v15 = vld [vmem:[%s6026_s10 + $0x8f0] sm:$0xff]  ;;  %1050 = vst [vmem:[%s6034_s11 + $0x468] sm:$0xff] %v1049_v13 }
  0x63   : > { %1052 = vst [vmem:[%s6034_s11 + $0x470] sm:$0xff] %v1051_v14  ;;  %1054 = vst [vmem:[%s6034_s11 + $0x478] sm:$0xff] %v1053_v15  ;;  %v1055_v16 = vld [vmem:[%s6026_s10 + $0x900] sm:$0xff]  ;;  %v1057_v17 = vld [vmem:[%s6026_s10 + $0x910] sm:$0xff] }
  0x64   : > { %v1059_v18 = vld [vmem:[%s6026_s10 + $0x920] sm:$0xff]  ;;  %1056 = vst [vmem:[%s6034_s11 + $0x480] sm:$0xff] %v1055_v16  ;;  %1058 = vst [vmem:[%s6034_s11 + $0x488] sm:$0xff] %v1057_v17  ;;  %v1061_v19 = vld [vmem:[%s6026_s10 + $0x930] sm:$0xff] }
  0x65   : > { %1060 = vst [vmem:[%s6034_s11 + $0x490] sm:$0xff] %v1059_v18  ;;  %v1063_v20 = vld [vmem:[%s6026_s10 + $0x940] sm:$0xff]  ;;  %v1065_v21 = vld [vmem:[%s6026_s10 + $0x950] sm:$0xff]  ;;  %1062 = vst [vmem:[%s6034_s11 + $0x498] sm:$0xff] %v1061_v19 }
  0x66   : > { %1064 = vst [vmem:[%s6034_s11 + $0x4a0] sm:$0xff] %v1063_v20  ;;  %1066 = vst [vmem:[%s6034_s11 + $0x4a8] sm:$0xff] %v1065_v21  ;;  %v1067_v22 = vld [vmem:[%s6026_s10 + $0x960] sm:$0xff]  ;;  %v1069_v23 = vld [vmem:[%s6026_s10 + $0x970] sm:$0xff] }
  0x67   : > { %v1071_v24 = vld [vmem:[%s6026_s10 + $0x980] sm:$0xff]  ;;  %1068 = vst [vmem:[%s6034_s11 + $0x4b0] sm:$0xff] %v1067_v22  ;;  %1070 = vst [vmem:[%s6034_s11 + $0x4b8] sm:$0xff] %v1069_v23  ;;  %v1073_v25 = vld [vmem:[%s6026_s10 + $0x990] sm:$0xff] }
  0x68   : > { %1072 = vst [vmem:[%s6034_s11 + $0x4c0] sm:$0xff] %v1071_v24  ;;  %v1075_v26 = vld [vmem:[%s6026_s10 + $0x9a0] sm:$0xff]  ;;  %v1077_v27 = vld [vmem:[%s6026_s10 + $0x9b0] sm:$0xff]  ;;  %1074 = vst [vmem:[%s6034_s11 + $0x4c8] sm:$0xff] %v1073_v25 }
  0x69   : > { %1076 = vst [vmem:[%s6034_s11 + $0x4d0] sm:$0xff] %v1075_v26  ;;  %1078 = vst [vmem:[%s6034_s11 + $0x4d8] sm:$0xff] %v1077_v27  ;;  %v1079_v28 = vld [vmem:[%s6026_s10 + $0x9c0] sm:$0xff]  ;;  %v1081_v29 = vld [vmem:[%s6026_s10 + $0x9d0] sm:$0xff] }
  0x6a   : > { %v1083_v30 = vld [vmem:[%s6026_s10 + $0x9e0] sm:$0xff]  ;;  %1080 = vst [vmem:[%s6034_s11 + $0x4e0] sm:$0xff] %v1079_v28  ;;  %1082 = vst [vmem:[%s6034_s11 + $0x4e8] sm:$0xff] %v1081_v29  ;;  %v1085_v31 = vld [vmem:[%s6026_s10 + $0x9f0] sm:$0xff] }
  0x6b   : > { %1084 = vst [vmem:[%s6034_s11 + $0x4f0] sm:$0xff] %v1083_v30  ;;  %v1087_v32 = vld [vmem:[%s6026_s10 + $0xa00] sm:$0xff]  ;;  %v1089_v33 = vld [vmem:[%s6026_s10 + $0xa10] sm:$0xff]  ;;  %1086 = vst [vmem:[%s6034_s11 + $0x4f8] sm:$0xff] %v1085_v31 }
  0x6c   : > { %1088 = vst [vmem:[%s6034_s11 + $0x500] sm:$0xff] %v1087_v32  ;;  %1090 = vst [vmem:[%s6034_s11 + $0x508] sm:$0xff] %v1089_v33  ;;  %v1091_v34 = vld [vmem:[%s6026_s10 + $0xa20] sm:$0xff]  ;;  %v1093_v35 = vld [vmem:[%s6026_s10 + $0xa30] sm:$0xff] }
  0x6d   : > { %v1095_v36 = vld [vmem:[%s6026_s10 + $0xa40] sm:$0xff]  ;;  %1092 = vst [vmem:[%s6034_s11 + $0x510] sm:$0xff] %v1091_v34  ;;  %1094 = vst [vmem:[%s6034_s11 + $0x518] sm:$0xff] %v1093_v35  ;;  %v1097_v37 = vld [vmem:[%s6026_s10 + $0xa50] sm:$0xff] }
  0x6e   : > { %1096 = vst [vmem:[%s6034_s11 + $0x520] sm:$0xff] %v1095_v36  ;;  %v1099_v38 = vld [vmem:[%s6026_s10 + $0xa60] sm:$0xff]  ;;  %v1101_v39 = vld [vmem:[%s6026_s10 + $0xa70] sm:$0xff]  ;;  %1098 = vst [vmem:[%s6034_s11 + $0x528] sm:$0xff] %v1097_v37 }
  0x6f   : > { %1100 = vst [vmem:[%s6034_s11 + $0x530] sm:$0xff] %v1099_v38  ;;  %1102 = vst [vmem:[%s6034_s11 + $0x538] sm:$0xff] %v1101_v39  ;;  %v1103_v40 = vld [vmem:[%s6026_s10 + $0xa80] sm:$0xff]  ;;  %v1105_v41 = vld [vmem:[%s6026_s10 + $0xa90] sm:$0xff] }
  0x70   : > { %v1107_v42 = vld [vmem:[%s6026_s10 + $0xaa0] sm:$0xff]  ;;  %1104 = vst [vmem:[%s6034_s11 + $0x540] sm:$0xff] %v1103_v40  ;;  %1106 = vst [vmem:[%s6034_s11 + $0x548] sm:$0xff] %v1105_v41  ;;  %v1109_v43 = vld [vmem:[%s6026_s10 + $0xab0] sm:$0xff] }
  0x71   : > { %1108 = vst [vmem:[%s6034_s11 + $0x550] sm:$0xff] %v1107_v42  ;;  %v1111_v44 = vld [vmem:[%s6026_s10 + $0xac0] sm:$0xff]  ;;  %v1113_v45 = vld [vmem:[%s6026_s10 + $0xad0] sm:$0xff]  ;;  %1110 = vst [vmem:[%s6034_s11 + $0x558] sm:$0xff] %v1109_v43 }
  0x72   : > { %1112 = vst [vmem:[%s6034_s11 + $0x560] sm:$0xff] %v1111_v44  ;;  %1114 = vst [vmem:[%s6034_s11 + $0x568] sm:$0xff] %v1113_v45  ;;  %v1115_v46 = vld [vmem:[%s6026_s10 + $0xae0] sm:$0xff]  ;;  %v1117_v47 = vld [vmem:[%s6026_s10 + $0xaf0] sm:$0xff] }
  0x73   : > { %v1119_v48 = vld [vmem:[%s6026_s10 + $0xb00] sm:$0xff]  ;;  %1116 = vst [vmem:[%s6034_s11 + $0x570] sm:$0xff] %v1115_v46  ;;  %1118 = vst [vmem:[%s6034_s11 + $0x578] sm:$0xff] %v1117_v47  ;;  %v1121_v49 = vld [vmem:[%s6026_s10 + $0xb10] sm:$0xff] }
  0x74   : > { %1120 = vst [vmem:[%s6034_s11 + $0x580] sm:$0xff] %v1119_v48  ;;  %v1123_v50 = vld [vmem:[%s6026_s10 + $0xb20] sm:$0xff]  ;;  %v1125_v51 = vld [vmem:[%s6026_s10 + $0xb30] sm:$0xff]  ;;  %1122 = vst [vmem:[%s6034_s11 + $0x588] sm:$0xff] %v1121_v49 }
  0x75   : > { %1124 = vst [vmem:[%s6034_s11 + $0x590] sm:$0xff] %v1123_v50  ;;  %1126 = vst [vmem:[%s6034_s11 + $0x598] sm:$0xff] %v1125_v51  ;;  %v1127_v52 = vld [vmem:[%s6026_s10 + $0xb40] sm:$0xff]  ;;  %v1129_v53 = vld [vmem:[%s6026_s10 + $0xb50] sm:$0xff] }
  0x76   : > { %v1131_v54 = vld [vmem:[%s6026_s10 + $0xb60] sm:$0xff]  ;;  %1128 = vst [vmem:[%s6034_s11 + $0x5a0] sm:$0xff] %v1127_v52  ;;  %1130 = vst [vmem:[%s6034_s11 + $0x5a8] sm:$0xff] %v1129_v53  ;;  %v1133_v55 = vld [vmem:[%s6026_s10 + $0xb70] sm:$0xff] }
  0x77   : > { %1132 = vst [vmem:[%s6034_s11 + $0x5b0] sm:$0xff] %v1131_v54  ;;  %v1135_v56 = vld [vmem:[%s6026_s10 + $0xb80] sm:$0xff]  ;;  %v1137_v57 = vld [vmem:[%s6026_s10 + $0xb90] sm:$0xff]  ;;  %1134 = vst [vmem:[%s6034_s11 + $0x5b8] sm:$0xff] %v1133_v55 }
  0x78   : > { %1136 = vst [vmem:[%s6034_s11 + $0x5c0] sm:$0xff] %v1135_v56  ;;  %1138 = vst [vmem:[%s6034_s11 + $0x5c8] sm:$0xff] %v1137_v57  ;;  %v1139_v58 = vld [vmem:[%s6026_s10 + $0xba0] sm:$0xff]  ;;  %v1141_v59 = vld [vmem:[%s6026_s10 + $0xbb0] sm:$0xff] }
  0x79   : > { %v1143_v60 = vld [vmem:[%s6026_s10 + $0xbc0] sm:$0xff]  ;;  %1140 = vst [vmem:[%s6034_s11 + $0x5d0] sm:$0xff] %v1139_v58  ;;  %1142 = vst [vmem:[%s6034_s11 + $0x5d8] sm:$0xff] %v1141_v59  ;;  %v1145_v61 = vld [vmem:[%s6026_s10 + $0xbd0] sm:$0xff] }
  0x7a   : > { %1144 = vst [vmem:[%s6034_s11 + $0x5e0] sm:$0xff] %v1143_v60  ;;  %v1147_v62 = vld [vmem:[%s6026_s10 + $0xbe0] sm:$0xff]  ;;  %v1149_v63 = vld [vmem:[%s6026_s10 + $0xbf0] sm:$0xff]  ;;  %1146 = vst [vmem:[%s6034_s11 + $0x5e8] sm:$0xff] %v1145_v61 }
  0x7b   : > { %1148 = vst [vmem:[%s6034_s11 + $0x5f0] sm:$0xff] %v1147_v62  ;;  %1150 = vst [vmem:[%s6034_s11 + $0x5f8] sm:$0xff] %v1149_v63  ;;  %v1151_v0 = vld [vmem:[%s6026_s10 + $0xc00] sm:$0xff]  ;;  %v1153_v1 = vld [vmem:[%s6026_s10 + $0xc10] sm:$0xff] }
  0x7c   : > { %v1155_v2 = vld [vmem:[%s6026_s10 + $0xc20] sm:$0xff]  ;;  %1152 = vst [vmem:[%s6034_s11 + $0x600] sm:$0xff] %v1151_v0  ;;  %1154 = vst [vmem:[%s6034_s11 + $0x608] sm:$0xff] %v1153_v1  ;;  %v1157_v3 = vld [vmem:[%s6026_s10 + $0xc30] sm:$0xff] }
  0x7d   : > { %1156 = vst [vmem:[%s6034_s11 + $0x610] sm:$0xff] %v1155_v2  ;;  %v1159_v4 = vld [vmem:[%s6026_s10 + $0xc40] sm:$0xff]  ;;  %v1161_v5 = vld [vmem:[%s6026_s10 + $0xc50] sm:$0xff]  ;;  %1158 = vst [vmem:[%s6034_s11 + $0x618] sm:$0xff] %v1157_v3 }
  0x7e   : > { %1160 = vst [vmem:[%s6034_s11 + $0x620] sm:$0xff] %v1159_v4  ;;  %1162 = vst [vmem:[%s6034_s11 + $0x628] sm:$0xff] %v1161_v5  ;;  %v1163_v6 = vld [vmem:[%s6026_s10 + $0xc60] sm:$0xff]  ;;  %v1165_v7 = vld [vmem:[%s6026_s10 + $0xc70] sm:$0xff] }
  0x7f   : > { %v1167_v8 = vld [vmem:[%s6026_s10 + $0xc80] sm:$0xff]  ;;  %1164 = vst [vmem:[%s6034_s11 + $0x630] sm:$0xff] %v1163_v6  ;;  %1166 = vst [vmem:[%s6034_s11 + $0x638] sm:$0xff] %v1165_v7  ;;  %v1169_v9 = vld [vmem:[%s6026_s10 + $0xc90] sm:$0xff] }
  0x80   : > { %1168 = vst [vmem:[%s6034_s11 + $0x640] sm:$0xff] %v1167_v8  ;;  %v1171_v10 = vld [vmem:[%s6026_s10 + $0xca0] sm:$0xff]  ;;  %v1173_v11 = vld [vmem:[%s6026_s10 + $0xcb0] sm:$0xff]  ;;  %1170 = vst [vmem:[%s6034_s11 + $0x648] sm:$0xff] %v1169_v9 }
  0x81   : > { %1172 = vst [vmem:[%s6034_s11 + $0x650] sm:$0xff] %v1171_v10  ;;  %1174 = vst [vmem:[%s6034_s11 + $0x658] sm:$0xff] %v1173_v11  ;;  %v1175_v12 = vld [vmem:[%s6026_s10 + $0xcc0] sm:$0xff]  ;;  %v1177_v13 = vld [vmem:[%s6026_s10 + $0xcd0] sm:$0xff] }
  0x82   : > { %v1179_v14 = vld [vmem:[%s6026_s10 + $0xce0] sm:$0xff]  ;;  %1176 = vst [vmem:[%s6034_s11 + $0x660] sm:$0xff] %v1175_v12  ;;  %1178 = vst [vmem:[%s6034_s11 + $0x668] sm:$0xff] %v1177_v13  ;;  %v1181_v15 = vld [vmem:[%s6026_s10 + $0xcf0] sm:$0xff] }
  0x83   : > { %1180 = vst [vmem:[%s6034_s11 + $0x670] sm:$0xff] %v1179_v14  ;;  %v1183_v16 = vld [vmem:[%s6026_s10 + $0xd00] sm:$0xff]  ;;  %v1185_v17 = vld [vmem:[%s6026_s10 + $0xd10] sm:$0xff]  ;;  %1182 = vst [vmem:[%s6034_s11 + $0x678] sm:$0xff] %v1181_v15 }
  0x84   : > { %1184 = vst [vmem:[%s6034_s11 + $0x680] sm:$0xff] %v1183_v16  ;;  %1186 = vst [vmem:[%s6034_s11 + $0x688] sm:$0xff] %v1185_v17  ;;  %v1187_v18 = vld [vmem:[%s6026_s10 + $0xd20] sm:$0xff]  ;;  %v1189_v19 = vld [vmem:[%s6026_s10 + $0xd30] sm:$0xff] }
  0x85   : > { %v1191_v20 = vld [vmem:[%s6026_s10 + $0xd40] sm:$0xff]  ;;  %1188 = vst [vmem:[%s6034_s11 + $0x690] sm:$0xff] %v1187_v18  ;;  %1190 = vst [vmem:[%s6034_s11 + $0x698] sm:$0xff] %v1189_v19  ;;  %v1193_v21 = vld [vmem:[%s6026_s10 + $0xd50] sm:$0xff] }
  0x86   : > { %1192 = vst [vmem:[%s6034_s11 + $0x6a0] sm:$0xff] %v1191_v20  ;;  %v1195_v22 = vld [vmem:[%s6026_s10 + $0xd60] sm:$0xff]  ;;  %v1197_v23 = vld [vmem:[%s6026_s10 + $0xd70] sm:$0xff]  ;;  %1194 = vst [vmem:[%s6034_s11 + $0x6a8] sm:$0xff] %v1193_v21 }
  0x87   : > { %1196 = vst [vmem:[%s6034_s11 + $0x6b0] sm:$0xff] %v1195_v22  ;;  %1198 = vst [vmem:[%s6034_s11 + $0x6b8] sm:$0xff] %v1197_v23  ;;  %v1199_v24 = vld [vmem:[%s6026_s10 + $0xd80] sm:$0xff]  ;;  %v1201_v25 = vld [vmem:[%s6026_s10 + $0xd90] sm:$0xff] }
  0x88   : > { %v1203_v26 = vld [vmem:[%s6026_s10 + $0xda0] sm:$0xff]  ;;  %1200 = vst [vmem:[%s6034_s11 + $0x6c0] sm:$0xff] %v1199_v24  ;;  %1202 = vst [vmem:[%s6034_s11 + $0x6c8] sm:$0xff] %v1201_v25  ;;  %v1205_v27 = vld [vmem:[%s6026_s10 + $0xdb0] sm:$0xff] }
  0x89   : > { %1204 = vst [vmem:[%s6034_s11 + $0x6d0] sm:$0xff] %v1203_v26  ;;  %v1207_v28 = vld [vmem:[%s6026_s10 + $0xdc0] sm:$0xff]  ;;  %v1209_v29 = vld [vmem:[%s6026_s10 + $0xdd0] sm:$0xff]  ;;  %1206 = vst [vmem:[%s6034_s11 + $0x6d8] sm:$0xff] %v1205_v27 }
  0x8a   : > { %1208 = vst [vmem:[%s6034_s11 + $0x6e0] sm:$0xff] %v1207_v28  ;;  %1210 = vst [vmem:[%s6034_s11 + $0x6e8] sm:$0xff] %v1209_v29  ;;  %v1211_v30 = vld [vmem:[%s6026_s10 + $0xde0] sm:$0xff]  ;;  %v1213_v31 = vld [vmem:[%s6026_s10 + $0xdf0] sm:$0xff] }
  0x8b   : > { %v1215_v32 = vld [vmem:[%s6026_s10 + $0xe00] sm:$0xff]  ;;  %1212 = vst [vmem:[%s6034_s11 + $0x6f0] sm:$0xff] %v1211_v30  ;;  %1214 = vst [vmem:[%s6034_s11 + $0x6f8] sm:$0xff] %v1213_v31  ;;  %v1217_v33 = vld [vmem:[%s6026_s10 + $0xe10] sm:$0xff] }
  0x8c   : > { %1216 = vst [vmem:[%s6034_s11 + $0x700] sm:$0xff] %v1215_v32  ;;  %v1219_v34 = vld [vmem:[%s6026_s10 + $0xe20] sm:$0xff]  ;;  %v1221_v35 = vld [vmem:[%s6026_s10 + $0xe30] sm:$0xff]  ;;  %1218 = vst [vmem:[%s6034_s11 + $0x708] sm:$0xff] %v1217_v33 }
  0x8d   : > { %1220 = vst [vmem:[%s6034_s11 + $0x710] sm:$0xff] %v1219_v34  ;;  %1222 = vst [vmem:[%s6034_s11 + $0x718] sm:$0xff] %v1221_v35  ;;  %v1223_v36 = vld [vmem:[%s6026_s10 + $0xe40] sm:$0xff]  ;;  %v1225_v37 = vld [vmem:[%s6026_s10 + $0xe50] sm:$0xff] }
  0x8e   : > { %v1227_v38 = vld [vmem:[%s6026_s10 + $0xe60] sm:$0xff]  ;;  %1224 = vst [vmem:[%s6034_s11 + $0x720] sm:$0xff] %v1223_v36  ;;  %1226 = vst [vmem:[%s6034_s11 + $0x728] sm:$0xff] %v1225_v37  ;;  %v1229_v39 = vld [vmem:[%s6026_s10 + $0xe70] sm:$0xff] }
  0x8f   : > { %1228 = vst [vmem:[%s6034_s11 + $0x730] sm:$0xff] %v1227_v38  ;;  %v1231_v40 = vld [vmem:[%s6026_s10 + $0xe80] sm:$0xff]  ;;  %v1233_v41 = vld [vmem:[%s6026_s10 + $0xe90] sm:$0xff]  ;;  %1230 = vst [vmem:[%s6034_s11 + $0x738] sm:$0xff] %v1229_v39 }
  0x90   : > { %1232 = vst [vmem:[%s6034_s11 + $0x740] sm:$0xff] %v1231_v40  ;;  %1234 = vst [vmem:[%s6034_s11 + $0x748] sm:$0xff] %v1233_v41  ;;  %v1235_v42 = vld [vmem:[%s6026_s10 + $0xea0] sm:$0xff]  ;;  %v1237_v43 = vld [vmem:[%s6026_s10 + $0xeb0] sm:$0xff] }
  0x91   : > { %v1239_v44 = vld [vmem:[%s6026_s10 + $0xec0] sm:$0xff]  ;;  %1236 = vst [vmem:[%s6034_s11 + $0x750] sm:$0xff] %v1235_v42  ;;  %1238 = vst [vmem:[%s6034_s11 + $0x758] sm:$0xff] %v1237_v43  ;;  %v1241_v45 = vld [vmem:[%s6026_s10 + $0xed0] sm:$0xff] }
  0x92   : > { %1240 = vst [vmem:[%s6034_s11 + $0x760] sm:$0xff] %v1239_v44  ;;  %v1243_v46 = vld [vmem:[%s6026_s10 + $0xee0] sm:$0xff]  ;;  %v1245_v47 = vld [vmem:[%s6026_s10 + $0xef0] sm:$0xff]  ;;  %1242 = vst [vmem:[%s6034_s11 + $0x768] sm:$0xff] %v1241_v45 }
  0x93   : > { %1244 = vst [vmem:[%s6034_s11 + $0x770] sm:$0xff] %v1243_v46  ;;  %1246 = vst [vmem:[%s6034_s11 + $0x778] sm:$0xff] %v1245_v47  ;;  %v1247_v48 = vld [vmem:[%s6026_s10 + $0xf00] sm:$0xff]  ;;  %v1249_v49 = vld [vmem:[%s6026_s10 + $0xf10] sm:$0xff] }
  0x94   : > { %v1251_v50 = vld [vmem:[%s6026_s10 + $0xf20] sm:$0xff]  ;;  %1248 = vst [vmem:[%s6034_s11 + $0x780] sm:$0xff] %v1247_v48  ;;  %1250 = vst [vmem:[%s6034_s11 + $0x788] sm:$0xff] %v1249_v49  ;;  %v1253_v51 = vld [vmem:[%s6026_s10 + $0xf30] sm:$0xff] }
  0x95   : > { %1252 = vst [vmem:[%s6034_s11 + $0x790] sm:$0xff] %v1251_v50  ;;  %v1255_v52 = vld [vmem:[%s6026_s10 + $0xf40] sm:$0xff]  ;;  %v1257_v53 = vld [vmem:[%s6026_s10 + $0xf50] sm:$0xff]  ;;  %1254 = vst [vmem:[%s6034_s11 + $0x798] sm:$0xff] %v1253_v51 }
  0x96   : > { %1256 = vst [vmem:[%s6034_s11 + $0x7a0] sm:$0xff] %v1255_v52  ;;  %1258 = vst [vmem:[%s6034_s11 + $0x7a8] sm:$0xff] %v1257_v53  ;;  %v1259_v54 = vld [vmem:[%s6026_s10 + $0xf60] sm:$0xff]  ;;  %v1261_v55 = vld [vmem:[%s6026_s10 + $0xf70] sm:$0xff] }
  0x97   : > { %v1263_v56 = vld [vmem:[%s6026_s10 + $0xf80] sm:$0xff]  ;;  %1260 = vst [vmem:[%s6034_s11 + $0x7b0] sm:$0xff] %v1259_v54  ;;  %1262 = vst [vmem:[%s6034_s11 + $0x7b8] sm:$0xff] %v1261_v55  ;;  %v1265_v57 = vld [vmem:[%s6026_s10 + $0xf90] sm:$0xff] }
  0x98   : > { %1264 = vst [vmem:[%s6034_s11 + $0x7c0] sm:$0xff] %v1263_v56  ;;  %v1267_v58 = vld [vmem:[%s6026_s10 + $0xfa0] sm:$0xff]  ;;  %v1269_v59 = vld [vmem:[%s6026_s10 + $0xfb0] sm:$0xff]  ;;  %1266 = vst [vmem:[%s6034_s11 + $0x7c8] sm:$0xff] %v1265_v57 }
  0x99   : > { %1268 = vst [vmem:[%s6034_s11 + $0x7d0] sm:$0xff] %v1267_v58  ;;  %1270 = vst [vmem:[%s6034_s11 + $0x7d8] sm:$0xff] %v1269_v59  ;;  %v1271_v60 = vld [vmem:[%s6026_s10 + $0xfc0] sm:$0xff]  ;;  %v1273_v61 = vld [vmem:[%s6026_s10 + $0xfd0] sm:$0xff] }
  0x9a   : > { %v1275_v62 = vld [vmem:[%s6026_s10 + $0xfe0] sm:$0xff]  ;;  %1272 = vst [vmem:[%s6034_s11 + $0x7e0] sm:$0xff] %v1271_v60  ;;  %1274 = vst [vmem:[%s6034_s11 + $0x7e8] sm:$0xff] %v1273_v61  ;;  %v1277_v63 = vld [vmem:[%s6026_s10 + $0xff0] sm:$0xff] }
  0x9b   : > { %1276 = vst [vmem:[%s6034_s11 + $0x7f0] sm:$0xff] %v1275_v62  ;;  %v1279_v0 = vld [vmem:[%s6026_s10 + $0x1000] sm:$0xff]  ;;  %v1281_v1 = vld [vmem:[%s6026_s10 + $0x1010] sm:$0xff]  ;;  %1278 = vst [vmem:[%s6034_s11 + $0x7f8] sm:$0xff] %v1277_v63 }
  0x9c   : > { %1280 = vst [vmem:[%s6034_s11 + $0x800] sm:$0xff] %v1279_v0  ;;  %1282 = vst [vmem:[%s6034_s11 + $0x808] sm:$0xff] %v1281_v1  ;;  %v1283_v2 = vld [vmem:[%s6026_s10 + $0x1020] sm:$0xff]  ;;  %v1285_v3 = vld [vmem:[%s6026_s10 + $0x1030] sm:$0xff] }
  0x9d   : > { %v1287_v4 = vld [vmem:[%s6026_s10 + $0x1040] sm:$0xff]  ;;  %1284 = vst [vmem:[%s6034_s11 + $0x810] sm:$0xff] %v1283_v2  ;;  %1286 = vst [vmem:[%s6034_s11 + $0x818] sm:$0xff] %v1285_v3  ;;  %v1289_v5 = vld [vmem:[%s6026_s10 + $0x1050] sm:$0xff] }
  0x9e   : > { %1288 = vst [vmem:[%s6034_s11 + $0x820] sm:$0xff] %v1287_v4  ;;  %v1291_v6 = vld [vmem:[%s6026_s10 + $0x1060] sm:$0xff]  ;;  %v1293_v7 = vld [vmem:[%s6026_s10 + $0x1070] sm:$0xff]  ;;  %1290 = vst [vmem:[%s6034_s11 + $0x828] sm:$0xff] %v1289_v5 }
  0x9f   : > { %1292 = vst [vmem:[%s6034_s11 + $0x830] sm:$0xff] %v1291_v6  ;;  %1294 = vst [vmem:[%s6034_s11 + $0x838] sm:$0xff] %v1293_v7  ;;  %v1295_v8 = vld [vmem:[%s6026_s10 + $0x1080] sm:$0xff]  ;;  %v1297_v9 = vld [vmem:[%s6026_s10 + $0x1090] sm:$0xff] }
  0xa0   : > { %v1299_v10 = vld [vmem:[%s6026_s10 + $0x10a0] sm:$0xff]  ;;  %1296 = vst [vmem:[%s6034_s11 + $0x840] sm:$0xff] %v1295_v8  ;;  %1298 = vst [vmem:[%s6034_s11 + $0x848] sm:$0xff] %v1297_v9  ;;  %v1301_v11 = vld [vmem:[%s6026_s10 + $0x10b0] sm:$0xff] }
  0xa1   : > { %1300 = vst [vmem:[%s6034_s11 + $0x850] sm:$0xff] %v1299_v10  ;;  %v1303_v12 = vld [vmem:[%s6026_s10 + $0x10c0] sm:$0xff]  ;;  %v1305_v13 = vld [vmem:[%s6026_s10 + $0x10d0] sm:$0xff]  ;;  %1302 = vst [vmem:[%s6034_s11 + $0x858] sm:$0xff] %v1301_v11 }
  0xa2   : > { %1304 = vst [vmem:[%s6034_s11 + $0x860] sm:$0xff] %v1303_v12  ;;  %1306 = vst [vmem:[%s6034_s11 + $0x868] sm:$0xff] %v1305_v13  ;;  %v1307_v14 = vld [vmem:[%s6026_s10 + $0x10e0] sm:$0xff]  ;;  %v1309_v15 = vld [vmem:[%s6026_s10 + $0x10f0] sm:$0xff] }
  0xa3   : > { %v1311_v16 = vld [vmem:[%s6026_s10 + $0x1100] sm:$0xff]  ;;  %1308 = vst [vmem:[%s6034_s11 + $0x870] sm:$0xff] %v1307_v14  ;;  %1310 = vst [vmem:[%s6034_s11 + $0x878] sm:$0xff] %v1309_v15  ;;  %v1313_v17 = vld [vmem:[%s6026_s10 + $0x1110] sm:$0xff] }
  0xa4   : > { %1312 = vst [vmem:[%s6034_s11 + $0x880] sm:$0xff] %v1311_v16  ;;  %v1315_v18 = vld [vmem:[%s6026_s10 + $0x1120] sm:$0xff]  ;;  %v1317_v19 = vld [vmem:[%s6026_s10 + $0x1130] sm:$0xff]  ;;  %1314 = vst [vmem:[%s6034_s11 + $0x888] sm:$0xff] %v1313_v17 }
  0xa5   : > { %1316 = vst [vmem:[%s6034_s11 + $0x890] sm:$0xff] %v1315_v18  ;;  %1318 = vst [vmem:[%s6034_s11 + $0x898] sm:$0xff] %v1317_v19  ;;  %v1319_v20 = vld [vmem:[%s6026_s10 + $0x1140] sm:$0xff]  ;;  %v1321_v21 = vld [vmem:[%s6026_s10 + $0x1150] sm:$0xff] }
  0xa6   : > { %v1323_v22 = vld [vmem:[%s6026_s10 + $0x1160] sm:$0xff]  ;;  %1320 = vst [vmem:[%s6034_s11 + $0x8a0] sm:$0xff] %v1319_v20  ;;  %1322 = vst [vmem:[%s6034_s11 + $0x8a8] sm:$0xff] %v1321_v21  ;;  %v1325_v23 = vld [vmem:[%s6026_s10 + $0x1170] sm:$0xff] }
  0xa7   : > { %1324 = vst [vmem:[%s6034_s11 + $0x8b0] sm:$0xff] %v1323_v22  ;;  %v1327_v24 = vld [vmem:[%s6026_s10 + $0x1180] sm:$0xff]  ;;  %v1329_v25 = vld [vmem:[%s6026_s10 + $0x1190] sm:$0xff]  ;;  %1326 = vst [vmem:[%s6034_s11 + $0x8b8] sm:$0xff] %v1325_v23 }
  0xa8   : > { %1328 = vst [vmem:[%s6034_s11 + $0x8c0] sm:$0xff] %v1327_v24  ;;  %1330 = vst [vmem:[%s6034_s11 + $0x8c8] sm:$0xff] %v1329_v25  ;;  %v1331_v26 = vld [vmem:[%s6026_s10 + $0x11a0] sm:$0xff]  ;;  %v1333_v27 = vld [vmem:[%s6026_s10 + $0x11b0] sm:$0xff] }
  0xa9   : > { %v1335_v28 = vld [vmem:[%s6026_s10 + $0x11c0] sm:$0xff]  ;;  %1332 = vst [vmem:[%s6034_s11 + $0x8d0] sm:$0xff] %v1331_v26  ;;  %1334 = vst [vmem:[%s6034_s11 + $0x8d8] sm:$0xff] %v1333_v27  ;;  %v1337_v29 = vld [vmem:[%s6026_s10 + $0x11d0] sm:$0xff] }
  0xaa   : > { %1336 = vst [vmem:[%s6034_s11 + $0x8e0] sm:$0xff] %v1335_v28  ;;  %v1339_v30 = vld [vmem:[%s6026_s10 + $0x11e0] sm:$0xff]  ;;  %v1341_v31 = vld [vmem:[%s6026_s10 + $0x11f0] sm:$0xff]  ;;  %1338 = vst [vmem:[%s6034_s11 + $0x8e8] sm:$0xff] %v1337_v29 }
  0xab   : > { %1340 = vst [vmem:[%s6034_s11 + $0x8f0] sm:$0xff] %v1339_v30  ;;  %1342 = vst [vmem:[%s6034_s11 + $0x8f8] sm:$0xff] %v1341_v31 }
  0xac PF: > { %p4609_p11 = scmp.ge.s32.totalorder %s5924_s20, 1  ;;  %p1355_p12 = scmp.lt.s32.totalorder %s5924_s20, 5 }
  0xae   : > { %p1356_p13 = pnand %p4609_p11, %p1355_p12 }
  0xaf   : > { %s1362_s21 = sand.u32 (!%p1356_p13), 1, %s5900_s14   ;;  %s4611_s14 = sshll.u32 (!%p1356_p13), %s5912_s17, 3 }
  0xb0   : > { %1359 = sbr.rel (%p1356_p13) target bundleno = 790 (0x316), region = 66  ;;  %p1395_p0 = scmp.lt.s32.totalorder (!%p1356_p13), %s4611_s14, 15 }
  0xb1   : > { %s5176_s24 = smul.u32 (!%p1356_p13), 2304, %s1362_s21  ;;  %s6978_s6 = sshll.u32 (!%p1356_p13), %s5908_s16, 1 }
  0xb2   : > { %p1403_p1 = scmp.lt.s32.totalorder (!%p1356_p13), %s6978_s6, 3  ;;  %s1391_s16 = sand.u32 (!%p1356_p13), 1, %s5892_s12  }
  0xb3   : > { %s6609_s25 = scalar_lea.vmem (!%p1356_p13), [#allocation2], %s5176_s24  ;;  %s4610_s12 = sshll.u32 (!%p1356_p13), %s1391_s16, 6 }
  0xb4   : > { %v5250_v32 = vld [vmem:[%s6609_s25 + $0x4] ss:$8 sps:$4 sm:$0xff] (!%p1356_p13)   ;;  %v5254_v34 = vld [vmem:[%s6609_s25] ss:$8 sps:$4 sm:$0xff] (!%p1356_p13)   ;;  %v5256_v36 = vld [vmem:[%s6609_s25 + $0x14] ss:$8 sps:$4 sm:$0xff] (!%p1356_p13)  }
  0xb5   : > { %v5252_v33 = vld [vmem:[%s6609_s25 + $0x404] ss:$8 sps:$4 sm:$0xff] (!%p1356_p13)   ;;  %3581 = vmatprep.subr.bf16.mxu1 (!%p1356_p13), %v5250_v32  ;;  %v5255_v35 = vld [vmem:[%s6609_s25 + $0x400] ss:$8 sps:$4 sm:$0xff] (!%p1356_p13)   ;;  %v5258_v37 = vld [vmem:[%s6609_s25 + $0x414] ss:$8 sps:$4 sm:$0xff] (!%p1356_p13)  }
  0xb6   : > { %3873 = vmatprep.subr.bf16.mxu0 (!%p1356_p13), %v5252_v33  ;;  %3582 = vmatpush1.bf16.msra.mxu1 (!%p1356_p13), %v5254_v34  ;;  %v5260_v38 = vld [vmem:[%s6609_s25 + $0x10] ss:$8 sps:$4 sm:$0xff] (!%p1356_p13)   ;;  %v5262_v40 = vld [vmem:[%s6609_s25 + $0x24] ss:$8 sps:$4 sm:$0xff] (!%p1356_p13)   ;;  %v5266_v42 = vld [vmem:[%s6609_s25 + $0x20] ss:$8 sps:$4 sm:$0xff] (!%p1356_p13)  }
  0xb7   : > { %3874 = vmatpush1.bf16.msra.mxu0 %v5255_v35  ;;  %3583 = vmatprep.subr.bf16.mxu1 %v5256_v36  ;;  %v5261_v39 = vld [vmem:[%s6609_s25 + $0x410] ss:$8 sps:$4 sm:$0xff]   ;;  %v5264_v41 = vld [vmem:[%s6609_s25 + $0x424] ss:$8 sps:$4 sm:$0xff]   ;;  %v5267_v43 = vld [vmem:[%s6609_s25 + $0x420] ss:$8 sps:$4 sm:$0xff]  }
  0xb8   : > { %3875 = vmatprep.subr.bf16.mxu0 %v5258_v37  ;;  %v5268_v44 = vld [vmem:[%s6609_s25 + $0x34] ss:$8 sps:$4 sm:$0xff]   ;;  %v5272_v46 = vld [vmem:[%s6609_s25 + $0x30] ss:$8 sps:$4 sm:$0xff]   ;;  %v5274_v48 = vld [vmem:[%s6609_s25 + $0x44] ss:$8 sps:$4 sm:$0xff]  }
  0xb9   : > { %v5270_v45 = vld [vmem:[%s6609_s25 + $0x434] ss:$8 sps:$4 sm:$0xff]   ;;  %v5273_v47 = vld [vmem:[%s6609_s25 + $0x430] ss:$8 sps:$4 sm:$0xff]   ;;  %v5276_v49 = vld [vmem:[%s6609_s25 + $0x444] ss:$8 sps:$4 sm:$0xff]  }
  0xba   : > { %3584 = vmatpush1.bf16.msra.mxu1 %v5260_v38  ;;  %v5278_v50 = vld [vmem:[%s6609_s25 + $0x40] ss:$8 sps:$4 sm:$0xff]   ;;  %v5280_v52 = vld [vmem:[%s6609_s25 + $0x54] ss:$8 sps:$4 sm:$0xff]   ;;  %v5284_v54 = vld [vmem:[%s6609_s25 + $0x50] ss:$8 sps:$4 sm:$0xff]  }
  0xbb   : > { %3876 = vmatpush1.bf16.msra.mxu0 %v5261_v39  ;;  %3585 = vmatprep.subr.bf16.mxu1 %v5262_v40  ;;  %v5279_v51 = vld [vmem:[%s6609_s25 + $0x440] ss:$8 sps:$4 sm:$0xff]   ;;  %v5282_v53 = vld [vmem:[%s6609_s25 + $0x454] ss:$8 sps:$4 sm:$0xff]   ;;  %v5285_v55 = vld [vmem:[%s6609_s25 + $0x450] ss:$8 sps:$4 sm:$0xff]  }
  0xbc   : > { %3877 = vmatprep.subr.bf16.mxu0 %v5264_v41  ;;  %v5286_v56 = vld [vmem:[%s6609_s25 + $0x64] ss:$8 sps:$4 sm:$0xff]   ;;  %v5290_v58 = vld [vmem:[%s6609_s25 + $0x60] ss:$8 sps:$4 sm:$0xff]   ;;  %v5292_v60 = vld [vmem:[%s6609_s25 + $0x74] ss:$8 sps:$4 sm:$0xff]  }
  0xbd   : > { %v5288_v57 = vld [vmem:[%s6609_s25 + $0x464] ss:$8 sps:$4 sm:$0xff]   ;;  %v5291_v59 = vld [vmem:[%s6609_s25 + $0x460] ss:$8 sps:$4 sm:$0xff]   ;;  %v5294_v61 = vld [vmem:[%s6609_s25 + $0x474] ss:$8 sps:$4 sm:$0xff]  }
  0xbe   : > { %3586 = vmatpush1.bf16.msra.mxu1 %v5266_v42  ;;  %v5296_v62 = vld [vmem:[%s6609_s25 + $0x70] ss:$8 sps:$4 sm:$0xff]   ;;  %v5298_v0 = vld [vmem:[%s6609_s25 + $0x84] ss:$8 sps:$4 sm:$0xff]   ;;  %v5302_v2 = vld [vmem:[%s6609_s25 + $0x80] ss:$8 sps:$4 sm:$0xff]  }
  0xbf   : > { %3878 = vmatpush1.bf16.msra.mxu0 %v5267_v43  ;;  %3587 = vmatprep.subr.bf16.mxu1 %v5268_v44  ;;  %v5297_v63 = vld [vmem:[%s6609_s25 + $0x470] ss:$8 sps:$4 sm:$0xff]   ;;  %v5300_v1 = vld [vmem:[%s6609_s25 + $0x484] ss:$8 sps:$4 sm:$0xff]   ;;  %v5303_v3 = vld [vmem:[%s6609_s25 + $0x480] ss:$8 sps:$4 sm:$0xff]  }
  0xc0   : > { %3879 = vmatprep.subr.bf16.mxu0 %v5270_v45  ;;  %v5304_v4 = vld [vmem:[%s6609_s25 + $0x94] ss:$8 sps:$4 sm:$0xff]   ;;  %s7176_s14 = smov (!%p1395_p0, %s4611_s14), 15  ;;  %v5308_v6 = vld [vmem:[%s6609_s25 + $0x90] ss:$8 sps:$4 sm:$0xff]   ;;  %s7092_s11 = scalar_lea.vmem [#allocation3], %s4610_s12 }
  0xc1   : > { %v5306_v5 = vld [vmem:[%s6609_s25 + $0x494] ss:$8 sps:$4 sm:$0xff]   ;;  %v5309_v7 = vld [vmem:[%s6609_s25 + $0x490] ss:$8 sps:$4 sm:$0xff]   ;;  %v5310_v8 = vld [vmem:[%s6609_s25 + $0xa4] ss:$8 sps:$4 sm:$0xff]  }
  0xc2   : > { %3588 = vmatpush1.bf16.msra.mxu1 %v5272_v46  ;;  %s5177_s26 = smul.u32 72, %s7176_s14  ;;  %v5312_v9 = vld [vmem:[%s6609_s25 + $0x4a4] ss:$8 sps:$4 sm:$0xff]   ;;  %v5314_v10 = vld [vmem:[%s6609_s25 + $0xa0] ss:$8 sps:$4 sm:$0xff]   ;;  %s4998_s21 = sshll.u32 (%p6013_p9), %s5912_s17, 5 }
  0xc3   : > { %3880 = vmatpush1.bf16.msra.mxu0 %v5273_v47  ;;  %3589 = vmatprep.subr.bf16.mxu1 %v5274_v48  ;;  %v5315_v11 = vld [vmem:[%s6609_s25 + $0x4a0] ss:$8 sps:$4 sm:$0xff]   ;;  %v5316_v12 = vld [vmem:[%s6609_s25 + $0xb4] ss:$8 sps:$4 sm:$0xff]   ;;  %v5320_v14 = vld [vmem:[%s6609_s25 + $0xb0] ss:$8 sps:$4 sm:$0xff]   ;;  %s4448_s24 = sadd.s32 (%p6013_p9), %s4998_s21, %s6978_s6 }
  0xc4   : > { %3881 = vmatprep.subr.bf16.mxu0 %v5276_v49  ;;  %s6660_s5 = scalar_lea.vmem %s7156_s0, %s5177_s26  ;;  %v5318_v13 = vld [vmem:[%s6609_s25 + $0x4b4] ss:$8 sps:$4 sm:$0xff]   ;;  %v5321_v15 = vld [vmem:[%s6609_s25 + $0x4b0] ss:$8 sps:$4 sm:$0xff]   ;;  %v5322_v17 = vld [vmem:[%s6609_s25 + $0xc4] ss:$8 sps:$4 sm:$0xff]  }
  0xc5   : > { %v5348_v16 = vld [vmem:[%s6660_s5 + $0x4] ss:$72 sps:$4 sm:$0xff]   ;;  %v5326_v20 = vld [vmem:[%s6609_s25 + $0xc0] ss:$8 sps:$4 sm:$0xff]   ;;  %v5328_v22 = vld [vmem:[%s6609_s25 + $0xd4] ss:$8 sps:$4 sm:$0xff]  }
  0xc6   : > { %3590 = vmatpush1.bf16.msra.mxu1 %v5278_v50  ;;  %v5324_v18 = vld [vmem:[%s6609_s25 + $0x4c4] ss:$8 sps:$4 sm:$0xff]   ;;  %3613 = vmatprep.mubr.bf16.mxu1 %v5348_v16  ;;  %v5327_v21 = vld [vmem:[%s6609_s25 + $0x4c0] ss:$8 sps:$4 sm:$0xff]   ;;  %v5330_v23 = vld [vmem:[%s6609_s25 + $0x4d4] ss:$8 sps:$4 sm:$0xff]  }
  0xc7   : > { %3882 = vmatpush1.bf16.msra.mxu0 %v5279_v51  ;;  %3591 = vmatprep.subr.bf16.mxu1 %v5280_v52  ;;  %v5354_v19 = vld [vmem:[%s6660_s5 + $0x24] ss:$72 sps:$4 sm:$0xff]   ;;  %v5332_v24 = vld [vmem:[%s6609_s25 + $0xd0] ss:$8 sps:$4 sm:$0xff]   ;;  %v5338_v28 = vld [vmem:[%s6609_s25 + $0xe0] ss:$8 sps:$4 sm:$0xff]  }
  0xc8   : > { %3883 = vmatprep.subr.bf16.mxu0 %v5282_v53  ;;  %3905 = vmatprep.mubr.bf16.mxu0 %v5354_v19  ;;  %v5333_v25 = vld [vmem:[%s6609_s25 + $0x4d0] ss:$8 sps:$4 sm:$0xff]   ;;  %v5334_v26 = vld [vmem:[%s6609_s25 + $0xe4] ss:$8 sps:$4 sm:$0xff]   ;;  %v5339_v29 = vld [vmem:[%s6609_s25 + $0x4e0] ss:$8 sps:$4 sm:$0xff]  }
  0xc9   : > { %v5336_v27 = vld [vmem:[%s6609_s25 + $0x4e4] ss:$8 sps:$4 sm:$0xff]   ;;  %v5340_v30 = vld [vmem:[%s6609_s25 + $0xf4] ss:$8 sps:$4 sm:$0xff]   ;;  %v5344_v32 = vld [vmem:[%s6609_s25 + $0xf0] ss:$8 sps:$4 sm:$0xff]  }
  0xca   : > { %3592 = vmatpush1.bf16.msra.mxu1 %v5284_v54  ;;  %v5342_v31 = vld [vmem:[%s6609_s25 + $0x4f4] ss:$8 sps:$4 sm:$0xff]   ;;  %v5345_v33 = vld [vmem:[%s6609_s25 + $0x4f0] ss:$8 sps:$4 sm:$0xff]   ;;  %v5351_v34 = vld [vmem:[%s6609_s25 + $0x104] ss:$8 sps:$4 sm:$0xff]  }
  0xcb   : > { %3884 = vmatpush1.bf16.msra.mxu0 %v5285_v55  ;;  %3593 = vmatprep.subr.bf16.mxu1 %v5286_v56  ;;  %v5357_v35 = vld [vmem:[%s6609_s25 + $0x504] ss:$8 sps:$4 sm:$0xff]   ;;  %v5346_v36 = vld [vmem:[%s6660_s5] ss:$72 sps:$4 sm:$0xff]   ;;  %v5360_v40 = vld [vmem:[%s6609_s25 + $0x114] ss:$8 sps:$4 sm:$0xff]  }
  0xcc   : > { %3885 = vmatprep.subr.bf16.mxu0 %v5288_v57  ;;  %v5349_v37 = vld [vmem:[%s6609_s25 + $0x100] ss:$8 sps:$4 sm:$0xff]   ;;  %v5363_v41 = vld [vmem:[%s6609_s25 + $0x514] ss:$8 sps:$4 sm:$0xff]   ;;  %v5358_v42 = vld [vmem:[%s6609_s25 + $0x110] ss:$8 sps:$4 sm:$0xff]  }
  0xcd   : > { %v5352_v38 = vld [vmem:[%s6660_s5 + $0x20] ss:$72 sps:$4 sm:$0xff]   ;;  %v5361_v43 = vld [vmem:[%s6609_s25 + $0x510] ss:$8 sps:$4 sm:$0xff]   ;;  %v5366_v44 = vld [vmem:[%s6609_s25 + $0x124] ss:$8 sps:$4 sm:$0xff]  }
  0xce   : > { %3594 = vmatpush1.bf16.msra.mxu1 %v5290_v58  ;;  %v5355_v39 = vld [vmem:[%s6609_s25 + $0x500] ss:$8 sps:$4 sm:$0xff]   ;;  %v5369_v45 = vld [vmem:[%s6609_s25 + $0x524] ss:$8 sps:$4 sm:$0xff]   ;;  %v5372_v48 = vld [vmem:[%s6609_s25 + $0x134] ss:$8 sps:$4 sm:$0xff]  }
  0xcf   : > { %3886 = vmatpush1.bf16.msra.mxu0 %v5291_v59  ;;  %3595 = vmatprep.subr.bf16.mxu1 %v5292_v60  ;;  %v5364_v46 = vld [vmem:[%s6609_s25 + $0x120] ss:$8 sps:$4 sm:$0xff]   ;;  %v5412_v49 = vld [vmem:[%s6660_s5 + $0x94] ss:$72 sps:$4 sm:$0xff]   ;;  %v5370_v51 = vld [vmem:[%s6609_s25 + $0x130] ss:$8 sps:$4 sm:$0xff]  }
  0xd0   : > { %3887 = vmatprep.subr.bf16.mxu0 %v5294_v61  ;;  %v5367_v47 = vld [vmem:[%s6609_s25 + $0x520] ss:$8 sps:$4 sm:$0xff]   ;;  %v5375_v50 = vld [vmem:[%s6609_s25 + $0x534] ss:$8 sps:$4 sm:$0xff]   ;;  %v5373_v52 = vld [vmem:[%s6609_s25 + $0x530] ss:$8 sps:$4 sm:$0xff]  }
  0xd1   : > { %v5417_v53 = vld [vmem:[%s6660_s5 + $0xb4] ss:$72 sps:$4 sm:$0xff]   ;;  %v5378_v54 = vld [vmem:[%s6609_s25 + $0x144] ss:$8 sps:$4 sm:$0xff]   ;;  %v5422_v56 = vld [vmem:[%s6660_s5 + $0x90] ss:$72 sps:$4 sm:$0xff]  }
  0xd2   : > { %3596 = vmatpush1.bf16.msra.mxu1 %v5296_v62  ;;  %v5381_v55 = vld [vmem:[%s6609_s25 + $0x544] ss:$8 sps:$4 sm:$0xff]   ;;  %v5423_v57 = vld [vmem:[%s6660_s5 + $0xb0] ss:$72 sps:$4 sm:$0xff]   ;;  %v5376_v58 = vld [vmem:[%s6609_s25 + $0x140] ss:$8 sps:$4 sm:$0xff]  }
  0xd3   : > { %3888 = vmatpush1.bf16.msra.mxu0 %v5297_v63  ;;  %3597 = vmatprep.subr.bf16.mxu1 %v5298_v0  ;;  %v5379_v59 = vld [vmem:[%s6609_s25 + $0x540] ss:$8 sps:$4 sm:$0xff]   ;;  %v5384_v60 = vld [vmem:[%s6609_s25 + $0x154] ss:$8 sps:$4 sm:$0xff]   ;;  %v5430_v61 = vld [vmem:[%s6660_s5 + $0x124] ss:$72 sps:$4 sm:$0xff]  }
  0xd4   : > { %3889 = vmatprep.subr.bf16.mxu0 %v5300_v1  ;;  %v5387_v62 = vld [vmem:[%s6609_s25 + $0x554] ss:$8 sps:$4 sm:$0xff]   ;;  %v5382_v63 = vld [vmem:[%s6609_s25 + $0x150] ss:$8 sps:$4 sm:$0xff]   ;;  %v5435_v1 = vld [vmem:[%s6660_s5 + $0x144] ss:$72 sps:$4 sm:$0xff]  }
  0xd5   : > { %v5385_v0 = vld [vmem:[%s6609_s25 + $0x550] ss:$8 sps:$4 sm:$0xff]   ;;  %v5403_v19 = vld [vmem:[%s6609_s25 + $0x580] ss:$8 sps:$4 sm:$0xff]   ;;  %s1404_s7 = scalar_select %p1403_p1, %s6978_s6, 3 }
  0xd6   : > { %3598 = vmatpush1.bf16.msra.mxu1 %v5302_v2  ;;  %v5390_v2 = vld [vmem:[%s6609_s25 + $0x164] ss:$8 sps:$4 sm:$0xff]   ;;  %v5458_v16 = vld [vmem:[%s6660_s5 + $0x1b0] ss:$72 sps:$4 sm:$0xff]   ;;  %s4986_s30 = sshll.u32 (%p6013_p9), %s4448_s24, 2 }
  0xd7   : > { %3890 = vmatpush1.bf16.msra.mxu0 %v5303_v3  ;;  %3599 = vmatprep.subr.bf16.mxu1 %v5304_v4  ;;  %v5393_v3 = vld [vmem:[%s6609_s25 + $0x564] ss:$8 sps:$4 sm:$0xff]   ;;  %v5440_v4 = vld [vmem:[%s6660_s5 + $0x120] ss:$72 sps:$4 sm:$0xff]   ;;  %s1405_s10 = scalar_lea.vmem %s7158_s2, %s1404_s7  ;;  %s4450_s26 = scalar_lea.vmem (%p6013_p9), %s7159_s3, %s4986_s30 }
  0xd8   : > { %3891 = vmatprep.subr.bf16.mxu0 %v5306_v5  ;;  %v5441_v5 = vld [vmem:[%s6660_s5 + $0x140] ss:$72 sps:$4 sm:$0xff]  }
  0xda   : > { %3600 = vmatpush1.bf16.msra.mxu1 %v5308_v6  ;;  %v5388_v6 = vld [vmem:[%s6609_s25 + $0x160] ss:$8 sps:$4 sm:$0xff]  }
  0xdb   : > { %3892 = vmatpush1.bf16.msra.mxu0 %v5309_v7  ;;  %3601 = vmatprep.subr.bf16.mxu1 %v5310_v8  ;;  %v5391_v7 = vld [vmem:[%s6609_s25 + $0x560] ss:$8 sps:$4 sm:$0xff]   ;;  %v5396_v8 = vld [vmem:[%s6609_s25 + $0x174] ss:$8 sps:$4 sm:$0xff]  }
  0xdc   : > { %3893 = vmatprep.subr.bf16.mxu0 %v5312_v9  ;;  %v5448_v9 = vld [vmem:[%s6660_s5 + $0x1b4] ss:$72 sps:$4 sm:$0xff]  }
  0xde   : > { %3602 = vmatpush1.bf16.msra.mxu1 %v5314_v10  ;;  %v5399_v10 = vld [vmem:[%s6609_s25 + $0x574] ss:$8 sps:$4 sm:$0xff]  }
  0xdf   : > { %3894 = vmatpush1.bf16.msra.mxu0 %v5315_v11  ;;  %3603 = vmatprep.subr.bf16.mxu1 %v5316_v12  ;;  %v5394_v11 = vld [vmem:[%s6609_s25 + $0x170] ss:$8 sps:$4 sm:$0xff]  }
  0xe0   : > { %3895 = vmatprep.subr.bf16.mxu0 %v5318_v13  ;;  %v5397_v12 = vld [vmem:[%s6609_s25 + $0x570] ss:$8 sps:$4 sm:$0xff]   ;;  %v5453_v13 = vld [vmem:[%s6660_s5 + $0x1d4] ss:$72 sps:$4 sm:$0xff]  }
  0xe2   : > { %3604 = vmatpush1.bf16.msra.mxu1 %v5320_v14  ;;  %v5402_v14 = vld [vmem:[%s6609_s25 + $0x184] ss:$8 sps:$4 sm:$0xff]  }
  0xe3   : > { %3896 = vmatpush1.bf16.msra.mxu0 %v5321_v15  ;;  %3605 = vmatprep.subr.bf16.mxu1 %v5322_v17  ;;  %v5405_v15 = vld [vmem:[%s6609_s25 + $0x584] ss:$8 sps:$4 sm:$0xff]   ;;  %v5459_v17 = vld [vmem:[%s6660_s5 + $0x1d0] ss:$72 sps:$4 sm:$0xff]  }
  0xe4   : > { %3897 = vmatprep.subr.bf16.mxu0 %v5324_v18  ;;  %v5400_v18 = vld [vmem:[%s6609_s25 + $0x180] ss:$8 sps:$4 sm:$0xff]  }
  0xe6   : > { %3606 = vmatpush1.bf16.msra.mxu1 %v5326_v20  ;;  %v5408_v20 = vld [vmem:[%s6609_s25 + $0x194] ss:$8 sps:$4 sm:$0xff]  }
  0xe7   : > { %3898 = vmatpush1.bf16.msra.mxu0 %v5327_v21  ;;  %3607 = vmatprep.subr.bf16.mxu1 %v5328_v22  ;;  %v5411_v21 = vld [vmem:[%s6609_s25 + $0x594] ss:$8 sps:$4 sm:$0xff]  }
  0xe8   : > { %3899 = vmatprep.subr.bf16.mxu0 %v5330_v23  ;;  %v5468_v22 = vld [vmem:[%s6660_s5 + $0xc] ss:$72 sps:$4 sm:$0xff]   ;;  %v5406_v23 = vld [vmem:[%s6609_s25 + $0x190] ss:$8 sps:$4 sm:$0xff]  }
  0xea   : > { %3608 = vmatpush1.bf16.msra.mxu1 %v5332_v24  ;;  %v5409_v24 = vld [vmem:[%s6609_s25 + $0x590] ss:$8 sps:$4 sm:$0xff]  }
  0xeb   : > { %3900 = vmatpush1.bf16.msra.mxu0 %v5333_v25  ;;  %3609 = vmatprep.subr.bf16.mxu1 %v5334_v26  ;;  %v5474_v25 = vld [vmem:[%s6660_s5 + $0x2c] ss:$72 sps:$4 sm:$0xff]  }
  0xec   : > { %3901 = vmatprep.subr.bf16.mxu0 %v5336_v27  ;;  %v5416_v26 = vld [vmem:[%s6609_s25 + $0x1a4] ss:$8 sps:$4 sm:$0xff]  }
  0xed   : > { %v5421_v27 = vld [vmem:[%s6609_s25 + $0x5a4] ss:$8 sps:$4 sm:$0xff]  }
  0xee   : > { %3610 = vmatpush1.bf16.msra.mxu1 %v5338_v28  ;;  %v5414_v28 = vld [vmem:[%s6609_s25 + $0x1a0] ss:$8 sps:$4 sm:$0xff]  }
  0xef   : > { %3902 = vmatpush1.bf16.msra.mxu0 %v5339_v29  ;;  %3611 = vmatprep.subr.bf16.mxu1 %v5340_v30  ;;  %v5419_v29 = vld [vmem:[%s6609_s25 + $0x5a0] ss:$8 sps:$4 sm:$0xff]   ;;  %v5426_v30 = vld [vmem:[%s6609_s25 + $0x1b4] ss:$8 sps:$4 sm:$0xff]  }
  0xf0   : > { %3903 = vmatprep.subr.bf16.mxu0 %v5342_v31  ;;  %v5429_v31 = vld [vmem:[%s6609_s25 + $0x5b4] ss:$8 sps:$4 sm:$0xff]  }
  0xf2   : > { %3612 = vmatpush1.bf16.msra.mxu1 %v5344_v32  ;;  %v5424_v32 = vld [vmem:[%s6609_s25 + $0x1b0] ss:$8 sps:$4 sm:$0xff]  }
  0xf3   : > { %3904 = vmatpush1.bf16.msra.mxu0 %v5345_v33  ;;  %3654 = vmatprep.subr.bf16.mxu1 %v5351_v34  ;;  %v5427_v33 = vld [vmem:[%s6609_s25 + $0x5b0] ss:$8 sps:$4 sm:$0xff]   ;;  %v5434_v34 = vld [vmem:[%s6609_s25 + $0x1c4] ss:$8 sps:$4 sm:$0xff]  }
  0xf4   : > { %3946 = vmatprep.subr.bf16.mxu0 %v5357_v35  ;;  %v5439_v35 = vld [vmem:[%s6609_s25 + $0x5c4] ss:$8 sps:$4 sm:$0xff]  }
  0xf5   : > { %3614 = vmatmul.mubr.bf16.vlgmr.msra.gmra.mrb[0].mxu1 %v5346_v36  ;;  %v5432_v36 = vld [vmem:[%s6609_s25 + $0x1c0] ss:$8 sps:$4 sm:$0xff]  }
  0xf6   : > { %3906 = vmatmul.mubr.bf16.vlgmr.msra.gmra.mrb[0].mxu0 %v5352_v38  ;;  %3655 = vmatpush1.bf16.msra.mxu1 %v5349_v37  ;;  %v5437_v37 = vld [vmem:[%s6609_s25 + $0x5c0] ss:$8 sps:$4 sm:$0xff]   ;;  %v5444_v38 = vld [vmem:[%s6609_s25 + $0x1d4] ss:$8 sps:$4 sm:$0xff]  }
  0xf7   : > { %3947 = vmatpush1.bf16.msra.mxu0 %v5355_v39  ;;  %3656 = vmatprep.subr.bf16.mxu1 %v5360_v40  ;;  %v5447_v39 = vld [vmem:[%s6609_s25 + $0x5d4] ss:$8 sps:$4 sm:$0xff]   ;;  %v5442_v40 = vld [vmem:[%s6609_s25 + $0x1d0] ss:$8 sps:$4 sm:$0xff]  }
  0xf8   : > { %3948 = vmatprep.subr.bf16.mxu0 %v5363_v41  ;;  %3623 = vmatprep.mubr.bf16.mxu1 %v5412_v49  ;;  %v5445_v41 = vld [vmem:[%s6609_s25 + $0x5d0] ss:$8 sps:$4 sm:$0xff]  }
  0xf9   : > { %3915 = vmatprep.mubr.bf16.mxu0 %v5417_v53  ;;  %v5463_v49 = vld [vmem:[%s6609_s25 + $0x5f0] ss:$8 sps:$4 sm:$0xff]   ;;  %v5469_v53 = vld [vmem:[%s6609_s25 + $0x200] ss:$8 sps:$4 sm:$0xff]  }
  0xfa   : > { %3657 = vmatpush1.bf16.msra.mxu1 %v5358_v42  ;;  %v5452_v42 = vld [vmem:[%s6609_s25 + $0x1e4] ss:$8 sps:$4 sm:$0xff]  }
  0xfb   : > { %3949 = vmatpush1.bf16.msra.mxu0 %v5361_v43  ;;  %3658 = vmatprep.subr.bf16.mxu1 %v5366_v44  ;;  %v5457_v43 = vld [vmem:[%s6609_s25 + $0x5e4] ss:$8 sps:$4 sm:$0xff]   ;;  %v5450_v44 = vld [vmem:[%s6609_s25 + $0x1e0] ss:$8 sps:$4 sm:$0xff]  }
  0xfc   : > { %3950 = vmatprep.subr.bf16.mxu0 %v5369_v45  ;;  %v5455_v45 = vld [vmem:[%s6609_s25 + $0x5e0] ss:$8 sps:$4 sm:$0xff]  }
  0xfd   : > { %3624 = vmatmul.mubr.bf16.gmra.mrb[4].mxu1 %v5422_v56  ;;  %v5480_v56 = vld [vmem:[%s6609_s25 + $0x214] ss:$8 sps:$4 sm:$0xff]  }
  0xfe   : > { %3659 = vmatpush1.bf16.msra.mxu1 %v5364_v46  ;;  %3916 = vmatmul.mubr.bf16.gmra.mrb[4].mxu0 %v5423_v57  ;;  %v5462_v46 = vld [vmem:[%s6609_s25 + $0x1f4] ss:$8 sps:$4 sm:$0xff]  }
  0xff   : > { %3951 = vmatpush1.bf16.msra.mxu0 %v5367_v47  ;;  %3660 = vmatprep.subr.bf16.mxu1 %v5372_v48  ;;  %v5465_v47 = vld [vmem:[%s6609_s25 + $0x5f4] ss:$8 sps:$4 sm:$0xff]   ;;  %v5460_v48 = vld [vmem:[%s6609_s25 + $0x1f0] ss:$8 sps:$4 sm:$0xff]  }
 0x100   : > { %3952 = vmatprep.subr.bf16.mxu0 %v5375_v50  ;;  %3633 = vmatprep.mubr.bf16.mxu1 %v5430_v61  ;;  %v5471_v50 = vld [vmem:[%s6609_s25 + $0x204] ss:$8 sps:$4 sm:$0xff]   ;;  %v5483_v57 = vld [vmem:[%s6609_s25 + $0x614] ss:$8 sps:$4 sm:$0xff]   ;;  %v5481_v61 = vld [vmem:[%s6609_s25 + $0x610] ss:$8 sps:$4 sm:$0xff]  }
 0x101   : > { %3925 = vmatprep.mubr.bf16.mxu0 %v5435_v1  ;;  %v5542_v1 = vld [vmem:[%s6660_s5 + $0x98] ss:$72 sps:$4 sm:$0xff]  }
 0x102   : > { %3661 = vmatpush1.bf16.msra.mxu1 %v5370_v51  ;;  %v5477_v51 = vld [vmem:[%s6609_s25 + $0x604] ss:$8 sps:$4 sm:$0xff]  }
 0x103   : > { %3953 = vmatpush1.bf16.msra.mxu0 %v5373_v52  ;;  %3662 = vmatprep.subr.bf16.mxu1 %v5378_v54  ;;  %v5466_v52 = vld [vmem:[%s6660_s5 + $0x8] ss:$72 sps:$4 sm:$0xff]  }
 0x104   : > { %3954 = vmatprep.subr.bf16.mxu0 %v5381_v55  ;;  %v5472_v54 = vld [vmem:[%s6660_s5 + $0x28] ss:$72 sps:$4 sm:$0xff]  }
 0x105   : > { %3634 = vmatmul.mubr.bf16.gmra.mrb[8].mxu1 %v5440_v4  ;;  %v5475_v55 = vld [vmem:[%s6609_s25 + $0x600] ss:$8 sps:$4 sm:$0xff]   ;;  %v5492_v4 = vld [vmem:[%s6609_s25 + $0x234] ss:$8 sps:$4 sm:$0xff]  }
 0x106   : > { %3663 = vmatpush1.bf16.msra.mxu1 %v5376_v58  ;;  %3926 = vmatmul.mubr.bf16.gmra.mrb[8].mxu0 %v5441_v5  ;;  %v5532_v58 = vld [vmem:[%s6660_s5 + $0x9c] ss:$72 sps:$4 sm:$0xff]  }
 0x107   : > { %3955 = vmatpush1.bf16.msra.mxu0 %v5379_v59  ;;  %3664 = vmatprep.subr.bf16.mxu1 %v5384_v60  ;;  %v5537_v59 = vld [vmem:[%s6660_s5 + $0xbc] ss:$72 sps:$4 sm:$0xff]   ;;  %v5478_v60 = vld [vmem:[%s6609_s25 + $0x210] ss:$8 sps:$4 sm:$0xff]  }
 0x108   : > { %3956 = vmatprep.subr.bf16.mxu0 %v5387_v62  ;;  %3643 = vmatprep.mubr.bf16.mxu1 %v5448_v9  ;;  %v5486_v62 = vld [vmem:[%s6609_s25 + $0x224] ss:$8 sps:$4 sm:$0xff]   ;;  %v5495_v5 = vld [vmem:[%s6609_s25 + $0x634] ss:$8 sps:$4 sm:$0xff]   ;;  %v5493_v9 = vld [vmem:[%s6609_s25 + $0x630] ss:$8 sps:$4 sm:$0xff]  }
 0x109   : > { %3935 = vmatprep.mubr.bf16.mxu0 %v5453_v13  ;;  %v5560_v13 = vld [vmem:[%s6660_s5 + $0x128] ss:$72 sps:$4 sm:$0xff]  }
 0x10a   : > { %3665 = vmatpush1.bf16.msra.mxu1 %v5382_v63  ;;  %v5489_v63 = vld [vmem:[%s6609_s25 + $0x624] ss:$8 sps:$4 sm:$0xff]  }
 0x10b   : > { %3957 = vmatpush1.bf16.msra.mxu0 %v5385_v0  ;;  %3666 = vmatprep.subr.bf16.mxu1 %v5390_v2  ;;  %v5484_v0 = vld [vmem:[%s6609_s25 + $0x220] ss:$8 sps:$4 sm:$0xff]  }
 0x10c   : > { %3958 = vmatprep.subr.bf16.mxu0 %v5393_v3  ;;  %v5543_v2 = vld [vmem:[%s6660_s5 + $0xb8] ss:$72 sps:$4 sm:$0xff]  }
 0x10d   : > { %3644 = vmatmul.mubr.bf16.gmra.mrb[12].mxu1 %v5458_v16  ;;  %v5487_v3 = vld [vmem:[%s6609_s25 + $0x620] ss:$8 sps:$4 sm:$0xff]   ;;  %v5504_v16 = vld [vmem:[%s6609_s25 + $0x254] ss:$8 sps:$4 sm:$0xff]  }
 0x10e   : > { %3667 = vmatpush1.bf16.msra.mxu1 %v5388_v6  ;;  %3936 = vmatmul.mubr.bf16.gmra.mrb[12].mxu0 %v5459_v17  ;;  %v5550_v6 = vld [vmem:[%s6660_s5 + $0x12c] ss:$72 sps:$4 sm:$0xff]  }
 0x10f   : > { %3959 = vmatpush1.bf16.msra.mxu0 %v5391_v7  ;;  %3668 = vmatprep.subr.bf16.mxu1 %v5396_v8  ;;  %v5555_v7 = vld [vmem:[%s6660_s5 + $0x14c] ss:$72 sps:$4 sm:$0xff]   ;;  %v5490_v8 = vld [vmem:[%s6609_s25 + $0x230] ss:$8 sps:$4 sm:$0xff]  }
 0x110   : > { %3960 = vmatprep.subr.bf16.mxu0 %v5399_v10  ;;  %3686 = vmatprep.mubr.bf16.mxu1 %v5468_v22  ;;  %v5498_v10 = vld [vmem:[%s6609_s25 + $0x244] ss:$8 sps:$4 sm:$0xff]   ;;  %v5507_v17 = vld [vmem:[%s6609_s25 + $0x654] ss:$8 sps:$4 sm:$0xff]  }
 0x111   : > { %3978 = vmatprep.mubr.bf16.mxu0 %v5474_v25  ;;  %v5510_v22 = vld [vmem:[%s6609_s25 + $0x264] ss:$8 sps:$4 sm:$0xff]   ;;  %v5511_v25 = vld [vmem:[%s6609_s25 + $0x660] ss:$8 sps:$4 sm:$0xff]  }
 0x112   : > { %3669 = vmatpush1.bf16.msra.mxu1 %v5394_v11  ;;  %v5501_v11 = vld [vmem:[%s6609_s25 + $0x644] ss:$8 sps:$4 sm:$0xff]  }
 0x113   : > { %3961 = vmatpush1.bf16.msra.mxu0 %v5397_v12  ;;  %3670 = vmatprep.subr.bf16.mxu1 %v5402_v14  ;;  %v5496_v12 = vld [vmem:[%s6609_s25 + $0x240] ss:$8 sps:$4 sm:$0xff]  }
 0x114   : > { %3962 = vmatprep.subr.bf16.mxu0 %v5405_v15  ;;  %v5561_v14 = vld [vmem:[%s6660_s5 + $0x148] ss:$72 sps:$4 sm:$0xff]  }
 0x115   : > { %v5499_v15 = vld [vmem:[%s6609_s25 + $0x640] ss:$8 sps:$4 sm:$0xff]  }
 0x116   : > { %3671 = vmatpush1.bf16.msra.mxu1 %v5400_v18  ;;  %v5568_v18 = vld [vmem:[%s6660_s5 + $0x1bc] ss:$72 sps:$4 sm:$0xff]  }
 0x117   : > { %3963 = vmatpush1.bf16.msra.mxu0 %v5403_v19  ;;  %3672 = vmatprep.subr.bf16.mxu1 %v5408_v20  ;;  %v5573_v19 = vld [vmem:[%s6660_s5 + $0x1dc] ss:$72 sps:$4 sm:$0xff]   ;;  %v5502_v20 = vld [vmem:[%s6609_s25 + $0x250] ss:$8 sps:$4 sm:$0xff]  }
 0x118   : > { %3964 = vmatprep.subr.bf16.mxu0 %v5411_v21  ;;  %v5505_v21 = vld [vmem:[%s6609_s25 + $0x650] ss:$8 sps:$4 sm:$0xff]  }
 0x11a   : > { %3673 = vmatpush1.bf16.msra.mxu1 %v5406_v23  ;;  %v5513_v23 = vld [vmem:[%s6609_s25 + $0x664] ss:$8 sps:$4 sm:$0xff]  }
 0x11b   : > { %3965 = vmatpush1.bf16.msra.mxu0 %v5409_v24  ;;  %3674 = vmatprep.subr.bf16.mxu1 %v5416_v26  ;;  %v5508_v24 = vld [vmem:[%s6609_s25 + $0x260] ss:$8 sps:$4 sm:$0xff]  }
 0x11c   : > { %3966 = vmatprep.subr.bf16.mxu0 %v5421_v27  ;;  %v5578_v26 = vld [vmem:[%s6660_s5 + $0x1b8] ss:$72 sps:$4 sm:$0xff]  }
 0x11d   : > { %v5579_v27 = vld [vmem:[%s6660_s5 + $0x1d8] ss:$72 sps:$4 sm:$0xff]  }
 0x11e   : > { %3675 = vmatpush1.bf16.msra.mxu1 %v5414_v28  ;;  %v5516_v28 = vld [vmem:[%s6609_s25 + $0x274] ss:$8 sps:$4 sm:$0xff]  }
 0x11f   : > { %3967 = vmatpush1.bf16.msra.mxu0 %v5419_v29  ;;  %3676 = vmatprep.subr.bf16.mxu1 %v5426_v30  ;;  %v5519_v29 = vld [vmem:[%s6609_s25 + $0x674] ss:$8 sps:$4 sm:$0xff]  }
 0x120   : > { %3968 = vmatprep.subr.bf16.mxu0 %v5429_v31  ;;  %v5588_v30 = vld [vmem:[%s6660_s5 + $0x14] ss:$72 sps:$4 sm:$0xff]  }
 0x121   : > { %v5594_v31 = vld [vmem:[%s6660_s5 + $0x34] ss:$72 sps:$4 sm:$0xff]  }
 0x122   : > { %3677 = vmatpush1.bf16.msra.mxu1 %v5424_v32  ;;  %v5514_v32 = vld [vmem:[%s6609_s25 + $0x270] ss:$8 sps:$4 sm:$0xff]  }
 0x123   : > { %3969 = vmatpush1.bf16.msra.mxu0 %v5427_v33  ;;  %3678 = vmatprep.subr.bf16.mxu1 %v5434_v34  ;;  %v5517_v33 = vld [vmem:[%s6609_s25 + $0x670] ss:$8 sps:$4 sm:$0xff]   ;;  %v5522_v34 = vld [vmem:[%s6609_s25 + $0x284] ss:$8 sps:$4 sm:$0xff]  }
 0x124   : > { %3970 = vmatprep.subr.bf16.mxu0 %v5439_v35  ;;  %v5525_v35 = vld [vmem:[%s6609_s25 + $0x684] ss:$8 sps:$4 sm:$0xff]  }
 0x126   : > { %3679 = vmatpush1.bf16.msra.mxu1 %v5432_v36  ;;  %v5520_v36 = vld [vmem:[%s6609_s25 + $0x280] ss:$8 sps:$4 sm:$0xff]  }
 0x127   : > { %3971 = vmatpush1.bf16.msra.mxu0 %v5437_v37  ;;  %3680 = vmatprep.subr.bf16.mxu1 %v5444_v38  ;;  %v5523_v37 = vld [vmem:[%s6609_s25 + $0x680] ss:$8 sps:$4 sm:$0xff]   ;;  %v5528_v38 = vld [vmem:[%s6609_s25 + $0x294] ss:$8 sps:$4 sm:$0xff]  }
 0x128   : > { %3972 = vmatprep.subr.bf16.mxu0 %v5447_v39  ;;  %v5531_v39 = vld [vmem:[%s6609_s25 + $0x694] ss:$8 sps:$4 sm:$0xff]  }
 0x12a   : > { %3681 = vmatpush1.bf16.msra.mxu1 %v5442_v40  ;;  %v5526_v40 = vld [vmem:[%s6609_s25 + $0x290] ss:$8 sps:$4 sm:$0xff]  }
 0x12b   : > { %3973 = vmatpush1.bf16.msra.mxu0 %v5445_v41  ;;  %3682 = vmatprep.subr.bf16.mxu1 %v5452_v42  ;;  %v5529_v41 = vld [vmem:[%s6609_s25 + $0x690] ss:$8 sps:$4 sm:$0xff]   ;;  %v5536_v42 = vld [vmem:[%s6609_s25 + $0x2a4] ss:$8 sps:$4 sm:$0xff]  }
 0x12c   : > { %3974 = vmatprep.subr.bf16.mxu0 %v5457_v43  ;;  %v5541_v43 = vld [vmem:[%s6609_s25 + $0x6a4] ss:$8 sps:$4 sm:$0xff]  }
 0x12e   : > { %3683 = vmatpush1.bf16.msra.mxu1 %v5450_v44  ;;  %v5534_v44 = vld [vmem:[%s6609_s25 + $0x2a0] ss:$8 sps:$4 sm:$0xff]  }
 0x12f   : > { %3975 = vmatpush1.bf16.msra.mxu0 %v5455_v45  ;;  %3684 = vmatprep.subr.bf16.mxu1 %v5462_v46  ;;  %v5539_v45 = vld [vmem:[%s6609_s25 + $0x6a0] ss:$8 sps:$4 sm:$0xff]   ;;  %v5546_v46 = vld [vmem:[%s6609_s25 + $0x2b4] ss:$8 sps:$4 sm:$0xff]  }
 0x130   : > { %3976 = vmatprep.subr.bf16.mxu0 %v5465_v47  ;;  %v5549_v47 = vld [vmem:[%s6609_s25 + $0x6b4] ss:$8 sps:$4 sm:$0xff]  }
 0x132   : > { %3685 = vmatpush1.bf16.msra.mxu1 %v5460_v48  ;;  %v5544_v48 = vld [vmem:[%s6609_s25 + $0x2b0] ss:$8 sps:$4 sm:$0xff]  }
 0x133   : > { %3977 = vmatpush1.bf16.msra.mxu0 %v5463_v49  ;;  %3727 = vmatprep.subr.bf16.mxu1 %v5471_v50  ;;  %v5547_v49 = vld [vmem:[%s6609_s25 + $0x6b0] ss:$8 sps:$4 sm:$0xff]   ;;  %v5554_v50 = vld [vmem:[%s6609_s25 + $0x2c4] ss:$8 sps:$4 sm:$0xff]  }
 0x134   : > { %4019 = vmatprep.subr.bf16.mxu0 %v5477_v51  ;;  %v5559_v51 = vld [vmem:[%s6609_s25 + $0x6c4] ss:$8 sps:$4 sm:$0xff]  }
 0x135   : > { %3687 = vmatmul.mubr.bf16.vlgmr.msra.gmra.mrb[0].mxu1 %v5466_v52  ;;  %v5552_v52 = vld [vmem:[%s6609_s25 + $0x2c0] ss:$8 sps:$4 sm:$0xff]  }
 0x136   : > { %3979 = vmatmul.mubr.bf16.vlgmr.msra.gmra.mrb[0].mxu0 %v5472_v54  ;;  %3728 = vmatpush1.bf16.msra.mxu1 %v5469_v53  ;;  %v5557_v53 = vld [vmem:[%s6609_s25 + $0x6c0] ss:$8 sps:$4 sm:$0xff]   ;;  %v5564_v54 = vld [vmem:[%s6609_s25 + $0x2d4] ss:$8 sps:$4 sm:$0xff]  }
 0x137   : > { %4020 = vmatpush1.bf16.msra.mxu0 %v5475_v55  ;;  %3729 = vmatprep.subr.bf16.mxu1 %v5480_v56  ;;  %v5567_v55 = vld [vmem:[%s6609_s25 + $0x6d4] ss:$8 sps:$4 sm:$0xff]   ;;  %v5562_v56 = vld [vmem:[%s6609_s25 + $0x2d0] ss:$8 sps:$4 sm:$0xff]  }
 0x138   : > { %4021 = vmatprep.subr.bf16.mxu0 %v5483_v57  ;;  %3696 = vmatprep.mubr.bf16.mxu1 %v5532_v58  ;;  %v5565_v57 = vld [vmem:[%s6609_s25 + $0x6d0] ss:$8 sps:$4 sm:$0xff]   ;;  %v5572_v58 = vld [vmem:[%s6609_s25 + $0x2e4] ss:$8 sps:$4 sm:$0xff]  }
 0x139   : > { %3988 = vmatprep.mubr.bf16.mxu0 %v5537_v59  ;;  %v5577_v59 = vld [vmem:[%s6609_s25 + $0x6e4] ss:$8 sps:$4 sm:$0xff]  }
 0x13a   : > { %3730 = vmatpush1.bf16.msra.mxu1 %v5478_v60  ;;  %v5570_v60 = vld [vmem:[%s6609_s25 + $0x2e0] ss:$8 sps:$4 sm:$0xff]  }
 0x13b   : > { %4022 = vmatpush1.bf16.msra.mxu0 %v5481_v61  ;;  %3731 = vmatprep.subr.bf16.mxu1 %v5486_v62  ;;  %v5575_v61 = vld [vmem:[%s6609_s25 + $0x6e0] ss:$8 sps:$4 sm:$0xff]   ;;  %v5582_v62 = vld [vmem:[%s6609_s25 + $0x2f4] ss:$8 sps:$4 sm:$0xff]  }
 0x13c   : > { %4023 = vmatprep.subr.bf16.mxu0 %v5489_v63  ;;  %v5585_v63 = vld [vmem:[%s6609_s25 + $0x6f4] ss:$8 sps:$4 sm:$0xff]  }
 0x13d   : > { %3697 = vmatmul.mubr.bf16.gmra.mrb[4].mxu1 %v5542_v1  ;;  %v5583_v1 = vld [vmem:[%s6609_s25 + $0x6f0] ss:$8 sps:$4 sm:$0xff]  }
 0x13e   : > { %3989 = vmatmul.mubr.bf16.gmra.mrb[4].mxu0 %v5543_v2  ;;  %3732 = vmatpush1.bf16.msra.mxu1 %v5484_v0  ;;  %v5580_v0 = vld [vmem:[%s6609_s25 + $0x2f0] ss:$8 sps:$4 sm:$0xff]   ;;  %v5591_v2 = vld [vmem:[%s6609_s25 + $0x304] ss:$8 sps:$4 sm:$0xff]  }
 0x13f   : > { %4024 = vmatpush1.bf16.msra.mxu0 %v5487_v3  ;;  %3733 = vmatprep.subr.bf16.mxu1 %v5492_v4  ;;  %v5597_v3 = vld [vmem:[%s6609_s25 + $0x704] ss:$8 sps:$4 sm:$0xff]   ;;  %v5586_v4 = vld [vmem:[%s6660_s5 + $0x10] ss:$72 sps:$4 sm:$0xff]  }
 0x140   : > { %4025 = vmatprep.subr.bf16.mxu0 %v5495_v5  ;;  %3706 = vmatprep.mubr.bf16.mxu1 %v5550_v6  ;;  %v5589_v5 = vld [vmem:[%s6609_s25 + $0x300] ss:$8 sps:$4 sm:$0xff]   ;;  %v5592_v6 = vld [vmem:[%s6660_s5 + $0x30] ss:$72 sps:$4 sm:$0xff]  }
 0x141   : > { %3998 = vmatprep.mubr.bf16.mxu0 %v5555_v7  ;;  %v5595_v7 = vld [vmem:[%s6609_s25 + $0x700] ss:$8 sps:$4 sm:$0xff]  }
 0x142   : > { %3734 = vmatpush1.bf16.msra.mxu1 %v5490_v8  ;;  %v5600_v8 = vld [vmem:[%s6609_s25 + $0x314] ss:$8 sps:$4 sm:$0xff]  }
 0x143   : > { %4026 = vmatpush1.bf16.msra.mxu0 %v5493_v9  ;;  %3735 = vmatprep.subr.bf16.mxu1 %v5498_v10  ;;  %v5603_v9 = vld [vmem:[%s6609_s25 + $0x714] ss:$8 sps:$4 sm:$0xff]   ;;  %v5652_v10 = vld [vmem:[%s6660_s5 + $0xa4] ss:$72 sps:$4 sm:$0xff]  }
 0x144   : > { %4027 = vmatprep.subr.bf16.mxu0 %v5501_v11  ;;  %v5654_v11 = vld [vmem:[%s6660_s5 + $0xc4] ss:$72 sps:$4 sm:$0xff]  }
 0x145   : > { %3707 = vmatmul.mubr.bf16.gmra.mrb[8].mxu1 %v5560_v13  ;;  %v5601_v13 = vld [vmem:[%s6609_s25 + $0x710] ss:$8 sps:$4 sm:$0xff]  }
 0x146   : > { %3999 = vmatmul.mubr.bf16.gmra.mrb[8].mxu0 %v5561_v14  ;;  %3736 = vmatpush1.bf16.msra.mxu1 %v5496_v12  ;;  %v5598_v12 = vld [vmem:[%s6609_s25 + $0x310] ss:$8 sps:$4 sm:$0xff]   ;;  %v5606_v14 = vld [vmem:[%s6609_s25 + $0x324] ss:$8 sps:$4 sm:$0xff]  }
 0x147   : > { %4028 = vmatpush1.bf16.msra.mxu0 %v5499_v15  ;;  %3737 = vmatprep.subr.bf16.mxu1 %v5504_v16  ;;  %v5609_v15 = vld [vmem:[%s6609_s25 + $0x724] ss:$8 sps:$4 sm:$0xff]   ;;  %v5604_v16 = vld [vmem:[%s6609_s25 + $0x320] ss:$8 sps:$4 sm:$0xff]  }
 0x148   : > { %4029 = vmatprep.subr.bf16.mxu0 %v5507_v17  ;;  %3716 = vmatprep.mubr.bf16.mxu1 %v5568_v18  ;;  %v5607_v17 = vld [vmem:[%s6609_s25 + $0x720] ss:$8 sps:$4 sm:$0xff]  }
 0x149   : > { %4008 = vmatprep.mubr.bf16.mxu0 %v5573_v19  ;;  %v5656_v18 = vld [vmem:[%s6660_s5 + $0xa0] ss:$72 sps:$4 sm:$0xff]  }
 0x14a   : > { %3738 = vmatpush1.bf16.msra.mxu1 %v5502_v20  ;;  %v5660_v19 = vld [vmem:[%s6660_s5 + $0xc0] ss:$72 sps:$4 sm:$0xff]   ;;  %v5612_v20 = vld [vmem:[%s6609_s25 + $0x334] ss:$8 sps:$4 sm:$0xff]  }
 0x14b   : > { %4030 = vmatpush1.bf16.msra.mxu0 %v5505_v21  ;;  %3739 = vmatprep.subr.bf16.mxu1 %v5510_v22  ;;  %v5615_v21 = vld [vmem:[%s6609_s25 + $0x734] ss:$8 sps:$4 sm:$0xff]  }
 0x14c   : > { %4031 = vmatprep.subr.bf16.mxu0 %v5513_v23  ;;  %v5670_v22 = vld [vmem:[%s6660_s5 + $0x134] ss:$72 sps:$4 sm:$0xff]  }
 0x14d   : > { %3717 = vmatmul.mubr.bf16.gmra.mrb[12].mxu1 %v5578_v26  ;;  %v5672_v23 = vld [vmem:[%s6660_s5 + $0x154] ss:$72 sps:$4 sm:$0xff]   ;;  %v5618_v26 = vld [vmem:[%s6609_s25 + $0x344] ss:$8 sps:$4 sm:$0xff]  }
 0x14e   : > { %4009 = vmatmul.mubr.bf16.gmra.mrb[12].mxu0 %v5579_v27  ;;  %3740 = vmatpush1.bf16.msra.mxu1 %v5508_v24  ;;  %v5610_v24 = vld [vmem:[%s6609_s25 + $0x330] ss:$8 sps:$4 sm:$0xff]   ;;  %v5621_v27 = vld [vmem:[%s6609_s25 + $0x744] ss:$8 sps:$4 sm:$0xff]  }
 0x14f   : > { %4032 = vmatpush1.bf16.msra.mxu0 %v5511_v25  ;;  %3741 = vmatprep.subr.bf16.mxu1 %v5516_v28  ;;  %v5613_v25 = vld [vmem:[%s6609_s25 + $0x730] ss:$8 sps:$4 sm:$0xff]   ;;  %v5616_v28 = vld [vmem:[%s6609_s25 + $0x340] ss:$8 sps:$4 sm:$0xff]  }
 0x150   : > { %4033 = vmatprep.subr.bf16.mxu0 %v5519_v29  ;;  %3759 = vmatprep.mubr.bf16.mxu1 %v5588_v30  ;;  %v5619_v29 = vld [vmem:[%s6609_s25 + $0x740] ss:$8 sps:$4 sm:$0xff]   ;;  %v5674_v30 = vld [vmem:[%s6660_s5 + $0x130] ss:$72 sps:$4 sm:$0xff]  }
 0x151   : > { %4051 = vmatprep.mubr.bf16.mxu0 %v5594_v31  ;;  %v5678_v31 = vld [vmem:[%s6660_s5 + $0x150] ss:$72 sps:$4 sm:$0xff]  }
 0x152   : > { %3742 = vmatpush1.bf16.msra.mxu1 %v5514_v32  ;;  %v5624_v32 = vld [vmem:[%s6609_s25 + $0x354] ss:$8 sps:$4 sm:$0xff]  }
 0x153   : > { %4034 = vmatpush1.bf16.msra.mxu0 %v5517_v33  ;;  %3743 = vmatprep.subr.bf16.mxu1 %v5522_v34  ;;  %v5627_v33 = vld [vmem:[%s6609_s25 + $0x754] ss:$8 sps:$4 sm:$0xff]   ;;  %v5688_v34 = vld [vmem:[%s6660_s5 + $0x1c4] ss:$72 sps:$4 sm:$0xff]  }
 0x154   : > { %4035 = vmatprep.subr.bf16.mxu0 %v5525_v35  ;;  %v5690_v35 = vld [vmem:[%s6660_s5 + $0x1e4] ss:$72 sps:$4 sm:$0xff]  }
 0x156   : > { %3744 = vmatpush1.bf16.msra.mxu1 %v5520_v36  ;;  %v5622_v36 = vld [vmem:[%s6609_s25 + $0x350] ss:$8 sps:$4 sm:$0xff]  }
 0x157   : > { %4036 = vmatpush1.bf16.msra.mxu0 %v5523_v37  ;;  %3745 = vmatprep.subr.bf16.mxu1 %v5528_v38  ;;  %v5625_v37 = vld [vmem:[%s6609_s25 + $0x750] ss:$8 sps:$4 sm:$0xff]   ;;  %v5630_v38 = vld [vmem:[%s6609_s25 + $0x364] ss:$8 sps:$4 sm:$0xff]  }
 0x158   : > { %4037 = vmatprep.subr.bf16.mxu0 %v5531_v39  ;;  %v5633_v39 = vld [vmem:[%s6609_s25 + $0x764] ss:$8 sps:$4 sm:$0xff]  }
 0x15a   : > { %3746 = vmatpush1.bf16.msra.mxu1 %v5526_v40  ;;  %v5628_v40 = vld [vmem:[%s6609_s25 + $0x360] ss:$8 sps:$4 sm:$0xff]  }
 0x15b   : > { %4038 = vmatpush1.bf16.msra.mxu0 %v5529_v41  ;;  %3747 = vmatprep.subr.bf16.mxu1 %v5536_v42  ;;  %v5631_v41 = vld [vmem:[%s6609_s25 + $0x760] ss:$8 sps:$4 sm:$0xff]  }
 0x15c   : > { %4039 = vmatprep.subr.bf16.mxu0 %v5541_v43  ;;  %v5692_v42 = vld [vmem:[%s6660_s5 + $0x1c0] ss:$72 sps:$4 sm:$0xff]  }
 0x15d   : > { %v5696_v43 = vld [vmem:[%s6660_s5 + $0x1e0] ss:$72 sps:$4 sm:$0xff]  }
 0x15e   : > { %3748 = vmatpush1.bf16.msra.mxu1 %v5534_v44  ;;  %v5636_v44 = vld [vmem:[%s6609_s25 + $0x374] ss:$8 sps:$4 sm:$0xff]  }
 0x15f   : > { %4040 = vmatpush1.bf16.msra.mxu0 %v5539_v45  ;;  %3749 = vmatprep.subr.bf16.mxu1 %v5546_v46  ;;  %v5639_v45 = vld [vmem:[%s6609_s25 + $0x774] ss:$8 sps:$4 sm:$0xff]  }
 0x160   : > { %4041 = vmatprep.subr.bf16.mxu0 %v5549_v47  ;;  %v5708_v46 = vld [vmem:[%s6660_s5 + $0x1c] ss:$72 sps:$4 sm:$0xff]  }
 0x161   : > { %v5711_v47 = vld [vmem:[%s6660_s5 + $0x3c] ss:$72 sps:$4 sm:$0xff]  }
 0x162   : > { %3750 = vmatpush1.bf16.msra.mxu1 %v5544_v48  ;;  %v5634_v48 = vld [vmem:[%s6609_s25 + $0x370] ss:$8 sps:$4 sm:$0xff]  }
 0x163   : > { %4042 = vmatpush1.bf16.msra.mxu0 %v5547_v49  ;;  %3751 = vmatprep.subr.bf16.mxu1 %v5554_v50  ;;  %v5637_v49 = vld [vmem:[%s6609_s25 + $0x770] ss:$8 sps:$4 sm:$0xff]   ;;  %v5642_v50 = vld [vmem:[%s6609_s25 + $0x384] ss:$8 sps:$4 sm:$0xff]  }
 0x164   : > { %4043 = vmatprep.subr.bf16.mxu0 %v5559_v51  ;;  %v5645_v51 = vld [vmem:[%s6609_s25 + $0x784] ss:$8 sps:$4 sm:$0xff]  }
 0x166   : > { %3752 = vmatpush1.bf16.msra.mxu1 %v5552_v52  ;;  %v5640_v52 = vld [vmem:[%s6609_s25 + $0x380] ss:$8 sps:$4 sm:$0xff]  }
 0x167   : > { %4044 = vmatpush1.bf16.msra.mxu0 %v5557_v53  ;;  %3753 = vmatprep.subr.bf16.mxu1 %v5564_v54  ;;  %v5643_v53 = vld [vmem:[%s6609_s25 + $0x780] ss:$8 sps:$4 sm:$0xff]   ;;  %v5648_v54 = vld [vmem:[%s6609_s25 + $0x394] ss:$8 sps:$4 sm:$0xff]  }
 0x168   : > { %4045 = vmatprep.subr.bf16.mxu0 %v5567_v55  ;;  %v5651_v55 = vld [vmem:[%s6609_s25 + $0x794] ss:$8 sps:$4 sm:$0xff]  }
 0x16a   : > { %3754 = vmatpush1.bf16.msra.mxu1 %v5562_v56  ;;  %v5646_v56 = vld [vmem:[%s6609_s25 + $0x390] ss:$8 sps:$4 sm:$0xff]  }
 0x16b   : > { %4046 = vmatpush1.bf16.msra.mxu0 %v5565_v57  ;;  %3755 = vmatprep.subr.bf16.mxu1 %v5572_v58  ;;  %v5649_v57 = vld [vmem:[%s6609_s25 + $0x790] ss:$8 sps:$4 sm:$0xff]   ;;  %v5659_v58 = vld [vmem:[%s6609_s25 + $0x3a4] ss:$8 sps:$4 sm:$0xff]  }
 0x16c   : > { %4047 = vmatprep.subr.bf16.mxu0 %v5577_v59  ;;  %v5663_v59 = vld [vmem:[%s6609_s25 + $0x7a4] ss:$8 sps:$4 sm:$0xff]  }
 0x16e   : > { %3756 = vmatpush1.bf16.msra.mxu1 %v5570_v60  ;;  %v5657_v60 = vld [vmem:[%s6609_s25 + $0x3a0] ss:$8 sps:$4 sm:$0xff]  }
 0x16f   : > { %4048 = vmatpush1.bf16.msra.mxu0 %v5575_v61  ;;  %3757 = vmatprep.subr.bf16.mxu1 %v5582_v62  ;;  %v5661_v61 = vld [vmem:[%s6609_s25 + $0x7a0] ss:$8 sps:$4 sm:$0xff]   ;;  %v5666_v62 = vld [vmem:[%s6609_s25 + $0x3b4] ss:$8 sps:$4 sm:$0xff]  }
 0x170   : > { %4049 = vmatprep.subr.bf16.mxu0 %v5585_v63  ;;  %v5669_v63 = vld [vmem:[%s6609_s25 + $0x7b4] ss:$8 sps:$4 sm:$0xff]  }
 0x172   : > { %3758 = vmatpush1.bf16.msra.mxu1 %v5580_v0  ;;  %v5664_v0 = vld [vmem:[%s6609_s25 + $0x3b0] ss:$8 sps:$4 sm:$0xff]  }
 0x173   : > { %4050 = vmatpush1.bf16.msra.mxu0 %v5583_v1  ;;  %3800 = vmatprep.subr.bf16.mxu1 %v5591_v2  ;;  %v5667_v1 = vld [vmem:[%s6609_s25 + $0x7b0] ss:$8 sps:$4 sm:$0xff]   ;;  %v5677_v2 = vld [vmem:[%s6609_s25 + $0x3c4] ss:$8 sps:$4 sm:$0xff]  }
 0x174   : > { %4092 = vmatprep.subr.bf16.mxu0 %v5597_v3  ;;  %v5681_v3 = vld [vmem:[%s6609_s25 + $0x7c4] ss:$8 sps:$4 sm:$0xff]  }
 0x175   : > { %3760 = vmatmul.mubr.bf16.vlgmr.msra.gmra.mrb[0].mxu1 %v5586_v4  ;;  %v5675_v4 = vld [vmem:[%s6609_s25 + $0x3c0] ss:$8 sps:$4 sm:$0xff]  }
 0x176   : > { %4052 = vmatmul.mubr.bf16.vlgmr.msra.gmra.mrb[0].mxu0 %v5592_v6  ;;  %3801 = vmatpush1.bf16.msra.mxu1 %v5589_v5  ;;  %v5679_v5 = vld [vmem:[%s6609_s25 + $0x7c0] ss:$8 sps:$4 sm:$0xff]   ;;  %v5684_v6 = vld [vmem:[%s6609_s25 + $0x3d4] ss:$8 sps:$4 sm:$0xff]  }
 0x177   : > { %4093 = vmatpush1.bf16.msra.mxu0 %v5595_v7  ;;  %3802 = vmatprep.subr.bf16.mxu1 %v5600_v8  ;;  %v5687_v7 = vld [vmem:[%s6609_s25 + $0x7d4] ss:$8 sps:$4 sm:$0xff]   ;;  %v5682_v8 = vld [vmem:[%s6609_s25 + $0x3d0] ss:$8 sps:$4 sm:$0xff]  }
 0x178   : > { %4094 = vmatprep.subr.bf16.mxu0 %v5603_v9  ;;  %3769 = vmatprep.mubr.bf16.mxu1 %v5652_v10  ;;  %v5685_v9 = vld [vmem:[%s6609_s25 + $0x7d0] ss:$8 sps:$4 sm:$0xff]   ;;  %v5695_v10 = vld [vmem:[%s6609_s25 + $0x3e4] ss:$8 sps:$4 sm:$0xff]  }
 0x179   : > { %4061 = vmatprep.mubr.bf16.mxu0 %v5654_v11  ;;  %v5699_v11 = vld [vmem:[%s6609_s25 + $0x7e4] ss:$8 sps:$4 sm:$0xff]  }
 0x17a   : > { %3803 = vmatpush1.bf16.msra.mxu1 %v5598_v12  ;;  %v5693_v12 = vld [vmem:[%s6609_s25 + $0x3e0] ss:$8 sps:$4 sm:$0xff]  }
 0x17b   : > { %4095 = vmatpush1.bf16.msra.mxu0 %v5601_v13  ;;  %3804 = vmatprep.subr.bf16.mxu1 %v5606_v14  ;;  %v5697_v13 = vld [vmem:[%s6609_s25 + $0x7e0] ss:$8 sps:$4 sm:$0xff]   ;;  %v5702_v14 = vld [vmem:[%s6609_s25 + $0x3f4] ss:$8 sps:$4 sm:$0xff]  }
 0x17c   : > { %4096 = vmatprep.subr.bf16.mxu0 %v5609_v15  ;;  %v5705_v15 = vld [vmem:[%s6609_s25 + $0x7f4] ss:$8 sps:$4 sm:$0xff]  }
 0x17d   : > { %3770 = vmatmul.mubr.bf16.gmra.mrb[4].mxu1 %v5656_v18  ;;  %v5714_v18 = vld [vmem:[%s6609_s25 + $0x804] ss:$8 sps:$4 sm:$0xff]  }
 0x17e   : > { %4062 = vmatmul.mubr.bf16.gmra.mrb[4].mxu0 %v5660_v19  ;;  %3805 = vmatpush1.bf16.msra.mxu1 %v5604_v16  ;;  %v5700_v16 = vld [vmem:[%s6609_s25 + $0x3f0] ss:$8 sps:$4 sm:$0xff]  }
 0x17f   : > { %4097 = vmatpush1.bf16.msra.mxu0 %v5607_v17  ;;  %3806 = vmatprep.subr.bf16.mxu1 %v5612_v20  ;;  %v5703_v17 = vld [vmem:[%s6609_s25 + $0x7f0] ss:$8 sps:$4 sm:$0xff]  }
 0x180   : > { %4098 = vmatprep.subr.bf16.mxu0 %v5615_v21  ;;  %3779 = vmatprep.mubr.bf16.mxu1 %v5670_v22  ;;  %v5706_v19 = vld [vmem:[%s6660_s5 + $0x18] ss:$72 sps:$4 sm:$0xff]   ;;  %v5717_v22 = vld [vmem:[%s6609_s25 + $0x814] ss:$8 sps:$4 sm:$0xff]  }
 0x181   : > { %4071 = vmatprep.mubr.bf16.mxu0 %v5672_v23  ;;  %v5709_v20 = vld [vmem:[%s6660_s5 + $0x38] ss:$72 sps:$4 sm:$0xff]   ;;  %v5718_v23 = vld [vmem:[%s6660_s5 + $0xac] ss:$72 sps:$4 sm:$0xff]  }
 0x182   : > { %3807 = vmatpush1.bf16.msra.mxu1 %v5610_v24  ;;  %v5712_v21 = vld [vmem:[%s6609_s25 + $0x800] ss:$8 sps:$4 sm:$0xff]   ;;  %v5720_v24 = vld [vmem:[%s6660_s5 + $0xcc] ss:$72 sps:$4 sm:$0xff]  }
 0x183   : > { %4099 = vmatpush1.bf16.msra.mxu0 %v5613_v25  ;;  %3808 = vmatprep.subr.bf16.mxu1 %v5618_v26  ;;  %v5715_v25 = vld [vmem:[%s6609_s25 + $0x810] ss:$8 sps:$4 sm:$0xff]   ;;  %v5726_v26 = vld [vmem:[%s6609_s25 + $0x824] ss:$8 sps:$4 sm:$0xff]  }
 0x184   : > { %4100 = vmatprep.subr.bf16.mxu0 %v5621_v27  ;;  %v5722_v27 = vld [vmem:[%s6660_s5 + $0xa8] ss:$72 sps:$4 sm:$0xff]  }
 0x185   : > { %3780 = vmatmul.mubr.bf16.gmra.mrb[8].mxu1 %v5674_v30  ;;  %v5729_v30 = vld [vmem:[%s6609_s25 + $0x834] ss:$8 sps:$4 sm:$0xff]  }
 0x186   : > { %4072 = vmatmul.mubr.bf16.gmra.mrb[8].mxu0 %v5678_v31  ;;  %3809 = vmatpush1.bf16.msra.mxu1 %v5616_v28  ;;  %v5723_v28 = vld [vmem:[%s6660_s5 + $0xc8] ss:$72 sps:$4 sm:$0xff]   ;;  %v5730_v31 = vld [vmem:[%s6660_s5 + $0x13c] ss:$72 sps:$4 sm:$0xff]  }
 0x187   : > { %4101 = vmatpush1.bf16.msra.mxu0 %v5619_v29  ;;  %3810 = vmatprep.subr.bf16.mxu1 %v5624_v32  ;;  %v5724_v29 = vld [vmem:[%s6609_s25 + $0x820] ss:$8 sps:$4 sm:$0xff]   ;;  %v5732_v32 = vld [vmem:[%s6660_s5 + $0x15c] ss:$72 sps:$4 sm:$0xff]  }
 0x188   : > { %4102 = vmatprep.subr.bf16.mxu0 %v5627_v33  ;;  %3789 = vmatprep.mubr.bf16.mxu1 %v5688_v34  ;;  %v5727_v33 = vld [vmem:[%s6609_s25 + $0x830] ss:$8 sps:$4 sm:$0xff]   ;;  %v5738_v34 = vld [vmem:[%s6609_s25 + $0x844] ss:$8 sps:$4 sm:$0xff]  }
 0x189   : > { %4081 = vmatprep.mubr.bf16.mxu0 %v5690_v35  ;;  %v5734_v35 = vld [vmem:[%s6660_s5 + $0x138] ss:$72 sps:$4 sm:$0xff]  }
 0x18a   : > { %3811 = vmatpush1.bf16.msra.mxu1 %v5622_v36  ;;  %v5735_v36 = vld [vmem:[%s6660_s5 + $0x158] ss:$72 sps:$4 sm:$0xff]  }
 0x18b   : > { %4103 = vmatpush1.bf16.msra.mxu0 %v5625_v37  ;;  %3812 = vmatprep.subr.bf16.mxu1 %v5630_v38  ;;  %v5736_v37 = vld [vmem:[%s6609_s25 + $0x840] ss:$8 sps:$4 sm:$0xff]   ;;  %v5741_v38 = vld [vmem:[%s6609_s25 + $0x854] ss:$8 sps:$4 sm:$0xff]  }
 0x18c   : > { %4104 = vmatprep.subr.bf16.mxu0 %v5633_v39  ;;  %v5742_v39 = vld [vmem:[%s6660_s5 + $0x1cc] ss:$72 sps:$4 sm:$0xff]  }
 0x18d   : > { %3790 = vmatmul.mubr.bf16.gmra.mrb[12].mxu1 %v5692_v42  ;;  %v5750_v42 = vld [vmem:[%s6609_s25 + $0x864] ss:$8 sps:$4 sm:$0xff]  }
 0x18e   : > { %4082 = vmatmul.mubr.bf16.gmra.mrb[12].mxu0 %v5696_v43  ;;  %3813 = vmatpush1.bf16.msra.mxu1 %v5628_v40  ;;  %v5744_v40 = vld [vmem:[%s6660_s5 + $0x1ec] ss:$72 sps:$4 sm:$0xff]   ;;  %v5746_v43 = vld [vmem:[%s6660_s5 + $0x1c8] ss:$72 sps:$4 sm:$0xff]  }
 0x18f   : > { %4105 = vmatpush1.bf16.msra.mxu0 %v5631_v41  ;;  %3814 = vmatprep.subr.bf16.mxu1 %v5636_v44  ;;  %v5739_v41 = vld [vmem:[%s6609_s25 + $0x850] ss:$8 sps:$4 sm:$0xff]  }
 0x190   : > { %4106 = vmatprep.subr.bf16.mxu0 %v5639_v45  ;;  %3832 = vmatprep.mubr.bf16.mxu1 %v5708_v46  ;;  %v5747_v44 = vld [vmem:[%s6660_s5 + $0x1e8] ss:$72 sps:$4 sm:$0xff]   ;;  %v5753_v46 = vld [vmem:[%s6609_s25 + $0x874] ss:$8 sps:$4 sm:$0xff]  }
 0x191   : > { %4124 = vmatprep.mubr.bf16.mxu0 %v5711_v47  ;;  %v5748_v45 = vld [vmem:[%s6609_s25 + $0x860] ss:$8 sps:$4 sm:$0xff]   ;;  %v5780_v47 = vld [vmem:[%s6660_s5 + $0x44] ss:$72 sps:$4 sm:$0xff]  }
 0x192   : > { %3815 = vmatpush1.bf16.msra.mxu1 %v5634_v48  ;;  %v5783_v48 = vld [vmem:[%s6660_s5 + $0x164] ss:$72 sps:$4 sm:$0xff]  }
 0x193   : > { %4107 = vmatpush1.bf16.msra.mxu0 %v5637_v49  ;;  %3816 = vmatprep.subr.bf16.mxu1 %v5642_v50  ;;  %v5751_v49 = vld [vmem:[%s6609_s25 + $0x870] ss:$8 sps:$4 sm:$0xff]   ;;  %v5756_v50 = vld [vmem:[%s6609_s25 + $0x884] ss:$8 sps:$4 sm:$0xff]  }
 0x194   : > { %4108 = vmatprep.subr.bf16.mxu0 %v5645_v51  ;;  %v5754_v51 = vld [vmem:[%s6609_s25 + $0x880] ss:$8 sps:$4 sm:$0xff]  }
 0x196   : > { %3817 = vmatpush1.bf16.msra.mxu1 %v5640_v52  ;;  %v5759_v52 = vld [vmem:[%s6609_s25 + $0x894] ss:$8 sps:$4 sm:$0xff]  }
 0x197   : > { %4109 = vmatpush1.bf16.msra.mxu0 %v5643_v53  ;;  %3818 = vmatprep.subr.bf16.mxu1 %v5648_v54  ;;  %v5757_v53 = vld [vmem:[%s6609_s25 + $0x890] ss:$8 sps:$4 sm:$0xff]   ;;  %v5762_v54 = vld [vmem:[%s6609_s25 + $0x8a4] ss:$8 sps:$4 sm:$0xff]  }
 0x198   : > { %4110 = vmatprep.subr.bf16.mxu0 %v5651_v55  ;;  %v5760_v55 = vld [vmem:[%s6609_s25 + $0x8a0] ss:$8 sps:$4 sm:$0xff]  }
 0x19a   : > { %3819 = vmatpush1.bf16.msra.mxu1 %v5646_v56  ;;  %v5765_v56 = vld [vmem:[%s6609_s25 + $0x8b4] ss:$8 sps:$4 sm:$0xff]  }
 0x19b   : > { %4111 = vmatpush1.bf16.msra.mxu0 %v5649_v57  ;;  %3820 = vmatprep.subr.bf16.mxu1 %v5659_v58  ;;  %v5763_v57 = vld [vmem:[%s6609_s25 + $0x8b0] ss:$8 sps:$4 sm:$0xff]   ;;  %v5768_v58 = vld [vmem:[%s6609_s25 + $0x8c4] ss:$8 sps:$4 sm:$0xff]  }
 0x19c   : > { %4112 = vmatprep.subr.bf16.mxu0 %v5663_v59  ;;  %v5766_v59 = vld [vmem:[%s6609_s25 + $0x8c0] ss:$8 sps:$4 sm:$0xff]  }
 0x19e   : > { %3821 = vmatpush1.bf16.msra.mxu1 %v5657_v60  ;;  %v5771_v60 = vld [vmem:[%s6609_s25 + $0x8d4] ss:$8 sps:$4 sm:$0xff]  }
 0x19f   : > { %4113 = vmatpush1.bf16.msra.mxu0 %v5661_v61  ;;  %3822 = vmatprep.subr.bf16.mxu1 %v5666_v62  ;;  %v5769_v61 = vld [vmem:[%s6609_s25 + $0x8d0] ss:$8 sps:$4 sm:$0xff]   ;;  %v5774_v62 = vld [vmem:[%s6609_s25 + $0x8e4] ss:$8 sps:$4 sm:$0xff]  }
 0x1a0   : > { %4114 = vmatprep.subr.bf16.mxu0 %v5669_v63  ;;  %v5772_v63 = vld [vmem:[%s6609_s25 + $0x8e0] ss:$8 sps:$4 sm:$0xff]  }
 0x1a2   : > { %3823 = vmatpush1.bf16.msra.mxu1 %v5664_v0  ;;  %v5777_v0 = vld [vmem:[%s6609_s25 + $0x8f4] ss:$8 sps:$4 sm:$0xff]  }
 0x1a3   : > { %4115 = vmatpush1.bf16.msra.mxu0 %v5667_v1  ;;  %3824 = vmatprep.subr.bf16.mxu1 %v5677_v2  ;;  %v5775_v1 = vld [vmem:[%s6609_s25 + $0x8f0] ss:$8 sps:$4 sm:$0xff]   ;;  %v5778_v2 = vld [vmem:[%s6660_s5 + $0x40] ss:$72 sps:$4 sm:$0xff]  }
 0x1a4   : > { %4116 = vmatprep.subr.bf16.mxu0 %v5681_v3  ;;  %v5781_v3 = vld [vmem:[%s6660_s5 + $0x160] ss:$72 sps:$4 sm:$0xff]  }
 0x1a6   : > { %3825 = vmatpush1.bf16.msra.mxu1 %v5675_v4  ;;  %v5784_v4 = vld [vmem:[%s6660_s5 + $0xd4] ss:$72 sps:$4 sm:$0xff]  }
 0x1a7   : > { %4117 = vmatpush1.bf16.msra.mxu0 %v5679_v5  ;;  %3826 = vmatprep.subr.bf16.mxu1 %v5684_v6  ;;  %v5786_v5 = vld [vmem:[%s6660_s5 + $0x1f4] ss:$72 sps:$4 sm:$0xff]   ;;  %v5788_v6 = vld [vmem:[%s6660_s5 + $0xd0] ss:$72 sps:$4 sm:$0xff]  }
 0x1a8   : > { %4118 = vmatprep.subr.bf16.mxu0 %v5687_v7  ;;  %v5789_v7 = vld [vmem:[%s6660_s5 + $0x1f0] ss:$72 sps:$4 sm:$0xff]  }
 0x1aa   : > { %3827 = vmatpush1.bf16.msra.mxu1 %v5682_v8 }
 0x1ab   : > { %4119 = vmatpush1.bf16.msra.mxu0 %v5685_v9  ;;  %3828 = vmatprep.subr.bf16.mxu1 %v5695_v10 }
 0x1ac   : > { %4120 = vmatprep.subr.bf16.mxu0 %v5699_v11  ;;  %v1771_v11 = vlaneseq }
 0x1ae   : > { %3829 = vmatpush1.bf16.msra.mxu1 %v5693_v12 }
 0x1af   : > { %4121 = vmatpush1.bf16.msra.mxu0 %v5697_v13  ;;  %3830 = vmatprep.subr.bf16.mxu1 %v5702_v14  ;;  %v1772_v13 = vshrl.u32 %v1771_v11, 7 }
 0x1b0   : > { %4122 = vmatprep.subr.bf16.mxu0 %v5705_v15 }
 0x1b2   : > { %3831 = vmatpush1.bf16.msra.mxu1 %v5700_v16 }
 0x1b3   : > { %4123 = vmatpush1.bf16.msra.mxu0 %v5703_v17  ;;  %4999 = vmatprep.subr.bf16.mxu1 %v5714_v18  ;;  %v1773_v17 = vsub.s32 0, %v1772_v13 }
 0x1b4   : > { %4165 = vmatprep.subr.bf16.mxu0 %v5714_v18 }
 0x1b5   : > { %3833 = vmatmul.mubr.bf16.vlgmr.msra.gmra.mrb[0].mxu1 %v5706_v19  ;;  %v1769_v19 = vld [vmem:[%s1405_s10] sm:$0x3] }
 0x1b6   : > { %4125 = vmatmul.mubr.bf16.vlgmr.msra.gmra.mrb[0].mxu0 %v5709_v20  ;;  %5015 = vmatpush1.bf16.msra.mxu1 %v5712_v21  ;;  %v1777_v20 = vsub.s32 1, %v1772_v13 }
 0x1b7   : > { %4166 = vmatpush1.bf16.msra.mxu0 %v5712_v21  ;;  %5000 = vmatprep.subr.bf16.mxu1 %v5717_v22  ;;  %v6993_v21 = vrot.slane %v1769_v19, %v1773_v17 }
 0x1b8   : > { %4167 = vmatprep.subr.bf16.mxu0 %v5717_v22  ;;  %3842 = vmatprep.mubr.bf16.mxu1 %v5718_v23  ;;  %v6995_v22 = vrot.slane %v1769_v19, %v1777_v20 }
 0x1b9   : > { %4134 = vmatprep.mubr.bf16.mxu0 %v5720_v24 }
 0x1ba   : > { %5016 = vmatpush1.bf16.msra.mxu1 %v5715_v25 }
 0x1bb   : > { %4168 = vmatpush1.bf16.msra.mxu0 %v5715_v25  ;;  %5001 = vmatprep.subr.bf16.mxu1 %v5726_v26 }
 0x1bc   : > { %4169 = vmatprep.subr.bf16.mxu0 %v5726_v26 }
 0x1bd   : > { %3843 = vmatmul.mubr.bf16.gmra.mrb[4].mxu1 %v5722_v27 }
 0x1be   : > { %4135 = vmatmul.mubr.bf16.gmra.mrb[4].mxu0 %v5723_v28  ;;  %5017 = vmatpush1.bf16.msra.mxu1 %v5724_v29 }
 0x1bf   : > { %4170 = vmatpush1.bf16.msra.mxu0 %v5724_v29  ;;  %5002 = vmatprep.subr.bf16.mxu1 %v5729_v30 }
 0x1c0   : > { %4171 = vmatprep.subr.bf16.mxu0 %v5729_v30  ;;  %3852 = vmatprep.mubr.bf16.mxu1 %v5730_v31 }
 0x1c1   : > { %4144 = vmatprep.mubr.bf16.mxu0 %v5732_v32 }
 0x1c2   : > { %5018 = vmatpush1.bf16.msra.mxu1 %v5727_v33 }
 0x1c3   : > { %4172 = vmatpush1.bf16.msra.mxu0 %v5727_v33  ;;  %5003 = vmatprep.subr.bf16.mxu1 %v5738_v34 }
 0x1c4   : > { %4173 = vmatprep.subr.bf16.mxu0 %v5738_v34 }
 0x1c5   : > { %3853 = vmatmul.mubr.bf16.gmra.mrb[8].mxu1 %v5734_v35 }
 0x1c6   : > { %4145 = vmatmul.mubr.bf16.gmra.mrb[8].mxu0 %v5735_v36  ;;  %5019 = vmatpush1.bf16.msra.mxu1 %v5736_v37 }
 0x1c7   : > { %4174 = vmatpush1.bf16.msra.mxu0 %v5736_v37  ;;  %5004 = vmatprep.subr.bf16.mxu1 %v5741_v38 }
 0x1c8   : > { %4175 = vmatprep.subr.bf16.mxu0 %v5741_v38  ;;  %3862 = vmatprep.mubr.bf16.mxu1 %v5742_v39 }
 0x1c9   : > { %4154 = vmatprep.mubr.bf16.mxu0 %v5744_v40 }
 0x1ca   : > { %5020 = vmatpush1.bf16.msra.mxu1 %v5739_v41 }
 0x1cb   : > { %4176 = vmatpush1.bf16.msra.mxu0 %v5739_v41  ;;  %5005 = vmatprep.subr.bf16.mxu1 %v5750_v42 }
 0x1cc   : > { %4177 = vmatprep.subr.bf16.mxu0 %v5750_v42 }
 0x1cd   : > { %3863 = vmatmul.mubr.bf16.gmra.mrb[12].mxu1 %v5746_v43 }
 0x1ce   : > { %4155 = vmatmul.mubr.bf16.gmra.mrb[12].mxu0 %v5747_v44  ;;  %5021 = vmatpush1.bf16.msra.mxu1 %v5748_v45 }
 0x1cf   : > { %4178 = vmatpush1.bf16.msra.mxu0 %v5748_v45  ;;  %5006 = vmatprep.subr.bf16.mxu1 %v5753_v46 }
 0x1d0   : > { %4179 = vmatprep.subr.bf16.mxu0 %v5753_v46  ;;  %4197 = vmatprep.mubr.bf16.mxu0 %v5780_v47 }
 0x1d1   : > { %4217 = vmatprep.mubr.bf16.mxu1 %v5783_v48 }
 0x1d2   : > { %5022 = vmatpush1.bf16.msra.mxu1 %v5751_v49 }
 0x1d3   : > { %4180 = vmatpush1.bf16.msra.mxu0 %v5751_v49  ;;  %5007 = vmatprep.subr.bf16.mxu1 %v5756_v50 }
 0x1d4   : > { %4181 = vmatprep.subr.bf16.mxu0 %v5756_v50 }
 0x1d6   : > { %5023 = vmatpush1.bf16.msra.mxu1 %v5754_v51 }
 0x1d7   : > { %4182 = vmatpush1.bf16.msra.mxu0 %v5754_v51  ;;  %5008 = vmatprep.subr.bf16.mxu1 %v5759_v52 }
 0x1d8   : > { %4183 = vmatprep.subr.bf16.mxu0 %v5759_v52 }
 0x1da   : > { %5024 = vmatpush1.bf16.msra.mxu1 %v5757_v53 }
 0x1db   : > { %4184 = vmatpush1.bf16.msra.mxu0 %v5757_v53  ;;  %5009 = vmatprep.subr.bf16.mxu1 %v5762_v54 }
 0x1dc   : > { %4185 = vmatprep.subr.bf16.mxu0 %v5762_v54 }
 0x1de   : > { %5025 = vmatpush1.bf16.msra.mxu1 %v5760_v55 }
 0x1df   : > { %4186 = vmatpush1.bf16.msra.mxu0 %v5760_v55  ;;  %5010 = vmatprep.subr.bf16.mxu1 %v5765_v56 }
 0x1e0   : > { %4187 = vmatprep.subr.bf16.mxu0 %v5765_v56 }
 0x1e2   : > { %5026 = vmatpush1.bf16.msra.mxu1 %v5763_v57 }
 0x1e3   : > { %4188 = vmatpush1.bf16.msra.mxu0 %v5763_v57  ;;  %5011 = vmatprep.subr.bf16.mxu1 %v5768_v58 }
 0x1e4   : > { %4189 = vmatprep.subr.bf16.mxu0 %v5768_v58 }
 0x1e6   : > { %5027 = vmatpush1.bf16.msra.mxu1 %v5766_v59 }
 0x1e7   : > { %4190 = vmatpush1.bf16.msra.mxu0 %v5766_v59  ;;  %5012 = vmatprep.subr.bf16.mxu1 %v5771_v60 }
 0x1e8   : > { %4191 = vmatprep.subr.bf16.mxu0 %v5771_v60 }
 0x1ea   : > { %5028 = vmatpush1.bf16.msra.mxu1 %v5769_v61 }
 0x1eb   : > { %4192 = vmatpush1.bf16.msra.mxu0 %v5769_v61  ;;  %5013 = vmatprep.subr.bf16.mxu1 %v5774_v62 }
 0x1ec   : > { %4193 = vmatprep.subr.bf16.mxu0 %v5774_v62 }
 0x1ee   : > { %5029 = vmatpush1.bf16.msra.mxu1 %v5772_v63 }
 0x1ef   : > { %4194 = vmatpush1.bf16.msra.mxu0 %v5772_v63  ;;  %5014 = vmatprep.subr.bf16.mxu1 %v5777_v0 }
 0x1f0   : > { %4195 = vmatprep.subr.bf16.mxu0 %v5777_v0 }
 0x1f2   : > { %5030 = vmatpush1.bf16.msra.mxu1 %v5775_v1 }
 0x1f3   : > { %4196 = vmatpush1.bf16.msra.mxu0 %v5775_v1 }
 0x1f5   : > { %4218 = vmatmul.mubr.bf16.vlgmr.msra.gmra.mrb[16].mxu1 %v5781_v3 }
 0x1f6   : > { %4198 = vmatmul.mubr.bf16.vlgmr.msra.gmra.mrb[0].mxu0 %v5778_v2  ;;  %4227 = vmatprep.mubr.bf16.mxu1 %v5786_v5 }
 0x1f7   : > { %4207 = vmatprep.mubr.bf16.mxu0 %v5784_v4 }
 0x1fd   : > { %4228 = vmatmul.mubr.bf16.gmra.mrb[20].mxu1 %v5789_v7 }
 0x1fe   : > { %4208 = vmatmul.mubr.bf16.gmra.mrb[4].mxu0 %v5788_v6 }
 0x288   : > { %v3834_v8 = vpop.f32.mrb[0].mxu1 }
 0x289   : > { %v3836_v9 = vpop.f32.mrb[1].mxu1  ;;  %v5031_v55 = vadd.f32 %v3834_v8, %v6993_v21 }
 0x28a   : > { %v3838_v10 = vpop.f32.mrb[2].mxu1  ;;  %v5033_v56 = vadd.f32 %v3836_v9, %v6995_v22 }
 0x28b   : > { %v3840_v12 = vpop.f32.mrb[3].mxu1  ;;  %v5035_v59 = vadd.f32 %v3838_v10, %v6993_v21 }
 0x28c   : > { %v5037_v0 = vadd.f32 %v3840_v12, %v6995_v22 }
 0x290   : > { %v6982_v14 = vpop.f32.mrb[4].mxu1 }
 0x291   : > { %v6987_v15 = vpop.f32.mrb[5].mxu1 }
 0x292   : > { %v6989_v16 = vpop.f32.mrb[6].mxu1 }
 0x293   : > { %v6991_v18 = vpop.f32.mrb[7].mxu1 }
 0x298   : > { %v3854_v23 = vpop.f32.mrb[8].mxu1 }
 0x299   : > { %v4146_v24 = vpop.f32.mrb[8].mxu0  ;;  %v5047_v25 = vadd.f32 %v3854_v23, %v6993_v21  ;;  %v3856_v26 = vpop.f32.mrb[9].mxu1 }
 0x29a   : > { %v4148_v27 = vpop.f32.mrb[9].mxu0  ;;  %v5050_v28 = vadd.f32 %v3856_v26, %v6995_v22  ;;  %v3858_v29 = vpop.f32.mrb[10].mxu1 }
 0x29b   : > { %v4150_v30 = vpop.f32.mrb[10].mxu0  ;;  %v5048_v31 = vadd.f32 %v5047_v25, %v4146_v24  ;;  %v5053_v32 = vadd.f32 %v3858_v29, %v6993_v21  ;;  %v3860_v33 = vpop.f32.mrb[11].mxu1  ;;  %v5039_v29 = vadd.f32 %v6982_v14, %v6993_v21 }
 0x29c   : > { %v4152_v34 = vpop.f32.mrb[11].mxu0  ;;  %v5051_v35 = vadd.f32 %v5050_v28, %v4148_v27  ;;  %v5056_v36 = vadd.f32 %v3860_v33, %v6995_v22  ;;  %v5045_v33 = vadd.f32 %v6991_v18, %v6995_v22 }
 0x29d   : > { %v5054_v37 = vadd.f32 %v5053_v32, %v4150_v30  ;;  %v5041_v30 = vadd.f32 %v6987_v15, %v6995_v22  ;;  %v5043_v32 = vadd.f32 %v6989_v16, %v6993_v21 }
 0x29e   : > { %v5057_v38 = vadd.f32 %v5056_v36, %v4152_v34 }
 0x2a0   : > { %v3864_v39 = vpop.f32.mrb[12].mxu1 }
 0x2a1   : > { %v4156_v40 = vpop.f32.mrb[12].mxu0  ;;  %v5059_v41 = vadd.f32 %v3864_v39, %v6993_v21  ;;  %v3866_v42 = vpop.f32.mrb[13].mxu1 }
 0x2a2   : > { %v4158_v43 = vpop.f32.mrb[13].mxu0  ;;  %v5062_v44 = vadd.f32 %v3866_v42, %v6995_v22  ;;  %v3868_v45 = vpop.f32.mrb[14].mxu1 }
 0x2a3   : > { %v4160_v46 = vpop.f32.mrb[14].mxu0  ;;  %v5060_v47 = vadd.f32 %v5059_v41, %v4156_v40  ;;  %v5065_v48 = vadd.f32 %v3868_v45, %v6993_v21  ;;  %v3870_v49 = vpop.f32.mrb[15].mxu1 }
 0x2a4   : > { %v4162_v50 = vpop.f32.mrb[15].mxu0  ;;  %v5063_v51 = vadd.f32 %v5062_v44, %v4158_v43  ;;  %v5068_v52 = vadd.f32 %v3870_v49, %v6995_v22 }
 0x2a5   : > { %v7005_v53 = vadd.f32 %v5065_v48, %v4160_v46 }
 0x2a6   : > { %v7007_v54 = vadd.f32 %v5068_v52, %v4162_v50 }
 0x2c8   : > { %v4219_v58 = vpop.f32.mrb[16].mxu1 }
 0x2c9   : > { %v4199_v57 = vpop.f32.mrb[0].mxu0  ;;  %v7014_v61 = vadd.f32 %v5048_v31, %v4219_v58  ;;  %v4221_v63 = vpop.f32.mrb[17].mxu1 }
 0x2ca   : > { %v7012_v60 = vadd.f32 %v5031_v55, %v4199_v57  ;;  %v4201_v62 = vpop.f32.mrb[1].mxu0  ;;  %v7019_v2 = vadd.f32 %v5051_v35, %v4221_v63  ;;  %v4223_v4 = vpop.f32.mrb[18].mxu1 }
 0x2cb   : > { %v7017_v1 = vadd.f32 %v5033_v56, %v4201_v62  ;;  %v4203_v3 = vpop.f32.mrb[2].mxu0  ;;  %v4246_v6 = vmin.f32 %v7014_v61, 20.0  ;;  %v7025_v8 = vadd.f32 %v5054_v37, %v4223_v4  ;;  %v4225_v10 = vpop.f32.mrb[19].mxu1 }
 0x2cc   : > { %v4238_v5 = vmin.f32 %v7012_v60, 20.0  ;;  %v7023_v7 = vadd.f32 %v5035_v59, %v4203_v3  ;;  %v4205_v9 = vpop.f32.mrb[3].mxu0  ;;  %v4247_v12 = vmin.f32 %v7019_v2, 20.0  ;;  %v7031_v17 = vadd.f32 %v5057_v38, %v4225_v10 }
 0x2cd   : > { %v4239_v11 = vmin.f32 %v7017_v1, 20.0  ;;  %v7029_v13 = vadd.f32 %v5037_v0, %v4205_v9  ;;  %v4270_v20 = vmul.f32 1.442695, %v4246_v6  ;;  %v4248_v24 = vmin.f32 %v7025_v8, 20.0 }
 0x2ce   : > { %v4254_v19 = vmul.f32 1.442695, %v4238_v5  ;;  %v4240_v23 = vmin.f32 %v7023_v7, 20.0  ;;  %v4272_v26 = vmul.f32 1.442695, %v4247_v12  ;;  %v4249_v28 = vmin.f32 %v7031_v17, 20.0 }
 0x2cf   : > { %v4256_v25 = vmul.f32 1.442695, %v4239_v11  ;;  %v4241_v27 = vmin.f32 %v7029_v13, 20.0  ;;  %v4274_v34 = vmul.f32 1.442695, %v4248_v24 }
 0x2d0   : > { %5790 = vpow2.f32 %v4254_v19  ;;  %v4258_v31 = vmul.f32 1.442695, %v4240_v23  ;;  %v4229_v36 = vpop.f32.mrb[20].mxu1  ;;  %v4276_v40 = vmul.f32 1.442695, %v4249_v28 }
 0x2d1   : > { %5792 = vpow2.f32 %v4270_v20  ;;  %v4209_v35 = vpop.f32.mrb[4].mxu0  ;;  %v4260_v37 = vmul.f32 1.442695, %v4241_v27  ;;  %v7047_v14 = vadd.f32 %v5060_v47, %v4229_v36  ;;  %v4231_v15 = vpop.f32.mrb[21].mxu1 }
 0x2d2   : > { %5794 = vpow2.f32 %v4256_v25  ;;  %v7045_v38 = vadd.f32 %v5039_v29, %v4209_v35  ;;  %v4211_v39 = vpop.f32.mrb[5].mxu0  ;;  %v7051_v16 = vadd.f32 %v5063_v51, %v4231_v15  ;;  %v4233_v18 = vpop.f32.mrb[22].mxu1 }
 0x2d3   : > { %5796 = vpow2.f32 %v4272_v26  ;;  %v7049_v41 = vadd.f32 %v5041_v30, %v4211_v39  ;;  %v4213_v21 = vpop.f32.mrb[6].mxu0  ;;  %v4250_v42 = vmin.f32 %v7047_v14, 20.0  ;;  %v4235_v45 = vpop.f32.mrb[23].mxu1  ;;  %v7060_v48 = vadd.f32 %v7005_v53, %v4233_v18 }
 0x2d4   : > { %5798 = vpow2.f32 %v4258_v31  ;;  %v4242_v22 = vmin.f32 %v7045_v38, 20.0  ;;  %v7055_v43 = vadd.f32 %v5043_v32, %v4213_v21  ;;  %v4215_v44 = vpop.f32.mrb[7].mxu0  ;;  %v4251_v47 = vmin.f32 %v7051_v16, 20.0 }
 0x2d5   : > { %5800 = vpow2.f32 %v4274_v34  ;;  %v4243_v46 = vmin.f32 %v7049_v41, 20.0  ;;  %v4278_v50 = vmul.f32 1.442695, %v4250_v42  ;;  %v4252_v56 = vmin.f32 %v7060_v48, 20.0 }
 0x2d6   : > { %5802 = vpow2.f32 %v4260_v37  ;;  %v4262_v49 = vmul.f32 1.442695, %v4242_v22  ;;  %v4244_v51 = vmin.f32 %v7055_v43, 20.0  ;;  %v4280_v55 = vmul.f32 1.442695, %v4251_v47 }
 0x2d7   : > { %5804 = vpow2.f32 %v4276_v40  ;;  %v4264_v52 = vmul.f32 1.442695, %v4243_v46  ;;  %v7064_v57 = vadd.f32 %v5045_v33, %v4215_v44  ;;  %v7067_v58 = vadd.f32 %v7007_v54, %v4235_v45 }
 0x2d8   : > { %5806 = vpow2.f32 %v4262_v49  ;;  %v4266_v53 = vmul.f32 1.442695, %v4244_v51  ;;  %v4282_v5 = vmul.f32 1.442695, %v4252_v56 }
 0x2d9   : > { %5808 = vpow2.f32 %v4278_v50  ;;  %v4245_v62 = vmin.f32 %v7064_v57, 20.0  ;;  %v4253_v18 = vmin.f32 %v7067_v58, 20.0 }
 0x2da   : > { %v5791_v59 = vpop.eup %5790  ;;  %5810 = vpow2.f32 %v4264_v52 }
 0x2db   : > { %v5793_v63 = vpop.eup %5792  ;;  %v4286_v0 = vadd.f32 2.0, %v5791_v59  ;;  %5812 = vpow2.f32 %v4280_v55  ;;  %v4268_v6 = vmul.f32 1.442695, %v4245_v62 }
 0x2dc   : > { %v5795_v3 = vpop.eup %5794  ;;  %v4294_v4 = vadd.f32 2.0, %v5793_v63  ;;  %5814 = vpow2.f32 %v4266_v53 }
 0x2dd   : > { %v5797_v9 = vpop.eup %5796  ;;  %v4302_v10 = vmul.f32 %v5791_v59, %v4286_v0  ;;  %v4287_v11 = vadd.f32 2.0, %v5795_v3  ;;  %5816 = vpow2.f32 %v4268_v6  ;;  %v4284_v0 = vmul.f32 1.442695, %v4253_v18 }
 0x2de   : > { %v5799_v12 = vpop.eup %5798  ;;  %v4310_v19 = vmul.f32 %v5793_v63, %v4294_v4  ;;  %v4295_v54 = vadd.f32 2.0, %v5797_v9  ;;  %5818 = vpow2.f32 %v4282_v5 }
 0x2df   : > { %v5801_v20 = vpop.eup %5800  ;;  %v4334_v23 = vadd.f32 2.0, %v4302_v10  ;;  %v4303_v24 = vmul.f32 %v5795_v3, %v4287_v11  ;;  %v4288_v25 = vadd.f32 2.0, %v5799_v12  ;;  %v4318_v4 = vmul.f32 %v7012_v60, %v4302_v10 }
 0x2e0   : > { %v5803_v26 = vpop.eup %5802  ;;  %v4342_v27 = vadd.f32 2.0, %v4310_v19  ;;  %v4311_v28 = vmul.f32 %v5797_v9, %v4295_v54  ;;  %v4296_v29 = vadd.f32 2.0, %v5801_v20  ;;  %v4326_v11 = vmul.f32 %v7014_v61, %v4310_v19 }
 0x2e1   : > { %v5805_v30 = vpop.eup %5804  ;;  %5820 = vrcp.f32 %v4334_v23  ;;  %v4335_v31 = vadd.f32 2.0, %v4303_v24  ;;  %v7070_v32 = vmul.f32 %v5799_v12, %v4288_v25  ;;  %v4289_v39 = vadd.f32 2.0, %v5803_v26 }
 0x2e2   : > { %v5807_v33 = vpop.eup %5806  ;;  %5822 = vrcp.f32 %v4342_v27  ;;  %v4343_v34 = vadd.f32 2.0, %v4311_v28  ;;  %v7072_v35 = vmul.f32 %v5801_v20, %v4296_v29  ;;  %v4297_v21 = vadd.f32 2.0, %v5805_v30 }
 0x2e3   : > { %v5809_v36 = vpop.eup %5808  ;;  %5824 = vrcp.f32 %v4335_v31  ;;  %v4336_v37 = vadd.f32 2.0, %v7070_v32  ;;  %v4305_v42 = vmul.f32 %v5803_v26, %v4289_v39  ;;  %v4290_v44 = vadd.f32 2.0, %v5807_v33 }
 0x2e4   : > { %v5811_v15 = vpop.eup %5810  ;;  %5826 = vrcp.f32 %v4343_v34  ;;  %v4344_v40 = vadd.f32 2.0, %v7072_v35  ;;  %v4298_v45 = vadd.f32 2.0, %v5809_v36  ;;  %v4313_v46 = vmul.f32 %v5805_v30, %v4297_v21 }
 0x2e5   : > { %v5813_v22 = vpop.eup %5812  ;;  %5828 = vrcp.f32 %v4336_v37  ;;  %v4291_v47 = vadd.f32 2.0, %v5811_v15  ;;  %v4337_v50 = vadd.f32 2.0, %v4305_v42  ;;  %v4306_v51 = vmul.f32 %v5807_v33, %v4290_v44 }
 0x2e6   : > { %5830 = vrcp.f32 %v4344_v40  ;;  %v4299_v49 = vadd.f32 2.0, %v5813_v22  ;;  %v4314_v52 = vmul.f32 %v5809_v36, %v4298_v45  ;;  %v5815_v55 = vpop.eup %5814  ;;  %v4345_v56 = vadd.f32 2.0, %v4313_v46 }
 0x2e7   : > { %v7077_v59 = vmul.f32 %v5811_v15, %v4291_v47  ;;  %v5817_v62 = vpop.eup %5816  ;;  %5832 = vrcp.f32 %v4337_v50  ;;  %v4338_v63 = vadd.f32 2.0, %v4306_v51  ;;  %v4292_v54 = vadd.f32 2.0, %v5815_v55 }
 0x2e8   : > { %v7079_v53 = vmul.f32 %v5813_v22, %v4299_v49  ;;  %v5819_v3 = vpop.eup %5818  ;;  %5834 = vrcp.f32 %v4345_v56  ;;  %v4346_v5 = vadd.f32 2.0, %v4314_v52  ;;  %v4319_v25 = vmul.f32 %v7017_v1, %v4303_v24 }
 0x2e9   : > { %v4339_v6 = vadd.f32 2.0, %v7077_v59  ;;  %5836 = vrcp.f32 %v4338_v63  ;;  %v4293_v26 = vadd.f32 2.0, %v5817_v62  ;;  %v4327_v10 = vmul.f32 %v7019_v2, %v4311_v28 }
 0x2ea   : > { %v4347_v12 = vadd.f32 2.0, %v7079_v53  ;;  %5838 = vrcp.f32 %v4346_v5  ;;  %v4308_v29 = vmul.f32 %v5815_v55, %v4292_v54  ;;  %v4320_v1 = vmul.f32 %v7023_v7, %v7070_v32 }
 0x2eb   : > { %v5821_v9 = vpop.eup %5820  ;;  %5840 = vrcp.f32 %v4339_v6  ;;  %v4309_v61 = vmul.f32 %v5817_v62, %v4293_v26  ;;  %v4300_v24 = vadd.f32 2.0, %v5819_v3  ;;  %v4328_v2 = vmul.f32 %v7025_v8, %v7072_v35 }
 0x2ec   : > { %v5823_v20 = vpop.eup %5822  ;;  %v4366_v23 = vmul.f32 %v5821_v9, %v4318_v4  ;;  %5842 = vrcp.f32 %v4347_v12  ;;  %v4340_v34 = vadd.f32 2.0, %v4308_v29  ;;  %v4321_v15 = vmul.f32 %v7029_v13, %v4305_v42 }
 0x2ed   : > { %v5825_v27 = vpop.eup %5824  ;;  %v4374_v60 = vmul.f32 %v5823_v20, %v4326_v11  ;;  %5844 = vpow2.f32 %v4284_v0  ;;  %v4341_v40 = vadd.f32 2.0, %v4309_v61  ;;  %v4329_v7 = vmul.f32 %v7031_v17, %v4313_v46 }
 0x2ee   : > { %v5827_v30 = vpop.eup %5826  ;;  %v4367_v31 = vmul.f32 %v5825_v27, %v4319_v25  ;;  %5846 = vrcp.f32 %v4340_v34  ;;  %v4322_v8 = vmul.f32 %v7045_v38, %v4306_v51  ;;  %v4316_v35 = vmul.f32 %v5819_v3, %v4300_v24 }
 0x2ef   : > { %v5829_v19 = vpop.eup %5828  ;;  %v4375_v33 = vmul.f32 %v5827_v30, %v4327_v10  ;;  %5848 = vrcp.f32 %v4341_v40  ;;  %v4330_v47 = vmul.f32 %v7047_v14, %v4314_v52  ;;  %v4323_v50 = vmul.f32 %v7049_v41, %v7077_v59 }
 0x2f0   : > { %v5831_v36 = vpop.eup %5830  ;;  %v4990_v37 = vpack.c.bf16 %v4367_v31, %v4366_v23  ;;  %v4368_v28 = vmul.f32 %v5829_v19, %v4320_v1  ;;  %v4331_v38 = vmul.f32 %v7051_v16, %v7079_v53  ;;  %v4348_v62 = vadd.f32 2.0, %v4316_v35 }
 0x2f1   : > { %v4994_v39 = vpack.c.bf16 %v4375_v33, %v4374_v60  ;;  %v5833_v21 = vpop.eup %5832  ;;  %v4376_v18 = vmul.f32 %v5831_v36, %v4328_v2  ;;  %v4324_v59 = vmul.f32 %v7055_v43, %v4308_v29  ;;  %v4325_v53 = vmul.f32 %v7064_v57, %v4309_v61 }
 0x2f2   : > { %4430 = vst [vmem:[%s7092_s11] sm:$0xff] %v4990_v37  ;;  %v5835_v32 = vpop.eup %5834  ;;  %v4369_v22 = vmul.f32 %v5833_v21, %v4321_v15  ;;  %5850 = vrcp.f32 %v4348_v62  ;;  %v4332_v54 = vmul.f32 %v7060_v48, %v4316_v35 }
 0x2f3   : > { %4434 = vst [vmem:[%s7092_s11 + $0x20] sm:$0xff] %v4994_v39  ;;  %v5837_v44 = vpop.eup %5836  ;;  %v4377_v45 = vmul.f32 %v5835_v32, %v4329_v7 }
 0x2f4   : > { %v5839_v49 = vpop.eup %5838  ;;  %v4991_v13 = vpack.c.bf16 %v4369_v22, %v4368_v28  ;;  %v4370_v42 = vmul.f32 %v5837_v44, %v4322_v8 }
 0x2f5   : > { %v5841_v55 = vpop.eup %5840  ;;  %v4995_v17 = vpack.c.bf16 %v4377_v45, %v4376_v18  ;;  %v4378_v46 = vmul.f32 %v5839_v49, %v4330_v47 }
 0x2f6   : > { %v5843_v51 = vpop.eup %5842  ;;  %4431 = vst [vmem:[%s7092_s11 + $0x8] sm:$0xff] %v4991_v13  ;;  %v4371_v56 = vmul.f32 %v5841_v55, %v4323_v50 }
 0x2f7   : > { %v5845_v63 = vpop.eup %5844  ;;  %4435 = vst [vmem:[%s7092_s11 + $0x28] sm:$0xff] %v4995_v17  ;;  %v4379_v14 = vmul.f32 %v5843_v51, %v4331_v38 }
 0x2f8   : > { %v4992_v52 = vpack.c.bf16 %v4371_v56, %v4370_v42  ;;  %v4301_v0 = vadd.f32 2.0, %v5845_v63  ;;  %v5847_v3 = vpop.eup %5846 }
 0x2f9   : > { %v4996_v41 = vpack.c.bf16 %v4379_v14, %v4378_v46  ;;  %v4372_v16 = vmul.f32 %v5847_v3, %v4324_v59  ;;  %v5849_v5 = vpop.eup %5848  ;;  %v4492_v48 = vld [vmem:[%s7092_s11] sm:$0xff] (%p6013_p9) }
 0x2fa   : > { %4432 = vst [vmem:[%s7092_s11 + $0x10] sm:$0xff] %v4992_v52  ;;  %v4317_v4 = vmul.f32 %v5845_v63, %v4301_v0  ;;  %v4373_v9 = vmul.f32 %v5849_v5, %v4325_v53  ;;  %v4500_v60 = vld [vmem:[%s7092_s11 + $0x20] sm:$0xff] (%p6013_p9)  ;;  %4493 = vst [vmem:[%s4450_s26] sm:$0xff] (%p6013_p9), %v4492_v48 }
 0x2fb   : > { %4436 = vst [vmem:[%s7092_s11 + $0x30] sm:$0xff] %v4996_v41  ;;  %4501 = vst [vmem:[%s4450_s26 + $0x40] sm:$0xff] (%p6013_p9), %v4500_v60 }
 0x2fc   : > { %v4349_v6 = vadd.f32 2.0, %v4317_v4  ;;  %v4993_v11 = vpack.c.bf16 %v4373_v9, %v4372_v16  ;;  %v5851_v12 = vpop.eup %5850  ;;  %v4333_v43 = vmul.f32 %v7067_v58, %v4317_v4 }
 0x2fd   : > { %v4380_v20 = vmul.f32 %v5851_v12, %v4332_v54  ;;  %v4494_v57 = vld [vmem:[%s7092_s11 + $0x8] sm:$0xff] (%p6013_p9) }
 0x2fe   : > { %5852 = vrcp.f32 %v4349_v6  ;;  %4433 = vst [vmem:[%s7092_s11 + $0x18] sm:$0xff] %v4993_v11  ;;  %v4502_v10 = vld [vmem:[%s7092_s11 + $0x28] sm:$0xff] (%p6013_p9)  ;;  %4495 = vst [vmem:[%s4450_s26 + $0x10] sm:$0xff] (%p6013_p9), %v4494_v57 }
 0x2ff   : > { %4503 = vst [vmem:[%s4450_s26 + $0x50] sm:$0xff] (%p6013_p9), %v4502_v10 }
 0x301   : > { %v4496_v58 = vld [vmem:[%s7092_s11 + $0x10] sm:$0xff] (%p6013_p9) }
 0x302   : > { %v4504_v29 = vld [vmem:[%s7092_s11 + $0x30] sm:$0xff] (%p6013_p9)  ;;  %4497 = vst [vmem:[%s4450_s26 + $0x20] sm:$0xff] (%p6013_p9), %v4496_v58 }
 0x303   : > { %4505 = vst [vmem:[%s4450_s26 + $0x60] sm:$0xff] (%p6013_p9), %v4504_v29 }
 0x305   : > { %v4498_v27 = vld [vmem:[%s7092_s11 + $0x18] sm:$0xff] (%p6013_p9) }
 0x306   : > { %4499 = vst [vmem:[%s4450_s26 + $0x30] sm:$0xff] (%p6013_p9), %v4498_v27 }
 0x307   : > { %4444 = sbr.rel (!%p6013_p9) target bundleno = 790 (0x316), region = 74 }
 0x308   : > { %v5853_v23 = vpop.eup %5852 }
 0x309   : > { %v4381_v25 = vmul.f32 %v5853_v23, %v4333_v43 }
 0x30b   : > { %v4997_v26 = vpack.c.bf16 %v4381_v25, %v4380_v20 }
 0x30d   : > { %4437 = vst [vmem:[%s7092_s11 + $0x38] sm:$0xff] %v4997_v26 }
 0x314   : > { %v4506_v30 = vld [vmem:[%s7092_s11 + $0x38] sm:$0xff] }
 0x315   : > { %4507 = vst [vmem:[%s4450_s26 + $0x70] sm:$0xff] %v4506_v30 }
 0x316 PF: > { %s13_s20 = sadd.s32 1, %s5924_s20   ;;  %s7161_s12 = smov %s5896_s13 }
 0x317   : > { %p10_p2 = scmp.ge.s32.totalorder %s13_s20, 6   ;;  %s7162_s13 = smov %s6018_s4 }
 0x318   : > { %s7163_s14 = smov %s5904_s15  ;;  %s7164_s15 = smov %s6007_s27 }
 0x319   : > { %s7165_s16 = smov %s5916_s18  ;;  %s7166_s17 = smov %s5920_s19 }
 0x31a   : > { %s7167_s18 = smov %s7170_s22  ;;  %s7168_s19 = smov %s7174_s23 }
 0x31b   :  { %12 = sbr.rel (!%p10_p2) target bundleno = 5 (0x5), region = 149 }

// kernel: downsample4_forward.23
= control target key start
LH: loop header
LB: loop body
LE: loop exit
PB: predicated region body
PF: predicated region fallthrough
CT: control target
= control target key end

     0   :  { %s5596_s15 = smov 0   ;;  %s5598_s16 = smov 0   ;;  %s7197_s0 = inlined_call_operand.vmem [shape: bf16[2,10,10,256], index: 0, kind: input, shape index: {}]   ;;  %s7198_s1 = inlined_call_operand.vmem [shape: bf16[3,3,256,256], index: 1, kind: input, shape index: {}]   ;;  %s7199_s2 = inlined_call_operand.vmem [shape: f32[1,256], index: 2, kind: input, shape index: {}]   ;;  %s7200_s3 = inlined_call_operand.vmem [shape: bf16[2,8,8,256], index: 3, kind: input, shape index: {}]   ;;  %s7201_s4 = inlined_call_operand.vmem [shape: bf16[2,8,8,256], index: 4, kind: output, shape index: {}]  }
   0x1   :  { %s5600_s17 = smov 0  }
   0x2 LB: > { %s26_s18 = sadd.s32 1, %s5565_s16  ;;  %p4107_p0 = scmp.ge.s32.totalorder %s5569_s17, 1  ;;  %s5569_s17 = sphi %s5600_s17, %s14_s17   ;;  %s5565_s16 = sphi %s5598_s16, %s7207_s16   ;;  %s5561_s15 = sphi %s5596_s15, %s7206_s15  }
   0x3   : > { %p28_p1 = scmp.ge.s32.totalorder %s26_s18, 2  ;;  %p214_p2 = scmp.lt.s32.totalorder %s5569_s17, 3 }
   0x5   : > { %s7209_s18 = smov (%p28_p1, %s26_s18), 0  ;;  %p215_p3 = pnand %p4107_p0, %p214_p2 }
   0x6   : > { %v5022_v0 = vld [vmem:[%s7198_s1 + $0x104] ss:$8 sps:$4 sm:$0xff] (!%p215_p3)   ;;  %v5026_v2 = vld [vmem:[%s7198_s1 + $0x100] ss:$8 sps:$4 sm:$0xff] (!%p215_p3)   ;;  %v5028_v4 = vld [vmem:[%s7198_s1 + $0x114] ss:$8 sps:$4 sm:$0xff] (!%p215_p3)  }
   0x7   : > { %218 = sbr.rel (%p215_p3) target bundleno = 618 (0x26a), region = 36  ;;  %v5024_v1 = vld [vmem:[%s7198_s1 + $0x404] ss:$8 sps:$4 sm:$0xff] (!%p215_p3)   ;;  %686 = vmatprep.subr.bf16.mxu1 (!%p215_p3), %v5022_v0  ;;  %v5027_v3 = vld [vmem:[%s7198_s1 + $0x400] ss:$8 sps:$4 sm:$0xff] (!%p215_p3)   ;;  %p262_p4 = scmp.lt.s32.totalorder (!%p215_p3), %s5561_s15, 1 }
   0x8   : > { %2089 = vmatprep.subr.bf16.mxu0 (!%p215_p3), %v5024_v1  ;;  %687 = vmatpush1.bf16.msra.mxu1 (!%p215_p3), %v5026_v2  ;;  %v5030_v5 = vld [vmem:[%s7198_s1 + $0x414] ss:$8 sps:$4 sm:$0xff] (!%p215_p3)   ;;  %v5032_v6 = vld [vmem:[%s7198_s1 + $0x110] ss:$8 sps:$4 sm:$0xff] (!%p215_p3)   ;;  %v5034_v8 = vld [vmem:[%s7198_s1 + $0x124] ss:$8 sps:$4 sm:$0xff] (!%p215_p3)  }
   0x9   : > { %2090 = vmatpush1.bf16.msra.mxu0 (!%p215_p3), %v5027_v3  ;;  %688 = vmatprep.subr.bf16.mxu1 (!%p215_p3), %v5028_v4  ;;  %v5033_v7 = vld [vmem:[%s7198_s1 + $0x410] ss:$8 sps:$4 sm:$0xff] (!%p215_p3)   ;;  %v5036_v9 = vld [vmem:[%s7198_s1 + $0x424] ss:$8 sps:$4 sm:$0xff] (!%p215_p3)   ;;  %v5038_v10 = vld [vmem:[%s7198_s1 + $0x120] ss:$8 sps:$4 sm:$0xff] (!%p215_p3)  }
   0xa   : > { %2091 = vmatprep.subr.bf16.mxu0 (!%p215_p3), %v5030_v5  ;;  %v5039_v11 = vld [vmem:[%s7198_s1 + $0x420] ss:$8 sps:$4 sm:$0xff] (!%p215_p3)   ;;  %v5040_v12 = vld [vmem:[%s7198_s1 + $0x134] ss:$8 sps:$4 sm:$0xff] (!%p215_p3)   ;;  %v5044_v14 = vld [vmem:[%s7198_s1 + $0x130] ss:$8 sps:$4 sm:$0xff] (!%p215_p3)  }
   0xb   : > { %v5042_v13 = vld [vmem:[%s7198_s1 + $0x434] ss:$8 sps:$4 sm:$0xff] (!%p215_p3)   ;;  %v5045_v15 = vld [vmem:[%s7198_s1 + $0x430] ss:$8 sps:$4 sm:$0xff] (!%p215_p3)   ;;  %v5046_v16 = vld [vmem:[%s7198_s1 + $0x144] ss:$8 sps:$4 sm:$0xff] (!%p215_p3)  }
   0xc   : > { %689 = vmatpush1.bf16.msra.mxu1 (!%p215_p3), %v5032_v6  ;;  %v5048_v17 = vld [vmem:[%s7198_s1 + $0x444] ss:$8 sps:$4 sm:$0xff] (!%p215_p3)   ;;  %v5050_v18 = vld [vmem:[%s7198_s1 + $0x140] ss:$8 sps:$4 sm:$0xff] (!%p215_p3)   ;;  %v5052_v20 = vld [vmem:[%s7198_s1 + $0x154] ss:$8 sps:$4 sm:$0xff] (!%p215_p3)  }
   0xd   : > { %2092 = vmatpush1.bf16.msra.mxu0 (!%p215_p3), %v5033_v7  ;;  %690 = vmatprep.subr.bf16.mxu1 (!%p215_p3), %v5034_v8  ;;  %v5051_v19 = vld [vmem:[%s7198_s1 + $0x440] ss:$8 sps:$4 sm:$0xff] (!%p215_p3)   ;;  %v5054_v21 = vld [vmem:[%s7198_s1 + $0x454] ss:$8 sps:$4 sm:$0xff] (!%p215_p3)   ;;  %v5056_v22 = vld [vmem:[%s7198_s1 + $0x150] ss:$8 sps:$4 sm:$0xff] (!%p215_p3)  }
   0xe   : > { %2093 = vmatprep.subr.bf16.mxu0 %v5036_v9  ;;  %v5057_v23 = vld [vmem:[%s7198_s1 + $0x450] ss:$8 sps:$4 sm:$0xff]   ;;  %v5058_v24 = vld [vmem:[%s7198_s1 + $0x164] ss:$8 sps:$4 sm:$0xff]   ;;  %v5062_v26 = vld [vmem:[%s7198_s1 + $0x160] ss:$8 sps:$4 sm:$0xff]  }
   0xf   : > { %v5060_v25 = vld [vmem:[%s7198_s1 + $0x464] ss:$8 sps:$4 sm:$0xff]   ;;  %v5063_v27 = vld [vmem:[%s7198_s1 + $0x460] ss:$8 sps:$4 sm:$0xff]   ;;  %v5064_v28 = vld [vmem:[%s7198_s1 + $0x174] ss:$8 sps:$4 sm:$0xff]  }
  0x10   : > { %691 = vmatpush1.bf16.msra.mxu1 %v5038_v10  ;;  %v5066_v29 = vld [vmem:[%s7198_s1 + $0x474] ss:$8 sps:$4 sm:$0xff]   ;;  %v5068_v30 = vld [vmem:[%s7198_s1 + $0x170] ss:$8 sps:$4 sm:$0xff]   ;;  %v5070_v32 = vld [vmem:[%s7198_s1 + $0x184] ss:$8 sps:$4 sm:$0xff]  }
  0x11   : > { %2094 = vmatpush1.bf16.msra.mxu0 %v5039_v11  ;;  %692 = vmatprep.subr.bf16.mxu1 %v5040_v12  ;;  %v5069_v31 = vld [vmem:[%s7198_s1 + $0x470] ss:$8 sps:$4 sm:$0xff]   ;;  %v5072_v33 = vld [vmem:[%s7198_s1 + $0x484] ss:$8 sps:$4 sm:$0xff]   ;;  %v5074_v34 = vld [vmem:[%s7198_s1 + $0x180] ss:$8 sps:$4 sm:$0xff]  }
  0x12   : > { %2095 = vmatprep.subr.bf16.mxu0 %v5042_v13  ;;  %v5075_v35 = vld [vmem:[%s7198_s1 + $0x480] ss:$8 sps:$4 sm:$0xff]   ;;  %s7211_s15 = smov (!%p262_p4, %s5561_s15), 1  ;;  %v5076_v36 = vld [vmem:[%s7198_s1 + $0x194] ss:$8 sps:$4 sm:$0xff]   ;;  %vm1056_vm3 = vcmask 1042432  }
  0x13   : > { %v5078_v37 = vld [vmem:[%s7198_s1 + $0x494] ss:$8 sps:$4 sm:$0xff]   ;;  %v5080_v38 = vld [vmem:[%s7198_s1 + $0x190] ss:$8 sps:$4 sm:$0xff]   ;;  %s4997_s5 = smul.u32 160, %s7211_s15  ;;  %vm1057_vm4 = vcmask 1046532  }
  0x14   : > { %693 = vmatpush1.bf16.msra.mxu1 %v5044_v14  ;;  %v5081_v39 = vld [vmem:[%s7198_s1 + $0x490] ss:$8 sps:$4 sm:$0xff]   ;;  %v5082_v40 = vld [vmem:[%s7198_s1 + $0x1a4] ss:$8 sps:$4 sm:$0xff]   ;;  %v5086_v42 = vld [vmem:[%s7198_s1 + $0x1a0] ss:$8 sps:$4 sm:$0xff]  }
  0x15   : > { %2096 = vmatpush1.bf16.msra.mxu0 %v5045_v15  ;;  %694 = vmatprep.subr.bf16.mxu1 %v5046_v16  ;;  %v5084_v41 = vld [vmem:[%s7198_s1 + $0x4a4] ss:$8 sps:$4 sm:$0xff]   ;;  %v5087_v43 = vld [vmem:[%s7198_s1 + $0x4a0] ss:$8 sps:$4 sm:$0xff]   ;;  %s5756_s22 = scalar_lea.vmem %s7197_s0, %s4997_s5  ;;  %v5088_v44 = vld [vmem:[%s7198_s1 + $0x1b4] ss:$8 sps:$4 sm:$0xff]  }
  0x16   : > { %2097 = vmatprep.subr.bf16.mxu0 %v5048_v17  ;;  %vm346_vm0 = vsmask.f32 3328  ;;  %v5090_v45 = vld [vmem:[%s7198_s1 + $0x4b4] ss:$8 sps:$4 sm:$0xff]   ;;  %vm347_vm1 = vsmask.f32 7440  ;;  %vm6086_vm5 = vmor %vm1056_vm3, %vm1057_vm4 }
  0x17   : > { %v5092_v46 = vld [vmem:[%s7198_s1 + $0x1b0] ss:$8 sps:$4 sm:$0xff]   ;;  %v5771_v48 = vld [vmem:[%s5756_s22] sm:$0xff]  ;;  %v338_v50 = vld [vmem:[%s5756_s22 + $0x8] sm:$0x11]  ;;  %s4827_s29 = sshll.u32 %s7211_s15, 6 }
  0x18   : > { %695 = vmatpush1.bf16.msra.mxu1 %v5050_v18  ;;  %v5093_v47 = vld [vmem:[%s7198_s1 + $0x4b0] ss:$8 sps:$4 sm:$0xff]   ;;  %v350_v52 = vshrl.u32 %v5771_v48, 16  ;;  %v353_v53 = vshll.u32 %v5771_v48, 16  ;;  %v359_v54 = vshll.u32 %v338_v50, 16  ;;  %v5795_v4 = vld [vmem:[%s5756_s22 + $0x20] sm:$0xff]  ;;  %vm5817_vm2 = vmor %vm346_vm0, %vm347_vm1  ;;  %s7068_s6 = scalar_lea.vmem %s7200_s3, %s4827_s29  ;;  %s7155_s9 = scalar_lea.vmem %s7201_s4, %s4827_s29 }
  0x19   : > { %2098 = vmatpush1.bf16.msra.mxu0 %v5051_v19  ;;  %696 = vmatprep.subr.bf16.mxu1 %v5052_v20  ;;  %v5774_v49 = vld [vmem:[%s5756_s22 + $0x10] sm:$0xff]  ;;  %v339_v51 = vld [vmem:[%s5756_s22 + $0x18] sm:$0x11]  ;;  %v5094_v57 = vld [vmem:[%s7198_s1 + $0x1c4] ss:$8 sps:$4 sm:$0xff]   ;;  %v1767_v12 = vshrl.u32 %v5795_v4, 16 }
  0x1a   : > { %2099 = vmatprep.subr.bf16.mxu0 %v5054_v21  ;;  %v364_v55 = vshrl.u32 %v5774_v49, 16  ;;  %v367_v56 = vshll.u32 %v5774_v49, 16  ;;  %v5096_v58 = vld [vmem:[%s7198_s1 + $0x4c4] ss:$8 sps:$4 sm:$0xff]   ;;  %v352_v59 = vrot.slane %v350_v52, 4  ;;  %v373_v60 = vshll.u32 %v339_v51, 16 }
  0x1b   : > { %v5098_v61 = vld [vmem:[%s7198_s1 + $0x1c0] ss:$8 sps:$4 sm:$0xff]   ;;  %v355_v62 = vrot.slane %v353_v53, 5  ;;  %v361_v63 = vrot.slane %v359_v54, 5  ;;  %v5792_v3 = vld [vmem:[%s5756_s22 + $0x18] sm:$0x11]  ;;  %v4186_v6 = vcombine.high %v5771_v48, %v5774_v49  ;;  %v4185_v7 = vcombine.low %v5771_v48, %v5774_v49 }
  0x1c   : > { %697 = vmatpush1.bf16.msra.mxu1 %v5056_v22  ;;  %v366_v0 = vrot.slane %v364_v55, 4  ;;  %v369_v1 = vrot.slane %v367_v56, 5  ;;  %v375_v2 = vrot.slane %v373_v60, 5  ;;  %v5798_v5 = vld [vmem:[%s5756_s22 + $0x28] sm:$0x11]  ;;  %v1762_v11 = vshll.u32 %v5792_v3, 16 }
  0x1d   : > { %2100 = vmatpush1.bf16.msra.mxu0 %v5057_v23  ;;  %698 = vmatprep.subr.bf16.mxu1 %v5058_v24  ;;  %v5099_v8 = vld [vmem:[%s7198_s1 + $0x4c0] ss:$8 sps:$4 sm:$0xff]   ;;  %v356_v9 = vor.u32 %v355_v62, %v352_v59  ;;  %v5100_v13 = vld [vmem:[%s7198_s1 + $0x1d4] ss:$8 sps:$4 sm:$0xff]   ;;  %v1770_v16 = vshll.u32 %v5795_v4, 16  ;;  %v1776_v17 = vshll.u32 %v5798_v5, 16 }
  0x1e   : > { %2101 = vmatprep.subr.bf16.mxu0 %v5060_v25  ;;  %v370_v10 = vor.u32 %v369_v1, %v366_v0  ;;  %v5102_v14 = vld [vmem:[%s7198_s1 + $0x4d4] ss:$8 sps:$4 sm:$0xff]   ;;  %v1769_v20 = vrot.slane %v1767_v12, 4  ;;  %v5104_v21 = vld [vmem:[%s7198_s1 + $0x1d0] ss:$8 sps:$4 sm:$0xff]   ;;  %v1764_v23 = vrot.slane %v1762_v11, 5 }
  0x1f   : > { %v357_v18 = vrot.slane %v356_v9, 4  ;;  %v5105_v22 = vld [vmem:[%s7198_s1 + $0x4d0] ss:$8 sps:$4 sm:$0xff]   ;;  %v1772_v24 = vrot.slane %v1770_v16, 5  ;;  %v5106_v25 = vld [vmem:[%s7198_s1 + $0x1e4] ss:$8 sps:$4 sm:$0xff]  }
  0x20   : > { %699 = vmatpush1.bf16.msra.mxu1 %v5062_v26  ;;  %v371_v19 = vrot.slane %v370_v10, 4  ;;  %v5126_v50 = vld [vmem:[%s7198_s1 + $0x14] ss:$8 sps:$4 sm:$0xff]   ;;  %v5124_v52 = vld [vmem:[%s7198_s1 + $0x10] ss:$8 sps:$4 sm:$0xff]  }
  0x21   : > { %2102 = vmatpush1.bf16.msra.mxu0 %v5063_v27  ;;  %700 = vmatprep.subr.bf16.mxu1 %v5064_v28  ;;  %v362_v26 = vsel %vm5817_vm2, %v357_v18, %v361_v63  ;;  %v5108_v28 = vld [vmem:[%s7198_s1 + $0x4e4] ss:$8 sps:$4 sm:$0xff]   ;;  %v5129_v51 = vld [vmem:[%s7198_s1 + $0x514] ss:$8 sps:$4 sm:$0xff]   ;;  %v5127_v53 = vld [vmem:[%s7198_s1 + $0x510] ss:$8 sps:$4 sm:$0xff]  }
  0x22   : > { %2103 = vmatprep.subr.bf16.mxu0 %v5066_v29  ;;  %v376_v27 = vsel %vm5817_vm2, %v371_v19, %v375_v2  ;;  %v5132_v54 = vld [vmem:[%s7198_s1 + $0x24] ss:$8 sps:$4 sm:$0xff]   ;;  %v5130_v56 = vld [vmem:[%s7198_s1 + $0x20] ss:$8 sps:$4 sm:$0xff]   ;;  %v5141_v59 = vld [vmem:[%s7198_s1 + $0x534] ss:$8 sps:$4 sm:$0xff]  }
  0x23   : > { %v4146_v29 = vcombine.high %v362_v26, %v376_v27  ;;  %v5135_v55 = vld [vmem:[%s7198_s1 + $0x524] ss:$8 sps:$4 sm:$0xff]   ;;  %v5136_v60 = vld [vmem:[%s7198_s1 + $0x30] ss:$8 sps:$4 sm:$0xff]   ;;  %v5142_v16 = vld [vmem:[%s7198_s1 + $0x40] ss:$8 sps:$4 sm:$0xff]  }
  0x24   : > { %701 = vmatpush1.bf16.msra.mxu1 %v5068_v30  ;;  %v1773_v30 = vor.u32 %v1772_v24, %v1769_v20  ;;  %v5913_v62 = vld [vmem:[%s5756_s22 + $0x30] sm:$0xff]  ;;  %v340_v63 = vld [vmem:[%s5756_s22 + $0x28] sm:$0x11]  ;;  %v341_v0 = vld [vmem:[%s5756_s22 + $0x38] sm:$0x11] }
  0x25   : > { %2104 = vmatpush1.bf16.msra.mxu0 %v5069_v31  ;;  %702 = vmatprep.subr.bf16.mxu1 %v5070_v32  ;;  %v1778_v31 = vrot.slane %v1776_v17, 5  ;;  %v5110_v32 = vld [vmem:[%s7198_s1 + $0x1e0] ss:$8 sps:$4 sm:$0xff]   ;;  %v392_v1 = vshrl.u32 %v5913_v62, 16  ;;  %v395_v2 = vshll.u32 %v5913_v62, 16  ;;  %v387_v9 = vshll.u32 %v340_v63, 16 }
  0x26   : > { %2105 = vmatprep.subr.bf16.mxu0 %v5072_v33  ;;  %v5111_v33 = vld [vmem:[%s7198_s1 + $0x4e0] ss:$8 sps:$4 sm:$0xff]   ;;  %718 = vmatprep.mubr.bf16.mxu1 %v4146_v29  ;;  %v401_v10 = vshll.u32 %v341_v0, 16  ;;  %v5147_v11 = vld [vmem:[%s7198_s1 + $0x544] ss:$8 sps:$4 sm:$0xff]  }
  0x27   : > { %v394_v12 = vrot.slane %v392_v1, 4  ;;  %v389_v17 = vrot.slane %v387_v9, 5  ;;  %v5935_v20 = vld [vmem:[%s5756_s22 + $0x48] sm:$0x11]  ;;  %v5153_v29 = vld [vmem:[%s7198_s1 + $0x554] ss:$8 sps:$4 sm:$0xff]  }
  0x28   : > { %703 = vmatpush1.bf16.msra.mxu1 %v5074_v34  ;;  %v1765_v34 = vsel %vm5817_vm2, %v371_v19, %v1764_v23  ;;  %v403_v18 = vrot.slane %v401_v10, 5  ;;  %v5932_v19 = vld [vmem:[%s5756_s22 + $0x40] sm:$0xff]  ;;  %v5994_v63 = vld [vmem:[%s5756_s22 + $0x58] sm:$0x11]  ;;  %v5997_v0 = vld [vmem:[%s5756_s22 + $0x68] sm:$0x11] }
  0x29   : > { %2106 = vmatpush1.bf16.msra.mxu0 %v5075_v35  ;;  %704 = vmatprep.subr.bf16.mxu1 %v5076_v36  ;;  %v5847_v35 = vrot.slane %v1773_v30, 4  ;;  %v5112_v36 = vld [vmem:[%s7198_s1 + $0x1f4] ss:$8 sps:$4 sm:$0xff]   ;;  %v1795_v23 = vshrl.u32 %v5932_v19, 16  ;;  %v1798_v24 = vshll.u32 %v5932_v19, 16  ;;  %v1818_v10 = vshll.u32 %v5994_v63, 16 }
  0x2a   : > { %2107 = vmatprep.subr.bf16.mxu0 %v5078_v37  ;;  %v5114_v37 = vld [vmem:[%s7198_s1 + $0x4f4] ss:$8 sps:$4 sm:$0xff]   ;;  %v5230_v48 = vld [vmem:[%s7198_s1 + $0x224] ss:$8 sps:$4 sm:$0xff]  }
  0x2b   : > { %v5162_v1 = vld [vmem:[%s7198_s1 + $0x74] ss:$8 sps:$4 sm:$0xff]   ;;  %v5233_v49 = vld [vmem:[%s7198_s1 + $0x624] ss:$8 sps:$4 sm:$0xff]  }
  0x2c   : > { %705 = vmatpush1.bf16.msra.mxu1 %v5080_v38  ;;  %v1779_v38 = vsel %vm5817_vm2, %v5847_v35, %v1778_v31 }
  0x2d   : > { %2108 = vmatpush1.bf16.msra.mxu0 %v5081_v39  ;;  %706 = vmatprep.subr.bf16.mxu1 %v5082_v40  ;;  %v4434_v39 = vcombine.high %v1765_v34, %v1779_v38  ;;  %v5116_v40 = vld [vmem:[%s7198_s1 + $0x1f0] ss:$8 sps:$4 sm:$0xff]  }
  0x2e   : > { %2109 = vmatprep.subr.bf16.mxu0 %v5084_v41  ;;  %v5117_v41 = vld [vmem:[%s7198_s1 + $0x4f0] ss:$8 sps:$4 sm:$0xff]  }
  0x2f   : > { %2121 = vmatprep.mubr.bf16.mxu0 %v4434_v39 }
  0x30   : > { %707 = vmatpush1.bf16.msra.mxu1 %v5086_v42  ;;  %v5120_v42 = vld [vmem:[%s7198_s1 + $0x4] ss:$8 sps:$4 sm:$0xff]  }
  0x31   : > { %2110 = vmatpush1.bf16.msra.mxu0 %v5087_v43  ;;  %708 = vmatprep.subr.bf16.mxu1 %v5088_v44  ;;  %v5123_v43 = vld [vmem:[%s7198_s1 + $0x504] ss:$8 sps:$4 sm:$0xff]   ;;  %v4145_v44 = vcombine.low %v362_v26, %v376_v27  ;;  %v5145_v26 = vld [vmem:[%s7198_s1 + $0x540] ss:$8 sps:$4 sm:$0xff]   ;;  %v5150_v27 = vld [vmem:[%s7198_s1 + $0x54] ss:$8 sps:$4 sm:$0xff]  }
  0x32   : > { %2111 = vmatprep.subr.bf16.mxu0 %v5090_v45  ;;  %v5118_v45 = vld [vmem:[%s7198_s1] ss:$8 sps:$4 sm:$0xff]  }
  0x34   : > { %709 = vmatpush1.bf16.msra.mxu1 %v5092_v46  ;;  %v4433_v46 = vcombine.low %v1765_v34, %v1779_v38  ;;  %v5148_v34 = vld [vmem:[%s7198_s1 + $0x50] ss:$8 sps:$4 sm:$0xff]  }
  0x35   : > { %2112 = vmatpush1.bf16.msra.mxu0 %v5093_v47  ;;  %710 = vmatprep.subr.bf16.mxu1 %v5094_v57  ;;  %v5121_v47 = vld [vmem:[%s7198_s1 + $0x500] ss:$8 sps:$4 sm:$0xff]  }
  0x36   : > { %2113 = vmatprep.subr.bf16.mxu0 %v5096_v58  ;;  %v5133_v57 = vld [vmem:[%s7198_s1 + $0x520] ss:$8 sps:$4 sm:$0xff]   ;;  %v5138_v58 = vld [vmem:[%s7198_s1 + $0x34] ss:$8 sps:$4 sm:$0xff]  }
  0x38   : > { %711 = vmatpush1.bf16.msra.mxu1 %v5098_v61  ;;  %v5139_v61 = vld [vmem:[%s7198_s1 + $0x530] ss:$8 sps:$4 sm:$0xff]  }
  0x39   : > { %2114 = vmatpush1.bf16.msra.mxu0 %v5099_v8  ;;  %712 = vmatprep.subr.bf16.mxu1 %v5100_v13  ;;  %v5144_v8 = vld [vmem:[%s7198_s1 + $0x44] ss:$8 sps:$4 sm:$0xff]   ;;  %v397_v13 = vrot.slane %v395_v2, 5 }
  0x3a   : > { %2115 = vmatprep.subr.bf16.mxu0 %v5102_v14  ;;  %v5926_v14 = vld [vmem:[%s5756_s22 + $0x38] sm:$0x11] }
  0x3c   : > { %713 = vmatpush1.bf16.msra.mxu1 %v5104_v21  ;;  %v1790_v21 = vshll.u32 %v5926_v14, 16 }
  0x3d   : > { %2116 = vmatpush1.bf16.msra.mxu0 %v5105_v22  ;;  %714 = vmatprep.subr.bf16.mxu1 %v5106_v25  ;;  %v398_v22 = vor.u32 %v397_v13, %v394_v12  ;;  %v1804_v25 = vshll.u32 %v5935_v20, 16 }
  0x3e   : > { %2117 = vmatprep.subr.bf16.mxu0 %v5108_v28  ;;  %v390_v28 = vsel %vm5817_vm2, %v5847_v35, %v389_v17  ;;  %v1792_v31 = vrot.slane %v1790_v21, 5  ;;  %v5151_v35 = vld [vmem:[%s7198_s1 + $0x550] ss:$8 sps:$4 sm:$0xff]  }
  0x3f   : > { %v399_v30 = vrot.slane %v398_v22, 4  ;;  %v5160_v17 = vld [vmem:[%s7198_s1 + $0x70] ss:$8 sps:$4 sm:$0xff]  }
  0x40   : > { %715 = vmatpush1.bf16.msra.mxu1 %v5110_v32  ;;  %v1797_v32 = vrot.slane %v1795_v23, 4  ;;  %v5163_v22 = vld [vmem:[%s7198_s1 + $0x570] ss:$8 sps:$4 sm:$0xff]   ;;  %v1820_v23 = vrot.slane %v1818_v10, 5 }
  0x41   : > { %2118 = vmatpush1.bf16.msra.mxu0 %v5111_v33  ;;  %716 = vmatprep.subr.bf16.mxu1 %v5112_v36  ;;  %v1800_v33 = vrot.slane %v1798_v24, 5  ;;  %v5156_v36 = vld [vmem:[%s7198_s1 + $0x64] ss:$8 sps:$4 sm:$0xff]   ;;  %v404_v38 = vsel %vm5817_vm2, %v399_v30, %v403_v18  ;;  %v5172_v10 = vld [vmem:[%s7198_s1 + $0x90] ss:$8 sps:$4 sm:$0xff]  }
  0x42   : > { %2119 = vmatprep.subr.bf16.mxu0 %v5114_v37  ;;  %v5159_v37 = vld [vmem:[%s7198_s1 + $0x564] ss:$8 sps:$4 sm:$0xff]  }
  0x43   : > { %v1801_v39 = vor.u32 %v1800_v33, %v1797_v32  ;;  %v6029_v33 = vld [vmem:[%s5756_s22 + $0x68] sm:$0x11] }
  0x44   : > { %717 = vmatpush1.bf16.msra.mxu1 %v5116_v40  ;;  %v1806_v40 = vrot.slane %v1804_v25, 5 }
  0x45   : > { %2120 = vmatpush1.bf16.msra.mxu0 %v5117_v41  ;;  %959 = vmatprep.subr.bf16.mxu1 %v5120_v42  ;;  %v5968_v41 = vld [vmem:[%s5756_s22 + $0x50] sm:$0xff]  ;;  %v4148_v42 = vcombine.high %v390_v28, %v404_v38 }
  0x46   : > { %2459 = vmatprep.subr.bf16.mxu0 %v5123_v43  ;;  %v4147_v43 = vcombine.low %v390_v28, %v404_v38 }
  0x47   : > { %719 = vmatmul.mubr.bf16.vlgmr.msra.gmra.mrb[0].mxu1 %v4145_v44  ;;  %v5971_v44 = vld [vmem:[%s5756_s22 + $0x48] sm:$0x11] }
  0x48   : > { %2122 = vmatmul.mubr.bf16.vlgmr.msra.gmra.mrb[0].mxu0 %v4433_v46  ;;  %960 = vmatpush1.bf16.msra.mxu1 %v5118_v45  ;;  %v5974_v45 = vld [vmem:[%s5756_s22 + $0x58] sm:$0x11]  ;;  %v420_v46 = vshrl.u32 %v5968_v41, 16 }
  0x49   : > { %2460 = vmatpush1.bf16.msra.mxu0 %v5121_v47  ;;  %961 = vmatprep.subr.bf16.mxu1 %v5126_v50  ;;  %v423_v47 = vshll.u32 %v5968_v41, 16  ;;  %v1793_v50 = vsel %vm5817_vm2, %v399_v30, %v1792_v31  ;;  %v6026_v30 = vld [vmem:[%s5756_s22 + $0x70] sm:$0xff] }
  0x4a   : > { %2461 = vmatprep.subr.bf16.mxu0 %v5129_v51  ;;  %v1802_v51 = vrot.slane %v1801_v39, 4  ;;  %728 = vmatprep.mubr.bf16.mxu1 %v4148_v42  ;;  %v443_v39 = vshll.u32 %v6029_v33, 16 }
  0x4c   : > { %962 = vmatpush1.bf16.msra.mxu1 %v5124_v52  ;;  %v415_v52 = vshll.u32 %v5971_v44, 16 }
  0x4d   : > { %2462 = vmatpush1.bf16.msra.mxu0 %v5127_v53  ;;  %963 = vmatprep.subr.bf16.mxu1 %v5132_v54  ;;  %v429_v53 = vshll.u32 %v5974_v45, 16  ;;  %v5154_v54 = vld [vmem:[%s7198_s1 + $0x60] ss:$8 sps:$4 sm:$0xff]  }
  0x4e   : > { %2463 = vmatprep.subr.bf16.mxu0 %v5135_v55  ;;  %v5157_v55 = vld [vmem:[%s7198_s1 + $0x560] ss:$8 sps:$4 sm:$0xff]  }
  0x4f   : > { %729 = vmatmul.mubr.bf16.gmra.mrb[4].mxu1 %v4147_v43  ;;  %v5174_v43 = vld [vmem:[%s7198_s1 + $0x94] ss:$8 sps:$4 sm:$0xff]  }
  0x50   : > { %964 = vmatpush1.bf16.msra.mxu1 %v5130_v56  ;;  %v422_v56 = vrot.slane %v420_v46, 4  ;;  %v5177_v46 = vld [vmem:[%s7198_s1 + $0x594] ss:$8 sps:$4 sm:$0xff]  }
  0x51   : > { %2464 = vmatpush1.bf16.msra.mxu0 %v5133_v57  ;;  %965 = vmatprep.subr.bf16.mxu1 %v5138_v58  ;;  %v425_v57 = vrot.slane %v423_v47, 5  ;;  %v5989_v58 = vld [vmem:[%s5756_s22 + $0x60] sm:$0xff] }
  0x52   : > { %2465 = vmatprep.subr.bf16.mxu0 %v5141_v59  ;;  %v1807_v59 = vsel %vm5817_vm2, %v1802_v51, %v1806_v40  ;;  %v1823_v12 = vshrl.u32 %v5989_v58, 16  ;;  %v1826_v13 = vshll.u32 %v5989_v58, 16  ;;  %v451_v40 = vshll.u32 %v6026_v30, 16 }
  0x53   : > { %v4436_v2 = vcombine.high %v1793_v50, %v1807_v59  ;;  %v426_v9 = vor.u32 %v425_v57, %v422_v56  ;;  %v6057_v56 = vld [vmem:[%s5756_s22 + $0x88] sm:$0x11] }
  0x54   : > { %966 = vmatpush1.bf16.msra.mxu1 %v5136_v60  ;;  %v417_v60 = vrot.slane %v415_v52, 5  ;;  %v1825_v24 = vrot.slane %v1823_v12, 4  ;;  %v1828_v25 = vrot.slane %v1826_v13, 5  ;;  %v6053_v52 = vld [vmem:[%s5756_s22 + $0x78] sm:$0x11] }
  0x55   : > { %2466 = vmatpush1.bf16.msra.mxu0 %v5139_v61  ;;  %967 = vmatprep.subr.bf16.mxu1 %v5144_v8  ;;  %v431_v61 = vrot.slane %v429_v53, 5  ;;  %v4435_v8 = vcombine.low %v1793_v50, %v1807_v59  ;;  %v427_v21 = vrot.slane %v426_v9, 4  ;;  %v445_v53 = vrot.slane %v443_v39, 5 }
  0x56   : > { %2467 = vmatprep.subr.bf16.mxu0 %v5147_v11  ;;  %v5165_v11 = vld [vmem:[%s7198_s1 + $0x574] ss:$8 sps:$4 sm:$0xff]   ;;  %2131 = vmatprep.mubr.bf16.mxu0 %v4436_v2  ;;  %v418_v18 = vsel %vm5817_vm2, %v1802_v51, %v417_v60  ;;  %v1829_v32 = vor.u32 %v1828_v25, %v1825_v24  ;;  %v1846_v59 = vshll.u32 %v6053_v52, 16 }
  0x57   : > { %2132 = vmatmul.mubr.bf16.gmra.mrb[4].mxu0 %v4435_v8  ;;  %v432_v28 = vsel %vm5817_vm2, %v427_v21, %v431_v61  ;;  %v1821_v47 = vsel %vm5817_vm2, %v427_v21, %v1820_v23  ;;  %v5183_v23 = vld [vmem:[%s7198_s1 + $0x5a4] ss:$8 sps:$4 sm:$0xff]  }
  0x58   : > { %968 = vmatpush1.bf16.msra.mxu1 %v5142_v16  ;;  %v1832_v16 = vshll.u32 %v5997_v0, 16  ;;  %v4150_v31 = vcombine.high %v418_v18, %v432_v28  ;;  %v4149_v38 = vcombine.low %v418_v18, %v432_v28  ;;  %v1830_v50 = vrot.slane %v1829_v32, 4  ;;  %v5178_v28 = vld [vmem:[%s7198_s1 + $0xa0] ss:$8 sps:$4 sm:$0xff]  }
  0x59   : > { %2468 = vmatpush1.bf16.msra.mxu0 %v5145_v26  ;;  %969 = vmatprep.subr.bf16.mxu1 %v5150_v27  ;;  %v5168_v26 = vld [vmem:[%s7198_s1 + $0x84] ss:$8 sps:$4 sm:$0xff]  }
  0x5a   : > { %2469 = vmatprep.subr.bf16.mxu0 %v5153_v29  ;;  %v5171_v27 = vld [vmem:[%s7198_s1 + $0x584] ss:$8 sps:$4 sm:$0xff]   ;;  %v1834_v29 = vrot.slane %v1832_v16, 5  ;;  %738 = vmatprep.mubr.bf16.mxu1 %v4150_v31  ;;  %v1860_v16 = vshll.u32 %v6057_v56, 16  ;;  %v446_v18 = vsel %vm5817_vm2, %v1830_v50, %v445_v53 }
  0x5b   : > { %739 = vmatmul.mubr.bf16.gmra.mrb[8].mxu1 %v4149_v38  ;;  %v5181_v38 = vld [vmem:[%s7198_s1 + $0x5a0] ss:$8 sps:$4 sm:$0xff]  }
  0x5c   : > { %970 = vmatpush1.bf16.msra.mxu1 %v5148_v34  ;;  %v6032_v34 = vld [vmem:[%s5756_s22 + $0x78] sm:$0x11]  ;;  %v1835_v57 = vsel %vm5817_vm2, %v1830_v50, %v1834_v29  ;;  %v1862_v25 = vrot.slane %v1860_v16, 5 }
  0x5d   : > { %2470 = vmatpush1.bf16.msra.mxu0 %v5151_v35  ;;  %971 = vmatprep.subr.bf16.mxu1 %v5156_v36  ;;  %v448_v35 = vshrl.u32 %v6026_v30, 16  ;;  %v5166_v36 = vld [vmem:[%s7198_s1 + $0x80] ss:$8 sps:$4 sm:$0xff]   ;;  %v457_v42 = vshll.u32 %v6032_v34, 16  ;;  %v4437_v2 = vcombine.low %v1821_v47, %v1835_v57  ;;  %v5184_v50 = vld [vmem:[%s7198_s1 + $0xb0] ss:$8 sps:$4 sm:$0xff]  }
  0x5e   : > { %2471 = vmatprep.subr.bf16.mxu0 %v5159_v37  ;;  %v5169_v37 = vld [vmem:[%s7198_s1 + $0x580] ss:$8 sps:$4 sm:$0xff]   ;;  %v5210_v16 = vld [vmem:[%s7198_s1 + $0xf4] ss:$8 sps:$4 sm:$0xff]  }
  0x5f   : > { %v450_v51 = vrot.slane %v448_v35, 4  ;;  %v459_v9 = vrot.slane %v457_v42, 5  ;;  %v5186_v42 = vld [vmem:[%s7198_s1 + $0xb4] ss:$8 sps:$4 sm:$0xff]  }
  0x60   : > { %972 = vmatpush1.bf16.msra.mxu1 %v5154_v54  ;;  %v453_v54 = vrot.slane %v451_v40, 5 }
  0x61   : > { %2472 = vmatpush1.bf16.msra.mxu0 %v5157_v55  ;;  %973 = vmatprep.subr.bf16.mxu1 %v5162_v1  ;;  %v4399_v55 = vld [vmem:[%s5756_s22 + $0x80] sm:$0xff]  ;;  %v4438_v1 = vcombine.high %v1821_v47, %v1835_v57 }
  0x62   : > { %2473 = vmatprep.subr.bf16.mxu0 %v5165_v11  ;;  %v1851_v60 = vshrl.u32 %v4399_v55, 16  ;;  %v1854_v61 = vshll.u32 %v4399_v55, 16  ;;  %v454_v8 = vor.u32 %v453_v54, %v450_v51  ;;  %v1848_v11 = vrot.slane %v1846_v59, 5  ;;  %v5187_v55 = vld [vmem:[%s7198_s1 + $0x5b0] ss:$8 sps:$4 sm:$0xff]  }
  0x63   : > { %2141 = vmatprep.mubr.bf16.mxu0 %v4438_v1  ;;  %v5192_v57 = vld [vmem:[%s7198_s1 + $0xc4] ss:$8 sps:$4 sm:$0xff]   ;;  %v5193_v1 = vld [vmem:[%s7198_s1 + $0x5c0] ss:$8 sps:$4 sm:$0xff]  }
  0x64   : > { %974 = vmatpush1.bf16.msra.mxu1 %v5160_v17  ;;  %v1853_v12 = vrot.slane %v1851_v60, 4  ;;  %v1856_v13 = vrot.slane %v1854_v61, 5  ;;  %v5175_v17 = vld [vmem:[%s7198_s1 + $0x590] ss:$8 sps:$4 sm:$0xff]   ;;  %v455_v21 = vrot.slane %v454_v8, 4  ;;  %2142 = vmatmul.mubr.bf16.gmra.mrb[8].mxu0 %v4437_v2 }
  0x65   : > { %2474 = vmatpush1.bf16.msra.mxu0 %v5163_v22  ;;  %975 = vmatprep.subr.bf16.mxu1 %v5168_v26  ;;  %v5180_v22 = vld [vmem:[%s7198_s1 + $0xa4] ss:$8 sps:$4 sm:$0xff]   ;;  %v2204_v26 = vrot.slane %v5792_v3, 5  ;;  %v5190_v61 = vld [vmem:[%s7198_s1 + $0xc0] ss:$8 sps:$4 sm:$0xff]  }
  0x66   : > { %2475 = vmatprep.subr.bf16.mxu0 %v5171_v27  ;;  %v1857_v24 = vor.u32 %v1856_v13, %v1853_v12  ;;  %v2208_v27 = vrot.slane %v5798_v5, 5  ;;  %v460_v29 = vsel %vm5817_vm2, %v455_v21, %v459_v9  ;;  %v1849_v3 = vsel %vm5817_vm2, %v455_v21, %v1848_v11  ;;  %v5195_v59 = vld [vmem:[%s7198_s1 + $0x5c4] ss:$8 sps:$4 sm:$0xff]   ;;  %v5198_v2 = vld [vmem:[%s7198_s1 + $0xd4] ss:$8 sps:$4 sm:$0xff]  }
  0x67   : > { %v4152_v32 = vcombine.high %v446_v18, %v460_v29  ;;  %v4151_v35 = vcombine.low %v446_v18, %v460_v29  ;;  %v5196_v8 = vld [vmem:[%s7198_s1 + $0xd0] ss:$8 sps:$4 sm:$0xff]   ;;  %v5207_v11 = vld [vmem:[%s7198_s1 + $0x5e4] ss:$8 sps:$4 sm:$0xff]   ;;  %v5202_v12 = vld [vmem:[%s7198_s1 + $0xe0] ss:$8 sps:$4 sm:$0xff]  }
  0x68   : > { %976 = vmatpush1.bf16.msra.mxu1 %v5166_v36  ;;  %v1858_v5 = vrot.slane %v1857_v24, 4  ;;  %v4473_v36 = vld [vmem:[%s5756_s22 + $0x10] sm:$0xee]  ;;  %v5205_v13 = vld [vmem:[%s7198_s1 + $0x5e0] ss:$8 sps:$4 sm:$0xff]   ;;  %v2212_v29 = vrot.slane %v5926_v14, 5 }
  0x69   : > { %2476 = vmatpush1.bf16.msra.mxu0 %v5169_v37  ;;  %977 = vmatprep.subr.bf16.mxu1 %v5174_v43  ;;  %v4474_v37 = vld [vmem:[%s5756_s22 + $0x20] sm:$0xee]  ;;  %v4481_v39 = vrot.slane %v4473_v36, 9  ;;  %v5189_v43 = vld [vmem:[%s7198_s1 + $0x5b4] ss:$8 sps:$4 sm:$0xff]  }
  0x6a   : > { %2477 = vmatprep.subr.bf16.mxu0 %v5177_v46  ;;  %v4482_v40 = vrot.slane %v4474_v37, 9  ;;  %v1863_v46 = vsel %vm5817_vm2, %v1858_v5, %v1862_v25  ;;  %748 = vmatprep.mubr.bf16.mxu1 %v4152_v32  ;;  %v5199_v9 = vld [vmem:[%s7198_s1 + $0x5d0] ss:$8 sps:$4 sm:$0xff]   ;;  %v5215_v24 = vld [vmem:[%s7198_s1 + $0x200] ss:$8 sps:$4 sm:$0xff]   ;;  %v2216_v32 = vrot.slane %v5935_v20, 5 }
  0x6b   : > { %v4440_v47 = vcombine.high %v1849_v3, %v1863_v46  ;;  %749 = vmatmul.mubr.bf16.gmra.mrb[12].mxu1 %v4151_v35  ;;  %v4439_v51 = vcombine.low %v1849_v3, %v1863_v46  ;;  %v2205_v53 = vsel %vm6086_vm5, %v4481_v39, %v2204_v26  ;;  %v5208_v18 = vld [vmem:[%s7198_s1 + $0xf0] ss:$8 sps:$4 sm:$0xff]   ;;  %v5218_v26 = vld [vmem:[%s7198_s1 + $0x600] ss:$8 sps:$4 sm:$0xff]   ;;  %v4188_v3 = vcombine.high %v5795_v4, %v5913_v62 }
  0x6c   : > { %978 = vmatpush1.bf16.msra.mxu1 %v5172_v10  ;;  %v2209_v54 = vsel %vm6086_vm5, %v4482_v40, %v2208_v27  ;;  %991 = vmatprep.mubr.bf16.mxu1 %v4186_v6  ;;  %v5201_v6 = vld [vmem:[%s7198_s1 + $0x5d4] ss:$8 sps:$4 sm:$0xff]   ;;  %v5204_v10 = vld [vmem:[%s7198_s1 + $0xe4] ss:$8 sps:$4 sm:$0xff]   ;;  %v5211_v21 = vld [vmem:[%s7198_s1 + $0x5f0] ss:$8 sps:$4 sm:$0xff]  }
  0x6d   : > { %2478 = vmatpush1.bf16.msra.mxu0 %v5175_v17  ;;  %979 = vmatprep.subr.bf16.mxu1 %v5180_v22  ;;  %v4522_v60 = vcombine.high %v2205_v53, %v2209_v54  ;;  %v5213_v17 = vld [vmem:[%s7198_s1 + $0x5f4] ss:$8 sps:$4 sm:$0xff]   ;;  %v5217_v22 = vld [vmem:[%s7198_s1 + $0x204] ss:$8 sps:$4 sm:$0xff]   ;;  %v4521_v25 = vcombine.low %v2205_v53, %v2209_v54  ;;  %v5222_v36 = vld [vmem:[%s7198_s1 + $0x210] ss:$8 sps:$4 sm:$0xff]  }
  0x6e   : > { %2479 = vmatprep.subr.bf16.mxu0 %v5183_v23  ;;  %2151 = vmatprep.mubr.bf16.mxu0 %v4440_v47  ;;  %v5220_v23 = vld [vmem:[%s7198_s1 + $0x604] ss:$8 sps:$4 sm:$0xff]   ;;  %v5224_v27 = vld [vmem:[%s7198_s1 + $0x214] ss:$8 sps:$4 sm:$0xff]   ;;  %v5225_v14 = vld [vmem:[%s7198_s1 + $0x610] ss:$8 sps:$4 sm:$0xff]  }
  0x6f   : > { %2152 = vmatmul.mubr.bf16.gmra.mrb[12].mxu0 %v4439_v51  ;;  %v4475_v5 = vld [vmem:[%s5756_s22 + $0x30] sm:$0xee]  ;;  %v4476_v35 = vld [vmem:[%s5756_s22 + $0x40] sm:$0xee]  ;;  %v2220_v47 = vrot.slane %v5994_v63, 5  ;;  %v4190_v63 = vcombine.high %v5932_v19, %v5968_v41 }
  0x70   : > { %980 = vmatpush1.bf16.msra.mxu1 %v5178_v28  ;;  %2491 = vmatprep.mubr.bf16.mxu0 %v4522_v60  ;;  %v5227_v28 = vld [vmem:[%s7198_s1 + $0x614] ss:$8 sps:$4 sm:$0xff]   ;;  %v4483_v37 = vrot.slane %v4475_v5, 9  ;;  %v5228_v39 = vld [vmem:[%s7198_s1 + $0x220] ss:$8 sps:$4 sm:$0xff]  }
  0x71   : > { %2480 = vmatpush1.bf16.msra.mxu0 %v5181_v38  ;;  %981 = vmatprep.subr.bf16.mxu1 %v5186_v42  ;;  %v4484_v38 = vrot.slane %v4476_v35, 9  ;;  %v5231_v42 = vld [vmem:[%s7198_s1 + $0x620] ss:$8 sps:$4 sm:$0xff]   ;;  %v5236_v51 = vld [vmem:[%s7198_s1 + $0x234] ss:$8 sps:$4 sm:$0xff]  }
  0x72   : > { %2481 = vmatprep.subr.bf16.mxu0 %v5189_v43  ;;  %v4187_v43 = vcombine.low %v5795_v4, %v5913_v62  ;;  %v4477_v53 = vld [vmem:[%s5756_s22 + $0x50] sm:$0xee]  ;;  %v4478_v54 = vld [vmem:[%s5756_s22 + $0x60] sm:$0xee] }
  0x73   : > { %v2217_v20 = vsel %vm6086_vm5, %v4484_v38, %v2216_v32  ;;  %v4485_v4 = vrot.slane %v4477_v53, 9  ;;  %v1032_v32 = vld [vmem:[%s5756_s22] sm:$0xee] }
  0x74   : > { %982 = vmatpush1.bf16.msra.mxu1 %v5184_v50  ;;  %v2224_v50 = vrot.slane %v5997_v0, 5  ;;  %v5234_v0 = vld [vmem:[%s7198_s1 + $0x230] ss:$8 sps:$4 sm:$0xff]   ;;  %v5254_v5 = vld [vmem:[%s7198_s1 + $0x264] ss:$8 sps:$4 sm:$0xff]   ;;  %v4225_v35 = vrot.slane %v1032_v32, 9 }
  0x75   : > { %2482 = vmatpush1.bf16.msra.mxu0 %v5187_v55  ;;  %983 = vmatprep.subr.bf16.mxu1 %v5192_v57  ;;  %v5239_v55 = vld [vmem:[%s7198_s1 + $0x634] ss:$8 sps:$4 sm:$0xff]   ;;  %v4486_v57 = vrot.slane %v4478_v54, 9  ;;  %v5252_v38 = vld [vmem:[%s7198_s1 + $0x260] ss:$8 sps:$4 sm:$0xff]   ;;  %v1081_v32 = vrot.slane %v5974_v45, 5 }
  0x76   : > { %2483 = vmatprep.subr.bf16.mxu0 %v5195_v59  ;;  %v2221_v59 = vsel %vm6086_vm5, %v4485_v4, %v2220_v47  ;;  %v5261_v47 = vld [vmem:[%s7198_s1 + $0x670] ss:$8 sps:$4 sm:$0xff]   ;;  %v5267_v53 = vld [vmem:[%s7198_s1 + $0x680] ss:$8 sps:$4 sm:$0xff]   ;;  %v5272_v54 = vld [vmem:[%s7198_s1 + $0x294] ss:$8 sps:$4 sm:$0xff]  }
  0x77   : > { %v2225_v60 = vsel %vm6086_vm5, %v4486_v57, %v2224_v50  ;;  %v5266_v50 = vld [vmem:[%s7198_s1 + $0x284] ss:$8 sps:$4 sm:$0xff]   ;;  %v5270_v4 = vld [vmem:[%s7198_s1 + $0x290] ss:$8 sps:$4 sm:$0xff]   ;;  %v5308_v45 = vld [vmem:[%s7198_s1 + $0x6e0] ss:$8 sps:$4 sm:$0xff]  }
  0x78   : > { %984 = vmatpush1.bf16.msra.mxu1 %v5190_v61  ;;  %v5237_v61 = vld [vmem:[%s7198_s1 + $0x630] ss:$8 sps:$4 sm:$0xff]  }
  0x79   : > { %2484 = vmatpush1.bf16.msra.mxu0 %v5193_v1  ;;  %985 = vmatprep.subr.bf16.mxu1 %v5198_v2  ;;  %v5242_v1 = vld [vmem:[%s7198_s1 + $0x244] ss:$8 sps:$4 sm:$0xff]   ;;  %v4526_v2 = vcombine.high %v2221_v59, %v2225_v60  ;;  %v5273_v57 = vld [vmem:[%s7198_s1 + $0x690] ss:$8 sps:$4 sm:$0xff]  }
  0x7a   : > { %2485 = vmatprep.subr.bf16.mxu0 %v5201_v6  ;;  %v5245_v6 = vld [vmem:[%s7198_s1 + $0x644] ss:$8 sps:$4 sm:$0xff]  }
  0x7c   : > { %986 = vmatpush1.bf16.msra.mxu1 %v5196_v8  ;;  %v2228_v8 = vrot.slane %v6053_v52, 5  ;;  %v5243_v52 = vld [vmem:[%s7198_s1 + $0x640] ss:$8 sps:$4 sm:$0xff]  }
  0x7d   : > { %2486 = vmatpush1.bf16.msra.mxu0 %v5199_v9  ;;  %987 = vmatprep.subr.bf16.mxu1 %v5204_v10  ;;  %v2232_v9 = vrot.slane %v6057_v56, 5  ;;  %v4479_v10 = vld [vmem:[%s5756_s22 + $0x70] sm:$0xee]  ;;  %v5542_v56 = vld [vmem:[%s5756_s22 + $0x8] sm:$0x11] }
  0x7e   : > { %2487 = vmatprep.subr.bf16.mxu0 %v5207_v11  ;;  %v4480_v11 = vld [vmem:[%s5756_s22 + $0x80] sm:$0xee] }
  0x80   : > { %988 = vmatpush1.bf16.msra.mxu1 %v5202_v12  ;;  %v5240_v12 = vld [vmem:[%s7198_s1 + $0x240] ss:$8 sps:$4 sm:$0xff]  }
  0x81   : > { %2488 = vmatpush1.bf16.msra.mxu0 %v5205_v13  ;;  %989 = vmatprep.subr.bf16.mxu1 %v5210_v16  ;;  %v4189_v13 = vcombine.low %v5932_v19, %v5968_v41  ;;  %v4525_v16 = vcombine.low %v2221_v59, %v2225_v60  ;;  %v5251_v19 = vld [vmem:[%s7198_s1 + $0x654] ss:$8 sps:$4 sm:$0xff]   ;;  %v5277_v59 = vld [vmem:[%s7198_s1 + $0x2a0] ss:$8 sps:$4 sm:$0xff]  }
  0x82   : > { %2489 = vmatprep.subr.bf16.mxu0 %v5213_v17  ;;  %v4487_v17 = vrot.slane %v4479_v10, 9  ;;  %v5280_v60 = vld [vmem:[%s7198_s1 + $0x6a0] ss:$8 sps:$4 sm:$0xff]  }
  0x83   : > { %v5544_v10 = vld [vmem:[%s5756_s22 + $0x28] sm:$0x11] }
  0x84   : > { %990 = vmatpush1.bf16.msra.mxu1 %v5208_v18  ;;  %v4488_v18 = vrot.slane %v4480_v11, 9  ;;  %v2229_v41 = vsel %vm6086_vm5, %v4487_v17, %v2228_v8  ;;  %v5293_v8 = vld [vmem:[%s7198_s1 + $0x2c4] ss:$8 sps:$4 sm:$0xff]   ;;  %v1069_v11 = vrot.slane %v5544_v10, 5 }
  0x85   : > { %2490 = vmatpush1.bf16.msra.mxu0 %v5211_v21  ;;  %1316 = vmatprep.subr.bf16.mxu1 %v5217_v22  ;;  %v1061_v21 = vrot.slane %v5542_v56, 5  ;;  %v5248_v22 = vld [vmem:[%s7198_s1 + $0x254] ss:$8 sps:$4 sm:$0xff]  }
  0x86   : > { %2790 = vmatprep.subr.bf16.mxu0 %v5220_v23  ;;  %v2233_v23 = vsel %vm6086_vm5, %v4488_v18, %v2232_v9  ;;  %v5296_v9 = vld [vmem:[%s7198_s1 + $0x6c4] ss:$8 sps:$4 sm:$0xff]   ;;  %v5294_v18 = vld [vmem:[%s7198_s1 + $0x6c0] ss:$8 sps:$4 sm:$0xff]  }
  0x87   : > { %992 = vmatmul.mubr.bf16.vlgmr.msra.gmra.mrb[0].mxu1 %v4185_v7  ;;  %v2213_v7 = vsel %vm6086_vm5, %v4483_v37, %v2212_v29  ;;  %v4528_v29 = vcombine.high %v2229_v41, %v2233_v23  ;;  %v5257_v37 = vld [vmem:[%s7198_s1 + $0x664] ss:$8 sps:$4 sm:$0xff]  }
  0x88   : > { %2492 = vmatmul.mubr.bf16.vlgmr.msra.gmra.mrb[0].mxu0 %v4521_v25  ;;  %1317 = vmatpush1.bf16.msra.mxu1 %v5215_v24  ;;  %v4524_v40 = vcombine.high %v2213_v7, %v2217_v20  ;;  %v4523_v46 = vcombine.low %v2213_v7, %v2217_v20  ;;  %v5543_v24 = vld [vmem:[%s5756_s22 + $0x18] sm:$0x11]  ;;  %v4191_v7 = vcombine.low %v5989_v58, %v6026_v30 }
  0x89   : > { %2791 = vmatpush1.bf16.msra.mxu0 %v5218_v26  ;;  %1318 = vmatprep.subr.bf16.mxu1 %v5224_v27  ;;  %v1065_v25 = vrot.slane %v5543_v24, 5  ;;  %v5246_v26 = vld [vmem:[%s7198_s1 + $0x250] ss:$8 sps:$4 sm:$0xff]   ;;  %v4527_v20 = vcombine.low %v2229_v41, %v2233_v23 }
  0x8a   : > { %2792 = vmatprep.subr.bf16.mxu0 %v5227_v28  ;;  %1001 = vmatprep.mubr.bf16.mxu1 %v4188_v3  ;;  %v5249_v27 = vld [vmem:[%s7198_s1 + $0x650] ss:$8 sps:$4 sm:$0xff]   ;;  %v4192_v28 = vcombine.high %v5989_v58, %v6026_v30  ;;  %v5263_v58 = vld [vmem:[%s7198_s1 + $0x674] ss:$8 sps:$4 sm:$0xff]  }
  0x8b   : > { %2501 = vmatprep.mubr.bf16.mxu0 %v4524_v40  ;;  %v1033_v3 = vld [vmem:[%s5756_s22 + $0x10] sm:$0xee] }
  0x8c   : > { %1319 = vmatpush1.bf16.msra.mxu1 %v5222_v36  ;;  %v4226_v36 = vrot.slane %v1033_v3, 9  ;;  %v5298_v24 = vld [vmem:[%s7198_s1 + $0x2d0] ss:$8 sps:$4 sm:$0xff]   ;;  %v5310_v3 = vld [vmem:[%s7198_s1 + $0x6e4] ss:$8 sps:$4 sm:$0xff]  }
  0x8d   : > { %2793 = vmatpush1.bf16.msra.mxu0 %v5225_v14  ;;  %1320 = vmatprep.subr.bf16.mxu1 %v5230_v48  ;;  %v6290_v14 = vsel %vm6086_vm5, %v4225_v35, %v1061_v21  ;;  %v5300_v21 = vld [vmem:[%s7198_s1 + $0x2d4] ss:$8 sps:$4 sm:$0xff]  }
  0x8e   : > { %2794 = vmatprep.subr.bf16.mxu0 %v5233_v49  ;;  %v6294_v48 = vsel %vm6086_vm5, %v4226_v36, %v1065_v25  ;;  %v5255_v49 = vld [vmem:[%s7198_s1 + $0x660] ss:$8 sps:$4 sm:$0xff]   ;;  %v5301_v25 = vld [vmem:[%s7198_s1 + $0x6d0] ss:$8 sps:$4 sm:$0xff]  }
  0x8f   : > { %1002 = vmatmul.mubr.bf16.gmra.mrb[4].mxu1 %v4187_v43  ;;  %v4266_v40 = vcombine.high %v6290_v14, %v6294_v48  ;;  %v5260_v43 = vld [vmem:[%s7198_s1 + $0x274] ss:$8 sps:$4 sm:$0xff]  }
  0x90   : > { %2502 = vmatmul.mubr.bf16.gmra.mrb[4].mxu0 %v4523_v46  ;;  %1321 = vmatpush1.bf16.msra.mxu1 %v5228_v39  ;;  %v4265_v39 = vcombine.low %v6290_v14, %v6294_v48  ;;  %v5258_v46 = vld [vmem:[%s7198_s1 + $0x270] ss:$8 sps:$4 sm:$0xff]   ;;  %v5334_v14 = vld [vmem:[%s7198_s1 + $0x324] ss:$8 sps:$4 sm:$0xff]  }
  0x91   : > { %2795 = vmatpush1.bf16.msra.mxu0 %v5231_v42  ;;  %1322 = vmatprep.subr.bf16.mxu1 %v5236_v51  ;;  %v6306_v42 = vld [vmem:[%s5756_s22 + $0x20] sm:$0xff]  ;;  %v1037_v35 = vld [vmem:[%s5756_s22 + $0x50] sm:$0xee] }
  0x92   : > { %2796 = vmatprep.subr.bf16.mxu0 %v5239_v55  ;;  %1011 = vmatprep.mubr.bf16.mxu1 %v4190_v63  ;;  %v4602_v30 = vcombine.high %v6306_v42, %v5913_v62  ;;  %v5269_v62 = vld [vmem:[%s7198_s1 + $0x684] ss:$8 sps:$4 sm:$0xff]   ;;  %v5264_v51 = vld [vmem:[%s7198_s1 + $0x280] ss:$8 sps:$4 sm:$0xff]   ;;  %v5275_v55 = vld [vmem:[%s7198_s1 + $0x694] ss:$8 sps:$4 sm:$0xff]  }
  0x93   : > { %2511 = vmatprep.mubr.bf16.mxu0 %v4526_v2  ;;  %v5279_v63 = vld [vmem:[%s7198_s1 + $0x2a4] ss:$8 sps:$4 sm:$0xff]   ;;  %v5284_v2 = vld [vmem:[%s7198_s1 + $0x2b0] ss:$8 sps:$4 sm:$0xff]  }
  0x94   : > { %1323 = vmatpush1.bf16.msra.mxu1 %v5234_v0  ;;  %v5282_v0 = vld [vmem:[%s7198_s1 + $0x6a4] ss:$8 sps:$4 sm:$0xff]   ;;  %v6421_v36 = vld [vmem:[%s5756_s22 + $0x50] sm:$0xff] }
  0x95   : > { %2797 = vmatpush1.bf16.msra.mxu0 %v5237_v61  ;;  %1324 = vmatprep.subr.bf16.mxu1 %v5242_v1  ;;  %v5286_v61 = vld [vmem:[%s7198_s1 + $0x2b4] ss:$8 sps:$4 sm:$0xff]   ;;  %v5337_v48 = vld [vmem:[%s7198_s1 + $0x724] ss:$8 sps:$4 sm:$0xff]  }
  0x96   : > { %2798 = vmatprep.subr.bf16.mxu0 %v5245_v6  ;;  %v5289_v1 = vld [vmem:[%s7198_s1 + $0x6b4] ss:$8 sps:$4 sm:$0xff]   ;;  %v5287_v6 = vld [vmem:[%s7198_s1 + $0x6b0] ss:$8 sps:$4 sm:$0xff]  }
  0x97   : > { %1012 = vmatmul.mubr.bf16.gmra.mrb[8].mxu1 %v4189_v13  ;;  %v1034_v13 = vld [vmem:[%s5756_s22 + $0x20] sm:$0xee] }
  0x98   : > { %2512 = vmatmul.mubr.bf16.gmra.mrb[8].mxu0 %v4525_v16  ;;  %1325 = vmatpush1.bf16.msra.mxu1 %v5240_v12  ;;  %v5291_v12 = vld [vmem:[%s7198_s1 + $0x2c0] ss:$8 sps:$4 sm:$0xff]   ;;  %v5545_v16 = vld [vmem:[%s5756_s22 + $0x38] sm:$0x11]  ;;  %v4227_v56 = vrot.slane %v1034_v13, 9 }
  0x99   : > { %2799 = vmatpush1.bf16.msra.mxu0 %v5243_v52  ;;  %1326 = vmatprep.subr.bf16.mxu1 %v5248_v22  ;;  %v1073_v17 = vrot.slane %v5545_v16, 5  ;;  %v1035_v52 = vld [vmem:[%s5756_s22 + $0x30] sm:$0xee] }
  0x9a   : > { %2800 = vmatprep.subr.bf16.mxu0 %v5251_v19  ;;  %1021 = vmatprep.mubr.bf16.mxu1 %v4192_v28  ;;  %v4228_v22 = vrot.slane %v1035_v52, 9  ;;  %v5303_v19 = vld [vmem:[%s7198_s1 + $0x6d4] ss:$8 sps:$4 sm:$0xff]   ;;  %v6394_v41 = vsel %vm6086_vm5, %v4227_v56, %v1069_v11  ;;  %v5307_v28 = vld [vmem:[%s7198_s1 + $0x2e4] ss:$8 sps:$4 sm:$0xff]  }
  0x9b   : > { %2521 = vmatprep.mubr.bf16.mxu0 %v4528_v29  ;;  %v1077_v29 = vrot.slane %v5971_v44, 5  ;;  %v5305_v44 = vld [vmem:[%s7198_s1 + $0x2e0] ss:$8 sps:$4 sm:$0xff]   ;;  %v5328_v11 = vld [vmem:[%s7198_s1 + $0x314] ss:$8 sps:$4 sm:$0xff]  }
  0x9c   : > { %1327 = vmatpush1.bf16.msra.mxu1 %v5246_v26  ;;  %v6398_v23 = vsel %vm6086_vm5, %v4228_v22, %v1073_v17  ;;  %v5331_v16 = vld [vmem:[%s7198_s1 + $0x714] ss:$8 sps:$4 sm:$0xff]   ;;  %v5329_v52 = vld [vmem:[%s7198_s1 + $0x710] ss:$8 sps:$4 sm:$0xff]   ;;  %v5332_v22 = vld [vmem:[%s7198_s1 + $0x320] ss:$8 sps:$4 sm:$0xff]  }
  0x9d   : > { %2801 = vmatpush1.bf16.msra.mxu0 %v5249_v27  ;;  %1328 = vmatprep.subr.bf16.mxu1 %v5254_v5  ;;  %v4268_v26 = vcombine.high %v6394_v41, %v6398_v23  ;;  %v4267_v27 = vcombine.low %v6394_v41, %v6398_v23  ;;  %v1036_v5 = vld [vmem:[%s5756_s22 + $0x40] sm:$0xee]  ;;  %v6521_v56 = vld [vmem:[%s5756_s22 + $0x30] sm:$0xff] }
  0x9e   : > { %2802 = vmatprep.subr.bf16.mxu0 %v5257_v37  ;;  %v4229_v37 = vrot.slane %v1036_v5, 9  ;;  %v5349_v41 = vld [vmem:[%s7198_s1 + $0x744] ss:$8 sps:$4 sm:$0xff]   ;;  %v5344_v23 = vld [vmem:[%s7198_s1 + $0x340] ss:$8 sps:$4 sm:$0xff]  }
  0x9f   : > { %1022 = vmatmul.mubr.bf16.gmra.mrb[12].mxu1 %v4191_v7 }
  0xa0   : > { %2522 = vmatmul.mubr.bf16.gmra.mrb[12].mxu0 %v4527_v20  ;;  %1329 = vmatpush1.bf16.msra.mxu1 %v5252_v38  ;;  %v4230_v38 = vrot.slane %v1037_v35, 9  ;;  %v5314_v20 = vld [vmem:[%s7198_s1 + $0x2f4] ss:$8 sps:$4 sm:$0xff]  }
  0xa1   : > { %2803 = vmatpush1.bf16.msra.mxu0 %v5255_v49  ;;  %1330 = vmatprep.subr.bf16.mxu1 %v5260_v43  ;;  %v6424_v49 = vld [vmem:[%s5756_s22 + $0x60] sm:$0xff] }
  0xa2   : > { %2804 = vmatprep.subr.bf16.mxu0 %v5263_v58  ;;  %1348 = vmatprep.mubr.bf16.mxu1 %v4266_v40  ;;  %v4350_v7 = vcombine.high %v6421_v36, %v6424_v49  ;;  %v6439_v40 = vsel %vm6086_vm5, %v4229_v37, %v1077_v29  ;;  %v6443_v43 = vsel %vm6086_vm5, %v4230_v38, %v1081_v32  ;;  %v5317_v58 = vld [vmem:[%s7198_s1 + $0x6f4] ss:$8 sps:$4 sm:$0xff]   ;;  %v5338_v32 = vld [vmem:[%s7198_s1 + $0x330] ss:$8 sps:$4 sm:$0xff]   ;;  %v6562_v38 = vld [vmem:[%s5756_s22 + $0x28] sm:$0x11] }
  0xa3   : > { %2822 = vmatprep.mubr.bf16.mxu0 %v4602_v30  ;;  %v4270_v30 = vcombine.high %v6439_v40, %v6443_v43  ;;  %v5343_v29 = vld [vmem:[%s7198_s1 + $0x734] ss:$8 sps:$4 sm:$0xff]  }
  0xa4   : > { %1331 = vmatpush1.bf16.msra.mxu1 %v5258_v46  ;;  %v4269_v46 = vcombine.low %v6439_v40, %v6443_v43  ;;  %v5358_v40 = vld [vmem:[%s7198_s1 + $0x364] ss:$8 sps:$4 sm:$0xff]  }
  0xa5   : > { %2805 = vmatpush1.bf16.msra.mxu0 %v5261_v47  ;;  %1332 = vmatprep.subr.bf16.mxu1 %v5266_v50  ;;  %v5312_v47 = vld [vmem:[%s7198_s1 + $0x2f0] ss:$8 sps:$4 sm:$0xff]   ;;  %v5361_v43 = vld [vmem:[%s7198_s1 + $0x764] ss:$8 sps:$4 sm:$0xff]  }
  0xa6   : > { %2806 = vmatprep.subr.bf16.mxu0 %v5269_v62  ;;  %v5315_v50 = vld [vmem:[%s7198_s1 + $0x6f0] ss:$8 sps:$4 sm:$0xff]   ;;  %v4349_v62 = vcombine.low %v6421_v36, %v6424_v49 }
  0xa8   : > { %1333 = vmatpush1.bf16.msra.mxu1 %v5264_v51  ;;  %v5320_v51 = vld [vmem:[%s7198_s1 + $0x304] ss:$8 sps:$4 sm:$0xff]  }
  0xa9   : > { %2807 = vmatpush1.bf16.msra.mxu0 %v5267_v53  ;;  %1334 = vmatprep.subr.bf16.mxu1 %v5272_v54  ;;  %v6464_v53 = vld [vmem:[%s5756_s22 + $0x70] sm:$0xff]  ;;  %v1085_v54 = vrot.slane %v6029_v33, 5 }
  0xaa   : > { %2808 = vmatprep.subr.bf16.mxu0 %v5275_v55  ;;  %v1089_v55 = vrot.slane %v6032_v34, 5  ;;  %v5318_v34 = vld [vmem:[%s7198_s1 + $0x300] ss:$8 sps:$4 sm:$0xff]   ;;  %v4606_v5 = vcombine.high %v6424_v49, %v6464_v53 }
  0xac   : > { %1335 = vmatpush1.bf16.msra.mxu1 %v5270_v4  ;;  %v1038_v4 = vld [vmem:[%s5756_s22 + $0x60] sm:$0xee] }
  0xad   : > { %2809 = vmatpush1.bf16.msra.mxu0 %v5273_v57  ;;  %1336 = vmatprep.subr.bf16.mxu1 %v5279_v63  ;;  %v1039_v57 = vld [vmem:[%s5756_s22 + $0x70] sm:$0xee]  ;;  %v6471_v63 = vld [vmem:[%s5756_s22 + $0x80] sm:$0xff] }
  0xae   : > { %2810 = vmatprep.subr.bf16.mxu0 %v5282_v0  ;;  %v5325_v0 = vld [vmem:[%s7198_s1 + $0x704] ss:$8 sps:$4 sm:$0xff]   ;;  %v4352_v33 = vcombine.high %v6464_v53, %v6471_v63  ;;  %v4351_v10 = vcombine.low %v6464_v53, %v6471_v63 }
  0xb0   : > { %1337 = vmatpush1.bf16.msra.mxu1 %v5277_v59  ;;  %v4231_v59 = vrot.slane %v1038_v4, 9  ;;  %v5347_v4 = vld [vmem:[%s7198_s1 + $0x740] ss:$8 sps:$4 sm:$0xff]  }
  0xb1   : > { %2811 = vmatpush1.bf16.msra.mxu0 %v5280_v60  ;;  %1338 = vmatprep.subr.bf16.mxu1 %v5286_v61  ;;  %v4232_v60 = vrot.slane %v1039_v57, 9  ;;  %v5546_v61 = vld [vmem:[%s5756_s22 + $0x30] sm:$0xff] }
  0xb2   : > { %2812 = vmatprep.subr.bf16.mxu0 %v5289_v1  ;;  %v4601_v1 = vcombine.low %v6306_v42, %v5546_v61  ;;  %v5355_v57 = vld [vmem:[%s7198_s1 + $0x754] ss:$8 sps:$4 sm:$0xff]  }
  0xb4   : > { %1339 = vmatpush1.bf16.msra.mxu1 %v5284_v2  ;;  %v5323_v2 = vld [vmem:[%s7198_s1 + $0x700] ss:$8 sps:$4 sm:$0xff]  }
  0xb5   : > { %2813 = vmatpush1.bf16.msra.mxu0 %v5287_v6  ;;  %1340 = vmatprep.subr.bf16.mxu1 %v5293_v8  ;;  %v6487_v6 = vld [vmem:[%s5756_s22 + $0x40] sm:$0xff]  ;;  %v6491_v8 = vsel %vm6086_vm5, %v4231_v59, %v1085_v54 }
  0xb6   : > { %2814 = vmatprep.subr.bf16.mxu0 %v5296_v9  ;;  %v6495_v9 = vsel %vm6086_vm5, %v4232_v60, %v1089_v55  ;;  %v4604_v17 = vcombine.high %v6487_v6, %v6421_v36 }
  0xb7   : > { %v4271_v13 = vcombine.low %v6491_v8, %v6495_v9 }
  0xb8   : > { %1341 = vmatpush1.bf16.msra.mxu1 %v5291_v12  ;;  %v4272_v12 = vcombine.high %v6491_v8, %v6495_v9  ;;  %v4731_v9 = vld [vmem:[%s5756_s22 + $0x40] sm:$0xee] }
  0xb9   : > { %2815 = vmatpush1.bf16.msra.mxu0 %v5294_v18  ;;  %1342 = vmatprep.subr.bf16.mxu1 %v5300_v21  ;;  %v5326_v18 = vld [vmem:[%s7198_s1 + $0x310] ss:$8 sps:$4 sm:$0xff]   ;;  %v2899_v21 = vshll.u32 %v6306_v42, 16 }
  0xba   : > { %2816 = vmatprep.subr.bf16.mxu0 %v5303_v19  ;;  %v4603_v19 = vcombine.low %v6487_v6, %v6421_v36 }
  0xbb   : > { %v2901_v37 = vrot.slane %v2899_v21, 5 }
  0xbc   : > { %1343 = vmatpush1.bf16.msra.mxu1 %v5298_v24  ;;  %v2910_v24 = vshrl.u32 %v6521_v56, 16 }
  0xbd   : > { %2817 = vmatpush1.bf16.msra.mxu0 %v5301_v25  ;;  %1344 = vmatprep.subr.bf16.mxu1 %v5307_v28  ;;  %v2913_v25 = vshll.u32 %v6521_v56, 16  ;;  %v5340_v28 = vld [vmem:[%s7198_s1 + $0x334] ss:$8 sps:$4 sm:$0xff]  }
  0xbe   : > { %2818 = vmatprep.subr.bf16.mxu0 %v5310_v3  ;;  %v5341_v3 = vld [vmem:[%s7198_s1 + $0x730] ss:$8 sps:$4 sm:$0xff]  }
  0xc0   : > { %1345 = vmatpush1.bf16.msra.mxu1 %v5305_v44  ;;  %v2912_v44 = vrot.slane %v2910_v24, 4  ;;  %v5373_v24 = vld [vmem:[%s7198_s1 + $0x784] ss:$8 sps:$4 sm:$0xff]  }
  0xc1   : > { %2819 = vmatpush1.bf16.msra.mxu0 %v5308_v45  ;;  %1346 = vmatprep.subr.bf16.mxu1 %v5314_v20  ;;  %v2915_v45 = vrot.slane %v2913_v25, 5  ;;  %v6565_v20 = vld [vmem:[%s5756_s22 + $0x38] sm:$0x11]  ;;  %v3347_v25 = vrot.slane %v6562_v38, 5 }
  0xc2   : > { %2820 = vmatprep.subr.bf16.mxu0 %v5317_v58  ;;  %v5346_v58 = vld [vmem:[%s7198_s1 + $0x344] ss:$8 sps:$4 sm:$0xff]   ;;  %v2919_v55 = vshll.u32 %v6565_v20, 16 }
  0xc3   : > { %v2916_v54 = vor.u32 %v2915_v45, %v2912_v44  ;;  %v4739_v44 = vrot.slane %v4731_v9, 9  ;;  %v5368_v45 = vld [vmem:[%s7198_s1 + $0x380] ss:$8 sps:$4 sm:$0xff]   ;;  %v2955_v9 = vshll.u32 %v6424_v49, 16 }
  0xc4   : > { %1347 = vmatpush1.bf16.msra.mxu1 %v5312_v47  ;;  %v4605_v47 = vcombine.low %v6424_v49, %v6464_v53  ;;  %v2921_v61 = vrot.slane %v2919_v55, 5 }
  0xc5   : > { %2821 = vmatpush1.bf16.msra.mxu0 %v5315_v50  ;;  %1647 = vmatprep.subr.bf16.mxu1 %v5320_v51  ;;  %v6582_v50 = vld [vmem:[%s5756_s22 + $0x90] sm:$0xff]  ;;  %v2905_v51 = vshll.u32 %v6562_v38, 16 }
  0xc6   : > { %3232 = vmatprep.subr.bf16.mxu0 %v5325_v0  ;;  %v4608_v0 = vcombine.high %v6471_v63, %v6582_v50  ;;  %v4732_v38 = vld [vmem:[%s5756_s22 + $0x50] sm:$0xee] }
  0xc7   : > { %1349 = vmatmul.mubr.bf16.vlgmr.msra.gmra.mrb[0].mxu1 %v4265_v39  ;;  %v2896_v39 = vshrl.u32 %v6306_v42, 16  ;;  %v2907_v60 = vrot.slane %v2905_v51, 5 }
  0xc8   : > { %2823 = vmatmul.mubr.bf16.vlgmr.msra.gmra.mrb[0].mxu0 %v4601_v1  ;;  %1648 = vmatpush1.bf16.msra.mxu1 %v5318_v34  ;;  %v2917_v34 = vrot.slane %v2916_v54, 4  ;;  %v5350_v1 = vld [vmem:[%s7198_s1 + $0x350] ss:$8 sps:$4 sm:$0xff]  }
  0xc9   : > { %3233 = vmatpush1.bf16.msra.mxu0 %v5323_v2  ;;  %1649 = vmatprep.subr.bf16.mxu1 %v5328_v11  ;;  %v2898_v35 = vrot.slane %v2896_v39, 4  ;;  %v5353_v2 = vld [vmem:[%s7198_s1 + $0x750] ss:$8 sps:$4 sm:$0xff]  }
  0xca   : > { %3234 = vmatprep.subr.bf16.mxu0 %v5331_v16  ;;  %1358 = vmatprep.mubr.bf16.mxu1 %v4268_v26  ;;  %v5335_v26 = vld [vmem:[%s7198_s1 + $0x720] ss:$8 sps:$4 sm:$0xff]   ;;  %v6618_v11 = vld [vmem:[%s5756_s22 + $0x10] sm:$0xff] }
  0xcb   : > { %2832 = vmatprep.mubr.bf16.mxu0 %v4604_v17  ;;  %v6626_v17 = vsel %vm5817_vm2, %v2917_v34, %v2921_v61  ;;  %v5365_v39 = vld [vmem:[%s7198_s1 + $0x770] ss:$8 sps:$4 sm:$0xff]   ;;  %v4346_v21 = vcombine.high %v6618_v11, %v6306_v42  ;;  %v5381_v34 = vld [vmem:[%s7198_s1 + $0x3a0] ss:$8 sps:$4 sm:$0xff]  }
  0xcc   : > { %1650 = vmatpush1.bf16.msra.mxu1 %v5326_v18  ;;  %v5359_v18 = vld [vmem:[%s7198_s1 + $0x760] ss:$8 sps:$4 sm:$0xff]  }
  0xcd   : > { %3235 = vmatpush1.bf16.msra.mxu0 %v5329_v52  ;;  %1651 = vmatprep.subr.bf16.mxu1 %v5334_v14  ;;  %v5364_v52 = vld [vmem:[%s7198_s1 + $0x374] ss:$8 sps:$4 sm:$0xff]   ;;  %v5385_v61 = vld [vmem:[%s7198_s1 + $0x7a0] ss:$8 sps:$4 sm:$0xff]  }
  0xce   : > { %3236 = vmatprep.subr.bf16.mxu0 %v5337_v48  ;;  %v5367_v14 = vld [vmem:[%s7198_s1 + $0x774] ss:$8 sps:$4 sm:$0xff]   ;;  %v5362_v48 = vld [vmem:[%s7198_s1 + $0x370] ss:$8 sps:$4 sm:$0xff]  }
  0xcf   : > { %1359 = vmatmul.mubr.bf16.gmra.mrb[4].mxu1 %v4267_v27  ;;  %v2902_v27 = vor.u32 %v2901_v37, %v2898_v35 }
  0xd0   : > { %2833 = vmatmul.mubr.bf16.gmra.mrb[4].mxu0 %v4603_v19  ;;  %1652 = vmatpush1.bf16.msra.mxu1 %v5332_v22  ;;  %v5370_v19 = vld [vmem:[%s7198_s1 + $0x384] ss:$8 sps:$4 sm:$0xff]  }
  0xd1   : > { %3237 = vmatpush1.bf16.msra.mxu0 %v5335_v26  ;;  %1653 = vmatprep.subr.bf16.mxu1 %v5340_v28  ;;  %v2903_v59 = vrot.slane %v2902_v27, 4  ;;  %v6661_v26 = vld [vmem:[%s5756_s22 + $0x48] sm:$0x11]  ;;  %v4729_v28 = vld [vmem:[%s5756_s22 + $0x20] sm:$0xee] }
  0xd2   : > { %3238 = vmatprep.subr.bf16.mxu0 %v5343_v29  ;;  %1368 = vmatprep.mubr.bf16.mxu1 %v4270_v30  ;;  %v5352_v30 = vld [vmem:[%s7198_s1 + $0x354] ss:$8 sps:$4 sm:$0xff]   ;;  %v3351_v29 = vrot.slane %v6565_v20, 5  ;;  %v5371_v20 = vld [vmem:[%s7198_s1 + $0x780] ss:$8 sps:$4 sm:$0xff]  }
  0xd3   : > { %2842 = vmatprep.mubr.bf16.mxu0 %v4606_v5  ;;  %v6622_v16 = vsel %vm5817_vm2, %v2903_v59, %v2907_v60  ;;  %v4737_v5 = vrot.slane %v4729_v28, 9  ;;  %v5379_v27 = vld [vmem:[%s7198_s1 + $0x794] ss:$8 sps:$4 sm:$0xff]   ;;  %v5383_v59 = vld [vmem:[%s7198_s1 + $0x3a4] ss:$8 sps:$4 sm:$0xff]  }
  0xd4   : > { %1654 = vmatpush1.bf16.msra.mxu1 %v5338_v32  ;;  %v4690_v22 = vcombine.high %v6622_v16, %v6626_v17  ;;  %v6666_v32 = vld [vmem:[%s5756_s22 + $0x58] sm:$0x11]  ;;  %v5387_v60 = vld [vmem:[%s7198_s1 + $0x7a4] ss:$8 sps:$4 sm:$0xff]  }
  0xd5   : > { %3239 = vmatpush1.bf16.msra.mxu0 %v5341_v3  ;;  %1655 = vmatprep.subr.bf16.mxu1 %v5346_v58  ;;  %v4730_v3 = vld [vmem:[%s5756_s22 + $0x30] sm:$0xee]  ;;  %v3359_v35 = vrot.slane %v6666_v32, 5  ;;  %v6674_v37 = vsel %vm6086_vm5, %v4737_v5, %v3347_v25 }
  0xd6   : > { %3240 = vmatprep.subr.bf16.mxu0 %v5349_v41  ;;  %v4738_v8 = vrot.slane %v4730_v3, 9  ;;  %v4740_v41 = vrot.slane %v4732_v38, 9  ;;  %v5402_v3 = vld [vmem:[%s7198_s1 + $0x3d0] ss:$8 sps:$4 sm:$0xff]   ;;  %v2966_v38 = vshrl.u32 %v6464_v53, 16 }
  0xd7   : > { %1369 = vmatmul.mubr.bf16.gmra.mrb[8].mxu1 %v4269_v46  ;;  %v4607_v46 = vcombine.low %v6471_v63, %v6582_v50  ;;  %v5405_v5 = vld [vmem:[%s7198_s1 + $0x7d0] ss:$8 sps:$4 sm:$0xff]  }
  0xd8   : > { %2843 = vmatmul.mubr.bf16.gmra.mrb[8].mxu0 %v4605_v47  ;;  %1656 = vmatpush1.bf16.msra.mxu1 %v5344_v23  ;;  %v6685_v58 = vsel %vm6086_vm5, %v4738_v8, %v3351_v29  ;;  %v5376_v23 = vld [vmem:[%s7198_s1 + $0x394] ss:$8 sps:$4 sm:$0xff]   ;;  %v6703_v55 = vsel %vm6086_vm5, %v4740_v41, %v3359_v35  ;;  %v2952_v8 = vshrl.u32 %v6424_v49, 16  ;;  %v5415_v35 = vld [vmem:[%s7198_s1 + $0x7e4] ss:$8 sps:$4 sm:$0xff]  }
  0xd9   : > { %3241 = vmatpush1.bf16.msra.mxu0 %v5347_v4  ;;  %1657 = vmatprep.subr.bf16.mxu1 %v5352_v30  ;;  %v4777_v47 = vcombine.low %v6674_v37, %v6685_v58  ;;  %v4778_v51 = vcombine.high %v6674_v37, %v6685_v58 }
  0xda   : > { %3242 = vmatprep.subr.bf16.mxu0 %v5355_v57  ;;  %1378 = vmatprep.mubr.bf16.mxu1 %v4272_v12  ;;  %v5356_v12 = vld [vmem:[%s7198_s1 + $0x360] ss:$8 sps:$4 sm:$0xff]   ;;  %v5374_v57 = vld [vmem:[%s7198_s1 + $0x390] ss:$8 sps:$4 sm:$0xff]  }
  0xdb   : > { %2852 = vmatprep.mubr.bf16.mxu0 %v4608_v0  ;;  %v5377_v0 = vld [vmem:[%s7198_s1 + $0x790] ss:$8 sps:$4 sm:$0xff]  }
  0xdc   : > { %1658 = vmatpush1.bf16.msra.mxu1 %v5350_v1  ;;  %v5390_v1 = vld [vmem:[%s7198_s1 + $0x3b4] ss:$8 sps:$4 sm:$0xff]  }
  0xdd   : > { %3243 = vmatpush1.bf16.msra.mxu0 %v5353_v2  ;;  %1659 = vmatprep.subr.bf16.mxu1 %v5358_v40  ;;  %v5393_v2 = vld [vmem:[%s7198_s1 + $0x7b4] ss:$8 sps:$4 sm:$0xff]   ;;  %v5388_v40 = vld [vmem:[%s7198_s1 + $0x3b0] ss:$8 sps:$4 sm:$0xff]  }
  0xde   : > { %3244 = vmatprep.subr.bf16.mxu0 %v5361_v43  ;;  %v5391_v43 = vld [vmem:[%s7198_s1 + $0x7b0] ss:$8 sps:$4 sm:$0xff]  }
  0xdf   : > { %1379 = vmatmul.mubr.bf16.gmra.mrb[12].mxu1 %v4271_v13  ;;  %v3355_v13 = vrot.slane %v6661_v26, 5 }
  0xe0   : > { %2853 = vmatmul.mubr.bf16.gmra.mrb[12].mxu0 %v4607_v46  ;;  %1660 = vmatpush1.bf16.msra.mxu1 %v5356_v12  ;;  %v5397_v46 = vld [vmem:[%s7198_s1 + $0x3c4] ss:$8 sps:$4 sm:$0xff]  }
  0xe1   : > { %3245 = vmatpush1.bf16.msra.mxu0 %v5359_v18  ;;  %1661 = vmatprep.subr.bf16.mxu1 %v5364_v52  ;;  %v6699_v54 = vsel %vm6086_vm5, %v4739_v44, %v3355_v13  ;;  %v5401_v12 = vld [vmem:[%s7198_s1 + $0x7c4] ss:$8 sps:$4 sm:$0xff]   ;;  %v2924_v18 = vshrl.u32 %v6487_v6, 16  ;;  %v2927_v52 = vshll.u32 %v6487_v6, 16  ;;  %v2969_v44 = vshll.u32 %v6464_v53, 16 }
  0xe2   : > { %3246 = vmatprep.subr.bf16.mxu0 %v5367_v14  ;;  %1679 = vmatprep.mubr.bf16.mxu1 %v4346_v21  ;;  %v4780_v4 = vcombine.high %v6699_v54, %v6703_v55  ;;  %v4779_v30 = vcombine.low %v6699_v54, %v6703_v55  ;;  %v2938_v14 = vshrl.u32 %v6421_v36, 16  ;;  %v5399_v21 = vld [vmem:[%s7198_s1 + $0x7c0] ss:$8 sps:$4 sm:$0xff]   ;;  %v5411_v13 = vld [vmem:[%s7198_s1 + $0x3e4] ss:$8 sps:$4 sm:$0xff]  }
  0xe3   : > { %3264 = vmatprep.mubr.bf16.mxu0 %v4690_v22  ;;  %v5404_v22 = vld [vmem:[%s7198_s1 + $0x3d4] ss:$8 sps:$4 sm:$0xff]   ;;  %v2929_v25 = vrot.slane %v2927_v52, 5  ;;  %v5426_v52 = vld [vmem:[%s7198_s1 + $0x804] ss:$8 sps:$4 sm:$0xff]  }
  0xe4   : > { %1662 = vmatpush1.bf16.msra.mxu1 %v5362_v48  ;;  %v2941_v48 = vshll.u32 %v6421_v36, 16  ;;  %v2940_v28 = vrot.slane %v2938_v14, 4  ;;  %v5450_v36 = vld [vmem:[%s7198_s1 + $0x864] ss:$8 sps:$4 sm:$0xff]   ;;  %v5454_v53 = vld [vmem:[%s7198_s1 + $0x880] ss:$8 sps:$4 sm:$0xff]  }
  0xe5   : > { %3247 = vmatpush1.bf16.msra.mxu0 %v5365_v39  ;;  %1663 = vmatprep.subr.bf16.mxu1 %v5370_v19  ;;  %v5395_v39 = vld [vmem:[%s7198_s1 + $0x3c0] ss:$8 sps:$4 sm:$0xff]   ;;  %v5407_v19 = vld [vmem:[%s7198_s1 + $0x7d4] ss:$8 sps:$4 sm:$0xff]  }
  0xe6   : > { %3248 = vmatprep.subr.bf16.mxu0 %v5373_v24  ;;  %v2926_v24 = vrot.slane %v2924_v18, 4  ;;  %v2943_v29 = vrot.slane %v2941_v48, 5  ;;  %v6801_v18 = vld [vmem:[%s5756_s22 + $0x78] sm:$0x11] }
  0xe8   : > { %1664 = vmatpush1.bf16.msra.mxu1 %v5368_v45  ;;  %v2930_v45 = vor.u32 %v2929_v25, %v2926_v24  ;;  %v2944_v41 = vor.u32 %v2943_v29, %v2940_v28  ;;  %v2994_v25 = vshrl.u32 %v6582_v50, 16  ;;  %v4689_v28 = vcombine.low %v6622_v16, %v6626_v17 }
  0xe9   : > { %3249 = vmatpush1.bf16.msra.mxu0 %v5371_v20  ;;  %1665 = vmatprep.subr.bf16.mxu1 %v5376_v23  ;;  %v2933_v20 = vshll.u32 %v6661_v26, 16  ;;  %v2947_v23 = vshll.u32 %v6666_v32, 16  ;;  %v5418_v26 = vld [vmem:[%s7198_s1 + $0x3f4] ss:$8 sps:$4 sm:$0xff]  }
  0xea   : > { %3250 = vmatprep.subr.bf16.mxu0 %v5379_v27  ;;  %v5409_v27 = vld [vmem:[%s7198_s1 + $0x3e0] ss:$8 sps:$4 sm:$0xff]   ;;  %v5421_v32 = vld [vmem:[%s7198_s1 + $0x7f4] ss:$8 sps:$4 sm:$0xff]  }
  0xec   : > { %1666 = vmatpush1.bf16.msra.mxu1 %v5374_v57  ;;  %v5413_v57 = vld [vmem:[%s7198_s1 + $0x7e0] ss:$8 sps:$4 sm:$0xff]  }
  0xed   : > { %3251 = vmatpush1.bf16.msra.mxu0 %v5377_v0  ;;  %1667 = vmatprep.subr.bf16.mxu1 %v5383_v59  ;;  %v2954_v0 = vrot.slane %v2952_v8, 4  ;;  %v2957_v59 = vrot.slane %v2955_v9, 5  ;;  %v4348_v8 = vcombine.high %v6521_v56, %v6487_v6 }
  0xee   : > { %3252 = vmatprep.subr.bf16.mxu0 %v5387_v60  ;;  %v2968_v60 = vrot.slane %v2966_v38, 4 }
  0xef   : > { %v2958_v14 = vor.u32 %v2957_v59, %v2954_v0 }
  0xf0   : > { %1668 = vmatpush1.bf16.msra.mxu1 %v5381_v34  ;;  %v2971_v34 = vrot.slane %v2969_v44, 5  ;;  %v6829_v44 = vld [vmem:[%s5756_s22 + $0x88] sm:$0x11] }
  0xf1   : > { %3253 = vmatpush1.bf16.msra.mxu0 %v5385_v61  ;;  %1669 = vmatprep.subr.bf16.mxu1 %v5390_v1  ;;  %v2931_v61 = vrot.slane %v2930_v45, 4  ;;  %v2935_v1 = vrot.slane %v2933_v20, 5  ;;  %v2959_v16 = vrot.slane %v2958_v14, 4  ;;  %v2996_v45 = vrot.slane %v2994_v25, 4  ;;  %v5442_v14 = vld [vmem:[%s7198_s1 + $0x844] ss:$8 sps:$4 sm:$0xff]  }
  0xf2   : > { %3254 = vmatprep.subr.bf16.mxu0 %v5393_v2  ;;  %v2945_v2 = vrot.slane %v2944_v41, 4  ;;  %v2972_v48 = vor.u32 %v2971_v34, %v2968_v60  ;;  %v5427_v41 = vld [vmem:[%s7198_s1 + $0x810] ss:$8 sps:$4 sm:$0xff]  }
  0xf4   : > { %1670 = vmatpush1.bf16.msra.mxu1 %v5388_v40  ;;  %v2949_v40 = vrot.slane %v2947_v23, 5  ;;  %v2973_v9 = vrot.slane %v2972_v48, 4  ;;  %v6835_v23 = vld [vmem:[%s5756_s22 + $0x98] sm:$0x11] }
  0xf5   : > { %3255 = vmatpush1.bf16.msra.mxu0 %v5391_v43  ;;  %1671 = vmatprep.subr.bf16.mxu1 %v5397_v46  ;;  %v6792_v43 = vld [vmem:[%s5756_s22 + $0x68] sm:$0x11]  ;;  %v5416_v46 = vld [vmem:[%s7198_s1 + $0x3f0] ss:$8 sps:$4 sm:$0xff]  }
  0xf6   : > { %3256 = vmatprep.subr.bf16.mxu0 %v5401_v12  ;;  %v5419_v12 = vld [vmem:[%s7198_s1 + $0x7f0] ss:$8 sps:$4 sm:$0xff]   ;;  %v2961_v24 = vshll.u32 %v6792_v43, 16  ;;  %v2950_v29 = vsel %vm5817_vm2, %v2945_v2, %v2949_v40 }
  0xf8   : > { %1672 = vmatpush1.bf16.msra.mxu1 %v5395_v39  ;;  %v2980_v39 = vshrl.u32 %v6471_v63, 16 }
  0xf9   : > { %3257 = vmatpush1.bf16.msra.mxu0 %v5399_v21  ;;  %1673 = vmatprep.subr.bf16.mxu1 %v5404_v22  ;;  %v2983_v21 = vshll.u32 %v6471_v63, 16  ;;  %v4345_v22 = vcombine.low %v6618_v11, %v6306_v42  ;;  %v5424_v42 = vld [vmem:[%s7198_s1 + $0x800] ss:$8 sps:$4 sm:$0xff]   ;;  %v5429_v11 = vld [vmem:[%s7198_s1 + $0x814] ss:$8 sps:$4 sm:$0xff]  }
  0xfa   : > { %3258 = vmatprep.subr.bf16.mxu0 %v5407_v19  ;;  %v2936_v19 = vsel %vm5817_vm2, %v2931_v61, %v2935_v1  ;;  %v2982_v17 = vrot.slane %v2980_v39, 4  ;;  %v3003_v61 = vshll.u32 %v6835_v23, 16  ;;  %v5432_v1 = vld [vmem:[%s7198_s1 + $0x820] ss:$8 sps:$4 sm:$0xff]   ;;  %v5459_v63 = vld [vmem:[%s7198_s1 + $0x894] ss:$8 sps:$4 sm:$0xff]  }
  0xfb   : > { %v4691_v0 = vcombine.low %v2936_v19, %v2950_v29 }
  0xfc   : > { %1674 = vmatpush1.bf16.msra.mxu1 %v5402_v3  ;;  %v2975_v3 = vshll.u32 %v6801_v18, 16 }
  0xfd   : > { %3259 = vmatpush1.bf16.msra.mxu0 %v5405_v5  ;;  %1675 = vmatprep.subr.bf16.mxu1 %v5411_v13  ;;  %v2997_v5 = vshll.u32 %v6582_v50, 16  ;;  %v4692_v50 = vcombine.high %v2936_v19, %v2950_v29  ;;  %v2985_v13 = vrot.slane %v2983_v21, 5  ;;  %v4733_v19 = vld [vmem:[%s5756_s22 + $0x60] sm:$0xee] }
  0xfe   : > { %3260 = vmatprep.subr.bf16.mxu0 %v5415_v35  ;;  %v2963_v35 = vrot.slane %v2961_v24, 5  ;;  %v2977_v38 = vrot.slane %v2975_v3, 5  ;;  %v4734_v24 = vld [vmem:[%s5756_s22 + $0x70] sm:$0xee]  ;;  %v4741_v15 = vrot.slane %v4733_v19, 9  ;;  %v3367_v3 = vrot.slane %v6801_v18, 5 }
  0xff   : > { %v2999_v20 = vrot.slane %v2997_v5, 5  ;;  %v2986_v59 = vor.u32 %v2985_v13, %v2982_v17  ;;  %v4742_v29 = vrot.slane %v4734_v24, 9  ;;  %v5443_v5 = vld [vmem:[%s7198_s1 + $0x850] ss:$8 sps:$4 sm:$0xff]   ;;  %v5448_v18 = vld [vmem:[%s7198_s1 + $0x860] ss:$8 sps:$4 sm:$0xff]  }
 0x100   : > { %1676 = vmatpush1.bf16.msra.mxu1 %v5409_v27  ;;  %v5434_v27 = vld [vmem:[%s7198_s1 + $0x824] ss:$8 sps:$4 sm:$0xff]   ;;  %v2978_v60 = vsel %vm5817_vm2, %v2973_v9, %v2977_v38  ;;  %v5460_v17 = vld [vmem:[%s7198_s1 + $0x8a0] ss:$8 sps:$4 sm:$0xff]   ;;  %v5469_v38 = vld [vmem:[%s7198_s1 + $0x8d0] ss:$8 sps:$4 sm:$0xff]  }
 0x101   : > { %3261 = vmatpush1.bf16.msra.mxu0 %v5413_v57  ;;  %1677 = vmatprep.subr.bf16.mxu1 %v5418_v26  ;;  %v4347_v57 = vcombine.low %v6521_v56, %v6487_v6  ;;  %v2989_v26 = vshll.u32 %v6829_v44, 16  ;;  %v3000_v34 = vor.u32 %v2999_v20, %v2996_v45  ;;  %v5437_v6 = vld [vmem:[%s7198_s1 + $0x834] ss:$8 sps:$4 sm:$0xff]   ;;  %v2987_v2 = vrot.slane %v2986_v59, 4  ;;  %v5468_v9 = vld [vmem:[%s7198_s1 + $0x8c4] ss:$8 sps:$4 sm:$0xff]  }
 0x102   : > { %3262 = vmatprep.subr.bf16.mxu0 %v5421_v32  ;;  %v2964_v32 = vsel %vm5817_vm2, %v2959_v16, %v2963_v35  ;;  %v5456_v16 = vld [vmem:[%s7198_s1 + $0x884] ss:$8 sps:$4 sm:$0xff]   ;;  %v5466_v13 = vld [vmem:[%s7198_s1 + $0x8c0] ss:$8 sps:$4 sm:$0xff]   ;;  %v5471_v35 = vld [vmem:[%s7198_s1 + $0x8d4] ss:$8 sps:$4 sm:$0xff]  }
 0x103   : > { %v4694_v56 = vcombine.high %v2964_v32, %v2978_v60  ;;  %v2991_v40 = vrot.slane %v2989_v26, 5  ;;  %v4693_v48 = vcombine.low %v2964_v32, %v2978_v60  ;;  %v5474_v45 = vld [vmem:[%s7198_s1 + $0x8e4] ss:$8 sps:$4 sm:$0xff]   ;;  %v3371_v59 = vrot.slane %v6829_v44, 5  ;;  %v5475_v60 = vld [vmem:[%s7198_s1 + $0x8f0] ss:$8 sps:$4 sm:$0xff]  }
 0x104   : > { %1678 = vmatpush1.bf16.msra.mxu1 %v5416_v46  ;;  %v3001_v46 = vrot.slane %v3000_v34, 4  ;;  %v4735_v20 = vld [vmem:[%s5756_s22 + $0x80] sm:$0xee]  ;;  %v3375_v32 = vrot.slane %v6835_v23, 5 }
 0x105   : > { %3263 = vmatpush1.bf16.msra.mxu0 %v5419_v12  ;;  %4837 = vmatprep.subr.bf16.mxu1 %v5426_v52  ;;  %v3005_v12 = vrot.slane %v3003_v61, 5  ;;  %v2992_v39 = vsel %vm5817_vm2, %v2987_v2, %v2991_v40 }
 0x106   : > { %3602 = vmatprep.subr.bf16.mxu0 %v5426_v52  ;;  %v5435_v52 = vld [vmem:[%s7198_s1 + $0x830] ss:$8 sps:$4 sm:$0xff]  }
 0x107   : > { %1680 = vmatmul.mubr.bf16.vlgmr.msra.gmra.mrb[0].mxu1 %v4345_v22  ;;  %v3006_v21 = vsel %vm5817_vm2, %v3001_v46, %v3005_v12  ;;  %v5440_v22 = vld [vmem:[%s7198_s1 + $0x840] ss:$8 sps:$4 sm:$0xff]  }
 0x108   : > { %3265 = vmatmul.mubr.bf16.vlgmr.msra.gmra.mrb[0].mxu0 %v4689_v28  ;;  %4853 = vmatpush1.bf16.msra.mxu1 %v5424_v42  ;;  %v4696_v25 = vcombine.high %v2992_v39, %v3006_v21  ;;  %v3363_v28 = vrot.slane %v6792_v43, 5  ;;  %v4695_v49 = vcombine.low %v2992_v39, %v3006_v21  ;;  %v6895_v43 = vsel %vm6086_vm5, %v4742_v29, %v3367_v3 }
 0x109   : > { %3603 = vmatpush1.bf16.msra.mxu0 %v5424_v42  ;;  %4838 = vmatprep.subr.bf16.mxu1 %v5429_v11 }
 0x10a   : > { %3604 = vmatprep.subr.bf16.mxu0 %v5429_v11  ;;  %1689 = vmatprep.mubr.bf16.mxu1 %v4348_v8  ;;  %v5451_v11 = vld [vmem:[%s7198_s1 + $0x870] ss:$8 sps:$4 sm:$0xff]   ;;  %v5465_v8 = vld [vmem:[%s7198_s1 + $0x8b4] ss:$8 sps:$4 sm:$0xff]  }
 0x10b   : > { %3274 = vmatprep.mubr.bf16.mxu0 %v4692_v50  ;;  %v5463_v50 = vld [vmem:[%s7198_s1 + $0x8b0] ss:$8 sps:$4 sm:$0xff]  }
 0x10c   : > { %4854 = vmatpush1.bf16.msra.mxu1 %v5427_v41 }
 0x10d   : > { %3605 = vmatpush1.bf16.msra.mxu0 %v5427_v41  ;;  %4839 = vmatprep.subr.bf16.mxu1 %v5434_v27  ;;  %v4736_v41 = vld [vmem:[%s5756_s22 + $0x90] sm:$0xee] }
 0x10e   : > { %3606 = vmatprep.subr.bf16.mxu0 %v5434_v27  ;;  %v5472_v27 = vld [vmem:[%s7198_s1 + $0x8e0] ss:$8 sps:$4 sm:$0xff]   ;;  %v4744_v26 = vrot.slane %v4736_v41, 9 }
 0x10f   : > { %1690 = vmatmul.mubr.bf16.gmra.mrb[4].mxu1 %v4347_v57  ;;  %v5477_v57 = vld [vmem:[%s7198_s1 + $0x8f4] ss:$8 sps:$4 sm:$0xff]  }
 0x110   : > { %3275 = vmatmul.mubr.bf16.gmra.mrb[4].mxu0 %v4691_v0  ;;  %4855 = vmatpush1.bf16.msra.mxu1 %v5432_v1  ;;  %v4743_v0 = vrot.slane %v4735_v20, 9  ;;  %v3376_v61 = vsel %vm6086_vm5, %v4744_v26, %v3375_v32 }
 0x111   : > { %3607 = vmatpush1.bf16.msra.mxu0 %v5432_v1  ;;  %4840 = vmatprep.subr.bf16.mxu1 %v5437_v6 }
 0x112   : > { %3608 = vmatprep.subr.bf16.mxu0 %v5437_v6  ;;  %1699 = vmatprep.mubr.bf16.mxu1 %v4350_v7  ;;  %v5445_v7 = vld [vmem:[%s7198_s1 + $0x854] ss:$8 sps:$4 sm:$0xff]   ;;  %v3372_v34 = vsel %vm6086_vm5, %v4743_v0, %v3371_v59 }
 0x113   : > { %3284 = vmatprep.mubr.bf16.mxu0 %v4694_v56  ;;  %v4784_v23 = vcombine.high %v3372_v34, %v3376_v61  ;;  %v4783_v1 = vcombine.low %v3372_v34, %v3376_v61 }
 0x114   : > { %4856 = vmatpush1.bf16.msra.mxu1 %v5435_v52 }
 0x115   : > { %3609 = vmatpush1.bf16.msra.mxu0 %v5435_v52  ;;  %4841 = vmatprep.subr.bf16.mxu1 %v5442_v14 }
 0x116   : > { %3610 = vmatprep.subr.bf16.mxu0 %v5442_v14 }
 0x117   : > { %1700 = vmatmul.mubr.bf16.gmra.mrb[8].mxu1 %v4349_v62  ;;  %v6891_v62 = vsel %vm6086_vm5, %v4741_v15, %v3363_v28 }
 0x118   : > { %3285 = vmatmul.mubr.bf16.gmra.mrb[8].mxu0 %v4693_v48  ;;  %4857 = vmatpush1.bf16.msra.mxu1 %v5440_v22  ;;  %v4782_v42 = vcombine.high %v6891_v62, %v6895_v43  ;;  %v4781_v44 = vcombine.low %v6891_v62, %v6895_v43  ;;  %v3693_v43 = vlaneseq }
 0x119   : > { %3611 = vmatpush1.bf16.msra.mxu0 %v5440_v22  ;;  %4842 = vmatprep.subr.bf16.mxu1 %v5445_v7 }
 0x11a   : > { %3612 = vmatprep.subr.bf16.mxu0 %v5445_v7  ;;  %1709 = vmatprep.mubr.bf16.mxu1 %v4352_v33  ;;  %v5453_v33 = vld [vmem:[%s7198_s1 + $0x874] ss:$8 sps:$4 sm:$0xff]  }
 0x11b   : > { %3294 = vmatprep.mubr.bf16.mxu0 %v4696_v25 }
 0x11c   : > { %4858 = vmatpush1.bf16.msra.mxu1 %v5443_v5 }
 0x11d   : > { %3613 = vmatpush1.bf16.msra.mxu0 %v5443_v5  ;;  %4843 = vmatprep.subr.bf16.mxu1 %v5450_v36 }
 0x11e   : > { %3614 = vmatprep.subr.bf16.mxu0 %v5450_v36 }
 0x11f   : > { %1710 = vmatmul.mubr.bf16.gmra.mrb[12].mxu1 %v4351_v10  ;;  %v5457_v10 = vld [vmem:[%s7198_s1 + $0x890] ss:$8 sps:$4 sm:$0xff]  }
 0x120   : > { %3295 = vmatmul.mubr.bf16.gmra.mrb[12].mxu0 %v4695_v49  ;;  %4859 = vmatpush1.bf16.msra.mxu1 %v5448_v18 }
 0x121   : > { %3615 = vmatpush1.bf16.msra.mxu0 %v5448_v18  ;;  %4844 = vmatprep.subr.bf16.mxu1 %v5453_v33  ;;  %v3694_v18 = vshrl.u32 %v3693_v43, 7 }
 0x122   : > { %3616 = vmatprep.subr.bf16.mxu0 %v5453_v33  ;;  %3634 = vmatprep.mubr.bf16.mxu0 %v4778_v51  ;;  %v5462_v51 = vld [vmem:[%s7198_s1 + $0x8a4] ss:$8 sps:$4 sm:$0xff]  }
 0x123   : > { %3654 = vmatprep.mubr.bf16.mxu1 %v4782_v42  ;;  %v3695_v33 = vsub.s32 0, %v3694_v18  ;;  %v3691_v42 = vld [vmem:[%s7199_s2] sm:$0x3] }
 0x124   : > { %4860 = vmatpush1.bf16.msra.mxu1 %v5451_v11 }
 0x125   : > { %3617 = vmatpush1.bf16.msra.mxu0 %v5451_v11  ;;  %4845 = vmatprep.subr.bf16.mxu1 %v5456_v16  ;;  %v3699_v11 = vsub.s32 1, %v3694_v18 }
 0x126   : > { %3618 = vmatprep.subr.bf16.mxu0 %v5456_v16  ;;  %v7000_v16 = vrot.slane %v3691_v42, %v3695_v33 }
 0x128   : > { %4861 = vmatpush1.bf16.msra.mxu1 %v5454_v53 }
 0x129   : > { %3619 = vmatpush1.bf16.msra.mxu0 %v5454_v53  ;;  %4846 = vmatprep.subr.bf16.mxu1 %v5459_v63 }
 0x12a   : > { %3620 = vmatprep.subr.bf16.mxu0 %v5459_v63 }
 0x12c   : > { %4862 = vmatpush1.bf16.msra.mxu1 %v5457_v10 }
 0x12d   : > { %3621 = vmatpush1.bf16.msra.mxu0 %v5457_v10  ;;  %4847 = vmatprep.subr.bf16.mxu1 %v5462_v51  ;;  %v7002_v10 = vrot.slane %v3691_v42, %v3699_v11 }
 0x12e   : > { %3622 = vmatprep.subr.bf16.mxu0 %v5462_v51 }
 0x130   : > { %4863 = vmatpush1.bf16.msra.mxu1 %v5460_v17 }
 0x131   : > { %3623 = vmatpush1.bf16.msra.mxu0 %v5460_v17  ;;  %4848 = vmatprep.subr.bf16.mxu1 %v5465_v8 }
 0x132   : > { %3624 = vmatprep.subr.bf16.mxu0 %v5465_v8 }
 0x134   : > { %4864 = vmatpush1.bf16.msra.mxu1 %v5463_v50 }
 0x135   : > { %3625 = vmatpush1.bf16.msra.mxu0 %v5463_v50  ;;  %4849 = vmatprep.subr.bf16.mxu1 %v5468_v9 }
 0x136   : > { %3626 = vmatprep.subr.bf16.mxu0 %v5468_v9 }
 0x138   : > { %4865 = vmatpush1.bf16.msra.mxu1 %v5466_v13 }
 0x139   : > { %3627 = vmatpush1.bf16.msra.mxu0 %v5466_v13  ;;  %4850 = vmatprep.subr.bf16.mxu1 %v5471_v35 }
 0x13a   : > { %3628 = vmatprep.subr.bf16.mxu0 %v5471_v35 }
 0x13c   : > { %4866 = vmatpush1.bf16.msra.mxu1 %v5469_v38 }
 0x13d   : > { %3629 = vmatpush1.bf16.msra.mxu0 %v5469_v38  ;;  %4851 = vmatprep.subr.bf16.mxu1 %v5474_v45 }
 0x13e   : > { %3630 = vmatprep.subr.bf16.mxu0 %v5474_v45 }
 0x140   : > { %4867 = vmatpush1.bf16.msra.mxu1 %v5472_v27 }
 0x141   : > { %3631 = vmatpush1.bf16.msra.mxu0 %v5472_v27  ;;  %4852 = vmatprep.subr.bf16.mxu1 %v5477_v57 }
 0x142   : > { %3632 = vmatprep.subr.bf16.mxu0 %v5477_v57 }
 0x144   : > { %4868 = vmatpush1.bf16.msra.mxu1 %v5475_v60 }
 0x145   : > { %3633 = vmatpush1.bf16.msra.mxu0 %v5475_v60 }
 0x147   : > { %3655 = vmatmul.mubr.bf16.vlgmr.msra.gmra.mrb[16].mxu1 %v4781_v44 }
 0x148   : > { %3635 = vmatmul.mubr.bf16.vlgmr.msra.gmra.mrb[0].mxu0 %v4777_v47  ;;  %3664 = vmatprep.mubr.bf16.mxu1 %v4784_v23 }
 0x149   : > { %3644 = vmatprep.mubr.bf16.mxu0 %v4780_v4 }
 0x14f   : > { %3665 = vmatmul.mubr.bf16.gmra.mrb[20].mxu1 %v4783_v1 }
 0x150   : > { %3645 = vmatmul.mubr.bf16.gmra.mrb[4].mxu0 %v4779_v30 }
 0x1da   : > { %v1681_v31 = vpop.f32.mrb[0].mxu1 }
 0x1db   : > { %v1683_v6 = vpop.f32.mrb[1].mxu1 }
 0x1dc   : > { %v1685_v56 = vpop.f32.mrb[2].mxu1 }
 0x1dd   : > { %v1687_v2 = vpop.f32.mrb[3].mxu1 }
 0x1e2   : > { %v6981_v40 = vpop.f32.mrb[4].mxu1 }
 0x1e3   : > { %v6983_v37 = vpop.f32.mrb[5].mxu1 }
 0x1e4   : > { %v6985_v58 = vpop.f32.mrb[6].mxu1 }
 0x1e5   : > { %v6987_v47 = vpop.f32.mrb[7].mxu1 }
 0x1ea   : > { %v1701_v4 = vpop.f32.mrb[8].mxu1 }
 0x1eb   : > { %v3286_v46 = vpop.f32.mrb[8].mxu0  ;;  %v1703_v52 = vpop.f32.mrb[9].mxu1 }
 0x1ec   : > { %v4877_v12 = vadd.f32 %v3286_v46, %v1701_v4  ;;  %v3288_v14 = vpop.f32.mrb[9].mxu0  ;;  %v1705_v55 = vpop.f32.mrb[10].mxu1 }
 0x1ed   : > { %v4879_v54 = vadd.f32 %v3288_v14, %v1703_v52  ;;  %v3290_v30 = vpop.f32.mrb[10].mxu0  ;;  %v1707_v39 = vpop.f32.mrb[11].mxu1 }
 0x1ee   : > { %v4881_v48 = vadd.f32 %v3290_v30, %v1705_v55  ;;  %v3292_v21 = vpop.f32.mrb[11].mxu0 }
 0x1ef   : > { %v4883_v22 = vadd.f32 %v3292_v21, %v1707_v39 }
 0x1f2   : > { %v1711_v19 = vpop.f32.mrb[12].mxu1 }
 0x1f3   : > { %v3296_v24 = vpop.f32.mrb[12].mxu0  ;;  %v1713_v25 = vpop.f32.mrb[13].mxu1 }
 0x1f4   : > { %v6989_v7 = vadd.f32 %v3296_v24, %v1711_v19  ;;  %v3298_v15 = vpop.f32.mrb[13].mxu0  ;;  %v1715_v29 = vpop.f32.mrb[14].mxu1 }
 0x1f5   : > { %v6991_v28 = vadd.f32 %v3298_v15, %v1713_v25  ;;  %v3300_v3 = vpop.f32.mrb[14].mxu0  ;;  %v1717_v36 = vpop.f32.mrb[15].mxu1 }
 0x1f6   : > { %v6993_v5 = vadd.f32 %v3300_v3, %v1715_v29  ;;  %v3302_v49 = vpop.f32.mrb[15].mxu0 }
 0x1f7   : > { %v6995_v62 = vadd.f32 %v3302_v49, %v1717_v36 }
 0x21a   : > { %v3656_v63 = vpop.f32.mrb[16].mxu1 }
 0x21b   : > { %v3636_v53 = vpop.f32.mrb[0].mxu0  ;;  %v4878_v17 = vadd.f32 %v4877_v12, %v3656_v63  ;;  %v3658_v50 = vpop.f32.mrb[17].mxu1 }
 0x21c   : > { %v4869_v51 = vadd.f32 %v3636_v53, %v1681_v31  ;;  %v3638_v8 = vpop.f32.mrb[1].mxu0  ;;  %v4880_v13 = vadd.f32 %v4879_v54, %v3658_v50  ;;  %v3660_v38 = vpop.f32.mrb[18].mxu1 }
 0x21d   : > { %v4870_v9 = vadd.f32 %v3638_v8, %v1683_v6  ;;  %v3640_v35 = vpop.f32.mrb[2].mxu0  ;;  %v7008_v20 = vadd.f32 %v4878_v17, %v7000_v16  ;;  %v4882_v27 = vadd.f32 %v4881_v48, %v3660_v38  ;;  %v3662_v0 = vpop.f32.mrb[19].mxu1 }
 0x21e   : > { %v7005_v45 = vadd.f32 %v4869_v51, %v7000_v16  ;;  %v4871_v41 = vadd.f32 %v3640_v35, %v1685_v56  ;;  %v3642_v57 = vpop.f32.mrb[3].mxu0  ;;  %v7014_v26 = vadd.f32 %v4880_v13, %v7002_v10  ;;  %v4884_v60 = vadd.f32 %v4883_v22, %v3662_v0  ;;  %v7075_v0 = vld [vmem:[%s7068_s6] sm:$0xff] }
 0x21f   : > { %v7011_v59 = vadd.f32 %v4870_v9, %v7002_v10  ;;  %v4872_v32 = vadd.f32 %v3642_v57, %v1687_v2  ;;  %v3727_v61 = vmin.f32 %v7008_v20, 20.0  ;;  %v7022_v23 = vadd.f32 %v4882_v27, %v7000_v16 }
 0x220   : > { %v3719_v34 = vmin.f32 %v7005_v45, 20.0  ;;  %v7019_v44 = vadd.f32 %v4871_v41, %v7000_v16  ;;  %v3728_v31 = vmin.f32 %v7014_v26, 20.0  ;;  %v7030_v56 = vadd.f32 %v4884_v60, %v7002_v10 }
 0x221   : > { %v3720_v1 = vmin.f32 %v7011_v59, 20.0  ;;  %v7027_v6 = vadd.f32 %v4872_v32, %v7002_v10  ;;  %v3751_v4 = vmul.f32 1.442695, %v3727_v61  ;;  %v3729_v12 = vmin.f32 %v7022_v23, 20.0 }
 0x222   : > { %v3735_v2 = vmul.f32 1.442695, %v3719_v34  ;;  %v3721_v46 = vmin.f32 %v7019_v44, 20.0  ;;  %v3753_v14 = vmul.f32 1.442695, %v3728_v31  ;;  %v3730_v55 = vmin.f32 %v7030_v56, 20.0 }
 0x223   : > { %v3737_v52 = vmul.f32 1.442695, %v3720_v1  ;;  %v3722_v54 = vmin.f32 %v7027_v6, 20.0  ;;  %v3755_v48 = vmul.f32 1.442695, %v3729_v12  ;;  %v3646_v39 = vpop.f32.mrb[4].mxu0 }
 0x224   : > { %5478 = vpow2.f32 %v3735_v2  ;;  %v3739_v30 = vmul.f32 1.442695, %v3721_v46  ;;  %v3666_v21 = vpop.f32.mrb[20].mxu1  ;;  %v3757_v19 = vmul.f32 1.442695, %v3730_v55  ;;  %v4873_v24 = vadd.f32 %v3646_v39, %v6981_v40  ;;  %v3648_v25 = vpop.f32.mrb[5].mxu0 }
 0x225   : > { %5480 = vpow2.f32 %v3751_v4  ;;  %v3741_v22 = vmul.f32 1.442695, %v3722_v54  ;;  %v3668_v15 = vpop.f32.mrb[21].mxu1  ;;  %v4886_v29 = vadd.f32 %v6989_v7, %v3666_v21  ;;  %v4874_v3 = vadd.f32 %v3648_v25, %v6983_v37  ;;  %v3650_v49 = vpop.f32.mrb[6].mxu0  ;;  %v7082_v46 = vld [vmem:[%s7068_s6 + $0x20] sm:$0xff] }
 0x226   : > { %5482 = vpow2.f32 %v3737_v52  ;;  %v4888_v36 = vadd.f32 %v6991_v28, %v3668_v15  ;;  %v3670_v43 = vpop.f32.mrb[22].mxu1  ;;  %v7041_v18 = vadd.f32 %v4873_v24, %v7000_v16  ;;  %v4875_v33 = vadd.f32 %v3650_v49, %v6985_v58  ;;  %v3652_v42 = vpop.f32.mrb[7].mxu0 }
 0x227   : > { %5484 = vpow2.f32 %v3753_v14  ;;  %v4890_v40 = vadd.f32 %v6993_v5, %v3670_v43  ;;  %v3672_v11 = vpop.f32.mrb[23].mxu1  ;;  %v7046_v7 = vadd.f32 %v4886_v29, %v7000_v16  ;;  %v7049_v37 = vadd.f32 %v4874_v3, %v7002_v10 }
 0x228   : > { %5486 = vpow2.f32 %v3739_v30  ;;  %v7052_v28 = vadd.f32 %v4888_v36, %v7002_v10  ;;  %v3723_v53 = vmin.f32 %v7041_v18, 20.0  ;;  %v7057_v58 = vadd.f32 %v4875_v33, %v7000_v16 }
 0x229   : > { %5488 = vpow2.f32 %v3755_v48  ;;  %v3731_v5 = vmin.f32 %v7046_v7, 20.0  ;;  %v3724_v63 = vmin.f32 %v7049_v37, 20.0  ;;  %v4876_v35 = vadd.f32 %v3652_v42, %v6987_v47 }
 0x22a   : > { %5490 = vpow2.f32 %v3741_v22  ;;  %v3732_v51 = vmin.f32 %v7052_v28, 20.0  ;;  %v3743_v17 = vmul.f32 1.442695, %v3723_v53  ;;  %v3725_v8 = vmin.f32 %v7057_v58, 20.0 }
 0x22b   : > { %5492 = vpow2.f32 %v3757_v19  ;;  %v3759_v50 = vmul.f32 1.442695, %v3731_v5  ;;  %v3745_v9 = vmul.f32 1.442695, %v3724_v63  ;;  %v7072_v38 = vadd.f32 %v6995_v62, %v3672_v11 }
 0x22c   : > { %v3761_v13 = vmul.f32 1.442695, %v3732_v51  ;;  %5494 = vpow2.f32 %v3743_v17  ;;  %v7078_v32 = vadd.f32 %v4890_v40, %v7000_v16  ;;  %v3747_v61 = vmul.f32 1.442695, %v3725_v8 }
 0x22d   : > { %5496 = vpow2.f32 %v3759_v50  ;;  %v3871_v2 = vunpack.c.l.bf16 %v7075_v0  ;;  %v3879_v19 = vunpack.c.l.bf16 %v7082_v46  ;;  %v3872_v15 = vunpack.c.h.bf16 %v7075_v0  ;;  %v7100_v50 = vld [vmem:[%s7068_s6 + $0x8] sm:$0xff] }
 0x22e   : > { %v5479_v41 = vpop.eup %5478  ;;  %5498 = vpow2.f32 %v3745_v9  ;;  %v3733_v55 = vmin.f32 %v7078_v32, 20.0  ;;  %v3880_v42 = vunpack.c.h.bf16 %v7082_v46  ;;  %v7103_v9 = vld [vmem:[%s7068_s6 + $0x28] sm:$0xff] }
 0x22f   : > { %v5481_v27 = vpop.eup %5480  ;;  %v3767_v57 = vadd.f32 2.0, %v5479_v41  ;;  %5500 = vpow2.f32 %v3761_v13 }
 0x230   : > { %v5483_v60 = vpop.eup %5482  ;;  %v3775_v34 = vadd.f32 2.0, %v5481_v27  ;;  %5502 = vpow2.f32 %v3747_v61  ;;  %v3763_v33 = vmul.f32 1.442695, %v3733_v55 }
 0x231   : > { %v5485_v47 = vpop.eup %5484  ;;  %v3783_v1 = vmul.f32 %v5479_v41, %v3767_v57  ;;  %v3768_v31 = vadd.f32 2.0, %v5483_v60 }
 0x232   : > { %v5487_v62 = vpop.eup %5486  ;;  %v3791_v4 = vmul.f32 %v5481_v27, %v3775_v34  ;;  %v3776_v12 = vadd.f32 2.0, %v5485_v47  ;;  %v7108_v27 = vadd.f32 %v4876_v35, %v7002_v10  ;;  %v3881_v35 = vunpack.c.l.bf16 %v7103_v9 }
 0x233   : > { %v5489_v52 = vpop.eup %5488  ;;  %v3815_v14 = vadd.f32 2.0, %v3783_v1  ;;  %v7084_v54 = vmul.f32 %v5483_v60, %v3768_v31  ;;  %v3769_v16 = vadd.f32 2.0, %v5487_v62 }
 0x234   : > { %v5491_v30 = vpop.eup %5490  ;;  %v3823_v48 = vadd.f32 2.0, %v3791_v4  ;;  %v7087_v39 = vmul.f32 %v5485_v47, %v3776_v12  ;;  %v3777_v21 = vadd.f32 2.0, %v5489_v52  ;;  %v3873_v12 = vunpack.c.l.bf16 %v7100_v50 }
 0x235   : > { %v5493_v22 = vpop.eup %5492  ;;  %5504 = vrcp.f32 %v3815_v14  ;;  %v3816_v24 = vadd.f32 2.0, %v7084_v54  ;;  %v3785_v25 = vmul.f32 %v5487_v62, %v3769_v16  ;;  %v3770_v43 = vadd.f32 2.0, %v5491_v30 }
 0x236   : > { %5506 = vrcp.f32 %v3823_v48  ;;  %v3824_v29 = vadd.f32 2.0, %v7087_v39  ;;  %v7093_v3 = vmul.f32 %v5489_v52, %v3777_v21  ;;  %v5495_v36 = vpop.eup %5494  ;;  %v3778_v53 = vadd.f32 2.0, %v5493_v22 }
 0x237   : > { %5508 = vrcp.f32 %v3816_v24  ;;  %v3817_v49 = vadd.f32 2.0, %v3785_v25  ;;  %v5497_v40 = vpop.eup %5496  ;;  %v7097_v63 = vmul.f32 %v5491_v30, %v3770_v43  ;;  %v3771_v51 = vadd.f32 2.0, %v5495_v36 }
 0x238   : > { %5510 = vrcp.f32 %v3824_v29  ;;  %v3825_v11 = vadd.f32 2.0, %v7093_v3  ;;  %v5499_v5 = vpop.eup %5498  ;;  %v3779_v17 = vadd.f32 2.0, %v5497_v40  ;;  %v7105_v13 = vmul.f32 %v5493_v22, %v3778_v53 }
 0x239   : > { %5512 = vrcp.f32 %v3817_v49  ;;  %v5501_v8 = vpop.eup %5500  ;;  %v3772_v41 = vadd.f32 2.0, %v5499_v5  ;;  %v3818_v57 = vadd.f32 2.0, %v7097_v63  ;;  %v3787_v60 = vmul.f32 %v5495_v36, %v3771_v51 }
 0x23a   : > { %5514 = vrcp.f32 %v3825_v11  ;;  %v7111_v34 = vmul.f32 %v5497_v40, %v3779_v17  ;;  %v3826_v61 = vadd.f32 2.0, %v7105_v13  ;;  %v3780_v31 = vadd.f32 2.0, %v5501_v8  ;;  %v7122_v14 = vpop.eup %5502  ;;  %v3865_v40 = vld [vmem:[%s7068_s6 + $0x10] sm:$0xff] }
 0x23b   : > { %5516 = vpow2.f32 %v3763_v33  ;;  %v7114_v47 = vmul.f32 %v5499_v5, %v3772_v41  ;;  %v7118_v62 = vadd.f32 %v7072_v38, %v7002_v10  ;;  %v3819_v52 = vadd.f32 2.0, %v3787_v60 }
 0x23c   : > { %5518 = vrcp.f32 %v3818_v57  ;;  %v3799_v16 = vmul.f32 %v3783_v1, %v7005_v45  ;;  %v3827_v55 = vadd.f32 2.0, %v7111_v34  ;;  %v3807_v21 = vmul.f32 %v3791_v4, %v7008_v20 }
 0x23d   : > { %5520 = vrcp.f32 %v3826_v61  ;;  %v3820_v30 = vadd.f32 2.0, %v7114_v47  ;;  %v7128_v10 = vmul.f32 %v5501_v8, %v3780_v31  ;;  %v3726_v38 = vmin.f32 %v7108_v27, 20.0 }
 0x23e   : > { %5522 = vrcp.f32 %v3819_v52  ;;  %v3800_v29 = vmul.f32 %v7084_v54, %v7011_v59  ;;  %v3734_v45 = vmin.f32 %v7118_v62, 20.0  ;;  %v3808_v20 = vmul.f32 %v7087_v39, %v7014_v26  ;;  %v3869_v39 = vld [vmem:[%s7068_s6 + $0x30] sm:$0xff] }
 0x23f   : > { %v5505_v48 = vpop.eup %5504  ;;  %5524 = vrcp.f32 %v3827_v55  ;;  %v3828_v4 = vadd.f32 2.0, %v7128_v10  ;;  %v3801_v59 = vmul.f32 %v3785_v25, %v7019_v44  ;;  %v3874_v54 = vunpack.c.h.bf16 %v7100_v50 }
 0x240   : > { %v5507_v22 = vpop.eup %5506  ;;  %v3847_v24 = vmul.f32 %v5505_v48, %v3799_v16  ;;  %5526 = vrcp.f32 %v3820_v30  ;;  %v3809_v26 = vmul.f32 %v7093_v3, %v7022_v23  ;;  %v3882_v44 = vunpack.c.h.bf16 %v7103_v9 }
 0x241   : > { %v5509_v1 = vpop.eup %5508  ;;  %v3855_v36 = vmul.f32 %v5507_v22, %v3807_v21  ;;  %5528 = vrcp.f32 %v3828_v4  ;;  %v3749_v25 = vmul.f32 1.442695, %v3726_v38  ;;  %v3875_v3 = vunpack.c.l.bf16 %v3865_v40 }
 0x242   : > { %v5511_v49 = vpop.eup %5510  ;;  %v3887_v43 = vadd.f32 %v3871_v2, %v3847_v24  ;;  %v3848_v33 = vmul.f32 %v5509_v1, %v3800_v29  ;;  %v3765_v50 = vmul.f32 1.442695, %v3734_v45  ;;  %v3883_v41 = vunpack.c.l.bf16 %v3869_v39 }
 0x243   : > { %v5513_v11 = vpop.eup %5512  ;;  %v3895_v53 = vadd.f32 %v3879_v19, %v3855_v36  ;;  %v3856_v5 = vmul.f32 %v5511_v49, %v3808_v20  ;;  %v3876_v57 = vunpack.c.h.bf16 %v3865_v40  ;;  %v3810_v52 = vmul.f32 %v7105_v13, %v7030_v56 }
 0x244   : > { %v5515_v51 = vpop.eup %5514  ;;  %v3888_v2 = vadd.f32 %v3872_v15, %v3848_v33  ;;  %v3849_v17 = vmul.f32 %v5513_v11, %v3801_v59  ;;  %v3802_v15 = vmul.f32 %v7097_v63, %v7027_v6  ;;  %v3803_v16 = vmul.f32 %v3787_v60, %v7041_v18 }
 0x245   : > { %v5517_v8 = vpop.eup %5516  ;;  %v3896_v23 = vadd.f32 %v3880_v42, %v3856_v5  ;;  %v3857_v19 = vmul.f32 %v5515_v51, %v3809_v26  ;;  %v3773_v46 = vadd.f32 2.0, %v7122_v14  ;;  %5530 = vpow2.f32 %v3749_v25  ;;  %v3866_v51 = vld [vmem:[%s7068_s6 + $0x18] sm:$0xff] }
 0x246   : > { %v4829_v0 = vpack.c.bf16 %v3888_v2, %v3887_v43  ;;  %v5519_v61 = vpop.eup %5518  ;;  %v3889_v55 = vadd.f32 %v3873_v12, %v3849_v17  ;;  %v3781_v48 = vadd.f32 2.0, %v5517_v8  ;;  %v3811_v38 = vmul.f32 %v7111_v34, %v7046_v7 }
 0x247   : > { %v4833_v31 = vpack.c.bf16 %v3896_v23, %v3895_v53  ;;  %v5521_v42 = vpop.eup %5520  ;;  %v3850_v30 = vmul.f32 %v5519_v61, %v3802_v15  ;;  %v3897_v6 = vadd.f32 %v3881_v35, %v3857_v19  ;;  %5532 = vpow2.f32 %v3765_v50 }
 0x248   : > { %3967 = vst [vmem:[%s7155_s9] sm:$0xff] %v4829_v0  ;;  %v5523_v21 = vpop.eup %5522  ;;  %v3858_v63 = vmul.f32 %v5521_v42, %v3810_v52  ;;  %v3804_v60 = vmul.f32 %v7114_v47, %v7049_v37  ;;  %v3884_v12 = vunpack.c.h.bf16 %v3869_v39  ;;  %v3812_v9 = vmul.f32 %v7128_v10, %v7052_v28 }
 0x249   : > { %3971 = vst [vmem:[%s7155_s9 + $0x20] sm:$0xff] %v4833_v31  ;;  %v5525_v56 = vpop.eup %5524  ;;  %v3890_v18 = vadd.f32 %v3874_v54, %v3850_v30  ;;  %v3851_v13 = vmul.f32 %v5523_v21, %v3803_v16  ;;  %v3789_v35 = vmul.f32 %v7122_v14, %v3773_v46  ;;  %v3797_v1 = vmul.f32 %v5517_v8, %v3781_v48 }
 0x24a   : > { %v5527_v22 = vpop.eup %5526  ;;  %v3898_v24 = vadd.f32 %v3882_v44, %v3858_v63  ;;  %v3859_v29 = vmul.f32 %v5525_v56, %v3811_v38  ;;  %v3870_v44 = vld [vmem:[%s7068_s6 + $0x38] sm:$0xff]  ;;  %v3877_v23 = vunpack.c.l.bf16 %v3866_v51  ;;  %v3878_v0 = vunpack.c.h.bf16 %v3866_v51 }
 0x24b   : > { %v4830_v45 = vpack.c.bf16 %v3890_v18, %v3889_v55  ;;  %v3891_v7 = vadd.f32 %v3875_v3, %v3851_v13  ;;  %v3852_v34 = vmul.f32 %v5527_v22, %v3804_v60  ;;  %v5529_v36 = vpop.eup %5528  ;;  %v3821_v49 = vadd.f32 2.0, %v3789_v35 }
 0x24c   : > { %v4834_v20 = vpack.c.bf16 %v3898_v24, %v3897_v6  ;;  %v3899_v37 = vadd.f32 %v3883_v41, %v3859_v29  ;;  %v3860_v4 = vmul.f32 %v5529_v36, %v3812_v9  ;;  %v3829_v59 = vadd.f32 2.0, %v3797_v1 }
 0x24d   : > { %3968 = vst [vmem:[%s7155_s9 + $0x8] sm:$0xff] %v4830_v45  ;;  %v3892_v47 = vadd.f32 %v3876_v57, %v3852_v34  ;;  %5534 = vrcp.f32 %v3821_v49  ;;  %v3805_v17 = vmul.f32 %v3789_v35, %v7057_v58  ;;  %v3813_v25 = vmul.f32 %v3797_v1, %v7078_v32 }
 0x24e   : > { %3972 = vst [vmem:[%s7155_s9 + $0x28] sm:$0xff] %v4834_v20  ;;  %v3900_v33 = vadd.f32 %v3884_v12, %v3860_v4  ;;  %5536 = vrcp.f32 %v3829_v59  ;;  %v3885_v3 = vunpack.c.l.bf16 %v3870_v44  ;;  %v3886_v57 = vunpack.c.h.bf16 %v3870_v44 }
 0x24f   : > { %v4831_v43 = vpack.c.bf16 %v3892_v47, %v3891_v7  ;;  %v5531_v28 = vpop.eup %5530 }
 0x250   : > { %v4835_v14 = vpack.c.bf16 %v3900_v33, %v3899_v37  ;;  %v3774_v54 = vadd.f32 2.0, %v5531_v28 }
 0x251   : > { %3969 = vst [vmem:[%s7155_s9 + $0x10] sm:$0xff] %v4831_v43  ;;  %v5533_v10 = vpop.eup %5532 }
 0x252   : > { %3973 = vst [vmem:[%s7155_s9 + $0x30] sm:$0xff] %v4835_v14  ;;  %v3782_v40 = vadd.f32 2.0, %v5533_v10  ;;  %v3790_v11 = vmul.f32 %v5531_v28, %v3774_v54 }
 0x254   : > { %v3798_v53 = vmul.f32 %v5533_v10, %v3782_v40  ;;  %v3822_v5 = vadd.f32 2.0, %v3790_v11  ;;  %v3806_v50 = vmul.f32 %v3790_v11, %v7108_v27 }
 0x256   : > { %v3830_v26 = vadd.f32 2.0, %v3798_v53  ;;  %5538 = vrcp.f32 %v3822_v5  ;;  %v3814_v41 = vmul.f32 %v3798_v53, %v7118_v62 }
 0x257   : > { %v5535_v39 = vpop.eup %5534 }
 0x258   : > { %5540 = vrcp.f32 %v3830_v26  ;;  %v5537_v2 = vpop.eup %5536  ;;  %v3853_v8 = vmul.f32 %v5535_v39, %v3805_v17 }
 0x259   : > { %v3861_v19 = vmul.f32 %v5537_v2, %v3813_v25 }
 0x25a   : > { %v3893_v31 = vadd.f32 %v3877_v23, %v3853_v8 }
 0x25b   : > { %v3901_v58 = vadd.f32 %v3885_v3, %v3861_v19 }
 0x260   : > { %v5539_v15 = vpop.eup %5538 }
 0x261   : > { %v3854_v52 = vmul.f32 %v5539_v15, %v3806_v50 }
 0x262   : > { %v5541_v61 = vpop.eup %5540 }
 0x263   : > { %v3862_v16 = vmul.f32 %v5541_v61, %v3814_v41  ;;  %v3894_v46 = vadd.f32 %v3878_v0, %v3854_v52 }
 0x265   : > { %v3902_v32 = vadd.f32 %v3886_v57, %v3862_v16  ;;  %v4832_v42 = vpack.c.bf16 %v3894_v46, %v3893_v31 }
 0x267   : > { %v4836_v55 = vpack.c.bf16 %v3902_v32, %v3901_v58  ;;  %3970 = vst [vmem:[%s7155_s9 + $0x18] sm:$0xff] %v4832_v42 }
 0x269   : > { %3974 = vst [vmem:[%s7155_s9 + $0x38] sm:$0xff] %v4836_v55 }
 0x26a PF: > { %s14_s17 = sadd.s32 1, %s5569_s17   ;;  %s7206_s15 = smov %s5565_s16 }
 0x26b   : > { %p11_p5 = scmp.ge.s32.totalorder %s14_s17, 4   ;;  %s7207_s16 = smov %s7209_s18 }
 0x26d   :  { %13 = sbr.rel (!%p11_p5) target bundleno = 2 (0x2), region = 85 }

</bundles_post_ra>
